<compile_context>
chip_gen: v5e
topology: v5e:2x2
jax: 0.10.0
libtpu: 0.0.40
codegen_flags: <defaults>
</compile_context>

<pallas_src>
import functools

import jax
import jax.numpy as jnp
from jax.experimental import pallas as pl
from jax.experimental.pallas import tpu as pltpu


def _residual_attention_kernel(n_head, head_dim, eps,
                               x_ref,
                               ln1_w_ref, ln1_b_ref,
                               w_qkv_ref, b_qkv_ref,
                               wo_ref, bo_ref,
                               ln2_w_ref, ln2_b_ref,
                               wfc_ref, bfc_ref,
                               wpr_ref, bpr_ref,
                               o_ref):
    L, Bt, D = x_ref.shape            # seq, batch tile, d_model
    H, dh = n_head, head_dim
    R = Bt * L                        # rows, batch-major ordering (b, l)

    # (L, Bt, D) -> (Bt*L, D) batch-major rows.  One in-VMEM relayout pass
    # (replaces the two wrapper-side HBM transposes of the previous version).
    x = jnp.concatenate([x_ref[:, b, :] for b in range(Bt)], axis=0)
    x = x.astype(jnp.float32)

    def layer_norm(v, w_ref, b_ref):
        mu = jnp.mean(v, axis=-1, keepdims=True)
        var = jnp.mean((v - mu) ** 2, axis=-1, keepdims=True)
        return (v - mu) * jax.lax.rsqrt(var + eps) * w_ref[...] + b_ref[...]

    # ---------------- attention branch ----------------
    xn = layer_norm(x, ln1_w_ref, ln1_b_ref)

    # Fused Q/K/V projection: one (R, D) x (D, 3D) bf16 MXU pass, f32 accum.
    # NOTE: 1/sqrt(dh) is pre-folded into the Q columns of w_qkv / b_qkv.
    qkv = jnp.dot(xn.astype(jnp.bfloat16), w_qkv_ref[...],
                  preferred_element_type=jnp.float32) + b_qkv_ref[...]
    q = qkv[:, :D]
    k = qkv[:, D:2 * D]
    v = qkv[:, 2 * D:]

    def to_heads(t):
        # (R, D) -> (H*Bt, L, dh); leading batch index = h*Bt + b.
        # H lane slices + free leading reshapes + one leading concat.
        return jnp.concatenate(
            [t[:, h * dh:(h + 1) * dh].reshape(Bt, L, dh) for h in range(H)],
            axis=0)

    qh = to_heads(q).astype(jnp.bfloat16)
    kh = to_heads(k).astype(jnp.bfloat16)
    vh = to_heads(v).astype(jnp.bfloat16)

    # Single batched contraction over (head*batch); bf16 operands, f32 accum.
    s = jnp.einsum('bqd,bkd->bqk', qh, kh,
                   preferred_element_type=jnp.float32)        # (H*Bt, L, L)
    # TODO(synk): attn_mask would be added to `s` here; module uses attn_mask=None.
    s = s - jnp.max(s, axis=-1, keepdims=True)
    p = jnp.exp(s)                                            # f32 softmax
    # approx reciprocal: fine for inference; make exact if used for training.
    p = p * pl.reciprocal(jnp.sum(p, axis=-1, keepdims=True), approx=True)
    o = jnp.einsum('bqk,bkd->bqd', p.astype(jnp.bfloat16), vh,
                   preferred_element_type=jnp.float32)        # (H*Bt, L, dh)

    # Heads back onto lanes: (H*Bt, L, dh) -> (R, D).
    attn = jnp.concatenate(
        [o[h * Bt:(h + 1) * Bt].reshape(R, dh) for h in range(H)], axis=-1)

    attn = jnp.dot(attn.astype(jnp.bfloat16), wo_ref[...],
                   preferred_element_type=jnp.float32) + bo_ref[...]
    x1 = x + attn

    # ---------------- MLP branch ----------------
    xn2 = layer_norm(x1, ln2_w_ref, ln2_b_ref)
    hdn = jnp.dot(xn2.astype(jnp.bfloat16), wfc_ref[...],
                  preferred_element_type=jnp.float32) + bfc_ref[...]
    # QuickGELU in bf16 (result feeds a bf16 matmul anyway; halves EUP work
    # on v6e/v7x, harmless on v5e).
    hb = hdn.astype(jnp.bfloat16)
    act = hb * jax.nn.sigmoid(1.702 * hb)
    mlp = jnp.dot(act, wpr_ref[...],
                  preferred_element_type=jnp.float32) + bpr_ref[...]

    y = (x1 + mlp).reshape(Bt, L, D)
    for b in range(Bt):                       # (Bt*L, D) -> (L, Bt, D) block
        o_ref[:, b, :] = y[b].astype(o_ref.dtype)


# ----------------------- VMEM / tiling model -----------------------

def _vmem_limit_bytes():
    cap = 64 * 1024 * 1024                       # conservative (v7x-sized) default
    try:
        cap = int(pltpu.get_tpu_info().vmem_capacity_bytes)
    except Exception:
        pass
    # Leave headroom for Mosaic scratch / semaphores:
    # ~102 MiB on 128 MiB parts (v5e/v6e), ~51 MiB on 64 MiB parts (v7x).
    return max(min(int(cap * 0.8), cap - 12 * 1024 * 1024), 16 * 1024 * 1024)


def _weight_vmem_bytes(D, buffer_count):
    w = 12 * D * D * 2          # fused qkv + out_proj + c_fc + c_proj, bf16
    b = 13 * D * 4              # biases + LayerNorm params, f32
    return buffer_count * (w + b)


def _per_batch_vmem_bytes(L, D, n_head):
    f32, bf16 = 4, 2
    io = 2 * 2 * L * D * f32                          # in + out blocks, 2x buffered
    acts = 10 * L * D * f32 + 6 * L * D * bf16        # f32 temps + bf16 operand copies
    attn = n_head * L * L * (2 * f32 + bf16)          # scores / probs (+ bf16 probs)
    mlp = L * 4 * D * (f32 + 2 * bf16)                # c_fc out + bf16 activation
    return io + acts + attn + mlp


def _pick_batch_tile(N, L, D, n_head, budget_bytes, max_tile=16):
    """Largest batch tile that fits the VMEM model.  Tiles are restricted to
    multiples of 8 (or the full batch) so the second-to-last block dim always
    satisfies the (8,128) BlockSpec rule; >=2 grid steps are preferred so both
    v7x TensorCores get work."""
    per_b = _per_batch_vmem_bytes(L, D, n_head)
    cands = [t for t in range(1, min(N, max_tile) + 1)
             if N % t == 0 and (t % 8 == 0 or t == N)]
    if not cands:
        cands = [N]
    fit = [t for t in cands if t * per_b <= budget_bytes]
    if not fit:
        # TODO(synk): very large L/D; a flash-style query-tiled attention would
        # be needed to stay resident.  Best effort: smallest legal tile.
        return min(cands)
    multi = [t for t in fit if N // t >= 2]
    return max(multi) if multi else max(fit)


# ----------------------- wrapper -----------------------

def residual_attention_block(x, params, n_head):
    """x: (L, N, D) float32.  params: pre-transposed weights/biases (see __main__)."""
    L, N, D = x.shape
    dh = D // n_head

    (ln1_w, ln1_b, w_qkv, b_qkv, wo, bo,
     ln2_w, ln2_b, wfc, bfc, wpr, bpr) = params

    # Fold the 1/sqrt(dh) query scale into the Q columns of the fused QKV
    # projection (saves a full (R, D) VPU multiply per grid step).
    scale = 1.0 / (float(dh) ** 0.5)
    w_qkv = jnp.concatenate([w_qkv[:, :D] * scale, w_qkv[:, D:]], axis=1)
    b_qkv = jnp.concatenate([b_qkv[:, :D] * scale, b_qkv[:, D:]], axis=1)

    # bf16 weights for the MXU matmuls; biases / LayerNorm params stay f32.
    w_qkv = w_qkv.astype(jnp.bfloat16)
    wo = wo.astype(jnp.bfloat16)
    wfc = wfc.astype(jnp.bfloat16)
    wpr = wpr.astype(jnp.bfloat16)

    vmem_limit = _vmem_limit_bytes()
    budget = int(vmem_limit * 0.9) - _weight_vmem_bytes(D, buffer_count=1)
    b_tile = _pick_batch_tile(N, L, D, n_head, budget)
    grid = (N // b_tile,)

    kernel = functools.partial(_residual_attention_kernel, n_head, dh, 1e-5)
    xo_spec = pl.BlockSpec((L, b_tile, D), lambda n: (0, n, 0))

    def build(pipeline_mode):
        def const_spec(shape):
            imap = lambda n, _s=shape: (0,) * len(_s)
            if pipeline_mode is None:
                return pl.BlockSpec(shape, imap)
            # Weights never change across the grid -> single-buffer them.
            return pl.BlockSpec(shape, imap, pipeline_mode=pipeline_mode)

        return pl.pallas_call(
            kernel,
            out_shape=jax.ShapeDtypeStruct((L, N, D), x.dtype),
            grid=grid,
            in_specs=[
                xo_spec,                                         # x
                const_spec((1, D)), const_spec((1, D)),          # ln_1 w, b
                const_spec((D, 3 * D)), const_spec((1, 3 * D)),  # fused Wqkv, bqkv
                const_spec((D, D)), const_spec((1, D)),          # out_proj w, b
                const_spec((1, D)), const_spec((1, D)),          # ln_2 w, b
                const_spec((D, 4 * D)), const_spec((1, 4 * D)),  # c_fc w, b
                const_spec((4 * D, D)), const_spec((1, D)),      # c_proj w, b
            ],
            out_specs=xo_spec,
            compiler_params=pltpu.CompilerParams(
                dimension_semantics=("parallel",),
                vmem_limit_bytes=vmem_limit),
        )

    args = (x, ln1_w, ln1_b, w_qkv, b_qkv, wo, bo,
            ln2_w, ln2_b, wfc, bfc, wpr, bpr)
    try:
        out = build(pl.Buffered(1))(*args)       # single-buffered constant weights
        return jax.block_until_ready(out)
    except Exception:
        # TODO(synk): narrow fallback only for builds that reject buffer_count=1;
        # any error unrelated to buffering re-raises from this second call.
        return jax.block_until_ready(build(None)(*args))


# ----------------------- pure-JAX reference -----------------------

def reference(x, params, n_head, matmul_dtype=jnp.float32):
    """PyTorch-semantics reference.  matmul_dtype=jnp.bfloat16 mirrors the kernel's
    mixed-precision policy (bf16 matmul operands / QuickGELU, f32 accumulation)."""
    (ln1_w, ln1_b, w_qkv, b_qkv, wo, bo,
     ln2_w, ln2_b, wfc, bfc, wpr, bpr) = params
    L, N, D = x.shape
    dh = D // n_head
    bf16_policy = matmul_dtype == jnp.bfloat16

    def ln(v, w, b):
        mu = v.mean(-1, keepdims=True)
        var = ((v - mu) ** 2).mean(-1, keepdims=True)
        return (v - mu) * jax.lax.rsqrt(var + 1e-5) * w + b

    def mm(a, w):
        return jnp.dot(a.astype(matmul_dtype), w.astype(matmul_dtype),
                       preferred_element_type=jnp.float32)

    xn = ln(x, ln1_w, ln1_b)
    qkv = mm(xn.reshape(L * N, D), w_qkv) + b_qkv
    q = qkv[:, :D] / jnp.sqrt(float(dh))
    k = qkv[:, D:2 * D]
    v = qkv[:, 2 * D:]

    def heads(t):                                  # (L*N, D) -> (N, H, L, dh)
        return t.reshape(L, N, n_head, dh).transpose(1, 2, 0, 3)

    qh, kh, vh = heads(q), heads(k), heads(v)
    s = jnp.einsum('nhqd,nhkd->nhqk', qh.astype(matmul_dtype),
                   kh.astype(matmul_dtype), preferred_element_type=jnp.float32)
    p = jax.nn.softmax(s, axis=-1)
    o = jnp.einsum('nhqk,nhkd->nhqd', p.astype(matmul_dtype),
                   vh.astype(matmul_dtype), preferred_element_type=jnp.float32)
    o = o.transpose(2, 0, 1, 3).reshape(L * N, D)
    attn = (mm(o, wo) + bo).reshape(L, N, D)
    x1 = x + attn

    xn2 = ln(x1, ln2_w, ln2_b)
    h = mm(xn2.reshape(L * N, D), wfc) + bfc
    if bf16_policy:
        hb = h.astype(jnp.bfloat16)
        h = (hb * jax.nn.sigmoid(1.702 * hb)).astype(jnp.float32)
    else:
        h = h * jax.nn.sigmoid(1.702 * h)
    mlp = (mm(h, wpr) + bpr).reshape(L, N, D)
    return x1 + mlp


if __name__ == "__main__":
    L, N, D, n_head = 16, 4, 128, 4

    key = jax.random.PRNGKey(0)
    ks = jax.random.split(key, 12)

    # nn.MultiheadAttention parameters (torch stores in_proj as (3D, D), rows [q;k;v]).
    in_proj_w = 0.02 * jax.random.normal(ks[0], (3 * D, D), jnp.float32)
    in_proj_b = 0.02 * jax.random.normal(ks[1], (3 * D,), jnp.float32)
    out_proj_w = 0.02 * jax.random.normal(ks[2], (D, D), jnp.float32)
    out_proj_b = 0.02 * jax.random.normal(ks[3], (D,), jnp.float32)
    # MLP parameters (torch Linear stores (out, in); pre-transposed to (in, out)).
    fc_w = 0.02 * jax.random.normal(ks[4], (4 * D, D), jnp.float32)
    fc_b = 0.02 * jax.random.normal(ks[5], (4 * D,), jnp.float32)
    proj_w = 0.02 * jax.random.normal(ks[6], (D, 4 * D), jnp.float32)
    proj_b = 0.02 * jax.random.normal(ks[7], (D,), jnp.float32)
    # LayerNorm parameters (perturbed from the default ones/zeros init for coverage).
    ln1_w = 1.0 + 0.1 * jax.random.normal(ks[8], (1, D), jnp.float32)
    ln1_b = 0.1 * jax.random.normal(ks[9], (1, D), jnp.float32)
    ln2_w = 1.0 + 0.1 * jax.random.normal(ks[10], (1, D), jnp.float32)
    ln2_b = 0.1 * jax.random.normal(ks[11], (1, D), jnp.float32)

    params = (
        ln1_w, ln1_b,
        in_proj_w.T,                       # fused (D, 3D), columns = [q | k | v]
        in_proj_b.reshape(1, 3 * D),
        out_proj_w.T, out_proj_b.reshape(1, D),
        ln2_w, ln2_b,
        fc_w.T, fc_b.reshape(1, 4 * D),
        proj_w.T, proj_b.reshape(1, D),
    )

    x = jax.random.normal(jax.random.PRNGKey(1), (L, N, D), jnp.float32)

    y = jax.block_until_ready(residual_attention_block(x, params, n_head))

    # Tight check vs. a reference that mirrors the kernel's mixed-precision
    # policy, and a loose check vs. the pure-f32 PyTorch-semantics reference.
    y_policy = reference(x, params, n_head, matmul_dtype=jnp.bfloat16)
    y_f32 = reference(x, params, n_head, matmul_dtype=jnp.float32)

    assert y.shape == (L, N, D)
    err_policy = float(jnp.max(jnp.abs(y - y_policy)))
    err_f32 = float(jnp.max(jnp.abs(y - y_f32)))
    assert jnp.allclose(y, y_policy, atol=2e-3, rtol=2e-3), err_policy
    assert jnp.allclose(y, y_f32, atol=2e-2, rtol=2e-2), err_f32

    print("KERNEL_OK")
</pallas_src>

<mosaic_0001>
module attributes {stable_mosaic.version = 11 : i64} {
  func.func @_residual_attention_kernel(%arg0: i32, %arg1: memref<16x4x128xf32, #tpu.memory_space<vmem>>, %arg2: memref<1x128xf32, #tpu.memory_space<vmem>>, %arg3: memref<1x128xf32, #tpu.memory_space<vmem>>, %arg4: memref<128x384xbf16, #tpu.memory_space<vmem>>, %arg5: memref<1x384xf32, #tpu.memory_space<vmem>>, %arg6: memref<128x128xbf16, #tpu.memory_space<vmem>>, %arg7: memref<1x128xf32, #tpu.memory_space<vmem>>, %arg8: memref<1x128xf32, #tpu.memory_space<vmem>>, %arg9: memref<1x128xf32, #tpu.memory_space<vmem>>, %arg10: memref<128x512xbf16, #tpu.memory_space<vmem>>, %arg11: memref<1x512xf32, #tpu.memory_space<vmem>>, %arg12: memref<512x128xbf16, #tpu.memory_space<vmem>>, %arg13: memref<1x128xf32, #tpu.memory_space<vmem>>, %arg14: memref<16x4x128xf32, #tpu.memory_space<vmem>>) attributes {dimension_semantics = [#tpu.dimension_semantics<parallel>], iteration_bounds = array<i64: 1>, scalar_prefetch = 0 : i64, scratch_operands = 0 : i64, tpu.core_type = #tpu.core_type<tc>, window_params = [{transform_indices = @transform_0, window_bounds = array<i64: 16, 4, 128>}, {pipeline_mode = #tpu.pipeline_mode<synchronous>, transform_indices = @transform_1, window_bounds = array<i64: 1, 128>}, {pipeline_mode = #tpu.pipeline_mode<synchronous>, transform_indices = @transform_2, window_bounds = array<i64: 1, 128>}, {pipeline_mode = #tpu.pipeline_mode<synchronous>, transform_indices = @transform_3, window_bounds = array<i64: 128, 384>}, {pipeline_mode = #tpu.pipeline_mode<synchronous>, transform_indices = @transform_4, window_bounds = array<i64: 1, 384>}, {pipeline_mode = #tpu.pipeline_mode<synchronous>, transform_indices = @transform_5, window_bounds = array<i64: 128, 128>}, {pipeline_mode = #tpu.pipeline_mode<synchronous>, transform_indices = @transform_6, window_bounds = array<i64: 1, 128>}, {pipeline_mode = #tpu.pipeline_mode<synchronous>, transform_indices = @transform_7, window_bounds = array<i64: 1, 128>}, {pipeline_mode = #tpu.pipeline_mode<synchronous>, transform_indices = @transform_8, window_bounds = array<i64: 1, 128>}, {pipeline_mode = #tpu.pipeline_mode<synchronous>, transform_indices = @transform_9, window_bounds = array<i64: 128, 512>}, {pipeline_mode = #tpu.pipeline_mode<synchronous>, transform_indices = @transform_10, window_bounds = array<i64: 1, 512>}, {pipeline_mode = #tpu.pipeline_mode<synchronous>, transform_indices = @transform_11, window_bounds = array<i64: 512, 128>}, {pipeline_mode = #tpu.pipeline_mode<synchronous>, transform_indices = @transform_12, window_bounds = array<i64: 1, 128>}, {transform_indices = @transform_13, window_bounds = array<i64: 16, 4, 128>}]} {
    %c0 = arith.constant 0 : index
    %c0_0 = arith.constant 0 : index
    %c0_1 = arith.constant 0 : index
    %0 = vector.load %arg1[%c0, %c0_0, %c0_1] : memref<16x4x128xf32, #tpu.memory_space<vmem>>, vector<16x1x128xf32>
    %1 = vector.shape_cast %0 : vector<16x1x128xf32> to vector<16x128xf32>
    %c0_2 = arith.constant 0 : index
    %c1 = arith.constant 1 : index
    %c0_3 = arith.constant 0 : index
    %2 = vector.load %arg1[%c0_2, %c1, %c0_3] : memref<16x4x128xf32, #tpu.memory_space<vmem>>, vector<16x1x128xf32>
    %3 = vector.shape_cast %2 : vector<16x1x128xf32> to vector<16x128xf32>
    %c0_4 = arith.constant 0 : index
    %c2 = arith.constant 2 : index
    %c0_5 = arith.constant 0 : index
    %4 = vector.load %arg1[%c0_4, %c2, %c0_5] : memref<16x4x128xf32, #tpu.memory_space<vmem>>, vector<16x1x128xf32>
    %5 = vector.shape_cast %4 : vector<16x1x128xf32> to vector<16x128xf32>
    %c0_6 = arith.constant 0 : index
    %c3 = arith.constant 3 : index
    %c0_7 = arith.constant 0 : index
    %6 = vector.load %arg1[%c0_6, %c3, %c0_7] : memref<16x4x128xf32, #tpu.memory_space<vmem>>, vector<16x1x128xf32>
    %7 = vector.shape_cast %6 : vector<16x1x128xf32> to vector<16x128xf32>
    %8 = tpu.concatenate %1, %3, %5, %7 in 0 : vector<16x128xf32>, vector<16x128xf32>, vector<16x128xf32>, vector<16x128xf32> -> vector<64x128xf32>
    %cst = arith.constant dense<0.000000e+00> : vector<64xf32>
    %9 = vector.multi_reduction <add>, %8, %cst [1] : vector<64x128xf32> to vector<64xf32>
    %10 = vector.shape_cast %9 : vector<64xf32> to vector<64x1xf32>
    %cst_8 = arith.constant 1.280000e+02 : f32
    %11 = vector.broadcast %cst_8 : f32 to vector<64x1xf32>
    %12 = arith.divf %10, %11 : vector<64x1xf32>
    %13 = vector.broadcast %12 : vector<64x1xf32> to vector<64x128xf32>
    %14 = arith.subf %8, %13 : vector<64x128xf32>
    %15 = arith.mulf %14, %14 : vector<64x128xf32>
    %cst_9 = arith.constant dense<0.000000e+00> : vector<64xf32>
    %16 = vector.multi_reduction <add>, %15, %cst_9 [1] : vector<64x128xf32> to vector<64xf32>
    %17 = vector.shape_cast %16 : vector<64xf32> to vector<64x1xf32>
    %cst_10 = arith.constant 1.280000e+02 : f32
    %18 = vector.broadcast %cst_10 : f32 to vector<64x1xf32>
    %19 = arith.divf %17, %18 : vector<64x1xf32>
    %20 = vector.broadcast %12 : vector<64x1xf32> to vector<64x128xf32>
    %21 = arith.subf %8, %20 : vector<64x128xf32>
    %cst_11 = arith.constant 9.99999974E-6 : f32
    %22 = vector.broadcast %cst_11 : f32 to vector<64x1xf32>
    %23 = arith.addf %19, %22 : vector<64x1xf32>
    %24 = math.rsqrt %23 : vector<64x1xf32>
    %25 = vector.broadcast %24 : vector<64x1xf32> to vector<64x128xf32>
    %26 = arith.mulf %21, %25 : vector<64x128xf32>
    %c0_12 = arith.constant 0 : index
    %c0_13 = arith.constant 0 : index
    %27 = vector.load %arg2[%c0_12, %c0_13] : memref<1x128xf32, #tpu.memory_space<vmem>>, vector<1x128xf32>
    %28 = vector.broadcast %27 : vector<1x128xf32> to vector<64x128xf32>
    %29 = arith.mulf %26, %28 : vector<64x128xf32>
    %c0_14 = arith.constant 0 : index
    %c0_15 = arith.constant 0 : index
    %30 = vector.load %arg3[%c0_14, %c0_15] : memref<1x128xf32, #tpu.memory_space<vmem>>, vector<1x128xf32>
    %31 = vector.broadcast %30 : vector<1x128xf32> to vector<64x128xf32>
    %32 = arith.addf %29, %31 : vector<64x128xf32>
    %33 = arith.truncf %32 : vector<64x128xf32> to vector<64x128xbf16>
    %c0_16 = arith.constant 0 : index
    %c0_17 = arith.constant 0 : index
    %34 = vector.load %arg4[%c0_16, %c0_17] : memref<128x384xbf16, #tpu.memory_space<vmem>>, vector<128x384xbf16>
    %cst_18 = arith.constant dense<0.000000e+00> : vector<64x384xf32>
    %35 = tpu.matmul %33, %34, %cst_18 {dimension_numbers = #tpu.dot_dimension_numbers<[1], [0], [0], [1], [0, 0, 1, 1], [], []>} : vector<64x128xbf16>, vector<128x384xbf16>, vector<64x384xf32> -> vector<64x384xf32>
    %c0_19 = arith.constant 0 : index
    %c0_20 = arith.constant 0 : index
    %36 = vector.load %arg5[%c0_19, %c0_20] : memref<1x384xf32, #tpu.memory_space<vmem>>, vector<1x384xf32>
    %37 = vector.broadcast %36 : vector<1x384xf32> to vector<64x384xf32>
    %38 = arith.addf %35, %37 : vector<64x384xf32>
    %39 = vector.extract_strided_slice %38 {offsets = [0, 0], sizes = [64, 128], strides = [1, 1]} : vector<64x384xf32> to vector<64x128xf32>
    %40 = vector.extract_strided_slice %38 {offsets = [0, 128], sizes = [64, 128], strides = [1, 1]} : vector<64x384xf32> to vector<64x128xf32>
    %41 = vector.extract_strided_slice %38 {offsets = [0, 256], sizes = [64, 128], strides = [1, 1]} : vector<64x384xf32> to vector<64x128xf32>
    %42 = vector.extract_strided_slice %39 {offsets = [0, 0], sizes = [64, 32], strides = [1, 1]} : vector<64x128xf32> to vector<64x32xf32>
    %43 = vector.shape_cast %42 : vector<64x32xf32> to vector<4x16x32xf32>
    %44 = vector.extract_strided_slice %39 {offsets = [0, 32], sizes = [64, 32], strides = [1, 1]} : vector<64x128xf32> to vector<64x32xf32>
    %45 = vector.shape_cast %44 : vector<64x32xf32> to vector<4x16x32xf32>
    %46 = vector.extract_strided_slice %39 {offsets = [0, 64], sizes = [64, 32], strides = [1, 1]} : vector<64x128xf32> to vector<64x32xf32>
    %47 = vector.shape_cast %46 : vector<64x32xf32> to vector<4x16x32xf32>
    %48 = vector.extract_strided_slice %39 {offsets = [0, 96], sizes = [64, 32], strides = [1, 1]} : vector<64x128xf32> to vector<64x32xf32>
    %49 = vector.shape_cast %48 : vector<64x32xf32> to vector<4x16x32xf32>
    %50 = tpu.concatenate %43, %45, %47, %49 in 0 : vector<4x16x32xf32>, vector<4x16x32xf32>, vector<4x16x32xf32>, vector<4x16x32xf32> -> vector<16x16x32xf32>
    %51 = arith.truncf %50 : vector<16x16x32xf32> to vector<16x16x32xbf16>
    %52 = vector.extract_strided_slice %40 {offsets = [0, 0], sizes = [64, 32], strides = [1, 1]} : vector<64x128xf32> to vector<64x32xf32>
    %53 = vector.shape_cast %52 : vector<64x32xf32> to vector<4x16x32xf32>
    %54 = vector.extract_strided_slice %40 {offsets = [0, 32], sizes = [64, 32], strides = [1, 1]} : vector<64x128xf32> to vector<64x32xf32>
    %55 = vector.shape_cast %54 : vector<64x32xf32> to vector<4x16x32xf32>
    %56 = vector.extract_strided_slice %40 {offsets = [0, 64], sizes = [64, 32], strides = [1, 1]} : vector<64x128xf32> to vector<64x32xf32>
    %57 = vector.shape_cast %56 : vector<64x32xf32> to vector<4x16x32xf32>
    %58 = vector.extract_strided_slice %40 {offsets = [0, 96], sizes = [64, 32], strides = [1, 1]} : vector<64x128xf32> to vector<64x32xf32>
    %59 = vector.shape_cast %58 : vector<64x32xf32> to vector<4x16x32xf32>
    %60 = tpu.concatenate %53, %55, %57, %59 in 0 : vector<4x16x32xf32>, vector<4x16x32xf32>, vector<4x16x32xf32>, vector<4x16x32xf32> -> vector<16x16x32xf32>
    %61 = arith.truncf %60 : vector<16x16x32xf32> to vector<16x16x32xbf16>
    %62 = vector.extract_strided_slice %41 {offsets = [0, 0], sizes = [64, 32], strides = [1, 1]} : vector<64x128xf32> to vector<64x32xf32>
    %63 = vector.shape_cast %62 : vector<64x32xf32> to vector<4x16x32xf32>
    %64 = vector.extract_strided_slice %41 {offsets = [0, 32], sizes = [64, 32], strides = [1, 1]} : vector<64x128xf32> to vector<64x32xf32>
    %65 = vector.shape_cast %64 : vector<64x32xf32> to vector<4x16x32xf32>
    %66 = vector.extract_strided_slice %41 {offsets = [0, 64], sizes = [64, 32], strides = [1, 1]} : vector<64x128xf32> to vector<64x32xf32>
    %67 = vector.shape_cast %66 : vector<64x32xf32> to vector<4x16x32xf32>
    %68 = vector.extract_strided_slice %41 {offsets = [0, 96], sizes = [64, 32], strides = [1, 1]} : vector<64x128xf32> to vector<64x32xf32>
    %69 = vector.shape_cast %68 : vector<64x32xf32> to vector<4x16x32xf32>
    %70 = tpu.concatenate %63, %65, %67, %69 in 0 : vector<4x16x32xf32>, vector<4x16x32xf32>, vector<4x16x32xf32>, vector<4x16x32xf32> -> vector<16x16x32xf32>
    %71 = arith.truncf %70 : vector<16x16x32xf32> to vector<16x16x32xbf16>
    "tpu.trace_start"() <{level = 10 : i32, message = "bqd,bkd->bqk"}> : () -> ()
    %cst_21 = arith.constant dense<0.000000e+00> : vector<16x16x16xf32>
    %72 = tpu.matmul %51, %61, %cst_21 {dimension_numbers = #tpu.dot_dimension_numbers<[2], [2], [1], [1], [0, 0, 0, 1, 1, 1], [0], [0]>} : vector<16x16x32xbf16>, vector<16x16x32xbf16>, vector<16x16x16xf32> -> vector<16x16x16xf32>
    "tpu.trace_stop"() : () -> ()
    %cst_22 = arith.constant dense<0xFF800000> : vector<16x16xf32>
    %73 = vector.multi_reduction <maximumf>, %72, %cst_22 [2] : vector<16x16x16xf32> to vector<16x16xf32>
    %74 = vector.shape_cast %73 : vector<16x16xf32> to vector<16x16x1xf32>
    %75 = vector.broadcast %74 : vector<16x16x1xf32> to vector<16x16x16xf32>
    %76 = arith.subf %72, %75 : vector<16x16x16xf32>
    %77 = math.exp %76 : vector<16x16x16xf32>
    %cst_23 = arith.constant dense<0.000000e+00> : vector<16x16xf32>
    %78 = vector.multi_reduction <add>, %77, %cst_23 [2] : vector<16x16x16xf32> to vector<16x16xf32>
    %79 = vector.shape_cast %78 : vector<16x16xf32> to vector<16x16x1xf32>
    %80 = tpu.reciprocal %79 {approx = true} : vector<16x16x1xf32> -> vector<16x16x1xf32>
    %81 = vector.broadcast %80 : vector<16x16x1xf32> to vector<16x16x16xf32>
    %82 = arith.mulf %77, %81 : vector<16x16x16xf32>
    %83 = arith.truncf %82 : vector<16x16x16xf32> to vector<16x16x16xbf16>
    "tpu.trace_start"() <{level = 10 : i32, message = "bqk,bkd->bqd"}> : () -> ()
    %cst_24 = arith.constant dense<0.000000e+00> : vector<16x16x32xf32>
    %84 = tpu.matmul %83, %71, %cst_24 {dimension_numbers = #tpu.dot_dimension_numbers<[2], [1], [1], [2], [0, 0, 0, 1, 1, 2], [0], [0]>} : vector<16x16x16xbf16>, vector<16x16x32xbf16>, vector<16x16x32xf32> -> vector<16x16x32xf32>
    "tpu.trace_stop"() : () -> ()
    %85 = vector.extract_strided_slice %84 {offsets = [0, 0, 0], sizes = [4, 16, 32], strides = [1, 1, 1]} : vector<16x16x32xf32> to vector<4x16x32xf32>
    %86 = vector.shape_cast %85 : vector<4x16x32xf32> to vector<64x32xf32>
    %87 = vector.extract_strided_slice %84 {offsets = [4, 0, 0], sizes = [4, 16, 32], strides = [1, 1, 1]} : vector<16x16x32xf32> to vector<4x16x32xf32>
    %88 = vector.shape_cast %87 : vector<4x16x32xf32> to vector<64x32xf32>
    %89 = vector.extract_strided_slice %84 {offsets = [8, 0, 0], sizes = [4, 16, 32], strides = [1, 1, 1]} : vector<16x16x32xf32> to vector<4x16x32xf32>
    %90 = vector.shape_cast %89 : vector<4x16x32xf32> to vector<64x32xf32>
    %91 = vector.extract_strided_slice %84 {offsets = [12, 0, 0], sizes = [4, 16, 32], strides = [1, 1, 1]} : vector<16x16x32xf32> to vector<4x16x32xf32>
    %92 = vector.shape_cast %91 : vector<4x16x32xf32> to vector<64x32xf32>
    %93 = tpu.concatenate %86, %88, %90, %92 in 1 : vector<64x32xf32>, vector<64x32xf32>, vector<64x32xf32>, vector<64x32xf32> -> vector<64x128xf32>
    %94 = arith.truncf %93 : vector<64x128xf32> to vector<64x128xbf16>
    %c0_25 = arith.constant 0 : index
    %c0_26 = arith.constant 0 : index
    %95 = vector.load %arg6[%c0_25, %c0_26] : memref<128x128xbf16, #tpu.memory_space<vmem>>, vector<128x128xbf16>
    %cst_27 = arith.constant dense<0.000000e+00> : vector<64x128xf32>
    %96 = tpu.matmul %94, %95, %cst_27 {dimension_numbers = #tpu.dot_dimension_numbers<[1], [0], [0], [1], [0, 0, 1, 1], [], []>} : vector<64x128xbf16>, vector<128x128xbf16>, vector<64x128xf32> -> vector<64x128xf32>
    %c0_28 = arith.constant 0 : index
    %c0_29 = arith.constant 0 : index
    %97 = vector.load %arg7[%c0_28, %c0_29] : memref<1x128xf32, #tpu.memory_space<vmem>>, vector<1x128xf32>
    %98 = vector.broadcast %97 : vector<1x128xf32> to vector<64x128xf32>
    %99 = arith.addf %96, %98 : vector<64x128xf32>
    %100 = arith.addf %8, %99 : vector<64x128xf32>
    %cst_30 = arith.constant dense<0.000000e+00> : vector<64xf32>
    %101 = vector.multi_reduction <add>, %100, %cst_30 [1] : vector<64x128xf32> to vector<64xf32>
    %102 = vector.shape_cast %101 : vector<64xf32> to vector<64x1xf32>
    %cst_31 = arith.constant 1.280000e+02 : f32
    %103 = vector.broadcast %cst_31 : f32 to vector<64x1xf32>
    %104 = arith.divf %102, %103 : vector<64x1xf32>
    %105 = vector.broadcast %104 : vector<64x1xf32> to vector<64x128xf32>
    %106 = arith.subf %100, %105 : vector<64x128xf32>
    %107 = arith.mulf %106, %106 : vector<64x128xf32>
    %cst_32 = arith.constant dense<0.000000e+00> : vector<64xf32>
    %108 = vector.multi_reduction <add>, %107, %cst_32 [1] : vector<64x128xf32> to vector<64xf32>
    %109 = vector.shape_cast %108 : vector<64xf32> to vector<64x1xf32>
    %cst_33 = arith.constant 1.280000e+02 : f32
    %110 = vector.broadcast %cst_33 : f32 to vector<64x1xf32>
    %111 = arith.divf %109, %110 : vector<64x1xf32>
    %112 = vector.broadcast %104 : vector<64x1xf32> to vector<64x128xf32>
    %113 = arith.subf %100, %112 : vector<64x128xf32>
    %cst_34 = arith.constant 9.99999974E-6 : f32
    %114 = vector.broadcast %cst_34 : f32 to vector<64x1xf32>
    %115 = arith.addf %111, %114 : vector<64x1xf32>
    %116 = math.rsqrt %115 : vector<64x1xf32>
    %117 = vector.broadcast %116 : vector<64x1xf32> to vector<64x128xf32>
    %118 = arith.mulf %113, %117 : vector<64x128xf32>
    %c0_35 = arith.constant 0 : index
    %c0_36 = arith.constant 0 : index
    %119 = vector.load %arg8[%c0_35, %c0_36] : memref<1x128xf32, #tpu.memory_space<vmem>>, vector<1x128xf32>
    %120 = vector.broadcast %119 : vector<1x128xf32> to vector<64x128xf32>
    %121 = arith.mulf %118, %120 : vector<64x128xf32>
    %c0_37 = arith.constant 0 : index
    %c0_38 = arith.constant 0 : index
    %122 = vector.load %arg9[%c0_37, %c0_38] : memref<1x128xf32, #tpu.memory_space<vmem>>, vector<1x128xf32>
    %123 = vector.broadcast %122 : vector<1x128xf32> to vector<64x128xf32>
    %124 = arith.addf %121, %123 : vector<64x128xf32>
    %125 = arith.truncf %124 : vector<64x128xf32> to vector<64x128xbf16>
    %c0_39 = arith.constant 0 : index
    %c0_40 = arith.constant 0 : index
    %126 = vector.load %arg10[%c0_39, %c0_40] : memref<128x512xbf16, #tpu.memory_space<vmem>>, vector<128x512xbf16>
    %cst_41 = arith.constant dense<0.000000e+00> : vector<64x512xf32>
    %127 = tpu.matmul %125, %126, %cst_41 {dimension_numbers = #tpu.dot_dimension_numbers<[1], [0], [0], [1], [0, 0, 1, 1], [], []>} : vector<64x128xbf16>, vector<128x512xbf16>, vector<64x512xf32> -> vector<64x512xf32>
    %c0_42 = arith.constant 0 : index
    %c0_43 = arith.constant 0 : index
    %128 = vector.load %arg11[%c0_42, %c0_43] : memref<1x512xf32, #tpu.memory_space<vmem>>, vector<1x512xf32>
    %129 = vector.broadcast %128 : vector<1x512xf32> to vector<64x512xf32>
    %130 = arith.addf %127, %129 : vector<64x512xf32>
    %131 = arith.truncf %130 : vector<64x512xf32> to vector<64x512xbf16>
    %cst_44 = arith.constant 1.703130e+00 : bf16
    %132 = vector.broadcast %cst_44 : bf16 to vector<64x512xbf16>
    %133 = arith.mulf %132, %131 : vector<64x512xbf16>
    %134 = arith.negf %133 : vector<64x512xbf16>
    %135 = math.exp %134 : vector<64x512xbf16>
    %cst_45 = arith.constant 1.000000e+00 : bf16
    %136 = vector.broadcast %cst_45 : bf16 to vector<64x512xbf16>
    %137 = arith.addf %136, %135 : vector<64x512xbf16>
    %138 = arith.divf %136, %137 : vector<64x512xbf16>
    %139 = arith.mulf %131, %138 : vector<64x512xbf16>
    %c0_46 = arith.constant 0 : index
    %c0_47 = arith.constant 0 : index
    %140 = vector.load %arg12[%c0_46, %c0_47] : memref<512x128xbf16, #tpu.memory_space<vmem>>, vector<512x128xbf16>
    %cst_48 = arith.constant dense<0.000000e+00> : vector<64x128xf32>
    %141 = tpu.matmul %139, %140, %cst_48 {dimension_numbers = #tpu.dot_dimension_numbers<[1], [0], [0], [1], [0, 0, 1, 1], [], []>} : vector<64x512xbf16>, vector<512x128xbf16>, vector<64x128xf32> -> vector<64x128xf32>
    %c0_49 = arith.constant 0 : index
    %c0_50 = arith.constant 0 : index
    %142 = vector.load %arg13[%c0_49, %c0_50] : memref<1x128xf32, #tpu.memory_space<vmem>>, vector<1x128xf32>
    %143 = vector.broadcast %142 : vector<1x128xf32> to vector<64x128xf32>
    %144 = arith.addf %141, %143 : vector<64x128xf32>
    %145 = arith.addf %100, %144 : vector<64x128xf32>
    %146 = vector.shape_cast %145 : vector<64x128xf32> to vector<4x16x128xf32>
    %147 = vector.extract_strided_slice %146 {offsets = [0, 0, 0], sizes = [1, 16, 128], strides = [1, 1, 1]} : vector<4x16x128xf32> to vector<1x16x128xf32>
    %148 = vector.shape_cast %147 : vector<1x16x128xf32> to vector<16x128xf32>
    %c0_51 = arith.constant 0 : index
    %c0_52 = arith.constant 0 : index
    %c0_53 = arith.constant 0 : index
    %149 = vector.load %arg14[%c0_51, %c0_52, %c0_53] : memref<16x4x128xf32, #tpu.memory_space<vmem>>, vector<16x1x128xf32>
    %150 = vector.shape_cast %149 : vector<16x1x128xf32> to vector<16x128xf32>
    %151 = vector.shape_cast %148 : vector<16x128xf32> to vector<16x1x128xf32>
    tpu.vector_store %arg14[%c0_51, %c0_52, %c0_53], %151 {strides = array<i32>} : memref<16x4x128xf32, #tpu.memory_space<vmem>>, vector<16x1x128xf32>,
    %152 = vector.extract_strided_slice %146 {offsets = [1, 0, 0], sizes = [1, 16, 128], strides = [1, 1, 1]} : vector<4x16x128xf32> to vector<1x16x128xf32>
    %153 = vector.shape_cast %152 : vector<1x16x128xf32> to vector<16x128xf32>
    %c0_54 = arith.constant 0 : index
    %c1_55 = arith.constant 1 : index
    %c0_56 = arith.constant 0 : index
    %154 = vector.load %arg14[%c0_54, %c1_55, %c0_56] : memref<16x4x128xf32, #tpu.memory_space<vmem>>, vector<16x1x128xf32>
    %155 = vector.shape_cast %154 : vector<16x1x128xf32> to vector<16x128xf32>
    %156 = vector.shape_cast %153 : vector<16x128xf32> to vector<16x1x128xf32>
    tpu.vector_store %arg14[%c0_54, %c1_55, %c0_56], %156 {strides = array<i32>} : memref<16x4x128xf32, #tpu.memory_space<vmem>>, vector<16x1x128xf32>,
    %157 = vector.extract_strided_slice %146 {offsets = [2, 0, 0], sizes = [1, 16, 128], strides = [1, 1, 1]} : vector<4x16x128xf32> to vector<1x16x128xf32>
    %158 = vector.shape_cast %157 : vector<1x16x128xf32> to vector<16x128xf32>
    %c0_57 = arith.constant 0 : index
    %c2_58 = arith.constant 2 : index
    %c0_59 = arith.constant 0 : index
    %159 = vector.load %arg14[%c0_57, %c2_58, %c0_59] : memref<16x4x128xf32, #tpu.memory_space<vmem>>, vector<16x1x128xf32>
    %160 = vector.shape_cast %159 : vector<16x1x128xf32> to vector<16x128xf32>
    %161 = vector.shape_cast %158 : vector<16x128xf32> to vector<16x1x128xf32>
    tpu.vector_store %arg14[%c0_57, %c2_58, %c0_59], %161 {strides = array<i32>} : memref<16x4x128xf32, #tpu.memory_space<vmem>>, vector<16x1x128xf32>,
    %162 = vector.extract_strided_slice %146 {offsets = [3, 0, 0], sizes = [1, 16, 128], strides = [1, 1, 1]} : vector<4x16x128xf32> to vector<1x16x128xf32>
    %163 = vector.shape_cast %162 : vector<1x16x128xf32> to vector<16x128xf32>
    %c0_60 = arith.constant 0 : index
    %c3_61 = arith.constant 3 : index
    %c0_62 = arith.constant 0 : index
    %164 = vector.load %arg14[%c0_60, %c3_61, %c0_62] : memref<16x4x128xf32, #tpu.memory_space<vmem>>, vector<16x1x128xf32>
    %165 = vector.shape_cast %164 : vector<16x1x128xf32> to vector<16x128xf32>
    %166 = vector.shape_cast %163 : vector<16x128xf32> to vector<16x1x128xf32>
    tpu.vector_store %arg14[%c0_60, %c3_61, %c0_62], %166 {strides = array<i32>} : memref<16x4x128xf32, #tpu.memory_space<vmem>>, vector<16x1x128xf32>,
    return
  }
  func.func @transform_0(%arg0: i32) -> (i32, i32, i32) {
    %c0_i32 = arith.constant 0 : i32
    %c0_i32_0 = arith.constant 0 : i32
    %c0_i32_1 = arith.constant 0 : i32
    return %c0_i32, %arg0, %c0_i32_0 : i32, i32, i32
  }
  func.func @transform_1(%arg0: i32) -> (i32, i32) {
    %c0_i32 = arith.constant 0 : i32
    %c0_i32_0 = arith.constant 0 : i32
    %c0_i32_1 = arith.constant 0 : i32
    return %c0_i32, %c0_i32_0 : i32, i32
  }
  func.func @transform_2(%arg0: i32) -> (i32, i32) {
    %c0_i32 = arith.constant 0 : i32
    %c0_i32_0 = arith.constant 0 : i32
    %c0_i32_1 = arith.constant 0 : i32
    return %c0_i32, %c0_i32_0 : i32, i32
  }
  func.func @transform_3(%arg0: i32) -> (i32, i32) {
    %c0_i32 = arith.constant 0 : i32
    %c0_i32_0 = arith.constant 0 : i32
    %c0_i32_1 = arith.constant 0 : i32
    return %c0_i32, %c0_i32_0 : i32, i32
  }
  func.func @transform_4(%arg0: i32) -> (i32, i32) {
    %c0_i32 = arith.constant 0 : i32
    %c0_i32_0 = arith.constant 0 : i32
    %c0_i32_1 = arith.constant 0 : i32
    return %c0_i32, %c0_i32_0 : i32, i32
  }
  func.func @transform_5(%arg0: i32) -> (i32, i32) {
    %c0_i32 = arith.constant 0 : i32
    %c0_i32_0 = arith.constant 0 : i32
    %c0_i32_1 = arith.constant 0 : i32
    return %c0_i32, %c0_i32_0 : i32, i32
  }
  func.func @transform_6(%arg0: i32) -> (i32, i32) {
    %c0_i32 = arith.constant 0 : i32
    %c0_i32_0 = arith.constant 0 : i32
    %c0_i32_1 = arith.constant 0 : i32
    return %c0_i32, %c0_i32_0 : i32, i32
  }
  func.func @transform_7(%arg0: i32) -> (i32, i32) {
    %c0_i32 = arith.constant 0 : i32
    %c0_i32_0 = arith.constant 0 : i32
    %c0_i32_1 = arith.constant 0 : i32
    return %c0_i32, %c0_i32_0 : i32, i32
  }
  func.func @transform_8(%arg0: i32) -> (i32, i32) {
    %c0_i32 = arith.constant 0 : i32
    %c0_i32_0 = arith.constant 0 : i32
    %c0_i32_1 = arith.constant 0 : i32
    return %c0_i32, %c0_i32_0 : i32, i32
  }
  func.func @transform_9(%arg0: i32) -> (i32, i32) {
    %c0_i32 = arith.constant 0 : i32
    %c0_i32_0 = arith.constant 0 : i32
    %c0_i32_1 = arith.constant 0 : i32
    return %c0_i32, %c0_i32_0 : i32, i32
  }
  func.func @transform_10(%arg0: i32) -> (i32, i32) {
    %c0_i32 = arith.constant 0 : i32
    %c0_i32_0 = arith.constant 0 : i32
    %c0_i32_1 = arith.constant 0 : i32
    return %c0_i32, %c0_i32_0 : i32, i32
  }
  func.func @transform_11(%arg0: i32) -> (i32, i32) {
    %c0_i32 = arith.constant 0 : i32
    %c0_i32_0 = arith.constant 0 : i32
    %c0_i32_1 = arith.constant 0 : i32
    return %c0_i32, %c0_i32_0 : i32, i32
  }
  func.func @transform_12(%arg0: i32) -> (i32, i32) {
    %c0_i32 = arith.constant 0 : i32
    %c0_i32_0 = arith.constant 0 : i32
    %c0_i32_1 = arith.constant 0 : i32
    return %c0_i32, %c0_i32_0 : i32, i32
  }
  func.func @transform_13(%arg0: i32) -> (i32, i32, i32) {
    %c0_i32 = arith.constant 0 : i32
    %c0_i32_0 = arith.constant 0 : i32
    %c0_i32_1 = arith.constant 0 : i32
    return %c0_i32, %arg0, %c0_i32_0 : i32, i32, i32
  }
}

module attributes {stable_mosaic.version = 11 : i64} {
  func.func @_residual_attention_kernel(%arg0: i32, %arg1: memref<16x4x128xf32, #tpu.memory_space<vmem>>, %arg2: memref<1x128xf32, #tpu.memory_space<vmem>>, %arg3: memref<1x128xf32, #tpu.memory_space<vmem>>, %arg4: memref<128x384xbf16, #tpu.memory_space<vmem>>, %arg5: memref<1x384xf32, #tpu.memory_space<vmem>>, %arg6: memref<128x128xbf16, #tpu.memory_space<vmem>>, %arg7: memref<1x128xf32, #tpu.memory_space<vmem>>, %arg8: memref<1x128xf32, #tpu.memory_space<vmem>>, %arg9: memref<1x128xf32, #tpu.memory_space<vmem>>, %arg10: memref<128x512xbf16, #tpu.memory_space<vmem>>, %arg11: memref<1x512xf32, #tpu.memory_space<vmem>>, %arg12: memref<512x128xbf16, #tpu.memory_space<vmem>>, %arg13: memref<1x128xf32, #tpu.memory_space<vmem>>, %arg14: memref<16x4x128xf32, #tpu.memory_space<vmem>>) attributes {dimension_semantics = [#tpu.dimension_semantics<parallel>], iteration_bounds = array<i64: 1>, scalar_prefetch = 0 : i64, scratch_operands = 0 : i64, tpu.core_type = #tpu.core_type<tc>, window_params = [{transform_indices = @transform_0, window_bounds = array<i64: 16, 4, 128>}, {pipeline_mode = #tpu.pipeline_mode<synchronous>, transform_indices = @transform_1, window_bounds = array<i64: 1, 128>}, {pipeline_mode = #tpu.pipeline_mode<synchronous>, transform_indices = @transform_2, window_bounds = array<i64: 1, 128>}, {pipeline_mode = #tpu.pipeline_mode<synchronous>, transform_indices = @transform_3, window_bounds = array<i64: 128, 384>}, {pipeline_mode = #tpu.pipeline_mode<synchronous>, transform_indices = @transform_4, window_bounds = array<i64: 1, 384>}, {pipeline_mode = #tpu.pipeline_mode<synchronous>, transform_indices = @transform_5, window_bounds = array<i64: 128, 128>}, {pipeline_mode = #tpu.pipeline_mode<synchronous>, transform_indices = @transform_6, window_bounds = array<i64: 1, 128>}, {pipeline_mode = #tpu.pipeline_mode<synchronous>, transform_indices = @transform_7, window_bounds = array<i64: 1, 128>}, {pipeline_mode = #tpu.pipeline_mode<synchronous>, transform_indices = @transform_8, window_bounds = array<i64: 1, 128>}, {pipeline_mode = #tpu.pipeline_mode<synchronous>, transform_indices = @transform_9, window_bounds = array<i64: 128, 512>}, {pipeline_mode = #tpu.pipeline_mode<synchronous>, transform_indices = @transform_10, window_bounds = array<i64: 1, 512>}, {pipeline_mode = #tpu.pipeline_mode<synchronous>, transform_indices = @transform_11, window_bounds = array<i64: 512, 128>}, {pipeline_mode = #tpu.pipeline_mode<synchronous>, transform_indices = @transform_12, window_bounds = array<i64: 1, 128>}, {transform_indices = @transform_13, window_bounds = array<i64: 16, 4, 128>}]} {
    %c0 = arith.constant 0 : index
    %c0_0 = arith.constant 0 : index
    %c0_1 = arith.constant 0 : index
    %0 = vector.load %arg1[%c0, %c0_0, %c0_1] : memref<16x4x128xf32, #tpu.memory_space<vmem>>, vector<16x1x128xf32>
    %1 = vector.shape_cast %0 : vector<16x1x128xf32> to vector<16x128xf32>
    %c0_2 = arith.constant 0 : index
    %c1 = arith.constant 1 : index
    %c0_3 = arith.constant 0 : index
    %2 = vector.load %arg1[%c0_2, %c1, %c0_3] : memref<16x4x128xf32, #tpu.memory_space<vmem>>, vector<16x1x128xf32>
    %3 = vector.shape_cast %2 : vector<16x1x128xf32> to vector<16x128xf32>
    %c0_4 = arith.constant 0 : index
    %c2 = arith.constant 2 : index
    %c0_5 = arith.constant 0 : index
    %4 = vector.load %arg1[%c0_4, %c2, %c0_5] : memref<16x4x128xf32, #tpu.memory_space<vmem>>, vector<16x1x128xf32>
    %5 = vector.shape_cast %4 : vector<16x1x128xf32> to vector<16x128xf32>
    %c0_6 = arith.constant 0 : index
    %c3 = arith.constant 3 : index
    %c0_7 = arith.constant 0 : index
    %6 = vector.load %arg1[%c0_6, %c3, %c0_7] : memref<16x4x128xf32, #tpu.memory_space<vmem>>, vector<16x1x128xf32>
    %7 = vector.shape_cast %6 : vector<16x1x128xf32> to vector<16x128xf32>
    %8 = tpu.concatenate %1, %3, %5, %7 in 0 : vector<16x128xf32>, vector<16x128xf32>, vector<16x128xf32>, vector<16x128xf32> -> vector<64x128xf32>
    %cst = arith.constant dense<0.000000e+00> : vector<64xf32>
    %9 = vector.multi_reduction <add>, %8, %cst [1] : vector<64x128xf32> to vector<64xf32>
    %10 = vector.shape_cast %9 : vector<64xf32> to vector<64x1xf32>
    %cst_8 = arith.constant 1.280000e+02 : f32
    %11 = vector.broadcast %cst_8 : f32 to vector<64x1xf32>
    %12 = arith.divf %10, %11 : vector<64x1xf32>
    %13 = vector.broadcast %12 : vector<64x1xf32> to vector<64x128xf32>
    %14 = arith.subf %8, %13 : vector<64x128xf32>
    %15 = arith.mulf %14, %14 : vector<64x128xf32>
    %cst_9 = arith.constant dense<0.000000e+00> : vector<64xf32>
    %16 = vector.multi_reduction <add>, %15, %cst_9 [1] : vector<64x128xf32> to vector<64xf32>
    %17 = vector.shape_cast %16 : vector<64xf32> to vector<64x1xf32>
    %cst_10 = arith.constant 1.280000e+02 : f32
    %18 = vector.broadcast %cst_10 : f32 to vector<64x1xf32>
    %19 = arith.divf %17, %18 : vector<64x1xf32>
    %20 = vector.broadcast %12 : vector<64x1xf32> to vector<64x128xf32>
    %21 = arith.subf %8, %20 : vector<64x128xf32>
    %cst_11 = arith.constant 9.99999974E-6 : f32
    %22 = vector.broadcast %cst_11 : f32 to vector<64x1xf32>
    %23 = arith.addf %19, %22 : vector<64x1xf32>
    %24 = math.rsqrt %23 : vector<64x1xf32>
    %25 = vector.broadcast %24 : vector<64x1xf32> to vector<64x128xf32>
    %26 = arith.mulf %21, %25 : vector<64x128xf32>
    %c0_12 = arith.constant 0 : index
    %c0_13 = arith.constant 0 : index
    %27 = vector.load %arg2[%c0_12, %c0_13] : memref<1x128xf32, #tpu.memory_space<vmem>>, vector<1x128xf32>
    %28 = vector.broadcast %27 : vector<1x128xf32> to vector<64x128xf32>
    %29 = arith.mulf %26, %28 : vector<64x128xf32>
    %c0_14 = arith.constant 0 : index
    %c0_15 = arith.constant 0 : index
    %30 = vector.load %arg3[%c0_14, %c0_15] : memref<1x128xf32, #tpu.memory_space<vmem>>, vector<1x128xf32>
    %31 = vector.broadcast %30 : vector<1x128xf32> to vector<64x128xf32>
    %32 = arith.addf %29, %31 : vector<64x128xf32>
    %33 = arith.truncf %32 : vector<64x128xf32> to vector<64x128xbf16>
    %c0_16 = arith.constant 0 : index
    %c0_17 = arith.constant 0 : index
    %34 = vector.load %arg4[%c0_16, %c0_17] : memref<128x384xbf16, #tpu.memory_space<vmem>>, vector<128x384xbf16>
    %cst_18 = arith.constant dense<0.000000e+00> : vector<64x384xf32>
    %35 = tpu.matmul %33, %34, %cst_18 {dimension_numbers = #tpu.dot_dimension_numbers<[1], [0], [0], [1], [0, 0, 1, 1], [], []>} : vector<64x128xbf16>, vector<128x384xbf16>, vector<64x384xf32> -> vector<64x384xf32>
    %c0_19 = arith.constant 0 : index
    %c0_20 = arith.constant 0 : index
    %36 = vector.load %arg5[%c0_19, %c0_20] : memref<1x384xf32, #tpu.memory_space<vmem>>, vector<1x384xf32>
    %37 = vector.broadcast %36 : vector<1x384xf32> to vector<64x384xf32>
    %38 = arith.addf %35, %37 : vector<64x384xf32>
    %39 = vector.extract_strided_slice %38 {offsets = [0, 0], sizes = [64, 128], strides = [1, 1]} : vector<64x384xf32> to vector<64x128xf32>
    %40 = vector.extract_strided_slice %38 {offsets = [0, 128], sizes = [64, 128], strides = [1, 1]} : vector<64x384xf32> to vector<64x128xf32>
    %41 = vector.extract_strided_slice %38 {offsets = [0, 256], sizes = [64, 128], strides = [1, 1]} : vector<64x384xf32> to vector<64x128xf32>
    %42 = vector.extract_strided_slice %39 {offsets = [0, 0], sizes = [64, 32], strides = [1, 1]} : vector<64x128xf32> to vector<64x32xf32>
    %43 = vector.shape_cast %42 : vector<64x32xf32> to vector<4x16x32xf32>
    %44 = vector.extract_strided_slice %39 {offsets = [0, 32], sizes = [64, 32], strides = [1, 1]} : vector<64x128xf32> to vector<64x32xf32>
    %45 = vector.shape_cast %44 : vector<64x32xf32> to vector<4x16x32xf32>
    %46 = vector.extract_strided_slice %39 {offsets = [0, 64], sizes = [64, 32], strides = [1, 1]} : vector<64x128xf32> to vector<64x32xf32>
    %47 = vector.shape_cast %46 : vector<64x32xf32> to vector<4x16x32xf32>
    %48 = vector.extract_strided_slice %39 {offsets = [0, 96], sizes = [64, 32], strides = [1, 1]} : vector<64x128xf32> to vector<64x32xf32>
    %49 = vector.shape_cast %48 : vector<64x32xf32> to vector<4x16x32xf32>
    %50 = tpu.concatenate %43, %45, %47, %49 in 0 : vector<4x16x32xf32>, vector<4x16x32xf32>, vector<4x16x32xf32>, vector<4x16x32xf32> -> vector<16x16x32xf32>
    %51 = arith.truncf %50 : vector<16x16x32xf32> to vector<16x16x32xbf16>
    %52 = vector.extract_strided_slice %40 {offsets = [0, 0], sizes = [64, 32], strides = [1, 1]} : vector<64x128xf32> to vector<64x32xf32>
    %53 = vector.shape_cast %52 : vector<64x32xf32> to vector<4x16x32xf32>
    %54 = vector.extract_strided_slice %40 {offsets = [0, 32], sizes = [64, 32], strides = [1, 1]} : vector<64x128xf32> to vector<64x32xf32>
    %55 = vector.shape_cast %54 : vector<64x32xf32> to vector<4x16x32xf32>
    %56 = vector.extract_strided_slice %40 {offsets = [0, 64], sizes = [64, 32], strides = [1, 1]} : vector<64x128xf32> to vector<64x32xf32>
    %57 = vector.shape_cast %56 : vector<64x32xf32> to vector<4x16x32xf32>
    %58 = vector.extract_strided_slice %40 {offsets = [0, 96], sizes = [64, 32], strides = [1, 1]} : vector<64x128xf32> to vector<64x32xf32>
    %59 = vector.shape_cast %58 : vector<64x32xf32> to vector<4x16x32xf32>
    %60 = tpu.concatenate %53, %55, %57, %59 in 0 : vector<4x16x32xf32>, vector<4x16x32xf32>, vector<4x16x32xf32>, vector<4x16x32xf32> -> vector<16x16x32xf32>
    %61 = arith.truncf %60 : vector<16x16x32xf32> to vector<16x16x32xbf16>
    %62 = vector.extract_strided_slice %41 {offsets = [0, 0], sizes = [64, 32], strides = [1, 1]} : vector<64x128xf32> to vector<64x32xf32>
    %63 = vector.shape_cast %62 : vector<64x32xf32> to vector<4x16x32xf32>
    %64 = vector.extract_strided_slice %41 {offsets = [0, 32], sizes = [64, 32], strides = [1, 1]} : vector<64x128xf32> to vector<64x32xf32>
    %65 = vector.shape_cast %64 : vector<64x32xf32> to vector<4x16x32xf32>
    %66 = vector.extract_strided_slice %41 {offsets = [0, 64], sizes = [64, 32], strides = [1, 1]} : vector<64x128xf32> to vector<64x32xf32>
    %67 = vector.shape_cast %66 : vector<64x32xf32> to vector<4x16x32xf32>
    %68 = vector.extract_strided_slice %41 {offsets = [0, 96], sizes = [64, 32], strides = [1, 1]} : vector<64x128xf32> to vector<64x32xf32>
    %69 = vector.shape_cast %68 : vector<64x32xf32> to vector<4x16x32xf32>
    %70 = tpu.concatenate %63, %65, %67, %69 in 0 : vector<4x16x32xf32>, vector<4x16x32xf32>, vector<4x16x32xf32>, vector<4x16x32xf32> -> vector<16x16x32xf32>
    %71 = arith.truncf %70 : vector<16x16x32xf32> to vector<16x16x32xbf16>
    "tpu.trace_start"() <{level = 10 : i32, message = "bqd,bkd->bqk"}> : () -> ()
    %cst_21 = arith.constant dense<0.000000e+00> : vector<16x16x16xf32>
    %72 = tpu.matmul %51, %61, %cst_21 {dimension_numbers = #tpu.dot_dimension_numbers<[2], [2], [1], [1], [0, 0, 0, 1, 1, 1], [0], [0]>} : vector<16x16x32xbf16>, vector<16x16x32xbf16>, vector<16x16x16xf32> -> vector<16x16x16xf32>
    "tpu.trace_stop"() : () -> ()
    %cst_22 = arith.constant dense<0xFF800000> : vector<16x16xf32>
    %73 = vector.multi_reduction <maximumf>, %72, %cst_22 [2] : vector<16x16x16xf32> to vector<16x16xf32>
    %74 = vector.shape_cast %73 : vector<16x16xf32> to vector<16x16x1xf32>
    %75 = vector.broadcast %74 : vector<16x16x1xf32> to vector<16x16x16xf32>
    %76 = arith.subf %72, %75 : vector<16x16x16xf32>
    %77 = math.exp %76 : vector<16x16x16xf32>
    %cst_23 = arith.constant dense<0.000000e+00> : vector<16x16xf32>
    %78 = vector.multi_reduction <add>, %77, %cst_23 [2] : vector<16x16x16xf32> to vector<16x16xf32>
    %79 = vector.shape_cast %78 : vector<16x16xf32> to vector<16x16x1xf32>
    %80 = tpu.reciprocal %79 {approx = true} : vector<16x16x1xf32> -> vector<16x16x1xf32>
    %81 = vector.broadcast %80 : vector<16x16x1xf32> to vector<16x16x16xf32>
    %82 = arith.mulf %77, %81 : vector<16x16x16xf32>
    %83 = arith.truncf %82 : vector<16x16x16xf32> to vector<16x16x16xbf16>
    "tpu.trace_start"() <{level = 10 : i32, message = "bqk,bkd->bqd"}> : () -> ()
    %cst_24 = arith.constant dense<0.000000e+00> : vector<16x16x32xf32>
    %84 = tpu.matmul %83, %71, %cst_24 {dimension_numbers = #tpu.dot_dimension_numbers<[2], [1], [1], [2], [0, 0, 0, 1, 1, 2], [0], [0]>} : vector<16x16x16xbf16>, vector<16x16x32xbf16>, vector<16x16x32xf32> -> vector<16x16x32xf32>
    "tpu.trace_stop"() : () -> ()
    %85 = vector.extract_strided_slice %84 {offsets = [0, 0, 0], sizes = [4, 16, 32], strides = [1, 1, 1]} : vector<16x16x32xf32> to vector<4x16x32xf32>
    %86 = vector.shape_cast %85 : vector<4x16x32xf32> to vector<64x32xf32>
    %87 = vector.extract_strided_slice %84 {offsets = [4, 0, 0], sizes = [4, 16, 32], strides = [1, 1, 1]} : vector<16x16x32xf32> to vector<4x16x32xf32>
    %88 = vector.shape_cast %87 : vector<4x16x32xf32> to vector<64x32xf32>
    %89 = vector.extract_strided_slice %84 {offsets = [8, 0, 0], sizes = [4, 16, 32], strides = [1, 1, 1]} : vector<16x16x32xf32> to vector<4x16x32xf32>
    %90 = vector.shape_cast %89 : vector<4x16x32xf32> to vector<64x32xf32>
    %91 = vector.extract_strided_slice %84 {offsets = [12, 0, 0], sizes = [4, 16, 32], strides = [1, 1, 1]} : vector<16x16x32xf32> to vector<4x16x32xf32>
    %92 = vector.shape_cast %91 : vector<4x16x32xf32> to vector<64x32xf32>
    %93 = tpu.concatenate %86, %88, %90, %92 in 1 : vector<64x32xf32>, vector<64x32xf32>, vector<64x32xf32>, vector<64x32xf32> -> vector<64x128xf32>
    %94 = arith.truncf %93 : vector<64x128xf32> to vector<64x128xbf16>
    %c0_25 = arith.constant 0 : index
    %c0_26 = arith.constant 0 : index
    %95 = vector.load %arg6[%c0_25, %c0_26] : memref<128x128xbf16, #tpu.memory_space<vmem>>, vector<128x128xbf16>
    %cst_27 = arith.constant dense<0.000000e+00> : vector<64x128xf32>
    %96 = tpu.matmul %94, %95, %cst_27 {dimension_numbers = #tpu.dot_dimension_numbers<[1], [0], [0], [1], [0, 0, 1, 1], [], []>} : vector<64x128xbf16>, vector<128x128xbf16>, vector<64x128xf32> -> vector<64x128xf32>
    %c0_28 = arith.constant 0 : index
    %c0_29 = arith.constant 0 : index
    %97 = vector.load %arg7[%c0_28, %c0_29] : memref<1x128xf32, #tpu.memory_space<vmem>>, vector<1x128xf32>
    %98 = vector.broadcast %97 : vector<1x128xf32> to vector<64x128xf32>
    %99 = arith.addf %96, %98 : vector<64x128xf32>
    %100 = arith.addf %8, %99 : vector<64x128xf32>
    %cst_30 = arith.constant dense<0.000000e+00> : vector<64xf32>
    %101 = vector.multi_reduction <add>, %100, %cst_30 [1] : vector<64x128xf32> to vector<64xf32>
    %102 = vector.shape_cast %101 : vector<64xf32> to vector<64x1xf32>
    %cst_31 = arith.constant 1.280000e+02 : f32
    %103 = vector.broadcast %cst_31 : f32 to vector<64x1xf32>
    %104 = arith.divf %102, %103 : vector<64x1xf32>
    %105 = vector.broadcast %104 : vector<64x1xf32> to vector<64x128xf32>
    %106 = arith.subf %100, %105 : vector<64x128xf32>
    %107 = arith.mulf %106, %106 : vector<64x128xf32>
    %cst_32 = arith.constant dense<0.000000e+00> : vector<64xf32>
    %108 = vector.multi_reduction <add>, %107, %cst_32 [1] : vector<64x128xf32> to vector<64xf32>
    %109 = vector.shape_cast %108 : vector<64xf32> to vector<64x1xf32>
    %cst_33 = arith.constant 1.280000e+02 : f32
    %110 = vector.broadcast %cst_33 : f32 to vector<64x1xf32>
    %111 = arith.divf %109, %110 : vector<64x1xf32>
    %112 = vector.broadcast %104 : vector<64x1xf32> to vector<64x128xf32>
    %113 = arith.subf %100, %112 : vector<64x128xf32>
    %cst_34 = arith.constant 9.99999974E-6 : f32
    %114 = vector.broadcast %cst_34 : f32 to vector<64x1xf32>
    %115 = arith.addf %111, %114 : vector<64x1xf32>
    %116 = math.rsqrt %115 : vector<64x1xf32>
    %117 = vector.broadcast %116 : vector<64x1xf32> to vector<64x128xf32>
    %118 = arith.mulf %113, %117 : vector<64x128xf32>
    %c0_35 = arith.constant 0 : index
    %c0_36 = arith.constant 0 : index
    %119 = vector.load %arg8[%c0_35, %c0_36] : memref<1x128xf32, #tpu.memory_space<vmem>>, vector<1x128xf32>
    %120 = vector.broadcast %119 : vector<1x128xf32> to vector<64x128xf32>
    %121 = arith.mulf %118, %120 : vector<64x128xf32>
    %c0_37 = arith.constant 0 : index
    %c0_38 = arith.constant 0 : index
    %122 = vector.load %arg9[%c0_37, %c0_38] : memref<1x128xf32, #tpu.memory_space<vmem>>, vector<1x128xf32>
    %123 = vector.broadcast %122 : vector<1x128xf32> to vector<64x128xf32>
    %124 = arith.addf %121, %123 : vector<64x128xf32>
    %125 = arith.truncf %124 : vector<64x128xf32> to vector<64x128xbf16>
    %c0_39 = arith.constant 0 : index
    %c0_40 = arith.constant 0 : index
    %126 = vector.load %arg10[%c0_39, %c0_40] : memref<128x512xbf16, #tpu.memory_space<vmem>>, vector<128x512xbf16>
    %cst_41 = arith.constant dense<0.000000e+00> : vector<64x512xf32>
    %127 = tpu.matmul %125, %126, %cst_41 {dimension_numbers = #tpu.dot_dimension_numbers<[1], [0], [0], [1], [0, 0, 1, 1], [], []>} : vector<64x128xbf16>, vector<128x512xbf16>, vector<64x512xf32> -> vector<64x512xf32>
    %c0_42 = arith.constant 0 : index
    %c0_43 = arith.constant 0 : index
    %128 = vector.load %arg11[%c0_42, %c0_43] : memref<1x512xf32, #tpu.memory_space<vmem>>, vector<1x512xf32>
    %129 = vector.broadcast %128 : vector<1x512xf32> to vector<64x512xf32>
    %130 = arith.addf %127, %129 : vector<64x512xf32>
    %131 = arith.truncf %130 : vector<64x512xf32> to vector<64x512xbf16>
    %cst_44 = arith.constant 1.703130e+00 : bf16
    %132 = vector.broadcast %cst_44 : bf16 to vector<64x512xbf16>
    %133 = arith.mulf %132, %131 : vector<64x512xbf16>
    %134 = arith.negf %133 : vector<64x512xbf16>
    %135 = math.exp %134 : vector<64x512xbf16>
    %cst_45 = arith.constant 1.000000e+00 : bf16
    %136 = vector.broadcast %cst_45 : bf16 to vector<64x512xbf16>
    %137 = arith.addf %136, %135 : vector<64x512xbf16>
    %138 = arith.divf %136, %137 : vector<64x512xbf16>
    %139 = arith.mulf %131, %138 : vector<64x512xbf16>
    %c0_46 = arith.constant 0 : index
    %c0_47 = arith.constant 0 : index
    %140 = vector.load %arg12[%c0_46, %c0_47] : memref<512x128xbf16, #tpu.memory_space<vmem>>, vector<512x128xbf16>
    %cst_48 = arith.constant dense<0.000000e+00> : vector<64x128xf32>
    %141 = tpu.matmul %139, %140, %cst_48 {dimension_numbers = #tpu.dot_dimension_numbers<[1], [0], [0], [1], [0, 0, 1, 1], [], []>} : vector<64x512xbf16>, vector<512x128xbf16>, vector<64x128xf32> -> vector<64x128xf32>
    %c0_49 = arith.constant 0 : index
    %c0_50 = arith.constant 0 : index
    %142 = vector.load %arg13[%c0_49, %c0_50] : memref<1x128xf32, #tpu.memory_space<vmem>>, vector<1x128xf32>
    %143 = vector.broadcast %142 : vector<1x128xf32> to vector<64x128xf32>
    %144 = arith.addf %141, %143 : vector<64x128xf32>
    %145 = arith.addf %100, %144 : vector<64x128xf32>
    %146 = vector.shape_cast %145 : vector<64x128xf32> to vector<4x16x128xf32>
    %147 = vector.extract_strided_slice %146 {offsets = [0, 0, 0], sizes = [1, 16, 128], strides = [1, 1, 1]} : vector<4x16x128xf32> to vector<1x16x128xf32>
    %148 = vector.shape_cast %147 : vector<1x16x128xf32> to vector<16x128xf32>
    %c0_51 = arith.constant 0 : index
    %c0_52 = arith.constant 0 : index
    %c0_53 = arith.constant 0 : index
    %149 = vector.load %arg14[%c0_51, %c0_52, %c0_53] : memref<16x4x128xf32, #tpu.memory_space<vmem>>, vector<16x1x128xf32>
    %150 = vector.shape_cast %149 : vector<16x1x128xf32> to vector<16x128xf32>
    %151 = vector.shape_cast %148 : vector<16x128xf32> to vector<16x1x128xf32>
    tpu.vector_store %arg14[%c0_51, %c0_52, %c0_53], %151 {strides = array<i32>} : memref<16x4x128xf32, #tpu.memory_space<vmem>>, vector<16x1x128xf32>,
    %152 = vector.extract_strided_slice %146 {offsets = [1, 0, 0], sizes = [1, 16, 128], strides = [1, 1, 1]} : vector<4x16x128xf32> to vector<1x16x128xf32>
    %153 = vector.shape_cast %152 : vector<1x16x128xf32> to vector<16x128xf32>
    %c0_54 = arith.constant 0 : index
    %c1_55 = arith.constant 1 : index
    %c0_56 = arith.constant 0 : index
    %154 = vector.load %arg14[%c0_54, %c1_55, %c0_56] : memref<16x4x128xf32, #tpu.memory_space<vmem>>, vector<16x1x128xf32>
    %155 = vector.shape_cast %154 : vector<16x1x128xf32> to vector<16x128xf32>
    %156 = vector.shape_cast %153 : vector<16x128xf32> to vector<16x1x128xf32>
    tpu.vector_store %arg14[%c0_54, %c1_55, %c0_56], %156 {strides = array<i32>} : memref<16x4x128xf32, #tpu.memory_space<vmem>>, vector<16x1x128xf32>,
    %157 = vector.extract_strided_slice %146 {offsets = [2, 0, 0], sizes = [1, 16, 128], strides = [1, 1, 1]} : vector<4x16x128xf32> to vector<1x16x128xf32>
    %158 = vector.shape_cast %157 : vector<1x16x128xf32> to vector<16x128xf32>
    %c0_57 = arith.constant 0 : index
    %c2_58 = arith.constant 2 : index
    %c0_59 = arith.constant 0 : index
    %159 = vector.load %arg14[%c0_57, %c2_58, %c0_59] : memref<16x4x128xf32, #tpu.memory_space<vmem>>, vector<16x1x128xf32>
    %160 = vector.shape_cast %159 : vector<16x1x128xf32> to vector<16x128xf32>
    %161 = vector.shape_cast %158 : vector<16x128xf32> to vector<16x1x128xf32>
    tpu.vector_store %arg14[%c0_57, %c2_58, %c0_59], %161 {strides = array<i32>} : memref<16x4x128xf32, #tpu.memory_space<vmem>>, vector<16x1x128xf32>,
    %162 = vector.extract_strided_slice %146 {offsets = [3, 0, 0], sizes = [1, 16, 128], strides = [1, 1, 1]} : vector<4x16x128xf32> to vector<1x16x128xf32>
    %163 = vector.shape_cast %162 : vector<1x16x128xf32> to vector<16x128xf32>
    %c0_60 = arith.constant 0 : index
    %c3_61 = arith.constant 3 : index
    %c0_62 = arith.constant 0 : index
    %164 = vector.load %arg14[%c0_60, %c3_61, %c0_62] : memref<16x4x128xf32, #tpu.memory_space<vmem>>, vector<16x1x128xf32>
    %165 = vector.shape_cast %164 : vector<16x1x128xf32> to vector<16x128xf32>
    %166 = vector.shape_cast %163 : vector<16x128xf32> to vector<16x1x128xf32>
    tpu.vector_store %arg14[%c0_60, %c3_61, %c0_62], %166 {strides = array<i32>} : memref<16x4x128xf32, #tpu.memory_space<vmem>>, vector<16x1x128xf32>,
    return
  }
  func.func @transform_0(%arg0: i32) -> (i32, i32, i32) {
    %c0_i32 = arith.constant 0 : i32
    %c0_i32_0 = arith.constant 0 : i32
    %c0_i32_1 = arith.constant 0 : i32
    return %c0_i32, %arg0, %c0_i32_0 : i32, i32, i32
  }
  func.func @transform_1(%arg0: i32) -> (i32, i32) {
    %c0_i32 = arith.constant 0 : i32
    %c0_i32_0 = arith.constant 0 : i32
    %c0_i32_1 = arith.constant 0 : i32
    return %c0_i32, %c0_i32_0 : i32, i32
  }
  func.func @transform_2(%arg0: i32) -> (i32, i32) {
    %c0_i32 = arith.constant 0 : i32
    %c0_i32_0 = arith.constant 0 : i32
    %c0_i32_1 = arith.constant 0 : i32
    return %c0_i32, %c0_i32_0 : i32, i32
  }
  func.func @transform_3(%arg0: i32) -> (i32, i32) {
    %c0_i32 = arith.constant 0 : i32
    %c0_i32_0 = arith.constant 0 : i32
    %c0_i32_1 = arith.constant 0 : i32
    return %c0_i32, %c0_i32_0 : i32, i32
  }
  func.func @transform_4(%arg0: i32) -> (i32, i32) {
    %c0_i32 = arith.constant 0 : i32
    %c0_i32_0 = arith.constant 0 : i32
    %c0_i32_1 = arith.constant 0 : i32
    return %c0_i32, %c0_i32_0 : i32, i32
  }
  func.func @transform_5(%arg0: i32) -> (i32, i32) {
    %c0_i32 = arith.constant 0 : i32
    %c0_i32_0 = arith.constant 0 : i32
    %c0_i32_1 = arith.constant 0 : i32
    return %c0_i32, %c0_i32_0 : i32, i32
  }
  func.func @transform_6(%arg0: i32) -> (i32, i32) {
    %c0_i32 = arith.constant 0 : i32
    %c0_i32_0 = arith.constant 0 : i32
    %c0_i32_1 = arith.constant 0 : i32
    return %c0_i32, %c0_i32_0 : i32, i32
  }
  func.func @transform_7(%arg0: i32) -> (i32, i32) {
    %c0_i32 = arith.constant 0 : i32
    %c0_i32_0 = arith.constant 0 : i32
    %c0_i32_1 = arith.constant 0 : i32
    return %c0_i32, %c0_i32_0 : i32, i32
  }
  func.func @transform_8(%arg0: i32) -> (i32, i32) {
    %c0_i32 = arith.constant 0 : i32
    %c0_i32_0 = arith.constant 0 : i32
    %c0_i32_1 = arith.constant 0 : i32
    return %c0_i32, %c0_i32_0 : i32, i32
  }
  func.func @transform_9(%arg0: i32) -> (i32, i32) {
    %c0_i32 = arith.constant 0 : i32
    %c0_i32_0 = arith.constant 0 : i32
    %c0_i32_1 = arith.constant 0 : i32
    return %c0_i32, %c0_i32_0 : i32, i32
  }
  func.func @transform_10(%arg0: i32) -> (i32, i32) {
    %c0_i32 = arith.constant 0 : i32
    %c0_i32_0 = arith.constant 0 : i32
    %c0_i32_1 = arith.constant 0 : i32
    return %c0_i32, %c0_i32_0 : i32, i32
  }
  func.func @transform_11(%arg0: i32) -> (i32, i32) {
    %c0_i32 = arith.constant 0 : i32
    %c0_i32_0 = arith.constant 0 : i32
    %c0_i32_1 = arith.constant 0 : i32
    return %c0_i32, %c0_i32_0 : i32, i32
  }
  func.func @transform_12(%arg0: i32) -> (i32, i32) {
    %c0_i32 = arith.constant 0 : i32
    %c0_i32_0 = arith.constant 0 : i32
    %c0_i32_1 = arith.constant 0 : i32
    return %c0_i32, %c0_i32_0 : i32, i32
  }
  func.func @transform_13(%arg0: i32) -> (i32, i32, i32) {
    %c0_i32 = arith.constant 0 : i32
    %c0_i32_0 = arith.constant 0 : i32
    %c0_i32_1 = arith.constant 0 : i32
    return %c0_i32, %arg0, %c0_i32_0 : i32, i32, i32
  }
}

</mosaic_0001>

<bundles_post_ra>
// kernel: tpu_custom_call.1
= control target key start
LH: loop header
LB: loop body
LE: loop exit
PB: predicated region body
PF: predicated region fallthrough
CT: control target
= control target key end

     0   :  { %18 = vsyncpa [#allocation3], 0  ;;  %s7072_s0 = inlined_call_operand.hbm [shape: f32[16,4,128], index: 0, kind: input, shape index: {}]   ;;  %s7073_s1 = inlined_call_operand.hbm [shape: f32[1,128], index: 1, kind: input, shape index: {}]   ;;  %s7074_s2 = inlined_call_operand.hbm [shape: f32[1,128], index: 2, kind: input, shape index: {}]   ;;  %s7075_s3 = inlined_call_operand.hbm [shape: bf16[128,384], index: 3, kind: input, shape index: {}]   ;;  %s7076_s4 = inlined_call_operand.vmem [shape: f32[1,384], index: 4, kind: input, shape index: {}]   ;;  %s7077_s5 = inlined_call_operand.hbm [shape: bf16[128,128], index: 5, kind: input, shape index: {}]   ;;  %s7078_s6 = inlined_call_operand.hbm [shape: f32[1,128], index: 6, kind: input, shape index: {}]   ;;  %s7079_s7 = inlined_call_operand.hbm [shape: f32[1,128], index: 7, kind: input, shape index: {}]   ;;  %s7080_s8 = inlined_call_operand.hbm [shape: f32[1,128], index: 8, kind: input, shape index: {}]   ;;  %s7081_s9 = inlined_call_operand.hbm [shape: bf16[128,512], index: 9, kind: input, shape index: {}]   ;;  %s7082_s10 = inlined_call_operand.vmem [shape: f32[1,512], index: 10, kind: input, shape index: {}]   ;;  %s7083_s11 = inlined_call_operand.hbm [shape: bf16[512,128], index: 11, kind: input, shape index: {}]   ;;  %s7084_s12 = inlined_call_operand.vmem [shape: f32[1,128], index: 12, kind: input, shape index: {}]   ;;  %s7085_s13 = inlined_call_operand.hbm [shape: f32[16,4,128], index: 13, kind: output, shape index: {}]  }
   0x1   :  { %19 = vsyncpa [#allocation6], 0 }
   0x2   :  { %20 = vsyncpa [#allocation9], 0 }
   0x3   :  { %21 = vsyncpa [#allocation12], 0 }
   0x4   :  { %22 = vsyncpa [#allocation15], 0 }
   0x5   :  { %23 = vsyncpa [#allocation18], 0  ;;  %s43_s27 = sshll.u32 %s7073_s1, 4  ;;  %s44_s27 = int_to_ptr.hbm [resolvable:$true] %s43_s27 }
   0x6   :  { %24 = vsyncpa [#allocation4], 0  ;;  %s5730_s28 = smov [#allocation5]   ;;  %s64_s15 = sshll.u32 %s7075_s3, 4  ;;  %s65_s15 = int_to_ptr.hbm [resolvable:$true] %s64_s15 }
   0x7   :  { %s45_s29 = sshll.u32 %s5730_s28, 4  ;;  %s5731_s16 = smov [#allocation8]   ;;  %s46_s29 = int_to_ptr.vmem [resolvable:$true] %s45_s29 }
   0x8   :  { %48 = dma.hbm_to_vmem [thread:$0]  %s44_s27, 16, %s46_s29, [#allocation6]  }
   0x9   :  { %s66_s17 = sshll.u32 %s5731_s16, 4  ;;  %s5732_s18 = smov 192   ;;  %s67_s17 = int_to_ptr.vmem [resolvable:$true] %s66_s17 }
   0xa   :  { %s5733_s19 = smov 12   ;;  %s93_s1 = sshll.u32 %s7078_s6, 4  ;;  %s94_s1 = int_to_ptr.hbm [resolvable:$true] %s93_s1 }
   0xb   :  { %72 = dma.hbm_to_vmem [thread:$0]  %s65_s15, 3072, %s67_s17, [#allocation9], %s5732_s18, %s5732_s18, %s5733_s19  }
   0xc   :  { %s5734_s22 = smov [#allocation11]   ;;  %s115_s3 = sshll.u32 %s7080_s8, 4  ;;  %s116_s3 = int_to_ptr.hbm [resolvable:$true] %s115_s3 }
   0xd   :  { %s95_s23 = sshll.u32 %s5734_s22, 4  ;;  %s5735_s26 = smov [#allocation14]   ;;  %s96_s23 = int_to_ptr.vmem [resolvable:$true] %s95_s23 }
   0xe   :  { %98 = dma.hbm_to_vmem [thread:$0]  %s94_s1, 16, %s96_s23, [#allocation12]  }
   0xf   :  { %s117_s27 = sshll.u32 %s5735_s26, 4  ;;  %s29_s30 = sshll.u32 %s7072_s0, 4  ;;  %s118_s27 = int_to_ptr.vmem [resolvable:$true] %s117_s27  ;;  %s30_s30 = int_to_ptr.hbm [resolvable:$true] %s29_s30 }
  0x10   :  { %120 = dma.hbm_to_vmem [thread:$0]  %s116_s3, 16, %s118_s27, [#allocation15]  }
  0x11   :  { %s5736_s6 = smov [#allocation2]   ;;  %s54_s17 = sshll.u32 %s7074_s2, 4  ;;  %s55_s17 = int_to_ptr.hbm [resolvable:$true] %s54_s17 }
  0x12   :  { %s31_s14 = sshll.u32 %s5736_s6, 4  ;;  %s5737_s18 = smov 64   ;;  %s32_s14 = int_to_ptr.vmem [resolvable:$true] %s31_s14 }
  0x13   :  { %s5738_s8 = smov 4   ;;  %s5739_s19 = smov [#allocation7]  }
  0x14   :  { %37 = dma.hbm_to_vmem [thread:$0]  %s30_s30, 1024, %s32_s14, [#allocation3], %s5737_s18, %s5737_s18, %s5738_s8  }
  0x15   :  { %s56_s20 = sshll.u32 %s5739_s19, 4  ;;  %s79_s1 = sshll.u32 %s7077_s5, 4  ;;  %s57_s20 = int_to_ptr.vmem [resolvable:$true] %s56_s20  ;;  %s80_s1 = int_to_ptr.hbm [resolvable:$true] %s79_s1 }
  0x16   :  { %59 = dma.hbm_to_vmem [thread:$0]  %s55_s17, 16, %s57_s20, [#allocation6]  }
  0x17   :  { %s104_s2 = sshll.u32 %s7079_s7, 4  ;;  %s5740_s24 = smov [#allocation10]   ;;  %s105_s2 = int_to_ptr.hbm [resolvable:$true] %s104_s2 }
  0x18   :  { %s81_s25 = sshll.u32 %s5740_s24, 4  ;;  %s5741_s3 = smov [#allocation13]   ;;  %s82_s25 = int_to_ptr.vmem [resolvable:$true] %s81_s25 }
  0x19   :  { %87 = dma.hbm_to_vmem [thread:$0]  %s80_s1, 1024, %s82_s25, [#allocation9], %s5737_s18, %s5737_s18, %s5738_s8  }
  0x1a   :  { %s106_s26 = sshll.u32 %s5741_s3, 4  ;;  %s125_s5 = sshll.u32 %s7081_s9, 4  ;;  %s107_s26 = int_to_ptr.vmem [resolvable:$true] %s106_s26  ;;  %s126_s5 = int_to_ptr.hbm [resolvable:$true] %s125_s5 }
  0x1b   :  { %109 = dma.hbm_to_vmem [thread:$0]  %s105_s2, 16, %s107_s26, [#allocation12]  }
  0x1c   :  { %s5742_s29 = smov [#allocation16]   ;;  %s140_s14 = sshll.u32 %s7083_s11, 4  ;;  %s141_s14 = int_to_ptr.hbm [resolvable:$true] %s140_s14 }
  0x1d   :  { %s127_s30 = sshll.u32 %s5742_s29, 4  ;;  %s5743_s15 = smov 256   ;;  %s128_s30 = int_to_ptr.vmem [resolvable:$true] %s127_s30 }
  0x1e   :  { %s5744_s16 = smov 16   ;;  %s5745_s17 = smov [#allocation17]  }
  0x1f   :  { %133 = dma.hbm_to_vmem [thread:$0]  %s126_s5, 4096, %s128_s30, [#allocation15], %s5743_s15, %s5743_s15, %s5744_s16  }
  0x20   :  { %s142_s19 = sshll.u32 %s5745_s17, 4  ;;  %s143_s19 = int_to_ptr.vmem [resolvable:$true] %s142_s19 }
  0x21   :  { %148 = dma.hbm_to_vmem [thread:$0]  %s141_s14, 4096, %s143_s19, [#allocation18], %s5737_s18, %s5737_s18, %s5738_s8  }
  0x22   :  { %5716 = dma.done.wait [#allocation3], 1024  }
  0x23   :  { %5717 = vsyncadd [#allocation3], 4294966272 }
  0x24   :  { %5718 = dma.done.wait [#allocation6], 32  }
  0x25   :  { %5719 = vsyncadd [#allocation6], 4294967264 }
  0x26   :  { %5720 = dma.done.wait [#allocation9], 4096  }
  0x27   :  { %5721 = vsyncadd [#allocation9], 4294963200 }
  0x28   :  { %5722 = dma.done.wait [#allocation12], 32  }
  0x29   :  { %5723 = vsyncadd [#allocation12], 4294967264 }
  0x2a   :  { %5724 = dma.done.wait [#allocation15], 4112  }
  0x2b   :  { %5725 = vsyncadd [#allocation15], 4294963184 }
  0x2c   :  { %5726 = dma.done.wait [#allocation18], 4096  }
  0x2d   :  { %5727 = vsyncadd [#allocation18], 4294963200  ;;  %vm274_vm0 = vcmask 1041409   ;;  %vm277_vm1 = vcmask 1042434   ;;  %vm280_vm2 = vcmask 1043459   ;;  %vm283_vm3 = vcmask 1044484  }
  0x2e   :  { %vm286_vm4 = vcmask 1045509   ;;  %vm289_vm5 = vcmask 1046534   ;;  %v225_v0 = vld [vmem:[#allocation2 + $0x2] sm:$0x1]  ;;  %v226_v1 = vld [vmem:[#allocation2 + $0x6] sm:$0x1] }
  0x2f   :  { %v227_v2 = vld [vmem:[#allocation2 + $0xa] sm:$0x1]  ;;  %v228_v3 = vld [vmem:[#allocation2 + $0xe] sm:$0x1]  ;;  %v229_v4 = vld [vmem:[#allocation2 + $0x12] sm:$0x1] }
  0x30   :  { %v230_v5 = vld [vmem:[#allocation2 + $0x16] sm:$0x1]  ;;  %v231_v6 = vld [vmem:[#allocation2 + $0x1a] sm:$0x1]  ;;  %v232_v7 = vld [vmem:[#allocation2 + $0x1e] sm:$0x1] }
  0x31   :  { %v372_v8 = vrot.slane %v226_v1, 7  ;;  %v374_v9 = vrot.slane %v227_v2, 6  ;;  %vm292_vm6 = vcmask 1047559   ;;  %v376_v10 = vrot.slane %v228_v3, 5  ;;  %v209_v13 = vld [vmem:[#allocation2 + $0x1] sm:$0x1] }
  0x32   :  { %v378_v11 = vrot.slane %v229_v4, 4  ;;  %v380_v12 = vrot.slane %v230_v5, 3  ;;  %v382_v15 = vrot.slane %v231_v6, 2  ;;  %v384_v16 = vrot.slane %v232_v7, 1  ;;  %v210_v17 = vld [vmem:[#allocation2 + $0x5] sm:$0x1] }
  0x33   :  { %v373_v14 = vsel %vm274_vm0, %v372_v8, %v225_v0  ;;  %v211_v18 = vld [vmem:[#allocation2 + $0x9] sm:$0x1]  ;;  %v212_v20 = vld [vmem:[#allocation2 + $0xd] sm:$0x1]  ;;  %v213_v21 = vld [vmem:[#allocation2 + $0x11] sm:$0x1] }
  0x34   :  { %v375_v19 = vsel %vm277_vm1, %v374_v9, %v373_v14  ;;  %v214_v22 = vld [vmem:[#allocation2 + $0x15] sm:$0x1]  ;;  %v215_v24 = vld [vmem:[#allocation2 + $0x19] sm:$0x1]  ;;  %v216_v25 = vld [vmem:[#allocation2 + $0x1d] sm:$0x1] }
  0x35   :  { %v377_v23 = vsel %vm280_vm2, %v376_v10, %v375_v19  ;;  %v326_v26 = vrot.slane %v210_v17, 7  ;;  %v328_v27 = vrot.slane %v211_v18, 6  ;;  %v330_v29 = vrot.slane %v212_v20, 5  ;;  %v193_v32 = vld [vmem:[#allocation2] sm:$0x1]  ;;  %s5748_s20 = smov 32  }
  0x36   :  { %v379_v28 = vsel %vm283_vm3, %v378_v11, %v377_v23  ;;  %v332_v30 = vrot.slane %v213_v21, 4  ;;  %v334_v31 = vrot.slane %v214_v22, 3  ;;  %v336_v35 = vrot.slane %v215_v24, 2  ;;  %v194_v37 = vld [vmem:[#allocation2 + $0x4] sm:$0x1]  ;;  %s4357_s24 = sshll.u32 %s7085_s13, 4  ;;  %s4358_s24 = int_to_ptr.hbm [resolvable:$true] %s4357_s24 }
  0x37   :  { %v381_v33 = vsel %vm286_vm4, %v380_v12, %v379_v28  ;;  %v327_v34 = vsel %vm274_vm0, %v326_v26, %v209_v13  ;;  %v338_v36 = vrot.slane %v216_v25, 1  ;;  %v195_v38 = vld [vmem:[#allocation2 + $0x8] sm:$0x1]  ;;  %v196_v41 = vld [vmem:[#allocation2 + $0xc] sm:$0x1]  ;;  %v273_v48 = vrot.slane %v194_v37, 7 }
  0x38   :  { %v383_v39 = vsel %vm289_vm5, %v382_v15, %v381_v33  ;;  %v329_v40 = vsel %vm277_vm1, %v328_v27, %v327_v34  ;;  %v197_v42 = vld [vmem:[#allocation2 + $0x10] sm:$0x1]  ;;  %v198_v43 = vld [vmem:[#allocation2 + $0x14] sm:$0x1]  ;;  %v199_v46 = vld [vmem:[#allocation2 + $0x18] sm:$0x1] }
  0x39   :  { %v5869_v44 = vsel %vm292_vm6, %v384_v16, %v383_v39  ;;  %v331_v45 = vsel %vm280_vm2, %v330_v29, %v329_v40  ;;  %v200_v47 = vld [vmem:[#allocation2 + $0x1c] sm:$0x1]  ;;  %v276_v49 = vrot.slane %v195_v38, 6  ;;  %v279_v51 = vrot.slane %v196_v41, 5  ;;  %v233_v54 = vld [vmem:[#allocation2 + $0x22] sm:$0x1] }
  0x3a   :  { %456 = vadd.xlane.f32.xlu2 %v5869_v44  ;;  %v333_v50 = vsel %vm283_vm3, %v332_v30, %v331_v45  ;;  %v282_v52 = vrot.slane %v197_v42, 4  ;;  %v285_v53 = vrot.slane %v198_v43, 3  ;;  %v275_v56 = vsel %vm274_vm0, %v273_v48, %v193_v32  ;;  %v234_v59 = vld [vmem:[#allocation2 + $0x26] sm:$0x1]  ;;  %v235_v60 = vld [vmem:[#allocation2 + $0x2a] sm:$0x1] }
  0x3b   :  { %v335_v55 = vsel %vm286_vm4, %v334_v31, %v333_v50  ;;  %v288_v57 = vrot.slane %v199_v46, 2  ;;  %v291_v58 = vrot.slane %v200_v47, 1  ;;  %v278_v62 = vsel %vm277_vm1, %v276_v49, %v275_v56  ;;  %v236_v63 = vld [vmem:[#allocation2 + $0x2e] sm:$0x1]  ;;  %v237_v0 = vld [vmem:[#allocation2 + $0x32] sm:$0x1] }
  0x3c   :  { %v337_v61 = vsel %vm289_vm5, %v336_v35, %v335_v55  ;;  %v238_v1 = vld [vmem:[#allocation2 + $0x36] sm:$0x1]  ;;  %v281_v3 = vsel %vm280_vm2, %v279_v51, %v278_v62  ;;  %v239_v4 = vld [vmem:[#allocation2 + $0x3a] sm:$0x1]  ;;  %v240_v5 = vld [vmem:[#allocation2 + $0x3e] sm:$0x1] }
  0x3d   :  { %v5879_v2 = vsel %vm292_vm6, %v338_v36, %v337_v61  ;;  %v386_v6 = vrot.slane %v234_v59, 7  ;;  %v388_v7 = vrot.slane %v235_v60, 6  ;;  %v284_v8 = vsel %vm283_vm3, %v282_v52, %v281_v3  ;;  %v217_v12 = vld [vmem:[#allocation2 + $0x21] sm:$0x1]  ;;  %v218_v17 = vld [vmem:[#allocation2 + $0x25] sm:$0x1] }
  0x3e   :  { %452 = vadd.xlane.f32.xlu1 %v5879_v2  ;;  %v390_v9 = vrot.slane %v236_v63, 5  ;;  %v392_v10 = vrot.slane %v237_v0, 4  ;;  %v394_v11 = vrot.slane %v238_v1, 3  ;;  %v287_v13 = vsel %vm286_vm4, %v285_v53, %v284_v8  ;;  %v219_v18 = vld [vmem:[#allocation2 + $0x29] sm:$0x1] }
  0x3f   :  { %v387_v14 = vsel %vm274_vm0, %v386_v6, %v233_v54  ;;  %v396_v15 = vrot.slane %v239_v4, 2  ;;  %v398_v16 = vrot.slane %v240_v5, 1  ;;  %v290_v19 = vsel %vm289_vm5, %v288_v57, %v287_v13  ;;  %v220_v21 = vld [vmem:[#allocation2 + $0x2d] sm:$0x1]  ;;  %v221_v22 = vld [vmem:[#allocation2 + $0x31] sm:$0x1] }
  0x40   :  { %v389_v20 = vsel %vm277_vm1, %v388_v7, %v387_v14  ;;  %v222_v23 = vld [vmem:[#allocation2 + $0x35] sm:$0x1]  ;;  %v5889_v24 = vsel %vm292_vm6, %v291_v58, %v290_v19  ;;  %v223_v26 = vld [vmem:[#allocation2 + $0x39] sm:$0x1]  ;;  %v224_v27 = vld [vmem:[#allocation2 + $0x3d] sm:$0x1] }
  0x41   :  { %v391_v25 = vsel %vm280_vm2, %v390_v9, %v389_v20  ;;  %v340_v28 = vrot.slane %v218_v17, 7  ;;  %v342_v29 = vrot.slane %v219_v18, 6  ;;  %448 = vadd.xlane.f32.xlu0 %v5889_v24  ;;  %v344_v31 = vrot.slane %v220_v21, 5  ;;  %v201_v34 = vld [vmem:[#allocation2 + $0x20] sm:$0x1] }
  0x42   :  { %v393_v30 = vsel %vm283_vm3, %v392_v10, %v391_v25  ;;  %v346_v32 = vrot.slane %v221_v22, 4  ;;  %v348_v33 = vrot.slane %v222_v23, 3  ;;  %v350_v37 = vrot.slane %v223_v26, 2  ;;  %v202_v39 = vld [vmem:[#allocation2 + $0x24] sm:$0x1] }
  0x43   :  { %v395_v35 = vsel %vm286_vm4, %v394_v11, %v393_v30  ;;  %v341_v36 = vsel %vm274_vm0, %v340_v28, %v217_v12  ;;  %v352_v38 = vrot.slane %v224_v27, 1  ;;  %v203_v40 = vld [vmem:[#allocation2 + $0x28] sm:$0x1]  ;;  %v204_v43 = vld [vmem:[#allocation2 + $0x2c] sm:$0x1]  ;;  %v294_v51 = vrot.slane %v202_v39, 7 }
  0x44   :  { %v397_v41 = vsel %vm289_vm5, %v396_v15, %v395_v35  ;;  %v343_v42 = vsel %vm277_vm1, %v342_v29, %v341_v36  ;;  %v205_v45 = vld [vmem:[#allocation2 + $0x30] sm:$0x1]  ;;  %v206_v46 = vld [vmem:[#allocation2 + $0x34] sm:$0x1]  ;;  %v207_v49 = vld [vmem:[#allocation2 + $0x38] sm:$0x1] }
  0x45   :  { %v5899_v47 = vsel %vm292_vm6, %v398_v16, %v397_v41  ;;  %v345_v48 = vsel %vm280_vm2, %v344_v31, %v343_v42  ;;  %v208_v50 = vld [vmem:[#allocation2 + $0x3c] sm:$0x1]  ;;  %v296_v52 = vrot.slane %v203_v40, 6  ;;  %v298_v54 = vrot.slane %v204_v43, 5  ;;  %v241_v57 = vld [vmem:[#allocation2 + $0x3] sm:$0x1] }
  0x46   :  { %458 = vadd.xlane.f32.xlu2 %v5899_v47  ;;  %v347_v53 = vsel %vm283_vm3, %v346_v32, %v345_v48  ;;  %v300_v55 = vrot.slane %v205_v45, 4  ;;  %v302_v56 = vrot.slane %v206_v46, 3  ;;  %v295_v59 = vsel %vm274_vm0, %v294_v51, %v201_v34  ;;  %v242_v62 = vld [vmem:[#allocation2 + $0x7] sm:$0x1]  ;;  %v243_v63 = vld [vmem:[#allocation2 + $0xb] sm:$0x1] }
  0x47   :  { %v349_v58 = vsel %vm286_vm4, %v348_v33, %v347_v53  ;;  %v304_v60 = vrot.slane %v207_v49, 2  ;;  %v306_v61 = vrot.slane %v208_v50, 1  ;;  %v297_v1 = vsel %vm277_vm1, %v296_v52, %v295_v59  ;;  %v244_v3 = vld [vmem:[#allocation2 + $0xf] sm:$0x1]  ;;  %v245_v4 = vld [vmem:[#allocation2 + $0x13] sm:$0x1] }
  0x48   :  { %v351_v0 = vsel %vm289_vm5, %v350_v37, %v349_v58  ;;  %v246_v5 = vld [vmem:[#allocation2 + $0x17] sm:$0x1]  ;;  %v299_v7 = vsel %vm280_vm2, %v298_v54, %v297_v1  ;;  %v247_v8 = vld [vmem:[#allocation2 + $0x1b] sm:$0x1]  ;;  %v418_v9 = vrot.slane %v242_v62, 7  ;;  %v420_v10 = vrot.slane %v243_v63, 6 }
  0x49   :  { %v5909_v6 = vsel %vm292_vm6, %v352_v38, %v351_v0  ;;  %v301_v11 = vsel %vm283_vm3, %v300_v55, %v299_v7  ;;  %v248_v12 = vld [vmem:[#allocation2 + $0x1f] sm:$0x1]  ;;  %v422_v13 = vrot.slane %v244_v3, 5  ;;  %v424_v14 = vrot.slane %v245_v4, 4  ;;  %v250_v33 = vld [vmem:[#allocation2 + $0x27] sm:$0x1] }
  0x4a   :  { %454 = vadd.xlane.f32.xlu1 %v5909_v6  ;;  %v303_v15 = vsel %vm286_vm4, %v302_v56, %v301_v11  ;;  %v419_v16 = vsel %vm274_vm0, %v418_v9, %v241_v57  ;;  %v426_v17 = vrot.slane %v246_v5, 3  ;;  %v428_v20 = vrot.slane %v247_v8, 2  ;;  %v251_v35 = vld [vmem:[#allocation2 + $0x2b] sm:$0x1]  ;;  %v249_v37 = vld [vmem:[#allocation2 + $0x23] sm:$0x1] }
  0x4b   :  { %v305_v18 = vsel %vm289_vm5, %v304_v60, %v303_v15  ;;  %v421_v19 = vsel %vm277_vm1, %v420_v10, %v419_v16  ;;  %v430_v23 = vrot.slane %v248_v12, 1  ;;  %v5746_v29 = vmov 128.0   ;;  %v252_v38 = vld [vmem:[#allocation2 + $0x2f] sm:$0x1]  ;;  %v253_v43 = vld [vmem:[#allocation2 + $0x33] sm:$0x1] }
  0x4c   :  { %v5919_v21 = vsel %vm292_vm6, %v306_v61, %v305_v18  ;;  %v423_v22 = vsel %vm280_vm2, %v422_v13, %v421_v19  ;;  %5162 = vrcp.f32 %v5746_v29  ;;  %v432_v36 = vrot.slane %v250_v33, 7  ;;  %v254_v50 = vld [vmem:[#allocation2 + $0x37] sm:$0x1]  ;;  %v255_v55 = vld [vmem:[#allocation2 + $0x3b] sm:$0x1] }
  0x4d   :  { %450 = vadd.xlane.f32.xlu0 %v5919_v21  ;;  %v425_v25 = vsel %vm283_vm3, %v424_v14, %v423_v22  ;;  %v434_v39 = vrot.slane %v251_v35, 6  ;;  %v436_v45 = vrot.slane %v252_v38, 5  ;;  %v438_v51 = vrot.slane %v253_v43, 4  ;;  %v256_v60 = vld [vmem:[#allocation2 + $0x3f] sm:$0x1] }
  0x4e   :  { %v427_v26 = vsel %vm286_vm4, %v426_v17, %v425_v25  ;;  %v433_v41 = vsel %vm274_vm0, %v432_v36, %v249_v37  ;;  %v440_v56 = vrot.slane %v254_v50, 3  ;;  %v442_v61 = vrot.slane %v255_v55, 2  ;;  %v4461_v29 = vld [vmem:[#allocation8 + $0xa8] sm:$0xf]  ;;  %v4463_v33 = vld [vmem:[#allocation8 + $0xb4] sm:$0xf0] }
  0x4f   :  { %v429_v27 = vsel %vm289_vm5, %v428_v20, %v427_v26  ;;  %v435_v46 = vsel %vm277_vm1, %v434_v39, %v433_v41  ;;  %v444_v1 = vrot.slane %v256_v60, 1  ;;  %v4814_v35 = vld [vmem:[#allocation8 + $0xb8] sm:$0xf0]  ;;  %v4449_v38 = vld [vmem:[#allocation8 + $0x90] sm:$0xf] }
  0x50   :  { %v5927_v28 = vsel %vm292_vm6, %v430_v23, %v429_v27  ;;  %v437_v53 = vsel %vm280_vm2, %v436_v45, %v435_v46  ;;  %v4810_v39 = vld [vmem:[#allocation8 + $0x98] sm:$0xf0]  ;;  %v4457_v43 = vld [vmem:[#allocation8 + $0x98] sm:$0xf]  ;;  %v4811_v45 = vld [vmem:[#allocation8 + $0xa0] sm:$0xf0] }
  0x51   :  { %460 = vadd.xlane.f32.xlu2 %v5927_v28  ;;  %v439_v58 = vsel %vm283_vm3, %v438_v51, %v437_v53  ;;  %v4450_v41 = vor.u32 %v4810_v39, %v4449_v38  ;;  %v4437_v50 = vld [vmem:[#allocation8 + $0x78] sm:$0xf]  ;;  %v4807_v51 = vld [vmem:[#allocation8 + $0x80] sm:$0xf0]  ;;  %v4445_v55 = vld [vmem:[#allocation8 + $0x80] sm:$0xf] }
  0x52   :  { %v5163_v30 = vpop.eup %5162  ;;  %v441_v63 = vsel %vm286_vm4, %v440_v56, %v439_v58  ;;  %v4438_v53 = vor.u32 %v4807_v51, %v4437_v50  ;;  %v4808_v56 = vld [vmem:[#allocation8 + $0x88] sm:$0xf0]  ;;  %v4425_v60 = vld [vmem:[#allocation8 + $0x60] sm:$0xf]  ;;  %v4795_v38 = vld [vmem:[#allocation8 + $0x20] sm:$0xf0] }
  0x53   :  { %v465_v31 = vmul.f32 128.0, %v5163_v30  ;;  %vm469_vm7 = vweird.f32 %v5163_v30  ;;  %v443_v4 = vsel %vm289_vm5, %v442_v61, %v441_v63  ;;  %v4804_v61 = vld [vmem:[#allocation8 + $0x68] sm:$0xf0]  ;;  %v4794_v39 = vld [vmem:[#allocation8 + $0x1c] sm:$0xf] }
  0x54   :  { %v5950_v9 = vsel %vm292_vm6, %v444_v1, %v443_v4  ;;  %v4426_v63 = vor.u32 %v4804_v61, %v4425_v60  ;;  %v4433_v1 = vld [vmem:[#allocation8 + $0x68] sm:$0xf]  ;;  %v4377_v50 = vld [vmem:[#allocation8] sm:$0xf]  ;;  %v4792_v51 = vld [vmem:[#allocation8 + $0x8] sm:$0xf0] }
  0x55   :  { %v466_v32 = vsub.f32 1.0, %v465_v31  ;;  %v4812_v31 = vld [vmem:[#allocation8 + $0xac] sm:$0xf] }
  0x56   :  { %v4466_v36 = vor.u32 %v4812_v31, %v4463_v33  ;;  %v4409_v31 = vld [vmem:[#allocation8 + $0x38] sm:$0xf] }
  0x57   :  { %v467_v34 = vmul.f32 %v5163_v30, %v466_v32 }
  0x58   :  { %840 = vmatpush.bf16.msra.mxu1 %v4466_v36 }
  0x59   :  { %v468_v40 = vadd.f32 %v5163_v30, %v467_v34  ;;  %v4469_v34 = vld [vmem:[#allocation8 + $0xb0] sm:$0xf] }
  0x5a   :  { %v4470_v37 = vor.u32 %v4814_v35, %v4469_v34 }
  0x5b   :  { %v5932_v48 = vsel %vm469_vm7, %v5163_v30, %v468_v40  ;;  %v4813_v30 = vld [vmem:[#allocation8 + $0xb0] sm:$0xf0] }
  0x5c   :  { %v4462_v32 = vor.u32 %v4813_v30, %v4461_v29  ;;  %869 = vmatpush.bf16.msra.mxu2 %v4470_v37  ;;  %v4809_v40 = vld [vmem:[#allocation8 + $0x94] sm:$0xf]  ;;  %v4403_v30 = vld [vmem:[#allocation8 + $0x3c] sm:$0xf0]  ;;  %v4389_v37 = vld [vmem:[#allocation8 + $0x18] sm:$0xf] }
  0x5e   :  { %811 = vmatpush.bf16.msra.mxu0 %v4462_v32  ;;  %v4799_v32 = vld [vmem:[#allocation8 + $0x40] sm:$0xf0] }
  0x5f   :  { %v4410_v34 = vor.u32 %v4799_v32, %v4409_v31 }
  0x62   :  { %812 = vmatpush.bf16.msra.mxu0 %v4450_v41  ;;  %v4391_v41 = vld [vmem:[#allocation8 + $0x24] sm:$0xf0] }
  0x66   :  { %813 = vmatpush.bf16.msra.mxu0 %v4438_v53  ;;  %v4378_v53 = vor.u32 %v4792_v51, %v4377_v50 }
  0x6a   :  { %814 = vmatpush.bf16.msra.mxu0 %v4426_v63 }
  0xad   :  { %v457_v42 = vpop.xlane.xlu2 %456 }
  0xae   :  { %v475_v5 = vmul.f32 %v5932_v48, %v457_v42  ;;  %v4451_v42 = vld [vmem:[#allocation8 + $0x9c] sm:$0xf0] }
  0xaf   :  { %v4454_v46 = vor.u32 %v4809_v40, %v4451_v42  ;;  %v4390_v40 = vor.u32 %v4795_v38, %v4389_v37  ;;  %v4397_v42 = vld [vmem:[#allocation8 + $0x20] sm:$0xf] }
  0xb0   :  { %v5956_v12 = vsub.f32 %v5869_v44, %v475_v5 }
  0xb1   :  { %v453_v49 = vpop.xlane.xlu1 %452  ;;  %841 = vmatpush.bf16.msra.mxu1 %v4454_v46  ;;  %v4394_v46 = vor.u32 %v4794_v39, %v4391_v41 }
  0xb2   :  { %v473_v13 = vmul.f32 %v5932_v48, %v453_v49  ;;  %v491_v20 = vmul.f32 %v5956_v12, %v5956_v12  ;;  %v4458_v49 = vor.u32 %v4811_v45, %v4457_v43  ;;  %v4796_v43 = vld [vmem:[#allocation8 + $0x28] sm:$0xf0] }
  0xb4   :  { %v449_v52 = vpop.xlane.xlu0 %448  ;;  %v5967_v18 = vsub.f32 %v5879_v2, %v473_v13  ;;  %870 = vmatpush.bf16.msra.mxu2 %v4458_v49  ;;  %v4398_v49 = vor.u32 %v4796_v43, %v4397_v42 }
  0xb5   :  { %v471_v54 = vmul.f32 %v5932_v48, %v449_v52  ;;  %v4806_v52 = vld [vmem:[#allocation8 + $0x7c] sm:$0xf] }
  0xb6   :  { %v489_v25 = vmul.f32 %v5967_v18, %v5967_v18 }
  0xb7   :  { %v5937_v57 = vsub.f32 %v5889_v24, %v471_v54  ;;  %v4439_v54 = vld [vmem:[#allocation8 + $0x84] sm:$0xf0] }
  0xb8   :  { %v4442_v58 = vor.u32 %v4806_v52, %v4439_v54  ;;  %v4791_v52 = vld [vmem:[#allocation8 + $0x4] sm:$0xf]  ;;  %v4379_v54 = vld [vmem:[#allocation8 + $0xc] sm:$0xf0] }
  0xb9   :  { %v487_v59 = vmul.f32 %v5937_v57, %v5937_v57  ;;  %v459_v62 = vpop.xlane.xlu2 %458 }
  0xba   :  { %v476_v23 = vmul.f32 %v5932_v48, %v459_v62  ;;  %842 = vmatpush.bf16.msra.mxu1 %v4442_v58  ;;  %v4803_v62 = vld [vmem:[#allocation8 + $0x64] sm:$0xf]  ;;  %v4382_v58 = vor.u32 %v4791_v52, %v4379_v54 }
  0xbb   :  { %495 = vadd.xlane.f32.xlu0 %v487_v59  ;;  %v4446_v59 = vor.u32 %v4808_v56, %v4445_v55  ;;  %v4385_v55 = vld [vmem:[#allocation8 + $0x8] sm:$0xf]  ;;  %v4793_v56 = vld [vmem:[#allocation8 + $0x10] sm:$0xf0] }
  0xbc   :  { %v5980_v26 = vsub.f32 %v5899_v47, %v476_v23  ;;  %v4401_v23 = vld [vmem:[#allocation8 + $0x30] sm:$0xf] }
  0xbd   :  { %v455_v0 = vpop.xlane.xlu1 %454  ;;  %871 = vmatpush.bf16.msra.mxu2 %v4446_v59  ;;  %v4386_v59 = vor.u32 %v4793_v56, %v4385_v55  ;;  %v6012_v55 = vld [vmem:[#allocation7] ss:$0 sm:$0xff] }
  0xbe   :  { %v474_v3 = vmul.f32 %v5932_v48, %v455_v0  ;;  %v492_v27 = vmul.f32 %v5980_v26, %v5980_v26  ;;  %v4427_v0 = vld [vmem:[#allocation8 + $0x6c] sm:$0xf0] }
  0xbf   :  { %v4430_v4 = vor.u32 %v4803_v62, %v4427_v0 }
  0xc0   :  { %v5947_v7 = vsub.f32 %v5909_v6, %v474_v3  ;;  %v451_v8 = vpop.xlane.xlu0 %450  ;;  %v4805_v3 = vld [vmem:[#allocation8 + $0x70] sm:$0xf0] }
  0xc1   :  { %v472_v10 = vmul.f32 %v5932_v48, %v451_v8  ;;  %v4434_v5 = vor.u32 %v4805_v3, %v4433_v1  ;;  %843 = vmatpush.bf16.msra.mxu1 %v4430_v4  ;;  %v4413_v8 = vld [vmem:[#allocation8 + $0x48] sm:$0xf] }
  0xc2   :  { %v490_v11 = vmul.f32 %v5947_v7, %v5947_v7 }
  0xc3   :  { %v5960_v14 = vsub.f32 %v5919_v21, %v472_v10  ;;  %462 = vadd.xlane.f32.xlu0 %v5950_v9  ;;  %872 = vmatpush.bf16.msra.mxu2 %v4434_v5  ;;  %v4801_v10 = vld [vmem:[#allocation8 + $0x50] sm:$0xf0] }
  0xc4   :  { %501 = vadd.xlane.f32.xlu2 %v490_v11  ;;  %v461_v15 = vpop.xlane.xlu2 %460  ;;  %v4800_v11 = vld [vmem:[#allocation8 + $0x4c] sm:$0xf]  ;;  %v4414_v13 = vor.u32 %v4801_v10, %v4413_v8 }
  0xc5   :  { %v488_v16 = vmul.f32 %v5960_v14, %v5960_v14  ;;  %v477_v17 = vmul.f32 %v5932_v48, %v461_v15  ;;  %v4415_v15 = vld [vmem:[#allocation8 + $0x54] sm:$0xf0] }
  0xc6   :  { %815 = vmatpush.bf16.msra.mxu0 %v4414_v13 }
  0xc7   :  { %497 = vadd.xlane.f32.xlu1 %v488_v16  ;;  %v5970_v19 = vsub.f32 %v5927_v28, %v477_v17  ;;  %v4421_v16 = vld [vmem:[#allocation8 + $0x50] sm:$0xf]  ;;  %v4802_v17 = vld [vmem:[#allocation8 + $0x58] sm:$0xf0] }
  0xc9   :  { %v493_v22 = vmul.f32 %v5970_v19, %v5970_v19 }
  0xcb   :  { %503 = vadd.xlane.f32.xlu0 %v491_v20  ;;  %v4418_v20 = vor.u32 %v4800_v11, %v4415_v15 }
  0xcc   :  { %507 = vadd.xlane.f32.xlu2 %v493_v22  ;;  %v4422_v22 = vor.u32 %v4802_v17, %v4421_v16 }
  0xcd   :  { %844 = vmatpush.bf16.msra.mxu1 %v4418_v20 }
  0xce   :  { %873 = vmatpush.bf16.msra.mxu2 %v4422_v22 }
  0xcf   :  { %499 = vadd.xlane.f32.xlu1 %v489_v25  ;;  %v4798_v25 = vld [vmem:[#allocation8 + $0x38] sm:$0xf0] }
  0xd0   :  { %v4402_v29 = vor.u32 %v4798_v25, %v4401_v23 }
  0xd2   :  { %816 = vmatpush.bf16.msra.mxu0 %v4402_v29  ;;  %874 = vmatpush.bf16.msra.mxu2 %v4410_v34 }
  0xd6   :  { %817 = vmatpush.bf16.msra.mxu0 %v4390_v40  ;;  %875 = vmatpush.bf16.msra.mxu2 %v4398_v49 }
  0xd7   :  { %505 = vadd.xlane.f32.xlu1 %v492_v27  ;;  %v4797_v27 = vld [vmem:[#allocation8 + $0x34] sm:$0xf] }
  0xd8   :  { %v4406_v33 = vor.u32 %v4797_v27, %v4403_v30 }
  0xda   :  { %845 = vmatpush.bf16.msra.mxu1 %v4406_v33  ;;  %818 = vmatpush.bf16.msra.mxu0 %v4378_v53 }
  0xdb   :  { %876 = vmatpush.bf16.msra.mxu2 %v4386_v59 }
  0xde   :  { %846 = vmatpush.bf16.msra.mxu1 %v4394_v46 }
  0xe2   :  { %847 = vmatpush.bf16.msra.mxu1 %v4382_v58 }
 0x12e   :  { %v496_v35 = vpop.xlane.xlu0 %495 }
 0x12f   :  { %v511_v36 = vmul.f32 %v496_v35, %v5932_v48 }
 0x131   :  { %v519_v45 = vadd.f32 1e-05, %v511_v36 }
 0x133   :  { %5164 = vrsqrt.f32 %v519_v45  ;;  %vm533_vm9 = vweird.f32 %v519_v45 }
 0x136   :  { %v463_v61 = vpop.xlane.xlu0 %462 }
 0x137   :  { %v502_v60 = vpop.xlane.xlu2 %501  ;;  %v478_v63 = vmul.f32 %v5932_v48, %v463_v61 }
 0x138   :  { %v514_v62 = vmul.f32 %v502_v60, %v5932_v48 }
 0x139   :  { %v5165_v0 = vpop.eup %5164  ;;  %v5990_v3 = vsub.f32 %v5950_v9, %v478_v63 }
 0x13a   :  { %v5987_v1 = vadd.f32 1e-05, %v514_v62  ;;  %v528_v4 = vmul.f32 %v5165_v0, %v519_v45  ;;  %v498_v5 = vpop.xlane.xlu1 %497  ;;  %vm534_vm8 = vweird.f32 %v5165_v0  ;;  %v6008_v45 = vld [vmem:[#allocation5] ss:$0 sm:$0xff] }
 0x13b   :  { %v512_v8 = vmul.f32 %v498_v5, %v5932_v48  ;;  %v494_v10 = vmul.f32 %v5990_v3, %v5990_v3  ;;  %vm535_vm10 = vmor %vm533_vm9, %vm534_vm8 }
 0x13c   :  { %v529_v11 = vmul.f32 %v5165_v0, %v528_v4  ;;  %5166 = vrsqrt.f32 %v5987_v1  ;;  %vm563_vm0 = vweird.f32 %v5987_v1 }
 0x13d   :  { %v520_v13 = vadd.f32 1e-05, %v512_v8  ;;  %509 = vadd.xlane.f32.xlu0 %v494_v10 }
 0x13e   :  { %v530_v15 = vmul.f32 0.5, %v529_v11  ;;  %v504_v20 = vpop.xlane.xlu0 %503 }
 0x13f   :  { %5168 = vrsqrt.f32 %v520_v13  ;;  %v515_v29 = vmul.f32 %v504_v20, %v5932_v48  ;;  %vm543_vm11 = vweird.f32 %v520_v13 }
 0x140   :  { %v531_v16 = vsub.f32 1.5, %v530_v15 }
 0x141   :  { %v6002_v34 = vadd.f32 1e-05, %v515_v29 }
 0x142   :  { %v500_v17 = vpop.xlane.xlu1 %499  ;;  %v5996_v22 = vpop.eup %5166  ;;  %v532_v30 = vmul.f32 %v5165_v0, %v531_v16 }
 0x143   :  { %v513_v23 = vmul.f32 %v500_v17, %v5932_v48  ;;  %v558_v31 = vmul.f32 %v5996_v22, %v5987_v1  ;;  %vm564_vm1 = vweird.f32 %v5996_v22  ;;  %vm573_vm6 = vweird.f32 %v6002_v34 }
 0x144   :  { %v536_v35 = vsel %vm535_vm10, %v5165_v0, %v532_v30  ;;  %vm565_vm3 = vmor %vm563_vm0, %vm564_vm1  ;;  %vm1244_vm0 = vcmask 261120   ;;  %vm1715_vm1 = vcmask 130048  }
 0x145   :  { %v5169_v25 = vpop.eup %5168  ;;  %v521_v27 = vadd.f32 1e-05, %v513_v23  ;;  %v559_v36 = vmul.f32 %v5996_v22, %v558_v31  ;;  %v607_v42 = vmul.f32 %v536_v35, %v5937_v57 }
 0x146   :  { %v538_v32 = vmul.f32 %v5169_v25, %v520_v13  ;;  %vm544_vm12 = vweird.f32 %v5169_v25 }
 0x147   :  { %5170 = vrsqrt.f32 %v521_v27  ;;  %vm545_vm13 = vmor %vm543_vm11, %vm544_vm12  ;;  %v560_v46 = vmul.f32 0.5, %v559_v36  ;;  %v619_v54 = vmul.f32 %v6008_v45, %v607_v42  ;;  %vm553_vm14 = vweird.f32 %v521_v27  ;;  %v508_v42 = vpop.xlane.xlu2 %507 }
 0x148   :  { %v539_v33 = vmul.f32 %v5169_v25, %v538_v32  ;;  %5172 = vrsqrt.f32 %v6002_v34 }
 0x149   :  { %v561_v56 = vsub.f32 1.5, %v560_v46 }
 0x14a   :  { %v540_v37 = vmul.f32 0.5, %v539_v33  ;;  %v506_v38 = vpop.xlane.xlu1 %505 }
 0x14b   :  { %v516_v39 = vmul.f32 %v506_v38, %v5932_v48  ;;  %v562_v0 = vmul.f32 %v5996_v22, %v561_v56 }
 0x14c   :  { %v541_v40 = vsub.f32 1.5, %v540_v37 }
 0x14d   :  { %v5171_v41 = vpop.eup %5170  ;;  %v524_v43 = vadd.f32 1e-05, %v516_v39  ;;  %v566_v13 = vsel %vm565_vm3, %v5996_v22, %v562_v0  ;;  %vm2661_vm3 = vcmask 785408  }
 0x14e   :  { %v542_v49 = vmul.f32 %v5169_v25, %v541_v40  ;;  %v548_v50 = vmul.f32 %v5171_v41, %v521_v27  ;;  %vm554_vm15 = vweird.f32 %v5171_v41  ;;  %v5173_v58 = vpop.eup %5172  ;;  %v610_v20 = vmul.f32 %v566_v13, %v5947_v7 }
 0x14f   :  { %5174 = vrsqrt.f32 %v524_v43  ;;  %vm6017_vm2 = vmor %vm553_vm14, %vm554_vm15  ;;  %v568_v5 = vmul.f32 %v5173_v58, %v6002_v34  ;;  %vm583_vm4 = vweird.f32 %v524_v43  ;;  %vm574_vm7 = vweird.f32 %v5173_v58 }
 0x150   :  { %v546_v51 = vsel %vm545_vm13, %v5169_v25, %v542_v49  ;;  %v549_v52 = vmul.f32 %v5171_v41, %v548_v50  ;;  %v622_v29 = vmul.f32 %v6008_v45, %v610_v20  ;;  %vm575_vm9 = vmor %vm573_vm6, %vm574_vm7 }
 0x151   :  { %v608_v53 = vmul.f32 %v546_v51, %v5960_v14  ;;  %v631_v14 = vadd.f32 %v6012_v55, %v619_v54  ;;  %v569_v15 = vmul.f32 %v5173_v58, %v568_v5 }
 0x152   :  { %v550_v57 = vmul.f32 0.5, %v549_v52 }
 0x153   :  { %v620_v59 = vmul.f32 %v6008_v45, %v608_v53  ;;  %v570_v23 = vmul.f32 0.5, %v569_v15 }
 0x154   :  { %v551_v60 = vsub.f32 1.5, %v550_v57 }
 0x155   :  { %v5175_v61 = vpop.eup %5174  ;;  %v632_v63 = vadd.f32 %v6012_v55, %v620_v59  ;;  %v571_v30 = vsub.f32 1.5, %v570_v23 }
 0x156   :  { %v552_v4 = vmul.f32 %v5171_v41, %v551_v60  ;;  %v578_v8 = vmul.f32 %v5175_v61, %v524_v43  ;;  %vm584_vm5 = vweird.f32 %v5175_v61  ;;  %v517_v43 = vmul.f32 %v508_v42, %v5932_v48 }
 0x157   :  { %v639_v1 = vpack.c.bf16 %v632_v63, %v631_v14  ;;  %vm585_vm8 = vmor %vm583_vm4, %vm584_vm5  ;;  %v572_v32 = vmul.f32 %v5173_v58, %v571_v30 }
 0x158   :  { %v556_v10 = vsel %vm6017_vm2, %v5171_v41, %v552_v4  ;;  %v579_v11 = vmul.f32 %v5175_v61, %v578_v8  ;;  %v525_v46 = vadd.f32 1e-05, %v517_v43  ;;  %vm2652_vm2 = vcmask 523264  }
 0x159   :  { %819 = vmatmul.bf16.vlgmr.msra.gmra.mxu0 %v639_v1  ;;  %848 = vmatmul.bf16.vlgmr.msra.gmra.mxu1 %v639_v1  ;;  %v609_v16 = vmul.f32 %v556_v10, %v5967_v18  ;;  %v634_v18 = vadd.f32 %v6012_v55, %v622_v29  ;;  %v576_v35 = vsel %vm575_vm9, %v5173_v58, %v572_v32 }
 0x15a   :  { %877 = vmatmul.bf16.vlgmr.msra.gmra.mxu2 %v639_v1  ;;  %v580_v17 = vmul.f32 0.5, %v579_v11  ;;  %v611_v37 = vmul.f32 %v576_v35, %v5956_v12  ;;  %5176 = vrsqrt.f32 %v525_v46  ;;  %vm593_vm10 = vweird.f32 %v525_v46 }
 0x15b   :  { %v621_v25 = vmul.f32 %v6008_v45, %v609_v16 }
 0x15c   :  { %v581_v27 = vsub.f32 1.5, %v580_v17  ;;  %v623_v34 = vmul.f32 %v6008_v45, %v611_v37 }
 0x15d   :  { %v633_v31 = vadd.f32 %v6012_v55, %v621_v25 }
 0x15e   :  { %v582_v22 = vmul.f32 %v5175_v61, %v581_v27  ;;  %v635_v40 = vadd.f32 %v6012_v55, %v623_v34 }
 0x15f   :  { %v640_v7 = vpack.c.bf16 %v634_v18, %v633_v31 }
 0x160   :  { %v586_v33 = vsel %vm585_vm8, %v5175_v61, %v582_v22 }
 0x161   :  { %v612_v36 = vmul.f32 %v586_v33, %v5980_v26  ;;  %v5177_v26 = vpop.eup %5176 }
 0x162   :  { %v588_v49 = vmul.f32 %v5177_v26, %v525_v46  ;;  %vm594_vm11 = vweird.f32 %v5177_v26 }
 0x163   :  { %v624_v38 = vmul.f32 %v6008_v45, %v612_v36  ;;  %vm595_vm12 = vmor %vm593_vm10, %vm594_vm11 }
 0x164   :  { %v589_v12 = vmul.f32 %v5177_v26, %v588_v49 }
 0x165   :  { %v636_v39 = vadd.f32 %v6012_v55, %v624_v38 }
 0x166   :  { %v590_v53 = vmul.f32 0.5, %v589_v12 }
 0x167   :  { %v641_v41 = vpack.c.bf16 %v636_v39, %v635_v40 }
 0x168   :  { %v591_v54 = vsub.f32 1.5, %v590_v53 }
 0x169   :  { %824 = vmatmul.bf16.gmra.mxu0 %v640_v7  ;;  %853 = vmatmul.bf16.gmra.mxu1 %v640_v7 }
 0x16a   :  { %882 = vmatmul.bf16.gmra.mxu2 %v640_v7  ;;  %v592_v57 = vmul.f32 %v5177_v26, %v591_v54 }
 0x16c   :  { %v596_v60 = vsel %vm595_vm12, %v5177_v26, %v592_v57 }
 0x16d   :  { %v613_v14 = vmul.f32 %v596_v60, %v5970_v19  ;;  %v675_v19 = vld [vmem:[%s7076_s4] sm:$0x7]  ;;  %s5747_s4 = smov 96  }
 0x16e   :  { %v6052_v16 = vperm.slane %v675_v19, 1  ;;  %v6057_v20 = vperm.slane %v675_v19, 2 }
 0x16f   :  { %v625_v5 = vmul.f32 %v6008_v45, %v613_v14 }
 0x171   :  { %v637_v1 = vadd.f32 %v6012_v55, %v625_v5 }
 0x179   :  { %829 = vmatmul.bf16.gmra.mxu0 %v641_v41  ;;  %858 = vmatmul.bf16.gmra.mxu1 %v641_v41 }
 0x17a   :  { %887 = vmatmul.bf16.gmra.mxu2 %v641_v41 }
 0x1b0   :  { %v510_v50 = vpop.xlane.xlu0 %509 }
 0x1b1   :  { %v518_v51 = vmul.f32 %v510_v50, %v5932_v48 }
 0x1b3   :  { %v526_v52 = vadd.f32 1e-05, %v518_v51 }
 0x1b5   :  { %5178 = vrsqrt.f32 %v526_v52  ;;  %vm603_vm14 = vweird.f32 %v526_v52 }
 0x1bb   :  { %v5179_v56 = vpop.eup %5178 }
 0x1bc   :  { %v598_v58 = vmul.f32 %v5179_v56, %v526_v52  ;;  %vm604_vm13 = vweird.f32 %v5179_v56 }
 0x1bd   :  { %vm605_vm15 = vmor %vm603_vm14, %vm604_vm13 }
 0x1be   :  { %v599_v59 = vmul.f32 %v5179_v56, %v598_v58 }
 0x1c0   :  { %v600_v61 = vmul.f32 0.5, %v599_v59 }
 0x1c2   :  { %v601_v62 = vsub.f32 1.5, %v600_v61 }
 0x1c4   :  { %v602_v63 = vmul.f32 %v5179_v56, %v601_v62 }
 0x1c6   :  { %v606_v0 = vsel %vm605_vm15, %v5179_v56, %v602_v63 }
 0x1c7   :  { %v614_v4 = vmul.f32 %v606_v0, %v5990_v3  ;;  %v6054_v3 = vperm.slane %v675_v19, 0 }
 0x1c9   :  { %v626_v8 = vmul.f32 %v6008_v45, %v614_v4 }
 0x1cb   :  { %v638_v10 = vadd.f32 %v6012_v55, %v626_v8 }
 0x1cd   :  { %v642_v11 = vpack.c.bf16 %v638_v10, %v637_v1 }
 0x1cf   :  { %834 = vmatmul.bf16.gmra.mxu0 %v642_v11  ;;  %863 = vmatmul.bf16.gmra.mxu1 %v642_v11 }
 0x1d0   :  { %892 = vmatmul.bf16.gmra.mxu2 %v642_v11 }
 0x1d6   :  { %v820_v13 = vpop.f32.mrf.mxu0  ;;  %v849_v15 = vpop.f32.mrf.mxu1 }
 0x1d7   :  { %v850_v45 = vadd.f32 %v849_v15, %v6052_v16  ;;  %v821_v25 = vadd.f32 %v820_v13, %v6054_v3 }
 0x1d9   :  { %v1090_v30 = vpack.c.bf16 %v850_v45, %v850_v45  ;;  %v978_v41 = vpack.c.bf16 %v821_v25, %v821_v25 }
 0x1db   :  { %v1241_v7 = vunpack.c.l.b16 %v1090_v30  ;;  %v1236_v51 = vunpack.c.l.b16 %v978_v41 }
 0x1dd   :  { %v878_v17 = vpop.f32.mrf.mxu2 }
 0x1de   :  { %v822_v55 = vpop.f32.mrf.mxu0  ;;  %v851_v23 = vpop.f32.mrf.mxu1  ;;  %v879_v18 = vadd.f32 %v878_v17, %v6057_v20 }
 0x1df   :  { %v823_v27 = vadd.f32 %v822_v55, %v6054_v3  ;;  %v852_v29 = vadd.f32 %v851_v23, %v6052_v16 }
 0x1e0   :  { %v1202_v36 = vpack.c.bf16 %v879_v18, %v879_v18 }
 0x1e1   :  { %v4916_v31 = vpack.i.bf16 %v852_v29, %v850_v45  ;;  %v4921_v22 = vpack.i.bf16 %v823_v27, %v821_v25  ;;  %v1091_v32 = vpack.c.bf16 %v852_v29, %v852_v29  ;;  %v979_v37 = vpack.c.bf16 %v823_v27, %v823_v27 }
 0x1e2   :  { %v6068_v46 = vunpack.c.l.b16 %v1202_v36 }
 0x1e3   :  { %4917 = vrot.lane.b32.xlu1 %v4916_v31, %s5747_s4  ;;  %4922 = vrot.lane.b32.xlu2 %v4921_v22, %s5747_s4  ;;  %v1242_v33 = vunpack.c.l.b16 %v1091_v32  ;;  %v1237_v49 = vunpack.c.l.b16 %v979_v37 }
 0x1e4   :  { %4932 = vrot.lane.b32.xlu0 %v4921_v22, %s5737_s18 }
 0x1e5   :  { %v880_v35 = vpop.f32.mrf.mxu2  ;;  %v1243_v40 = vpack.c.b16 %v1242_v33, %v1241_v7  ;;  %v1238_v57 = vpack.c.b16 %v1237_v49, %v1236_v51 }
 0x1e6   :  { %v881_v38 = vadd.f32 %v880_v35, %v6057_v20  ;;  %v825_v34 = vpop.f32.mrf.mxu0  ;;  %v854_v39 = vpop.f32.mrf.mxu1 }
 0x1e7   :  { %v1249_v43 = vsel %vm1244_vm0, %v1243_v40, 0  ;;  %v855_v50 = vadd.f32 %v854_v39, %v6052_v16  ;;  %v826_v58 = vadd.f32 %v825_v34, %v6054_v3 }
 0x1e8   :  { %v1203_v42 = vpack.c.bf16 %v881_v38, %v881_v38  ;;  %1258 = vmatpush.bf16.xpose.msrb.mxu0 %v1249_v43  ;;  %v4946_v26 = vpack.i.bf16 %v881_v38, %v879_v18 }
 0x1e9   :  { %v1092_v61 = vpack.c.bf16 %v855_v50, %v855_v50  ;;  %v980_v17 = vpack.c.bf16 %v826_v58, %v826_v58 }
 0x1ea   :  { %v6070_v12 = vunpack.c.l.b16 %v1203_v42 }
 0x1eb   :  { %4937 = vrot.lane.b32.xlu1 %v4916_v31, %s5748_s20  ;;  %4927 = vrot.lane.b32.xlu2 %v4916_v31, %s5737_s18  ;;  %v1272_v4 = vunpack.c.l.b16 %v1092_v61  ;;  %v1267_v31 = vunpack.c.l.b16 %v980_v17 }
 0x1ec   :  { %4947 = vrot.lane.b32.xlu0 %v4946_v26, %s5747_s4  ;;  %v2109_v52 = vpack.c.b16 %v6070_v12, %v6068_v46 }
 0x1ed   :  { %v883_v53 = vpop.f32.mrf.mxu2 }
 0x1ee   :  { %v827_v54 = vpop.f32.mrf.mxu0  ;;  %v856_v56 = vpop.f32.mrf.mxu1  ;;  %v884_v0 = vadd.f32 %v883_v53, %v6057_v20 }
 0x1ef   :  { %v828_v59 = vadd.f32 %v827_v54, %v6054_v3  ;;  %v857_v60 = vadd.f32 %v856_v56, %v6052_v16  ;;  %4471 = vmatmul.msk.bf16.vlgmr.msrb.gmra.mxu0 %vm1244_vm0, %v1238_v57 }
 0x1f0   :  { %v1204_v11 = vpack.c.bf16 %v884_v0, %v884_v0 }
 0x1f1   :  { %v4956_v62 = vpack.i.bf16 %v828_v59, %v826_v58  ;;  %v4951_v14 = vpack.i.bf16 %v857_v60, %v855_v50  ;;  %v1093_v63 = vpack.c.bf16 %v857_v60, %v857_v60  ;;  %v981_v10 = vpack.c.bf16 %v828_v59, %v828_v59 }
 0x1f2   :  { %v6090_v27 = vunpack.c.l.b16 %v1204_v11 }
 0x1f3   :  { %4957 = vrot.lane.b32.xlu1 %v4956_v62, %s5747_s4  ;;  %4942 = vrot.lane.b32.xlu2 %v4921_v22, %s5748_s20  ;;  %v1273_v5 = vunpack.c.l.b16 %v1093_v63  ;;  %v1268_v25 = vunpack.c.l.b16 %v981_v10 }
 0x1f4   :  { %4952 = vrot.lane.b32.xlu0 %v4951_v14, %s5747_s4 }
 0x1f5   :  { %v885_v8 = vpop.f32.mrf.mxu2  ;;  %v1274_v1 = vpack.c.b16 %v1273_v5, %v1272_v4  ;;  %v1269_v32 = vpack.c.b16 %v1268_v25, %v1267_v31 }
 0x1f6   :  { %v886_v19 = vadd.f32 %v885_v8, %v6057_v20  ;;  %v830_v13 = vpop.f32.mrf.mxu0  ;;  %v859_v15 = vpop.f32.mrf.mxu1 }
 0x1f7   :  { %v1279_v45 = vsel %vm1244_vm0, %v1274_v1, 0  ;;  %v860_v30 = vadd.f32 %v859_v15, %v6052_v16  ;;  %v831_v39 = vadd.f32 %v830_v13, %v6054_v3 }
 0x1f8   :  { %v1205_v55 = vpack.c.bf16 %v886_v19, %v886_v19  ;;  %1288 = vmatpush.bf16.xpose.msra.mxu3 %v1279_v45  ;;  %v6088_v23 = vpack.i.bf16 %v886_v19, %v884_v0 }
 0x1f9   :  { %v1094_v36 = vpack.c.bf16 %v860_v30, %v860_v30  ;;  %v982_v53 = vpack.c.bf16 %v831_v39, %v831_v39 }
 0x1fa   :  { %v6092_v29 = vunpack.c.l.b16 %v1205_v55 }
 0x1fb   :  { %4972 = vrot.lane.b32.xlu1 %v4946_v26, %s5748_s20  ;;  %4962 = vrot.lane.b32.xlu2 %v4951_v14, %s5737_s18  ;;  %v1302_v40 = vunpack.c.l.b16 %v1094_v36  ;;  %v1297_v61 = vunpack.c.l.b16 %v982_v53 }
 0x1fc   :  { %4977 = vrot.lane.b32.xlu0 %v4956_v62, %s5737_s18  ;;  %v2137_v22 = vpack.c.b16 %v6092_v29, %v6090_v27 }
 0x1fd   :  { %v888_v18 = vpop.f32.mrf.mxu2 }
 0x1fe   :  { %v832_v7 = vpop.f32.mrf.mxu0  ;;  %v861_v33 = vpop.f32.mrf.mxu1  ;;  %v889_v34 = vadd.f32 %v888_v18, %v6057_v20 }
 0x1ff   :  { %v862_v35 = vadd.f32 %v861_v33, %v6052_v16  ;;  %4472 = vmatmul.msk.bf16.vlgmr.msra.gmra.mxu3 %vm1244_vm0, %v1269_v32  ;;  %v833_v37 = vadd.f32 %v832_v7, %v6054_v3 }
 0x200   :  { %v1206_v50 = vpack.c.bf16 %v889_v34, %v889_v34 }
 0x201   :  { %v1095_v38 = vpack.c.bf16 %v862_v35, %v862_v35  ;;  %v983_v42 = vpack.c.bf16 %v833_v37, %v833_v37  ;;  %v5006_v58 = vpack.i.bf16 %v833_v37, %v831_v39  ;;  %v5001_v63 = vpack.i.bf16 %v862_v35, %v860_v30 }
 0x203   :  { %4987 = vrot.lane.b32.xlu1 %v4956_v62, %s5748_s20  ;;  %4967 = vrot.lane.b32.xlu2 %v4946_v26, %s5737_s18  ;;  %v1303_v41 = vunpack.c.l.b16 %v1095_v38  ;;  %v1298_v59 = vunpack.c.l.b16 %v983_v42  ;;  %v6112_v26 = vunpack.c.l.b16 %v1206_v50 }
 0x204   :  { %4982 = vrot.lane.b32.xlu0 %v4951_v14, %s5748_s20 }
 0x205   :  { %v890_v43 = vpop.f32.mrf.mxu2  ;;  %v1304_v49 = vpack.c.b16 %v1303_v41, %v1302_v40  ;;  %v1299_v14 = vpack.c.b16 %v1298_v59, %v1297_v61 }
 0x206   :  { %v891_v51 = vadd.f32 %v890_v43, %v6057_v20 }
 0x207   :  { %v1309_v54 = vsel %vm1244_vm0, %v1304_v49, 0 }
 0x208   :  { %v1207_v56 = vpack.c.bf16 %v891_v51, %v891_v51  ;;  %1318 = vmatpush.bf16.xpose.msrb.mxu3 %v1309_v54  ;;  %v6110_v57 = vpack.i.bf16 %v891_v51, %v889_v34 }
 0x20a   :  { %v6114_v60 = vunpack.c.l.b16 %v1207_v56 }
 0x20b   :  { %4992 = vrot.lane.b32.xlu1 %v6088_v23, %s5747_s4  ;;  %5007 = vrot.lane.b32.xlu2 %v5006_v58, %s5747_s4 }
 0x20c   :  { %4997 = vrot.lane.b32.xlu0 %v6088_v23, %s5737_s18  ;;  %v2165_v62 = vpack.c.b16 %v6114_v60, %v6112_v26 }
 0x20f   :  { %4473 = vmatmul.msk.bf16.vlgmr.msrb.gmra.mxu3 %vm1244_vm0, %v1299_v14 }
 0x213   :  { %5002 = vrot.lane.b32.xlu1 %v5001_v63, %s5747_s4  ;;  %5012 = vrot.lane.b32.xlu2 %v5001_v63, %s5737_s18 }
 0x214   :  { %5017 = vrot.lane.b32.xlu0 %v5006_v58, %s5737_s18 }
 0x21b   :  { %5022 = vrot.lane.b32.xlu1 %v5001_v63, %s5748_s20  ;;  %5027 = vrot.lane.b32.xlu2 %v5006_v58, %s5748_s20 }
 0x223   :  { %5032 = vrot.lane.b32.xlu2 %v6110_v57, %s5747_s4 }
 0x23d   :  { %v6131_v0 = vpop.permute.xlu2 %4922 }
 0x245   :  { %v4928_v4 = vpop.permute.xlu2 %4927 }
 0x246   :  { %v4930_v5 = vunpack.i.h.bf16 %v4928_v4  ;;  %v4929_v8 = vunpack.i.l.bf16 %v4928_v4 }
 0x248   :  { %v1107_v1 = vpack.c.bf16 %v4930_v5, %v4930_v5  ;;  %v1106_v10 = vpack.c.bf16 %v4929_v8, %v4929_v8 }
 0x24a   :  { %v1483_v11 = vunpack.c.l.b16 %v1107_v1  ;;  %v1482_v19 = vunpack.c.l.b16 %v1106_v10 }
 0x24c   :  { %v1484_v13 = vpack.c.b16 %v1483_v11, %v1482_v19  ;;  %v835_v15 = vpop.f32.mrf.mxu0  ;;  %v864_v45 = vpop.f32.mrf.mxu1 }
 0x24d   :  { %v4943_v55 = vpop.permute.xlu2 %4942  ;;  %v865_v32 = vadd.f32 %v864_v45, %v6052_v16  ;;  %v836_v43 = vadd.f32 %v835_v15, %v6054_v3 }
 0x24e   :  { %v1489_v17 = vsel %vm1244_vm0, %v1484_v13, 0  ;;  %v4945_v59 = vunpack.i.h.bf16 %v4943_v55  ;;  %v4944_v1 = vunpack.i.l.bf16 %v4943_v55 }
 0x24f   :  { %1498 = vmatpush.bf16.xpose.msrb.mxu2 %v1489_v17  ;;  %v1096_v49 = vpack.c.bf16 %v865_v32, %v865_v32 }
 0x250   :  { %v1003_v17 = vpack.c.bf16 %v4945_v59, %v4945_v59 }
 0x251   :  { %v1332_v10 = vunpack.c.l.b16 %v1096_v49 }
 0x253   :  { %v893_v25 = vpop.f32.mrf.mxu2 }
 0x254   :  { %v866_v30 = vpop.f32.mrf.mxu1  ;;  %v837_v18 = vpop.f32.mrf.mxu0  ;;  %v6151_v55 = vadd.f32 %v893_v25, %v6057_v20 }
 0x255   :  { %v4918_v31 = vpop.permute.xlu1 %4917  ;;  %v867_v38 = vadd.f32 %v866_v30, %v6052_v16  ;;  %v838_v40 = vadd.f32 %v837_v18, %v6054_v3  ;;  %v6140_v61 = vpop.permute.xlu2 %4962  ;;  %v984_v30 = vpack.c.bf16 %v836_v43, %v836_v43 }
 0x256   :  { %v4920_v7 = vunpack.i.h.bf16 %v4918_v31  ;;  %v4919_v33 = vunpack.i.l.bf16 %v4918_v31  ;;  %v4933_v35 = vpop.permute.xlu0 %4932 }
 0x257   :  { %v4935_v36 = vunpack.i.h.bf16 %v4933_v35  ;;  %v4934_v37 = vunpack.i.l.bf16 %v4933_v35  ;;  %v5046_v53 = vpack.i.bf16 %v867_v38, %v865_v32  ;;  %v6138_v58 = vpack.i.bf16 %v838_v40, %v836_v43 }
 0x258   :  { %v1099_v34 = vpack.c.bf16 %v4920_v7, %v4920_v7  ;;  %v1098_v39 = vpack.c.bf16 %v4919_v33, %v4919_v33  ;;  %v1097_v63 = vpack.c.bf16 %v867_v38, %v867_v38  ;;  %v985_v13 = vpack.c.bf16 %v838_v40, %v838_v40 }
 0x259   :  { %v995_v41 = vpack.c.bf16 %v4935_v36, %v4935_v36  ;;  %v994_v42 = vpack.c.bf16 %v4934_v37, %v4934_v37  ;;  %5047 = vrot.lane.b32.xlu2 %v5046_v53, %s5737_s18  ;;  %5037 = vrot.lane.b32.xlu0 %v5046_v53, %s5747_s4  ;;  %v1002_v36 = vpack.c.bf16 %v4944_v1, %v4944_v1 }
 0x25a   :  { %v1363_v54 = vunpack.c.l.b16 %v1099_v34  ;;  %v1362_v56 = vunpack.c.l.b16 %v1098_v39  ;;  %5042 = vrot.lane.b32.xlu1 %v6138_v58, %s5747_s4  ;;  %v1333_v11 = vunpack.c.l.b16 %v1097_v63  ;;  %v1328_v38 = vunpack.c.l.b16 %v985_v13 }
 0x25b   :  { %v1478_v50 = vunpack.c.l.b16 %v995_v41  ;;  %v1477_v51 = vunpack.c.l.b16 %v994_v42  ;;  %v895_v8 = vpop.f32.mrf.mxu2  ;;  %v1327_v42 = vunpack.c.l.b16 %v984_v30 }
 0x25c   :  { %v1364_v19 = vpack.c.b16 %v1363_v54, %v1362_v56  ;;  %v6148_v31 = vadd.f32 %v895_v8, %v6057_v20  ;;  %v1334_v18 = vpack.c.b16 %v1333_v11, %v1332_v10  ;;  %v1598_v54 = vunpack.c.l.b16 %v1003_v17 }
 0x25d   :  { %v1479_v16 = vpack.c.b16 %v1478_v50, %v1477_v51  ;;  %v4938_v14 = vpop.permute.xlu1 %4937  ;;  %v1597_v56 = vunpack.c.l.b16 %v1002_v36  ;;  %v6165_v59 = vpop.permute.xlu2 %4967  ;;  %v4925_v10 = vunpack.i.h.bf16 %v6131_v0  ;;  %v4924_v11 = vunpack.i.l.bf16 %v6131_v0 }
 0x25e   :  { %v4940_v4 = vunpack.i.h.bf16 %v4938_v14  ;;  %v4939_v3 = vunpack.i.l.bf16 %v4938_v14  ;;  %v4948_v5 = vpop.permute.xlu0 %4947  ;;  %v1339_v37 = vsel %vm1244_vm0, %v1334_v18, 0  ;;  %v1369_v39 = vsel %vm1244_vm0, %v1364_v19, 0 }
 0x25f   :  { %4479 = vmatmul.msk.bf16.vlgmr.msrb.gmra.mxu2 %vm1244_vm0, %v1479_v16  ;;  %v4950_v33 = vunpack.i.h.bf16 %v4948_v5  ;;  %v4949_v35 = vunpack.i.l.bf16 %v4948_v5  ;;  %1348 = vmatpush.bf16.xpose.msra.mxu3 %v1339_v37  ;;  %v6161_v41 = vpack.i.bf16 %v6148_v31, %v6151_v55  ;;  %v1329_v16 = vpack.c.b16 %v1328_v38, %v1327_v42 }
 0x260   :  { %v1115_v15 = vpack.c.bf16 %v4940_v4, %v4940_v4  ;;  %v1114_v45 = vpack.c.bf16 %v4939_v3, %v4939_v3  ;;  %v4965_v4 = vunpack.i.h.bf16 %v6140_v61  ;;  %v4964_v5 = vunpack.i.l.bf16 %v6140_v61 }
 0x261   :  { %5052 = vrot.lane.b32.xlu0 %v6138_v58, %s5737_s18  ;;  %v1211_v20 = vpack.c.bf16 %v4950_v33, %v4950_v33  ;;  %v1210_v25 = vpack.c.bf16 %v4949_v35, %v4949_v35  ;;  %v1599_v19 = vpack.c.b16 %v1598_v54, %v1597_v56  ;;  %v987_v17 = vpack.c.bf16 %v4925_v10, %v4925_v10 }
 0x262   :  { %v1603_v32 = vunpack.c.l.b16 %v1115_v15  ;;  %v1602_v7 = vunpack.c.l.b16 %v1114_v45  ;;  %5057 = vrot.lane.b32.xlu1 %v5046_v53, %s5748_s20  ;;  %v1108_v61 = vpack.c.bf16 %v4964_v5, %v4964_v5  ;;  %v986_v30 = vpack.c.bf16 %v4924_v11, %v4924_v11 }
 0x263   :  { %v2220_v53 = vunpack.c.l.b16 %v1211_v20  ;;  %v2219_v3 = vunpack.c.l.b16 %v1210_v25 }
 0x264   :  { %v1604_v34 = vpack.c.b16 %v1603_v32, %v1602_v7  ;;  %v1512_v32 = vunpack.c.l.b16 %v1108_v61  ;;  %v1358_v7 = vunpack.c.l.b16 %v987_v17  ;;  %v1357_v33 = vunpack.c.l.b16 %v986_v30 }
 0x265   :  { %v6155_v40 = vpop.permute.xlu1 %4957  ;;  %v2221_v46 = vpack.c.b16 %v2220_v53, %v2219_v3  ;;  %v5008_v0 = vpop.permute.xlu2 %5007 }
 0x266   :  { %v4953_v43 = vpop.permute.xlu0 %4952  ;;  %v1609_v51 = vsel %vm1244_vm0, %v1604_v34, 0  ;;  %4474 = vmatmul.msk.bf16.vlgmr.msra.gmra.mxu3 %vm1244_vm0, %v1329_v16  ;;  %v1359_v37 = vpack.c.b16 %v1358_v7, %v1357_v33  ;;  %v4960_v20 = vunpack.i.h.bf16 %v6155_v40  ;;  %v4959_v25 = vunpack.i.l.bf16 %v6155_v40 }
 0x267   :  { %1378 = vmatpush.bf16.xpose.msrb.mxu3 %v1369_v39  ;;  %v4955_v49 = vunpack.i.h.bf16 %v4953_v43  ;;  %v4954_v50 = vunpack.i.l.bf16 %v4953_v43  ;;  %1618 = vmatpush.bf16.xpose.msra.mxu2 %v1609_v51  ;;  %v5010_v61 = vunpack.i.h.bf16 %v5008_v0 }
 0x268   :  { %v989_v56 = vpack.c.bf16 %v4960_v20, %v4960_v20  ;;  %v988_v16 = vpack.c.bf16 %v4959_v25, %v4959_v25 }
 0x269   :  { %v1101_v14 = vpack.c.bf16 %v4955_v49, %v4955_v49  ;;  %v1100_v63 = vpack.c.bf16 %v4954_v50, %v4954_v50  ;;  %5062 = vrot.lane.b32.xlu0 %v6138_v58, %s5748_s20 }
 0x26b   :  { %v1393_v8 = vunpack.c.l.b16 %v1101_v14  ;;  %v1392_v1 = vunpack.c.l.b16 %v1100_v63 }
 0x26c   :  { %v6191_v14 = vpop.f32.mrf.mxu0 }
 0x26d   :  { %v1394_v13 = vpack.c.b16 %v1393_v8, %v1392_v1  ;;  %v6175_v15 = vpop.permute.xlu1 %4972  ;;  %v5013_v42 = vpop.permute.xlu2 %5012  ;;  %v1388_v8 = vunpack.c.l.b16 %v989_v56  ;;  %v1387_v1 = vunpack.c.l.b16 %v988_v16  ;;  %v1716_v10 = vsel %vm1715_vm1, %v6191_v14, -inf }
 0x26e   :  { %v6179_v12 = vpop.permute.xlu0 %4977  ;;  %v5015_v49 = vunpack.i.h.bf16 %v5013_v42  ;;  %v5014_v50 = vunpack.i.l.bf16 %v5013_v42 }
 0x26f   :  { %2121 = vmatpush.bf16.msrb.mxu2 %v2109_v52  ;;  %v1109_v52 = vpack.c.bf16 %v4965_v4, %v4965_v4  ;;  %v1399_v45 = vsel %vm1244_vm0, %v1394_v13, 0  ;;  %v4979_v20 = vunpack.i.l.bf16 %v6179_v12 }
 0x270   :  { %4483 = vmatmul.msk.bf16.vlgmr.msra.gmra.mxu2 %vm1244_vm0, %v1599_v19  ;;  %1408 = vmatpush.bf16.xpose.msra.mxu3 %v1399_v45  ;;  %v1111_v4 = vpack.c.bf16 %v5015_v49, %v5015_v49  ;;  %v1110_v53 = vpack.c.bf16 %v5014_v50, %v5014_v50  ;;  %v5009_v45 = vunpack.i.l.bf16 %v5008_v0  ;;  %v4980_v0 = vunpack.i.h.bf16 %v6179_v12 }
 0x271   :  { %v1513_v18 = vunpack.c.l.b16 %v1109_v52 }
 0x272   :  { %v1543_v13 = vunpack.c.l.b16 %v1111_v4  ;;  %v997_v12 = vpack.c.bf16 %v4980_v0, %v4980_v0 }
 0x273   :  { %2233 = vmatpush.bf16.msra.mxu2 %v2221_v46  ;;  %v1514_v58 = vpack.c.b16 %v1513_v18, %v1512_v32  ;;  %v1542_v46 = vunpack.c.l.b16 %v1110_v53  ;;  %v1389_v18 = vpack.c.b16 %v1388_v8, %v1387_v1  ;;  %v996_v8 = vpack.c.bf16 %v4979_v20, %v4979_v20 }
 0x275   :  { %v6183_v35 = vpop.permute.xlu1 %4987  ;;  %v1519_v39 = vsel %vm1244_vm0, %v1514_v58, 0  ;;  %v1544_v58 = vpack.c.b16 %v1543_v13, %v1542_v46  ;;  %v1508_v13 = vunpack.c.l.b16 %v997_v12  ;;  %v1507_v46 = vunpack.c.l.b16 %v996_v8 }
 0x276   :  { %v4983_v36 = vpop.permute.xlu0 %4982  ;;  %4475 = vmatmul.msk.bf16.vlgmr.msrb.gmra.mxu3 %vm1244_vm0, %v1359_v37 }
 0x277   :  { %v4985_v38 = vunpack.i.h.bf16 %v4983_v36  ;;  %v4984_v34 = vunpack.i.l.bf16 %v4983_v36  ;;  %v1549_v16 = vsel %vm1244_vm0, %v1544_v58, 0  ;;  %v5028_v58 = vpop.permute.xlu2 %5027 }
 0x278   :  { %1528 = vmatpush.bf16.xpose.msrb.mxu3 %v1519_v39  ;;  %v6203_v39 = vpop.f32.mrf.mxu0 }
 0x279   :  { %v1117_v51 = vpack.c.bf16 %v4985_v38, %v4985_v38  ;;  %v1116_v54 = vpack.c.bf16 %v4984_v34, %v4984_v34  ;;  %v991_v38 = vpack.c.bf16 %v5010_v61, %v5010_v61  ;;  %v990_v34 = vpack.c.bf16 %v5009_v45, %v5009_v45 }
 0x27a   :  { %v1719_v56 = vsel %vm1715_vm1, %v6203_v39, -inf }
 0x27b   :  { %v1633_v3 = vunpack.c.l.b16 %v1117_v51  ;;  %v1632_v5 = vunpack.c.l.b16 %v1116_v54  ;;  %v1418_v4 = vunpack.c.l.b16 %v991_v38  ;;  %v1417_v53 = vunpack.c.l.b16 %v990_v34 }
 0x27c   :  { %v4990_v34 = vunpack.i.h.bf16 %v6183_v35 }
 0x27d   :  { %v6189_v43 = vpop.permute.xlu1 %4992  ;;  %v1634_v52 = vpack.c.b16 %v1633_v3, %v1632_v5 }
 0x27e   :  { %v6199_v36 = vpop.permute.xlu0 %4997  ;;  %v4995_v0 = vunpack.i.h.bf16 %v6189_v43  ;;  %v4994_v20 = vunpack.i.l.bf16 %v6189_v43  ;;  %v5030_v43 = vunpack.i.h.bf16 %v5028_v58 }
 0x27f   :  { %v1639_v37 = vsel %vm1244_vm0, %v1634_v52, 0 }
 0x282   :  { %v6193_v63 = vpop.f32.mrf.mxu3  ;;  %1717 = vmax.xlane.f32.xlu2 %v1716_v10 }
 0x283   :  { %v1722_v45 = vsel %vm1715_vm1, %v6193_v63, -inf }
 0x285   :  { %v5003_v40 = vpop.permute.xlu1 %5002 }
 0x286   :  { %v5005_v11 = vunpack.i.h.bf16 %v5003_v40  ;;  %v5004_v19 = vunpack.i.l.bf16 %v5003_v40  ;;  %4476 = vmatmul.msk.bf16.vlgmr.msra.gmra.mxu3 %vm1244_vm0, %v1389_v18  ;;  %v5018_v52 = vpop.permute.xlu0 %5017 }
 0x287   :  { %1648 = vmatpush.bf16.xpose.msra.mxu3 %v1639_v37  ;;  %v5019_v18 = vunpack.i.l.bf16 %v5018_v52 }
 0x288   :  { %v1103_v17 = vpack.c.bf16 %v5005_v11, %v5005_v11  ;;  %v1102_v30 = vpack.c.bf16 %v5004_v19, %v5004_v19  ;;  %v1419_v11 = vpack.c.b16 %v1418_v4, %v1417_v53 }
 0x289   :  { %v998_v38 = vpack.c.bf16 %v5019_v18, %v5019_v18 }
 0x28a   :  { %v1423_v32 = vunpack.c.l.b16 %v1103_v17  ;;  %v1422_v7 = vunpack.c.l.b16 %v1102_v30  ;;  %v6197_v33 = vpop.f32.mrf.mxu3  ;;  %v5020_v30 = vunpack.i.h.bf16 %v5018_v52 }
 0x28b   :  { %v1725_v49 = vsel %vm1715_vm1, %v6197_v33, -inf }
 0x28c   :  { %v1424_v42 = vpack.c.b16 %v1423_v32, %v1422_v7  ;;  %1726 = vmax.xlane.f32.xlu2 %v1725_v49  ;;  %1720 = vmax.xlane.f32.xlu1 %v1719_v56  ;;  %v1509_v32 = vpack.c.b16 %v1508_v13, %v1507_v46  ;;  %v999_v37 = vpack.c.bf16 %v5020_v30, %v5020_v30 }
 0x28d   :  { %v5023_v25 = vpop.permute.xlu1 %5022  ;;  %v1213_v56 = vpack.c.bf16 %v4995_v0, %v4995_v0 }
 0x28e   :  { %v5025_v50 = vunpack.i.h.bf16 %v5023_v25  ;;  %v5024_v51 = vunpack.i.l.bf16 %v5023_v25  ;;  %v1429_v54 = vsel %vm1244_vm0, %v1424_v42, 0  ;;  %v4989_v42 = vunpack.i.l.bf16 %v6183_v35  ;;  %v5033_v35 = vpop.permute.xlu2 %5032 }
 0x28f   :  { %1438 = vmatpush.bf16.xpose.msra.mxu0 %v1429_v54  ;;  %v1538_v49 = vunpack.c.l.b16 %v999_v37  ;;  %v2248_v4 = vunpack.c.l.b16 %v1213_v56  ;;  %v5035_v12 = vunpack.i.h.bf16 %v5033_v35  ;;  %v5034_v8 = vunpack.i.l.bf16 %v5033_v35 }
 0x290   :  { %v1119_v3 = vpack.c.bf16 %v5025_v50, %v5025_v50  ;;  %v1118_v5 = vpack.c.bf16 %v5024_v51, %v5024_v51  ;;  %v1537_v50 = vunpack.c.l.b16 %v998_v38  ;;  %v1005_v51 = vpack.c.bf16 %v4990_v34, %v4990_v34 }
 0x291   :  { %v1004_v54 = vpack.c.bf16 %v4989_v42, %v4989_v42  ;;  %v1214_v13 = vpack.c.bf16 %v5034_v8, %v5034_v8 }
 0x292   :  { %v1663_v1 = vunpack.c.l.b16 %v1119_v3  ;;  %v1662_v40 = vunpack.c.l.b16 %v1118_v5  ;;  %v6213_v10 = vpop.f32.mrf.mxu3  ;;  %v1539_v27 = vpack.c.b16 %v1538_v49, %v1537_v50  ;;  %v1628_v29 = vunpack.c.l.b16 %v1005_v51 }
 0x293   :  { %1723 = vmax.xlane.f32.xlu0 %v1722_v45  ;;  %v1728_v17 = vsel %vm1715_vm1, %v6213_v10, -inf  ;;  %v5029_v3 = vunpack.i.l.bf16 %v5028_v58  ;;  %v2275_v45 = vunpack.c.l.b16 %v1214_v13 }
 0x294   :  { %v1664_v19 = vpack.c.b16 %v1663_v1, %v1662_v40  ;;  %1729 = vmax.xlane.f32.xlu1 %v1728_v17  ;;  %v1007_v40 = vpack.c.bf16 %v5030_v43, %v5030_v43 }
 0x296   :  { %4477 = vmatmul.msk.bf16.vlgmr.msra.gmra.mxu0 %vm1244_vm0, %v1419_v11  ;;  %v1669_v61 = vsel %vm1244_vm0, %v1664_v19, 0  ;;  %4480 = vmatmul.msk.bf16.vlgmr.msrb.gmra.mxu3 %vm1244_vm0, %v1509_v32  ;;  %v1006_v11 = vpack.c.bf16 %v5029_v3, %v5029_v3  ;;  %v1215_v19 = vpack.c.bf16 %v5035_v12, %v5035_v12  ;;  %v1658_v46 = vunpack.c.l.b16 %v1007_v40 }
 0x297   :  { %1558 = vmatpush.bf16.xpose.msrb.mxu0 %v1549_v16  ;;  %2149 = vmatpush.bf16.msrb.mxu3 %v2137_v22  ;;  %v1212_v16 = vpack.c.bf16 %v4994_v20, %v4994_v20  ;;  %v1627_v22 = vunpack.c.l.b16 %v1004_v54 }
 0x298   :  { %v1657_v52 = vunpack.c.l.b16 %v1006_v11 }
 0x299   :  { %v2247_v53 = vunpack.c.l.b16 %v1212_v16  ;;  %v1629_v5 = vpack.c.b16 %v1628_v29, %v1627_v22 }
 0x29a   :  { %v6222_v7 = vpop.f32.mrf.mxu3  ;;  %v1659_v17 = vpack.c.b16 %v1658_v46, %v1657_v52 }
 0x29b   :  { %v1731_v25 = vsel %vm1715_vm1, %v6222_v7, -inf  ;;  %v2249_v1 = vpack.c.b16 %v2248_v4, %v2247_v53 }
 0x29c   :  { %1732 = vmax.xlane.f32.xlu0 %v1731_v25 }
 0x29f   :  { %1678 = vmatpush.bf16.xpose.msra.mxu0 %v1669_v61  ;;  %v2276_v61 = vunpack.c.l.b16 %v1215_v19 }
 0x2a1   :  { %v2277_v26 = vpack.c.b16 %v2276_v61, %v2275_v45 }
 0x2a6   :  { %4481 = vmatmul.msk.bf16.vlgmr.msrb.gmra.mxu0 %vm1244_vm0, %v1539_v27  ;;  %4484 = vmatmul.msk.bf16.vlgmr.msra.gmra.mxu3 %vm1244_vm0, %v1629_v5 }
 0x2a7   :  { %2177 = vmatpush.bf16.msrb.mxu0 %v2165_v62  ;;  %2261 = vmatpush.bf16.msra.mxu3 %v2249_v1 }
 0x2b3   :  { %v5048_v60 = vpop.permute.xlu2 %5047 }
 0x2b4   :  { %v5050_v62 = vunpack.i.h.bf16 %v5048_v60  ;;  %v5049_v30 = vunpack.i.l.bf16 %v5048_v60 }
 0x2b6   :  { %4485 = vmatmul.msk.bf16.vlgmr.msra.gmra.mxu0 %vm1244_vm0, %v1659_v17  ;;  %v1113_v18 = vpack.c.bf16 %v5050_v62, %v5050_v62  ;;  %v1112_v32 = vpack.c.bf16 %v5049_v30, %v5049_v30  ;;  %v1209_v62 = vpack.c.bf16 %v6148_v31, %v6148_v31  ;;  %v1208_v30 = vpack.c.bf16 %v6151_v55, %v6151_v55 }
 0x2b7   :  { %2289 = vmatpush.bf16.msra.mxu0 %v2277_v26 }
 0x2b8   :  { %v1573_v42 = vunpack.c.l.b16 %v1113_v18  ;;  %v1572_v0 = vunpack.c.l.b16 %v1112_v32 }
 0x2ba   :  { %v1574_v56 = vpack.c.b16 %v1573_v42, %v1572_v0 }
 0x2bc   :  { %v1579_v43 = vsel %vm1244_vm0, %v1574_v56, 0 }
 0x2cb   :  { %v5038_v58 = vpop.permute.xlu0 %5037 }
 0x2cc   :  { %v5043_v37 = vpop.permute.xlu1 %5042  ;;  %v5040_v38 = vunpack.i.h.bf16 %v5038_v58  ;;  %v5039_v34 = vunpack.i.l.bf16 %v5038_v58  ;;  %v2192_v58 = vunpack.c.l.b16 %v1209_v62 }
 0x2cd   :  { %v5045_v20 = vunpack.i.h.bf16 %v5043_v37  ;;  %v5044_v25 = vunpack.i.l.bf16 %v5043_v37  ;;  %v2191_v37 = vunpack.c.l.b16 %v1208_v30 }
 0x2ce   :  { %v1105_v49 = vpack.c.bf16 %v5040_v38, %v5040_v38  ;;  %v1104_v50 = vpack.c.bf16 %v5039_v34, %v5039_v34 }
 0x2cf   :  { %v993_v16 = vpack.c.bf16 %v5045_v20, %v5045_v20  ;;  %v992_v27 = vpack.c.bf16 %v5044_v25, %v5044_v25  ;;  %v2193_v20 = vpack.c.b16 %v2192_v58, %v2191_v37 }
 0x2d0   :  { %v1453_v51 = vunpack.c.l.b16 %v1105_v49  ;;  %v1452_v54 = vunpack.c.l.b16 %v1104_v50 }
 0x2d1   :  { %v1448_v3 = vunpack.c.l.b16 %v993_v16  ;;  %v1447_v5 = vunpack.c.l.b16 %v992_v27 }
 0x2d2   :  { %v1454_v29 = vpack.c.b16 %v1453_v51, %v1452_v54 }
 0x2d3   :  { %v1449_v11 = vpack.c.b16 %v1448_v3, %v1447_v5  ;;  %v5053_v13 = vpop.permute.xlu0 %5052 }
 0x2d4   :  { %v5058_v22 = vpop.permute.xlu1 %5057  ;;  %v1459_v4 = vsel %vm1244_vm0, %v1454_v29, 0  ;;  %v5055_v52 = vunpack.i.h.bf16 %v5053_v13  ;;  %v5054_v61 = vunpack.i.l.bf16 %v5053_v13 }
 0x2d5   :  { %v5060_v53 = vunpack.i.h.bf16 %v5058_v22  ;;  %v5059_v35 = vunpack.i.l.bf16 %v5058_v22  ;;  %1468 = vmatpush.bf16.xpose.msrb.mxu1 %v1459_v4 }
 0x2d6   :  { %v1001_v26 = vpack.c.bf16 %v5055_v52, %v5055_v52  ;;  %v1000_v60 = vpack.c.bf16 %v5054_v61, %v5054_v61 }
 0x2d7   :  { %v1121_v12 = vpack.c.bf16 %v5060_v53, %v5060_v53  ;;  %v1120_v8 = vpack.c.bf16 %v5059_v35, %v5059_v35 }
 0x2d8   :  { %v1568_v18 = vunpack.c.l.b16 %v1001_v26  ;;  %v1567_v32 = vunpack.c.l.b16 %v1000_v60 }
 0x2d9   :  { %v1693_v1 = vunpack.c.l.b16 %v1121_v12  ;;  %v1692_v40 = vunpack.c.l.b16 %v1120_v8 }
 0x2da   :  { %v1569_v38 = vpack.c.b16 %v1568_v18, %v1567_v32 }
 0x2db   :  { %v1694_v19 = vpack.c.b16 %v1693_v1, %v1692_v40  ;;  %v5063_v42 = vpop.permute.xlu0 %5062 }
 0x2dc   :  { %4478 = vmatmul.msk.bf16.vlgmr.msrb.gmra.mxu1 %vm1244_vm0, %v1449_v11  ;;  %v5065_v31 = vunpack.i.h.bf16 %v5063_v42  ;;  %v5064_v25 = vunpack.i.l.bf16 %v5063_v42 }
 0x2dd   :  { %1588 = vmatpush.bf16.xpose.msra.mxu1 %v1579_v43  ;;  %v1699_v46 = vsel %vm1244_vm0, %v1694_v19, 0 }
 0x2de   :  { %v1009_v55 = vpack.c.bf16 %v5065_v31, %v5065_v31  ;;  %v1008_v50 = vpack.c.bf16 %v5064_v25, %v5064_v25 }
 0x2e0   :  { %v1688_v27 = vunpack.c.l.b16 %v1009_v55  ;;  %v1687_v29 = vunpack.c.l.b16 %v1008_v50 }
 0x2e2   :  { %v6243_v45 = vpop.f32.mrf.mxu2  ;;  %v1689_v53 = vpack.c.b16 %v1688_v27, %v1687_v29 }
 0x2e3   :  { %v1764_v17 = vsel %vm1715_vm1, %v6243_v45, -inf }
 0x2e4   :  { %1765 = vmax.xlane.f32.xlu0 %v1764_v17 }
 0x2e5   :  { %1708 = vmatpush.bf16.xpose.msrb.mxu1 %v1699_v46 }
 0x2e9   :  { %v6251_v34 = vpop.f32.mrf.mxu3 }
 0x2ea   :  { %v1734_v0 = vsel %vm1715_vm1, %v6251_v34, -inf  ;;  %v6256_v49 = vpop.f32.mrf.mxu2 }
 0x2eb   :  { %1735 = vmax.xlane.f32.xlu2 %v1734_v0  ;;  %v1767_v56 = vsel %vm1715_vm1, %v6256_v49, -inf }
 0x2ec   :  { %4482 = vmatmul.msk.bf16.vlgmr.msra.gmra.mxu1 %vm1244_vm0, %v1569_v38 }
 0x2ed   :  { %2205 = vmatpush.bf16.msra.mxu1 %v2193_v20 }
 0x2f1   :  { %v6258_v51 = vpop.f32.mrf.mxu3 }
 0x2f2   :  { %v1737_v54 = vsel %vm1715_vm1, %v6258_v51, -inf }
 0x2f3   :  { %1738 = vmax.xlane.f32.xlu1 %v1737_v54  ;;  %1768 = vmax.xlane.f32.xlu2 %v1767_v56  ;;  %v6279_v11 = vpop.f32.mrf.mxu2 }
 0x2f4   :  { %v1788_v32 = vsel %vm1715_vm1, %v6279_v11, -inf }
 0x2f5   :  { %v1718_v16 = vpop.xlane.xlu2 %1717 }
 0x2f6   :  { %v1812_v22 = vsub.f32 %v6191_v14, %v1718_v16 }
 0x2f8   :  { %v1844_v4 = vmul.f32 1.442695, %v1812_v22 }
 0x2f9   :  { %v6265_v35 = vpop.f32.mrf.mxu3 }
 0x2fa   :  { %5180 = vpow2.f32 %v1844_v4  ;;  %v1740_v43 = vsel %vm1715_vm1, %v6265_v35, -inf }
 0x2fb   :  { %1741 = vmax.xlane.f32.xlu1 %v1740_v43  ;;  %v6291_v30 = vpop.f32.mrf.mxu2 }
 0x2fc   :  { %4486 = vmatmul.msk.bf16.vlgmr.msrb.gmra.mxu1 %vm1244_vm0, %v1689_v53  ;;  %v1791_v18 = vsel %vm1715_vm1, %v6291_v30, -inf }
 0x2ff   :  { %v1721_v3 = vpop.xlane.xlu1 %1720  ;;  %v1727_v19 = vpop.xlane.xlu2 %1726 }
 0x300   :  { %v6270_v5 = vpop.eup %5180  ;;  %v1813_v12 = vsub.f32 %v6203_v39, %v1721_v3  ;;  %v1815_v46 = vsub.f32 %v6197_v33, %v1727_v19 }
 0x301   :  { %v1908_v8 = vsel %vm1715_vm1, %v6270_v5, 0.0  ;;  %v6275_v1 = vpop.f32.mrf.mxu3 }
 0x302   :  { %v1846_v14 = vmul.f32 1.442695, %v1813_v12  ;;  %v1743_v40 = vsel %vm1715_vm1, %v6275_v1, -inf  ;;  %v1850_v60 = vmul.f32 1.442695, %v1815_v46 }
 0x303   :  { %1909 = vadd.xlane.f32.xlu1 %v1908_v8  ;;  %1744 = vmax.xlane.f32.xlu0 %v1743_v40 }
 0x304   :  { %5182 = vpow2.f32 %v1846_v14 }
 0x305   :  { %5184 = vpow2.f32 %v1850_v60 }
 0x306   :  { %v1724_v13 = vpop.xlane.xlu0 %1723 }
 0x307   :  { %v1814_v39 = vsub.f32 %v6193_v63, %v1724_v13  ;;  %v1730_v3 = vpop.xlane.xlu1 %1729 }
 0x309   :  { %v6285_v61 = vpop.f32.mrf.mxu3  ;;  %v1848_v62 = vmul.f32 1.442695, %v1814_v39 }
 0x30a   :  { %v6282_v52 = vpop.eup %5182  ;;  %v1746_v17 = vsel %vm1715_vm1, %v6285_v61, -inf }
 0x30b   :  { %v1911_v26 = vsel %vm1715_vm1, %v6282_v52, 0.0  ;;  %1747 = vmax.xlane.f32.xlu2 %v1746_v17  ;;  %5186 = vpow2.f32 %v1848_v62  ;;  %v6301_v58 = vpop.eup %5184 }
 0x30c   :  { %1912 = vadd.xlane.f32.xlu0 %v1911_v26  ;;  %v1917_v0 = vsel %vm1715_vm1, %v6301_v58, 0.0 }
 0x30f   :  { %v1733_v56 = vpop.xlane.xlu0 %1732 }
 0x310   :  { %v1817_v16 = vsub.f32 %v6222_v7, %v1733_v56  ;;  %v1816_v7 = vsub.f32 %v6213_v10, %v1730_v3 }
 0x311   :  { %v6293_v33 = vpop.f32.mrf.mxu3  ;;  %v6303_v37 = vpop.eup %5186 }
 0x312   :  { %v1749_v63 = vsel %vm1715_vm1, %v6293_v33, -inf  ;;  %v1914_v20 = vsel %vm1715_vm1, %v6303_v37, 0.0  ;;  %v1854_v29 = vmul.f32 1.442695, %v1817_v16  ;;  %v1852_v12 = vmul.f32 1.442695, %v1816_v7 }
 0x313   :  { %1750 = vmax.xlane.f32.xlu1 %v1749_v63  ;;  %1792 = vmax.xlane.f32.xlu2 %v1791_v18  ;;  %v6305_v38 = vpop.f32.mrf.mxu0 }
 0x314   :  { %1789 = vmax.xlane.f32.xlu0 %v1788_v32  ;;  %v1752_v31 = vsel %vm1715_vm1, %v6305_v38, -inf  ;;  %5188 = vpow2.f32 %v1854_v29 }
 0x315   :  { %5190 = vpow2.f32 %v1852_v12 }
 0x319   :  { %v6307_v42 = vpop.f32.mrf.mxu3 }
 0x31a   :  { %v1770_v50 = vsel %vm1715_vm1, %v6307_v42, -inf  ;;  %v6330_v53 = vpop.eup %5188 }
 0x31b   :  { %1918 = vadd.xlane.f32.xlu1 %v1917_v0  ;;  %1915 = vadd.xlane.f32.xlu2 %v1914_v20  ;;  %v6321_v54 = vpop.f32.mrf.mxu0  ;;  %v1923_v43 = vsel %vm1715_vm1, %v6330_v53, 0.0  ;;  %v6343_v13 = vpop.eup %5190 }
 0x31c   :  { %1753 = vmax.xlane.f32.xlu0 %v1752_v31  ;;  %v1755_v27 = vsel %vm1715_vm1, %v6321_v54, -inf  ;;  %v1920_v10 = vsel %vm1715_vm1, %v6343_v13, 0.0 }
 0x321   :  { %v6315_v25 = vpop.f32.mrf.mxu3 }
 0x322   :  { %v1773_v55 = vsel %vm1715_vm1, %v6315_v25, -inf }
 0x323   :  { %1774 = vmax.xlane.f32.xlu1 %v1773_v55  ;;  %1771 = vmax.xlane.f32.xlu2 %v1770_v50  ;;  %v6326_v22 = vpop.f32.mrf.mxu0 }
 0x324   :  { %v1776_v4 = vsel %vm1715_vm1, %v6326_v22, -inf }
 0x329   :  { %v6341_v19 = vpop.f32.mrf.mxu3 }
 0x32a   :  { %v1794_v20 = vsel %vm1715_vm1, %v6341_v19, -inf }
 0x32b   :  { %1756 = vmax.xlane.f32.xlu2 %v1755_v27  ;;  %v6339_v40 = vpop.f32.mrf.mxu0 }
 0x331   :  { %v6354_v63 = vpop.f32.mrf.mxu3 }
 0x332   :  { %v1797_v31 = vsel %vm1715_vm1, %v6354_v63, -inf }
 0x333   :  { %1777 = vmax.xlane.f32.xlu2 %v1776_v4  ;;  %v6352_v62 = vpop.f32.mrf.mxu0 }
 0x33b   :  { %1924 = vadd.xlane.f32.xlu2 %v1923_v43  ;;  %v6369_v29 = vpop.f32.mrf.mxu0  ;;  %v1779_v43 = vsel %vm1715_vm1, %v6339_v40, -inf }
 0x33c   :  { %v1803_v7 = vsel %vm1715_vm1, %v6369_v29, -inf }
 0x357   :  { %v1766_v18 = vpop.xlane.xlu0 %1765 }
 0x359   :  { %v6335_v8 = vpop.f32.mrf.mxu1 }
 0x35a   :  { %v1758_v14 = vsel %vm1715_vm1, %v6335_v8, -inf }
 0x35b   :  { %1759 = vmax.xlane.f32.xlu1 %v1758_v14 }
 0x35e   :  { %v1736_v46 = vpop.xlane.xlu2 %1735 }
 0x35f   :  { %v1818_v39 = vsub.f32 %v6251_v34, %v1736_v46  ;;  %v1828_v34 = vsub.f32 %v6243_v45, %v1766_v18 }
 0x361   :  { %v6346_v17 = vpop.f32.mrf.mxu1  ;;  %v1856_v60 = vmul.f32 1.442695, %v1818_v39  ;;  %v1876_v50 = vmul.f32 1.442695, %v1828_v34 }
 0x362   :  { %v1761_v26 = vsel %vm1715_vm1, %v6346_v17, -inf }
 0x363   :  { %1921 = vadd.xlane.f32.xlu1 %v1920_v10  ;;  %1762 = vmax.xlane.f32.xlu0 %v1761_v26  ;;  %5192 = vpow2.f32 %v1856_v60  ;;  %v1800_v60 = vsel %vm1715_vm1, %v6352_v62, -inf }
 0x364   :  { %5194 = vpow2.f32 %v1876_v50 }
 0x366   :  { %v1739_v32 = vpop.xlane.xlu1 %1738  ;;  %v1769_v56 = vpop.xlane.xlu2 %1768 }
 0x367   :  { %v1819_v45 = vsub.f32 %v6258_v51, %v1739_v32  ;;  %v1829_v4 = vsub.f32 %v6256_v49, %v1769_v56  ;;  %v4970_v56 = vunpack.i.h.bf16 %v6165_v59 }
 0x369   :  { %v6356_v0 = vpop.f32.mrf.mxu1  ;;  %v6365_v16 = vpop.eup %5192  ;;  %v1858_v12 = vmul.f32 1.442695, %v1819_v45  ;;  %v1878_v14 = vmul.f32 1.442695, %v1829_v4  ;;  %v4969_v4 = vunpack.i.l.bf16 %v6165_v59 }
 0x36a   :  { %v1782_v55 = vsel %vm1715_vm1, %v6356_v0, -inf  ;;  %v1926_v3 = vsel %vm1715_vm1, %v6365_v16, 0.0  ;;  %v6381_v49 = vpop.eup %5194 }
 0x36b   :  { %1795 = vmax.xlane.f32.xlu1 %v1794_v20  ;;  %1798 = vmax.xlane.f32.xlu0 %v1797_v31  ;;  %5196 = vpow2.f32 %v1858_v12  ;;  %v1956_v32 = vsel %vm1715_vm1, %v6381_v49, 0.0 }
 0x36c   :  { %1783 = vmax.xlane.f32.xlu2 %v1782_v55  ;;  %5198 = vpow2.f32 %v1878_v14 }
 0x36e   :  { %v6367_v27 = vpop.xlane.xlu1 %1741 }
 0x371   :  { %v6379_v46 = vpop.f32.mrf.mxu1  ;;  %v6390_v34 = vpop.eup %5196 }
 0x372   :  { %v1785_v18 = vsel %vm1715_vm1, %v6379_v46, -inf  ;;  %v6392_v20 = vpop.eup %5198 }
 0x373   :  { %1780 = vmax.xlane.f32.xlu1 %v1779_v43  ;;  %1927 = vadd.xlane.f32.xlu0 %v1926_v3  ;;  %v1959_v3 = vsel %vm1715_vm1, %v6392_v20, 0.0 }
 0x374   :  { %1804 = vmax.xlane.f32.xlu2 %v1803_v7  ;;  %v1929_v7 = vsel %vm1715_vm1, %v6390_v34, 0.0 }
 0x376   :  { %v1910_v51 = vpop.xlane.xlu1 %1909  ;;  %v1745_v39 = vpop.xlane.xlu0 %1744 }
 0x377   :  { %v1821_v10 = vsub.f32 %v6275_v1, %v1745_v39  ;;  %5200 = vrcp.f32 %v1910_v51  ;;  %v1219_v51 = vpack.c.bf16 %v4970_v56, %v4970_v56  ;;  %v1218_v39 = vpack.c.bf16 %v4969_v4, %v4969_v4 }
 0x379   :  { %v1862_v26 = vmul.f32 1.442695, %v1821_v10  ;;  %v6406_v14 = vpop.f32.mrf.mxu1  ;;  %v1820_v10 = vsub.f32 %v6265_v35, %v6367_v27  ;;  %v2331_v56 = vunpack.c.l.b16 %v1218_v39 }
 0x37a   :  { %v1806_v35 = vsel %vm1715_vm1, %v6406_v14, -inf }
 0x37b   :  { %1801 = vmax.xlane.f32.xlu1 %v1800_v60  ;;  %1786 = vmax.xlane.f32.xlu0 %v1785_v18  ;;  %5202 = vpow2.f32 %v1862_v26 }
 0x37c   :  { %1957 = vadd.xlane.f32.xlu2 %v1956_v32 }
 0x37d   :  { %v5201_v55 = vpop.eup %5200 }
 0x37e   :  { %v1748_v1 = vpop.xlane.xlu2 %1747  ;;  %v2036_v12 = vmul.f32 %v5201_v55, %v6270_v5 }
 0x37f   :  { %v1913_v31 = vpop.xlane.xlu0 %1912  ;;  %v1822_v50 = vsub.f32 %v6285_v61, %v1748_v1 }
 0x380   :  { %5204 = vrcp.f32 %v1913_v31  ;;  %v2068_v26 = vpack.c.bf16 %v2036_v12, %v2036_v12  ;;  %v2332_v31 = vunpack.c.l.b16 %v1219_v51 }
 0x381   :  { %v6396_v45 = vpop.eup %5202  ;;  %v1864_v43 = vmul.f32 1.442695, %v1822_v50 }
 0x382   :  { %v1935_v61 = vsel %vm1715_vm1, %v6396_v45, 0.0  ;;  %v2102_v27 = vunpack.c.l.b16 %v2068_v26 }
 0x383   :  { %1960 = vadd.xlane.f32.xlu1 %v1959_v3  ;;  %1930 = vadd.xlane.f32.xlu0 %v1929_v7  ;;  %5206 = vpow2.f32 %v1864_v43  ;;  %v1860_v3 = vmul.f32 1.442695, %v1820_v10 }
 0x384   :  { %1936 = vadd.xlane.f32.xlu2 %v1935_v61  ;;  %v2333_v61 = vpack.c.b16 %v2332_v31, %v2331_v56 }
 0x386   :  { %v5205_v59 = vpop.eup %5204  ;;  %v1751_v18 = vpop.xlane.xlu1 %1750 }
 0x387   :  { %v2037_v60 = vmul.f32 %v5205_v59, %v6282_v52  ;;  %v1793_v5 = vpop.xlane.xlu2 %1792  ;;  %v1823_v32 = vsub.f32 %v6293_v33, %v1751_v18  ;;  %v1790_v1 = vpop.xlane.xlu0 %1789 }
 0x388   :  { %v1836_v50 = vsub.f32 %v6279_v11, %v1790_v1  ;;  %v6419_v11 = vpop.f32.mrf.mxu1  ;;  %v1837_v10 = vsub.f32 %v6291_v30, %v1793_v5  ;;  %v4999_v1 = vunpack.i.l.bf16 %v6199_v36 }
 0x389   :  { %v2069_v55 = vpack.c.bf16 %v2037_v60, %v2037_v60  ;;  %v6413_v43 = vpop.eup %5206  ;;  %v1866_v4 = vmul.f32 1.442695, %v1823_v32  ;;  %v1809_v18 = vsel %vm1715_vm1, %v6419_v11, -inf  ;;  %v5000_v32 = vunpack.i.h.bf16 %v6199_v36 }
 0x38a   :  { %v1892_v52 = vmul.f32 1.442695, %v1836_v50  ;;  %v1938_v33 = vsel %vm1715_vm1, %v6413_v43, 0.0  ;;  %v1220_v36 = vpack.c.bf16 %v4999_v1, %v4999_v1 }
 0x38b   :  { %v2103_v7 = vunpack.c.l.b16 %v2069_v55  ;;  %1807 = vmax.xlane.f32.xlu0 %v1806_v35  ;;  %5208 = vpow2.f32 %v1866_v4  ;;  %v1221_v4 = vpack.c.bf16 %v5000_v32, %v5000_v32 }
 0x38c   :  { %1939 = vadd.xlane.f32.xlu2 %v1938_v33  ;;  %5210 = vpow2.f32 %v1892_v52 }
 0x38d   :  { %v2104_v12 = vpack.c.b16 %v2103_v7, %v2102_v27  ;;  %5212 = vpow2.f32 %v1860_v3 }
 0x38e   :  { %v1919_v51 = vpop.xlane.xlu1 %1918 }
 0x38f   :  { %v1916_v59 = vpop.xlane.xlu2 %1915  ;;  %4487 = vmatmul.msk.bf16.vlgmr.msrb.gmra.mxu2 %vm1715_vm1, %v2104_v12  ;;  %5214 = vrcp.f32 %v1919_v51  ;;  %v1754_v39 = vpop.xlane.xlu0 %1753 }
 0x390   :  { %2345 = vmatpush.bf16.msrb.mxu2 %v2333_v61  ;;  %5216 = vrcp.f32 %v1916_v59  ;;  %v1824_v26 = vsub.f32 %v6305_v38, %v1754_v39  ;;  %v1894_v38 = vmul.f32 1.442695, %v1837_v10  ;;  %v2360_v59 = vunpack.c.l.b16 %v1221_v4 }
 0x391   :  { %v6424_v60 = vpop.eup %5208  ;;  %v2359_v39 = vunpack.c.l.b16 %v1220_v36 }
 0x392   :  { %v1868_v31 = vmul.f32 1.442695, %v1824_v26  ;;  %v1941_v55 = vsel %vm1715_vm1, %v6424_v60, 0.0  ;;  %v6432_v50 = vpop.eup %5210 }
 0x393   :  { %1810 = vmax.xlane.f32.xlu0 %v1809_v18  ;;  %1942 = vadd.xlane.f32.xlu1 %v1941_v55  ;;  %v6434_v30 = vpop.eup %5212  ;;  %v1980_v5 = vsel %vm1715_vm1, %v6432_v50, 0.0 }
 0x394   :  { %5218 = vpow2.f32 %v1868_v31  ;;  %1981 = vadd.xlane.f32.xlu2 %v1980_v5  ;;  %v1932_v61 = vsel %vm1715_vm1, %v6434_v30, 0.0 }
 0x395   :  { %v5215_v56 = vpop.eup %5214  ;;  %5220 = vpow2.f32 %v1894_v38 }
 0x396   :  { %v5217_v3 = vpop.eup %5216  ;;  %v2039_v35 = vmul.f32 %v5215_v56, %v6301_v58  ;;  %v1775_v36 = vpop.xlane.xlu1 %1774 }
 0x397   :  { %v1772_v27 = vpop.xlane.xlu2 %1771  ;;  %v2038_v7 = vmul.f32 %v5217_v3, %v6303_v37 }
 0x398   :  { %v2071_v52 = vpack.c.bf16 %v2039_v35, %v2039_v35  ;;  %v1830_v33 = vsub.f32 %v6307_v42, %v1772_v27  ;;  %v2361_v42 = vpack.c.b16 %v2360_v59, %v2359_v39  ;;  %v1831_v35 = vsub.f32 %v6315_v25, %v1775_v36 }
 0x399   :  { %v2070_v12 = vpack.c.bf16 %v2038_v7, %v2038_v7 }
 0x39a   :  { %v6443_v51 = vpop.eup %5218  ;;  %v2131_v10 = vunpack.c.l.b16 %v2071_v52  ;;  %v1880_v18 = vmul.f32 1.442695, %v1830_v33  ;;  %v1882_v52 = vmul.f32 1.442695, %v1831_v35 }
 0x39b   :  { %1933 = vadd.xlane.f32.xlu0 %v1932_v61  ;;  %v2130_v26 = vunpack.c.l.b16 %v2070_v12  ;;  %v1944_v58 = vsel %vm1715_vm1, %v6443_v51, 0.0  ;;  %v6447_v32 = vpop.eup %5220 }
 0x39c   :  { %1945 = vadd.xlane.f32.xlu1 %v1944_v58  ;;  %5222 = vpow2.f32 %v1880_v18  ;;  %v1983_v38 = vsel %vm1715_vm1, %v6447_v32, 0.0 }
 0x39d   :  { %v2132_v37 = vpack.c.b16 %v2131_v10, %v2130_v26 }
 0x39f   :  { %v1757_v1 = vpop.xlane.xlu2 %1756  ;;  %4488 = vmatmul.msk.bf16.vlgmr.msrb.gmra.mxu3 %vm1715_vm1, %v2132_v37 }
 0x3a0   :  { %v1825_v31 = vsub.f32 %v6321_v54, %v1757_v1  ;;  %2373 = vmatpush.bf16.msrb.mxu3 %v2361_v42 }
 0x3a2   :  { %v1870_v55 = vmul.f32 1.442695, %v1825_v31  ;;  %v6453_v5 = vpop.eup %5222 }
 0x3a3   :  { %1984 = vadd.xlane.f32.xlu0 %v1983_v38  ;;  %v1962_v3 = vsel %vm1715_vm1, %v6453_v5, 0.0 }
 0x3a4   :  { %5224 = vpow2.f32 %v1870_v55 }
 0x3a7   :  { %v1778_v54 = vpop.xlane.xlu2 %1777 }
 0x3a8   :  { %v1832_v33 = vsub.f32 %v6326_v22, %v1778_v54 }
 0x3aa   :  { %v6455_v56 = vpop.eup %5224  ;;  %v1884_v39 = vmul.f32 1.442695, %v1832_v33 }
 0x3ab   :  { %v1947_v4 = vsel %vm1715_vm1, %v6455_v56, 0.0  ;;  %1963 = vadd.xlane.f32.xlu0 %v1962_v3 }
 0x3ac   :  { %1948 = vadd.xlane.f32.xlu2 %v1947_v4 }
 0x3af   :  { %v1925_v27 = vpop.xlane.xlu2 %1924 }
 0x3b0   :  { %5226 = vrcp.f32 %v1925_v27 }
 0x3b1   :  { %5228 = vpow2.f32 %v1882_v52 }
 0x3b5   :  { %5072 = vrot.lane.b32.xlu1 %v6161_v41, %s5747_s4 }
 0x3b6   :  { %v5227_v59 = vpop.eup %5226 }
 0x3b7   :  { %v6473_v26 = vpop.eup %5228 }
 0x3b8   :  { %v1965_v31 = vsel %vm1715_vm1, %v6473_v26, 0.0 }
 0x3bf   :  { %5077 = vrot.lane.b32.xlu0 %v6110_v57, %s5737_s18 }
 0x3c4   :  { %5067 = vrot.lane.b32.xlu2 %v6088_v23, %s5748_s20  ;;  %v2041_v23 = vmul.f32 %v5227_v59, %v6330_v53 }
 0x3c6   :  { %v2073_v25 = vpack.c.bf16 %v2041_v23, %v2041_v23 }
 0x3c7   :  { %5082 = vrot.lane.b32.xlu0 %v6161_v41, %s5737_s18 }
 0x3ce   :  { %v1760_v7 = vpop.xlane.xlu1 %1759 }
 0x3cf   :  { %v1826_v10 = vsub.f32 %v6335_v8, %v1760_v7  ;;  %v2159_v8 = vunpack.c.l.b16 %v2073_v25 }
 0x3d1   :  { %v1872_v1 = vmul.f32 1.442695, %v1826_v10 }
 0x3d6   :  { %v1922_v12 = vpop.xlane.xlu1 %1921  ;;  %v1763_v61 = vpop.xlane.xlu0 %1762 }
 0x3d7   :  { %5230 = vrcp.f32 %v1922_v12 }
 0x3d8   :  { %5232 = vpow2.f32 %v1884_v39 }
 0x3d9   :  { %5234 = vpow2.f32 %v1872_v1 }
 0x3dd   :  { %v5231_v58 = vpop.eup %5230 }
 0x3de   :  { %v2040_v18 = vmul.f32 %v5231_v58, %v6343_v13  ;;  %v1796_v37 = vpop.xlane.xlu1 %1795  ;;  %v1799_v42 = vpop.xlane.xlu0 %1798 }
 0x3df   :  { %v1838_v22 = vsub.f32 %v6341_v19, %v1796_v37  ;;  %v1839_v55 = vsub.f32 %v6354_v63, %v1799_v42  ;;  %v1784_v53 = vpop.xlane.xlu2 %1783  ;;  %1966 = vadd.xlane.f32.xlu1 %v1965_v31  ;;  %v6481_v36 = vpop.eup %5232  ;;  %v1827_v63 = vsub.f32 %v6346_v17, %v1763_v61 }
 0x3e0   :  { %v2072_v38 = vpack.c.bf16 %v2040_v18, %v2040_v18  ;;  %v1834_v13 = vsub.f32 %v6356_v0, %v1784_v53  ;;  %v1968_v52 = vsel %vm1715_vm1, %v6481_v36, 0.0  ;;  %v6487_v12 = vpop.eup %5234 }
 0x3e1   :  { %v1898_v4 = vmul.f32 1.442695, %v1839_v55  ;;  %v1896_v54 = vmul.f32 1.442695, %v1838_v22  ;;  %v1874_v59 = vmul.f32 1.442695, %v1827_v63 }
 0x3e2   :  { %v2158_v3 = vunpack.c.l.b16 %v2072_v38  ;;  %v1888_v7 = vmul.f32 1.442695, %v1834_v13  ;;  %v1950_v23 = vsel %vm1715_vm1, %v6487_v12, 0.0 }
 0x3e3   :  { %5236 = vpow2.f32 %v1898_v4 }
 0x3e4   :  { %v2160_v35 = vpack.c.b16 %v2159_v8, %v2158_v3  ;;  %5238 = vpow2.f32 %v1896_v54 }
 0x3e5   :  { %5240 = vpow2.f32 %v1888_v7 }
 0x3e6   :  { %v1781_v19 = vpop.xlane.xlu1 %1780  ;;  %v1928_v27 = vpop.xlane.xlu0 %1927  ;;  %4489 = vmatmul.msk.bf16.vlgmr.msrb.gmra.mxu0 %vm1715_vm1, %v2160_v35  ;;  %5242 = vpow2.f32 %v1874_v59 }
 0x3e7   :  { %v1805_v33 = vpop.xlane.xlu2 %1804  ;;  %1969 = vadd.xlane.f32.xlu1 %v1968_v52  ;;  %v1833_v25 = vsub.f32 %v6339_v40, %v1781_v19  ;;  %5244 = vrcp.f32 %v1928_v27 }
 0x3e8   :  { %v1841_v0 = vsub.f32 %v6369_v29, %v1805_v33 }
 0x3e9   :  { %v6490_v39 = vpop.eup %5236  ;;  %v1886_v31 = vmul.f32 1.442695, %v1833_v25 }
 0x3ea   :  { %v6494_v10 = vpop.eup %5238  ;;  %v1902_v17 = vmul.f32 1.442695, %v1841_v0  ;;  %v1989_v29 = vsel %vm1715_vm1, %v6490_v39, 0.0 }
 0x3eb   :  { %v1986_v42 = vsel %vm1715_vm1, %v6494_v10, 0.0  ;;  %v6504_v1 = vpop.eup %5240 }
 0x3ec   :  { %5246 = vpow2.f32 %v1902_v17  ;;  %v1974_v40 = vsel %vm1715_vm1, %v6504_v1, 0.0 }
 0x3ed   :  { %1951 = vadd.xlane.f32.xlu2 %v1950_v23 }
 0x3ee   :  { %v1802_v61 = vpop.xlane.xlu1 %1801  ;;  %v1787_v58 = vpop.xlane.xlu0 %1786 }
 0x3ef   :  { %v1840_v18 = vsub.f32 %v6352_v62, %v1802_v61  ;;  %v6500_v37 = vpop.xlane.xlu2 %1957  ;;  %1990 = vadd.xlane.f32.xlu1 %v1989_v29  ;;  %v6508_v62 = vpop.eup %5242  ;;  %v1835_v38 = vsub.f32 %v6379_v46, %v1787_v58 }
 0x3f0   :  { %v5245_v53 = vpop.eup %5244  ;;  %v1953_v4 = vsel %vm1715_vm1, %v6508_v62, 0.0 }
 0x3f1   :  { %v1900_v22 = vmul.f32 1.442695, %v1840_v18  ;;  %1987 = vadd.xlane.f32.xlu0 %v1986_v42  ;;  %v2042_v35 = vmul.f32 %v5245_v53, %v6365_v16  ;;  %v1890_v19 = vmul.f32 1.442695, %v1835_v38 }
 0x3f2   :  { %v6511_v3 = vpop.eup %5246 }
 0x3f3   :  { %5248 = vpow2.f32 %v1900_v22  ;;  %v1995_v46 = vsel %vm1715_vm1, %v6511_v3, 0.0  ;;  %v2074_v52 = vpack.c.bf16 %v2042_v35, %v2042_v35 }
 0x3f4   :  { %5250 = vpow2.f32 %v1886_v31 }
 0x3f5   :  { %1975 = vadd.xlane.f32.xlu2 %v1974_v40  ;;  %v2186_v58 = vunpack.c.l.b16 %v2074_v52 }
 0x3f6   :  { %v1931_v55 = vpop.xlane.xlu0 %1930  ;;  %v1961_v33 = vpop.xlane.xlu1 %1960 }
 0x3f7   :  { %v1937_v8 = vpop.xlane.xlu2 %1936  ;;  %5252 = vrcp.f32 %v1931_v55 }
 0x3f8   :  { %5254 = vpow2.f32 %v1890_v19 }
 0x3f9   :  { %v6515_v54 = vpop.eup %5248  ;;  %1954 = vadd.xlane.f32.xlu0 %v1953_v4 }
 0x3fa   :  { %v1992_v13 = vsel %vm1715_vm1, %v6515_v54, 0.0  ;;  %v6522_v27 = vpop.eup %5250 }
 0x3fb   :  { %1993 = vadd.xlane.f32.xlu1 %v1992_v13  ;;  %v1971_v16 = vsel %vm1715_vm1, %v6522_v27, 0.0 }
 0x3fd   :  { %1996 = vadd.xlane.f32.xlu2 %v1995_v46  ;;  %v5253_v63 = vpop.eup %5252 }
 0x3fe   :  { %v1808_v7 = vpop.xlane.xlu0 %1807  ;;  %v2043_v0 = vmul.f32 %v5253_v63, %v6390_v34  ;;  %v6528_v18 = vpop.eup %5254  ;;  %v4974_v63 = vunpack.i.l.bf16 %v6175_v15 }
 0x3ff   :  { %v1842_v59 = vsub.f32 %v6406_v14, %v1808_v7  ;;  %v1940_v23 = vpop.xlane.xlu2 %1939  ;;  %v1977_v31 = vsel %vm1715_vm1, %v6528_v18, 0.0 }
 0x400   :  { %v2075_v17 = vpack.c.bf16 %v2043_v0, %v2043_v0  ;;  %5256 = vrcp.f32 %v1940_v23 }
 0x401   :  { %v1904_v61 = vmul.f32 1.442695, %v1842_v59  ;;  %1972 = vadd.xlane.f32.xlu0 %v1971_v16  ;;  %v1226_v16 = vpack.c.bf16 %v4974_v63, %v4974_v63 }
 0x402   :  { %v2187_v25 = vunpack.c.l.b16 %v2075_v17 }
 0x403   :  { %5258 = vpow2.f32 %v1904_v61 }
 0x404   :  { %v2188_v29 = vpack.c.b16 %v2187_v25, %v2186_v58 }
 0x406   :  { %v1811_v42 = vpop.xlane.xlu0 %1810  ;;  %v1943_v22 = vpop.xlane.xlu1 %1942  ;;  %4490 = vmatmul.msk.bf16.vlgmr.msra.gmra.mxu1 %vm1715_vm1, %v2188_v29 }
 0x407   :  { %v1843_v34 = vsub.f32 %v6419_v11, %v1811_v42  ;;  %v5257_v14 = vpop.eup %5256  ;;  %5260 = vrcp.f32 %v1943_v22  ;;  %v2443_v42 = vunpack.c.l.b16 %v1226_v16 }
 0x408   :  { %5262 = vrcp.f32 %v1937_v8  ;;  %v2046_v38 = vmul.f32 %v5257_v14, %v6413_v43  ;;  %v4975_v8 = vunpack.i.h.bf16 %v6175_v15  ;;  %v1982_v15 = vpop.xlane.xlu2 %1981 }
 0x409   :  { %v6534_v40 = vpop.eup %5258  ;;  %v1906_v55 = vmul.f32 1.442695, %v1843_v34  ;;  %1978 = vadd.xlane.f32.xlu0 %v1977_v31 }
 0x40a   :  { %v1998_v53 = vsel %vm1715_vm1, %v6534_v40, 0.0  ;;  %v2078_v35 = vpack.c.bf16 %v2046_v38, %v2046_v38  ;;  %v1227_v23 = vpack.c.bf16 %v4975_v8, %v4975_v8 }
 0x40b   :  { %5264 = vpow2.f32 %v1906_v55  ;;  %1999 = vadd.xlane.f32.xlu2 %v1998_v53 }
 0x40c   :  { %v2242_v0 = vunpack.c.l.b16 %v2078_v35  ;;  %v2444_v29 = vunpack.c.l.b16 %v1227_v23 }
 0x40d   :  { %v5261_v4 = vpop.eup %5260 }
 0x40e   :  { %v1934_v13 = vpop.xlane.xlu0 %1933  ;;  %v5263_v11 = vpop.eup %5262  ;;  %v2047_v19 = vmul.f32 %v5261_v4, %v6424_v60  ;;  %v2445_v31 = vpack.c.b16 %v2444_v29, %v2443_v42 }
 0x40f   :  { %5266 = vrcp.f32 %v1934_v13  ;;  %v2045_v52 = vmul.f32 %v5263_v11, %v6396_v45  ;;  %v1946_v25 = vpop.xlane.xlu1 %1945 }
 0x410   :  { %v2079_v7 = vpack.c.bf16 %v2047_v19, %v2047_v19  ;;  %5268 = vrcp.f32 %v1961_v33 }
 0x411   :  { %v6540_v46 = vpop.eup %5264  ;;  %v2077_v61 = vpack.c.bf16 %v2045_v52, %v2045_v52  ;;  %5270 = vrcp.f32 %v6500_v37 }
 0x412   :  { %v2001_v43 = vsel %vm1715_vm1, %v6540_v46, 0.0  ;;  %v2243_v59 = vunpack.c.l.b16 %v2079_v7  ;;  %5272 = vrcp.f32 %v1946_v25 }
 0x413   :  { %2002 = vadd.xlane.f32.xlu2 %v2001_v43  ;;  %v2215_v22 = vunpack.c.l.b16 %v2077_v61 }
 0x414   :  { %5087 = vrot.lane.b32.xlu1 %v6110_v57, %s5748_s20  ;;  %v2244_v17 = vpack.c.b16 %v2243_v59, %v2242_v0 }
 0x415   :  { %v5267_v60 = vpop.eup %5266 }
 0x416   :  { %v2044_v58 = vmul.f32 %v5267_v60, %v6434_v30  ;;  %4492 = vmatmul.msk.bf16.vlgmr.msra.gmra.mxu3 %vm1715_vm1, %v2244_v17  ;;  %v5269_v14 = vpop.eup %5268  ;;  %v1985_v33 = vpop.xlane.xlu0 %1984 }
 0x417   :  { %v5271_v30 = vpop.eup %5270  ;;  %v2053_v38 = vmul.f32 %v5269_v14, %v6392_v20 }
 0x418   :  { %v2076_v45 = vpack.c.bf16 %v2044_v58, %v2044_v58  ;;  %v5273_v53 = vpop.eup %5272  ;;  %v2052_v37 = vmul.f32 %v5271_v30, %v6381_v49 }
 0x419   :  { %v2048_v4 = vmul.f32 %v5273_v53, %v6443_v51  ;;  %v2085_v13 = vpack.c.bf16 %v2053_v38, %v2053_v38 }
 0x41a   :  { %v2214_v57 = vunpack.c.l.b16 %v2076_v45  ;;  %v2084_v35 = vpack.c.bf16 %v2052_v37, %v2052_v37 }
 0x41b   :  { %v2080_v19 = vpack.c.bf16 %v2048_v4, %v2048_v4  ;;  %v2327_v63 = vunpack.c.l.b16 %v2085_v13 }
 0x41c   :  { %v2216_v34 = vpack.c.b16 %v2215_v22, %v2214_v57  ;;  %v2326_v49 = vunpack.c.l.b16 %v2084_v35 }
 0x41d   :  { %5092 = vrot.lane.b32.xlu0 %v6161_v41, %s5748_s20  ;;  %v2270_v16 = vunpack.c.l.b16 %v2080_v19 }
 0x41e   :  { %4491 = vmatmul.msk.bf16.vlgmr.msra.gmra.mxu2 %vm1715_vm1, %v2216_v34  ;;  %v1964_v20 = vpop.xlane.xlu0 %1963  ;;  %v2328_v25 = vpack.c.b16 %v2327_v63, %v2326_v49 }
 0x41f   :  { %v1949_v55 = vpop.xlane.xlu2 %1948  ;;  %2457 = vmatpush.bf16.msra.mxu2 %v2445_v31 }
 0x420   :  { %5274 = vrcp.f32 %v1949_v55 }
 0x421   :  { %5276 = vrcp.f32 %v1985_v33 }
 0x422   :  { %5278 = vrcp.f32 %v1982_v15 }
 0x423   :  { %5280 = vrcp.f32 %v1964_v20 }
 0x426   :  { %v5275_v11 = vpop.eup %5274 }
 0x427   :  { %v2049_v41 = vmul.f32 %v5275_v11, %v6455_v56  ;;  %v5068_v8 = vpop.permute.xlu2 %5067  ;;  %v5073_v43 = vpop.permute.xlu1 %5072 }
 0x428   :  { %v5070_v7 = vunpack.i.h.bf16 %v5068_v8  ;;  %v5069_v52 = vunpack.i.l.bf16 %v5068_v8  ;;  %v5075_v59 = vunpack.i.h.bf16 %v5073_v43  ;;  %v5074_v60 = vunpack.i.l.bf16 %v5073_v43  ;;  %v5277_v29 = vpop.eup %5276 }
 0x429   :  { %v2081_v0 = vpack.c.bf16 %v2049_v41, %v2049_v41  ;;  %v5279_v15 = vpop.eup %5278  ;;  %v2061_v31 = vmul.f32 %v5277_v29, %v6447_v32 }
 0x42a   :  { %v1229_v23 = vpack.c.bf16 %v5070_v7, %v5070_v7  ;;  %v1228_v51 = vpack.c.bf16 %v5069_v52, %v5069_v52  ;;  %v1217_v61 = vpack.c.bf16 %v5075_v59, %v5075_v59  ;;  %v1216_v58 = vpack.c.bf16 %v5074_v60, %v5074_v60 }
 0x42b   :  { %v2271_v17 = vunpack.c.l.b16 %v2081_v0  ;;  %v2060_v33 = vmul.f32 %v5279_v15, %v6432_v50  ;;  %v2093_v38 = vpack.c.bf16 %v2061_v31, %v2061_v31 }
 0x42c   :  { %v2472_v45 = vunpack.c.l.b16 %v1229_v23  ;;  %v2471_v56 = vunpack.c.l.b16 %v1228_v51  ;;  %v2304_v22 = vunpack.c.l.b16 %v1217_v61  ;;  %v2303_v57 = vunpack.c.l.b16 %v1216_v58  ;;  %v5281_v23 = vpop.eup %5280 }
 0x42d   :  { %v2272_v42 = vpack.c.b16 %v2271_v17, %v2270_v16  ;;  %v2092_v13 = vpack.c.bf16 %v2060_v33, %v2060_v33  ;;  %v2439_v19 = vunpack.c.l.b16 %v2093_v38  ;;  %v2054_v51 = vmul.f32 %v5281_v23, %v6453_v5 }
 0x42e   :  { %v2473_v34 = vpack.c.b16 %v2472_v45, %v2471_v56  ;;  %4495 = vmatmul.msk.bf16.vlgmr.msrb.gmra.mxu2 %vm1715_vm1, %v2328_v25  ;;  %v2305_v14 = vpack.c.b16 %v2304_v22, %v2303_v57 }
 0x42f   :  { %4493 = vmatmul.msk.bf16.vlgmr.msra.gmra.mxu0 %vm1715_vm1, %v2272_v42  ;;  %v2438_v63 = vunpack.c.l.b16 %v2092_v13  ;;  %v2086_v17 = vpack.c.bf16 %v2054_v51, %v2054_v51 }
 0x430   :  { %2485 = vmatpush.bf16.msra.mxu3 %v2473_v34  ;;  %2317 = vmatpush.bf16.msrb.mxu1 %v2305_v14 }
 0x431   :  { %v5078_v30 = vpop.permute.xlu0 %5077  ;;  %v2440_v32 = vpack.c.b16 %v2439_v19, %v2438_v63  ;;  %v2354_v45 = vunpack.c.l.b16 %v2086_v17 }
 0x432   :  { %v5080_v55 = vunpack.i.h.bf16 %v5078_v30  ;;  %v5079_v53 = vunpack.i.l.bf16 %v5078_v30 }
 0x434   :  { %v1223_v37 = vpack.c.bf16 %v5080_v55, %v5080_v55  ;;  %v1222_v4 = vpack.c.bf16 %v5079_v53, %v5079_v53 }
 0x436   :  { %v2388_v11 = vunpack.c.l.b16 %v1223_v37  ;;  %v2387_v35 = vunpack.c.l.b16 %v1222_v4 }
 0x438   :  { %v2389_v41 = vpack.c.b16 %v2388_v11, %v2387_v35 }
 0x439   :  { %v5083_v8 = vpop.permute.xlu0 %5082 }
 0x43a   :  { %v5085_v7 = vunpack.i.h.bf16 %v5083_v8  ;;  %v5084_v52 = vunpack.i.l.bf16 %v5083_v8  ;;  %2401 = vmatpush.bf16.msrb.mxu0 %v2389_v41 }
 0x43c   :  { %v1225_v43 = vpack.c.bf16 %v5085_v7, %v5085_v7  ;;  %v1224_v0 = vpack.c.bf16 %v5084_v52, %v5084_v52 }
 0x43e   :  { %v2416_v59 = vunpack.c.l.b16 %v1225_v43  ;;  %v2415_v50 = vunpack.c.l.b16 %v1224_v0  ;;  %4499 = vmatmul.msk.bf16.vlgmr.msra.gmra.mxu2 %vm1715_vm1, %v2440_v32 }
 0x440   :  { %v2417_v60 = vpack.c.b16 %v2416_v59, %v2415_v50 }
 0x442   :  { %2429 = vmatpush.bf16.msra.mxu1 %v2417_v60 }
 0x452   :  { %v1967_v49 = vpop.xlane.xlu1 %1966 }
 0x453   :  { %5282 = vrcp.f32 %v1967_v49 }
 0x459   :  { %v5283_v16 = vpop.eup %5282 }
 0x45a   :  { %v2055_v61 = vmul.f32 %v5283_v16, %v6473_v26  ;;  %v1970_v58 = vpop.xlane.xlu1 %1969 }
 0x45c   :  { %v2087_v25 = vpack.c.bf16 %v2055_v61, %v2055_v61 }
 0x45e   :  { %v2355_v56 = vunpack.c.l.b16 %v2087_v25 }
 0x460   :  { %v2356_v29 = vpack.c.b16 %v2355_v56, %v2354_v45  ;;  %v1952_v42 = vpop.xlane.xlu2 %1951 }
 0x462   :  { %v1991_v22 = vpop.xlane.xlu1 %1990  ;;  %4496 = vmatmul.msk.bf16.vlgmr.msrb.gmra.mxu3 %vm1715_vm1, %v2356_v29 }
 0x463   :  { %5284 = vrcp.f32 %v1991_v22 }
 0x464   :  { %v1988_v20 = vpop.xlane.xlu0 %1987 }
 0x465   :  { %5286 = vrcp.f32 %v1988_v20 }
 0x466   :  { %5288 = vrcp.f32 %v1952_v42 }
 0x468   :  { %v1976_v26 = vpop.xlane.xlu2 %1975 }
 0x469   :  { %v5285_v57 = vpop.eup %5284 }
 0x46a   :  { %v2063_v5 = vmul.f32 %v5285_v57, %v6490_v39 }
 0x46b   :  { %v5287_v34 = vpop.eup %5286 }
 0x46c   :  { %v2062_v15 = vmul.f32 %v5287_v34, %v6494_v10  ;;  %v1955_v14 = vpop.xlane.xlu0 %1954  ;;  %v5289_v31 = vpop.eup %5288  ;;  %v2095_v30 = vpack.c.bf16 %v2063_v5, %v2063_v5 }
 0x46d   :  { %5290 = vrcp.f32 %v1955_v14  ;;  %v2050_v55 = vmul.f32 %v5289_v31, %v6487_v12 }
 0x46e   :  { %v2094_v33 = vpack.c.bf16 %v2062_v15, %v2062_v15  ;;  %5292 = vrcp.f32 %v1970_v58  ;;  %v2467_v53 = vunpack.c.l.b16 %v2095_v30  ;;  %v1994_v12 = vpop.xlane.xlu1 %1993 }
 0x46f   :  { %v2082_v13 = vpack.c.bf16 %v2050_v55, %v2050_v55 }
 0x470   :  { %v2466_v38 = vunpack.c.l.b16 %v2094_v33  ;;  %v1997_v19 = vpop.xlane.xlu2 %1996 }
 0x471   :  { %v2298_v8 = vunpack.c.l.b16 %v2082_v13 }
 0x472   :  { %v2468_v37 = vpack.c.b16 %v2467_v53, %v2466_v38  ;;  %v6582_v53 = vpop.f32.mrf.mxu2 }
 0x473   :  { %v5291_v4 = vpop.eup %5290 }
 0x474   :  { %v2051_v11 = vmul.f32 %v5291_v4, %v6508_v62  ;;  %v1973_v35 = vpop.xlane.xlu0 %1972  ;;  %4500 = vmatmul.msk.bf16.vlgmr.msra.gmra.mxu3 %vm1715_vm1, %v2468_v37  ;;  %v5293_v39 = vpop.eup %5292 }
 0x475   :  { %5294 = vrcp.f32 %v1973_v35  ;;  %v2056_v41 = vmul.f32 %v5293_v39, %v6481_v36 }
 0x476   :  { %v2083_v10 = vpack.c.bf16 %v2051_v11, %v2051_v11  ;;  %5296 = vrcp.f32 %v1976_v26 }
 0x477   :  { %5298 = vrcp.f32 %v1994_v12  ;;  %v2088_v32 = vpack.c.bf16 %v2056_v41, %v2056_v41 }
 0x478   :  { %v2299_v63 = vunpack.c.l.b16 %v2083_v10  ;;  %5300 = vrcp.f32 %v1997_v19 }
 0x479   :  { %v2382_v60 = vunpack.c.l.b16 %v2088_v32 }
 0x47a   :  { %v2300_v7 = vpack.c.b16 %v2299_v63, %v2298_v8 }
 0x47b   :  { %v5295_v52 = vpop.eup %5294 }
 0x47c   :  { %v2057_v62 = vmul.f32 %v5295_v52, %v6522_v27  ;;  %v1979_v43 = vpop.xlane.xlu0 %1978  ;;  %4494 = vmatmul.msk.bf16.vlgmr.msrb.gmra.mxu1 %vm1715_vm1, %v2300_v7  ;;  %v5297_v0 = vpop.eup %5296 }
 0x47d   :  { %5302 = vrcp.f32 %v1979_v43  ;;  %v2058_v36 = vmul.f32 %v5297_v0, %v6504_v1  ;;  %v5299_v23 = vpop.eup %5298  ;;  %v6586_v7 = vpop.f32.mrf.mxu2 }
 0x47e   :  { %v2089_v59 = vpack.c.bf16 %v2057_v62, %v2057_v62  ;;  %v2000_v50 = vpop.xlane.xlu2 %1999  ;;  %v5301_v51 = vpop.eup %5300  ;;  %v2064_v27 = vmul.f32 %v5299_v23, %v6515_v54 }
 0x47f   :  { %v2090_v61 = vpack.c.bf16 %v2058_v36, %v2058_v36  ;;  %v2065_v25 = vmul.f32 %v5301_v51, %v6511_v3  ;;  %5304 = vrcp.f32 %v2000_v50  ;;  %v6588_v52 = vpop.f32.mrf.mxu0  ;;  %v6591_v62 = vpop.f32.mrf.mxu3 }
 0x480   :  { %v2383_v49 = vunpack.c.l.b16 %v2089_v59  ;;  %v2096_v5 = vpack.c.bf16 %v2064_v27, %v2064_v27 }
 0x481   :  { %v2410_v22 = vunpack.c.l.b16 %v2090_v61  ;;  %v2097_v15 = vpack.c.bf16 %v2065_v25, %v2065_v25 }
 0x482   :  { %v2384_v16 = vpack.c.b16 %v2383_v49, %v2382_v60  ;;  %v2494_v30 = vunpack.c.l.b16 %v2096_v5 }
 0x483   :  { %v5303_v17 = vpop.eup %5302  ;;  %v2495_v33 = vunpack.c.l.b16 %v2097_v15 }
 0x484   :  { %v2059_v58 = vmul.f32 %v5303_v17, %v6528_v18  ;;  %4497 = vmatmul.msk.bf16.vlgmr.msrb.gmra.mxu0 %vm1715_vm1, %v2384_v16 }
 0x485   :  { %v5305_v31 = vpop.eup %5304  ;;  %v2496_v11 = vpack.c.b16 %v2495_v33, %v2494_v30  ;;  %v4820_v33 = vld [vmem:[#allocation10 + $0x28] sm:$0xff] }
 0x486   :  { %v2091_v45 = vpack.c.bf16 %v2059_v58, %v2059_v58  ;;  %v5088_v56 = vpop.permute.xlu1 %5087  ;;  %v2003_v29 = vpop.xlane.xlu2 %2002  ;;  %v2066_v37 = vmul.f32 %v5305_v31, %v6534_v40  ;;  %v4821_v31 = vld [vmem:[#allocation10 + $0x30] sm:$0xff] }
 0x487   :  { %v5090_v42 = vunpack.i.h.bf16 %v5088_v56  ;;  %v5089_v1 = vunpack.i.l.bf16 %v5088_v56  ;;  %5306 = vrcp.f32 %v2003_v29  ;;  %v6593_v43 = vpop.f32.mrf.mxu0  ;;  %v6596_v60 = vpop.f32.mrf.mxu3 }
 0x488   :  { %v2411_v20 = vunpack.c.l.b16 %v2091_v45  ;;  %v2098_v19 = vpack.c.bf16 %v2066_v37, %v2066_v37  ;;  %v6602_v29 = vpop.f32.mrf.mxu1 }
 0x489   :  { %v1231_v57 = vpack.c.bf16 %v5090_v42, %v5090_v42  ;;  %v1230_v34 = vpack.c.bf16 %v5089_v1, %v5089_v1 }
 0x48a   :  { %v2412_v18 = vpack.c.b16 %v2411_v20, %v2410_v22 }
 0x48b   :  { %v2500_v26 = vunpack.c.l.b16 %v1231_v57  ;;  %v2499_v14 = vunpack.c.l.b16 %v1230_v34 }
 0x48c   :  { %4498 = vmatmul.msk.bf16.vlgmr.msra.gmra.mxu1 %vm1715_vm1, %v2412_v18 }
 0x48d   :  { %v5307_v3 = vpop.eup %5306  ;;  %v2501_v54 = vpack.c.b16 %v2500_v26, %v2499_v14  ;;  %v4822_v14 = vld [vmem:[#allocation10 + $0x38] sm:$0xff] }
 0x48e   :  { %v2067_v55 = vmul.f32 %v5307_v3, %v6540_v46  ;;  %v2522_v46 = vunpack.c.l.b16 %v2098_v19  ;;  %2742 = vmatpush.bf16.msrb.mxu2 %v4822_v14  ;;  %4887 = vmatpush.bf16.msrb.mxu3 %v4822_v14  ;;  %v4816_v19 = vld [vmem:[#allocation10 + $0x8] sm:$0xff] }
 0x48f   :  { %v5093_v38 = vpop.permute.xlu0 %5092  ;;  %2513 = vmatpush.bf16.msra.mxu0 %v2501_v54 }
 0x490   :  { %v5095_v4 = vunpack.i.h.bf16 %v5093_v38  ;;  %v5094_v13 = vunpack.i.l.bf16 %v5093_v38  ;;  %v2099_v35 = vpack.c.bf16 %v2067_v55, %v2067_v55  ;;  %v6604_v22 = vpop.f32.mrf.mxu1  ;;  %v4819_v38 = vld [vmem:[#allocation10 + $0x20] sm:$0xff] }
 0x492   :  { %v1233_v39 = vpack.c.bf16 %v5095_v4, %v5095_v4  ;;  %v1232_v10 = vpack.c.bf16 %v5094_v13, %v5094_v13  ;;  %v2523_v63 = vunpack.c.l.b16 %v2099_v35  ;;  %2743 = vmatpush.bf16.msrb.mxu2 %v4821_v31  ;;  %4888 = vmatpush.bf16.msrb.mxu3 %v4821_v31  ;;  %v4818_v13 = vld [vmem:[#allocation10 + $0x18] sm:$0xff]  ;;  %v4817_v35 = vld [vmem:[#allocation10 + $0x10] sm:$0xff] }
 0x494   :  { %v2528_v41 = vunpack.c.l.b16 %v1233_v39  ;;  %v2527_v8 = vunpack.c.l.b16 %v1232_v10  ;;  %4501 = vmatmul.msk.bf16.vlgmr.msra.gmra.mxu0 %vm1715_vm1, %v2496_v11  ;;  %v2524_v40 = vpack.c.b16 %v2523_v63, %v2522_v46  ;;  %v4815_v63 = vld [vmem:[#allocation10] sm:$0xff] }
 0x496   :  { %v2529_v12 = vpack.c.b16 %v2528_v41, %v2527_v8  ;;  %2744 = vmatpush.bf16.msrb.mxu2 %v4820_v33  ;;  %4889 = vmatpush.bf16.msrb.mxu3 %v4820_v33 }
 0x498   :  { %2541 = vmatpush.bf16.msrb.mxu1 %v2529_v12 }
 0x499   :  { %v2263_v23 = vpop.f32.mrf.mxu3 }
 0x49a   :  { %2745 = vmatpush.bf16.msrb.mxu2 %v4819_v38  ;;  %4890 = vmatpush.bf16.msrb.mxu3 %v4819_v38 }
 0x49c   :  { %4502 = vmatmul.msk.bf16.vlgmr.msrb.gmra.mxu1 %vm1715_vm1, %v2524_v40 }
 0x49e   :  { %2746 = vmatpush.bf16.msrb.mxu2 %v4818_v13  ;;  %4891 = vmatpush.bf16.msrb.mxu3 %v4818_v13 }
 0x4a1   :  { %v2235_v32 = vpop.f32.mrf.mxu2  ;;  %v2265_v61 = vpop.f32.mrf.mxu3 }
 0x4a2   :  { %v5111_v27 = vpack.i.bf16 %v2265_v61, %v2263_v23  ;;  %2747 = vmatpush.bf16.msrb.mxu2 %v4817_v35  ;;  %4892 = vmatpush.bf16.msrb.mxu3 %v4817_v35 }
 0x4a6   :  { %2748 = vmatpush.bf16.msrb.mxu2 %v4816_v19  ;;  %4893 = vmatpush.bf16.msrb.mxu3 %v4816_v19 }
 0x4a9   :  { %v2237_v0 = vpop.f32.mrf.mxu2 }
 0x4aa   :  { %v5096_v59 = vpack.i.bf16 %v2237_v0, %v2235_v32  ;;  %2749 = vmatpush.bf16.msrb.mxu2 %v4815_v63  ;;  %4894 = vmatpush.bf16.msrb.mxu3 %v4815_v63 }
 0x4ac   :  { %v2291_v50 = vpop.f32.mrf.mxu0  ;;  %5097 = vrot.lane.b32.xlu2 %v5096_v59, %s5748_s20 }
 0x4b1   :  { %v2347_v36 = vpop.f32.mrf.mxu2 }
 0x4b4   :  { %v2293_v49 = vpop.f32.mrf.mxu0 }
 0x4b5   :  { %v5126_v51 = vpack.i.bf16 %v2293_v49, %v2291_v50 }
 0x4b7   :  { %5127 = vrot.lane.b32.xlu2 %v5126_v51, %s5748_s20 }
 0x4b9   :  { %v2349_v16 = vpop.f32.mrf.mxu2 }
 0x4ba   :  { %v5101_v17 = vpack.i.bf16 %v2349_v16, %v2347_v36 }
 0x4bc   :  { %5102 = vrot.lane.b32.xlu0 %v5101_v17, %s5737_s18 }
 0x4c1   :  { %v2459_v58 = vpop.f32.mrf.mxu2 }
 0x4c4   :  { %5112 = vrot.lane.b32.xlu0 %v5111_v27, %s5748_s20 }
 0x4c9   :  { %v2461_v25 = vpop.f32.mrf.mxu2 }
 0x4ca   :  { %v5106_v45 = vpack.i.bf16 %v2461_v25, %v2459_v58 }
 0x4cc   :  { %5107 = vrot.lane.b32.xlu1 %v5106_v45, %s5747_s4 }
 0x4e5   :  { %v2375_v56 = vpop.f32.mrf.mxu3 }
 0x4ed   :  { %v2377_v42 = vpop.f32.mrf.mxu3 }
 0x4ee   :  { %v5116_v1 = vpack.i.bf16 %v2377_v42, %v2375_v56 }
 0x4f0   :  { %5117 = vrot.lane.b32.xlu1 %v5116_v1, %s5737_s18 }
 0x4f7   :  { %v2487_v20 = vpop.f32.mrf.mxu3 }
 0x4f9   :  { %v2319_v57 = vpop.f32.mrf.mxu1 }
 0x4ff   :  { %v2489_v34 = vpop.f32.mrf.mxu3 }
 0x500   :  { %v5121_v5 = vpack.i.bf16 %v2489_v34, %v2487_v20 }
 0x501   :  { %v2321_v15 = vpop.f32.mrf.mxu1  ;;  %v2403_v18 = vpop.f32.mrf.mxu0 }
 0x502   :  { %v5141_v26 = vpack.i.bf16 %v2321_v15, %v2319_v57  ;;  %5122 = vrot.lane.b32.xlu0 %v5121_v5, %s5747_s4 }
 0x504   :  { %5142 = vrot.lane.b32.xlu2 %v5141_v26, %s5748_s20 }
 0x506   :  { %v5098_v12 = vpop.permute.xlu2 %5097 }
 0x507   :  { %v5100_v40 = vunpack.i.h.bf16 %v5098_v12  ;;  %v5099_v32 = vunpack.i.l.bf16 %v5098_v12 }
 0x509   :  { %v2405_v3 = vpop.f32.mrf.mxu0  ;;  %v2431_v54 = vpop.f32.mrf.mxu1  ;;  %v2645_v36 = vsel %vm1244_vm0, %v6586_v7, %v5100_v40  ;;  %v2644_v49 = vsel %vm1244_vm0, %v6582_v53, %v5099_v32 }
 0x50a   :  { %v5131_v30 = vpack.i.bf16 %v2405_v3, %v2403_v18 }
 0x50c   :  { %5132 = vrot.lane.b32.xlu1 %v5131_v30, %s5737_s18 }
 0x511   :  { %v2433_v55 = vpop.f32.mrf.mxu1  ;;  %v2515_v4 = vpop.f32.mrf.mxu0 }
 0x512   :  { %v5146_v37 = vpack.i.bf16 %v2433_v55, %v2431_v54  ;;  %v5128_v3 = vpop.permute.xlu2 %5127 }
 0x513   :  { %v5130_v30 = vunpack.i.h.bf16 %v5128_v3  ;;  %v5129_v33 = vunpack.i.l.bf16 %v5128_v3 }
 0x514   :  { %5147 = vrot.lane.b32.xlu1 %v5146_v37, %s5737_s18 }
 0x515   :  { %v2648_v37 = vsel %vm1244_vm0, %v6588_v52, %v5129_v33 }
 0x519   :  { %v2543_v11 = vpop.f32.mrf.mxu1  ;;  %v2517_v39 = vpop.f32.mrf.mxu0 }
 0x51a   :  { %v5136_v10 = vpack.i.bf16 %v2517_v39, %v2515_v4 }
 0x51c   :  { %5137 = vrot.lane.b32.xlu0 %v5136_v10, %s5747_s4 }
 0x521   :  { %v2545_v41 = vpop.f32.mrf.mxu1 }
 0x522   :  { %v5151_v8 = vpack.i.bf16 %v2545_v41, %v2543_v11 }
 0x524   :  { %5152 = vrot.lane.b32.xlu0 %v5151_v8, %s5747_s4 }
 0x52e   :  { %v5103_v46 = vpop.permute.xlu0 %5102 }
 0x52f   :  { %v5105_v0 = vunpack.i.h.bf16 %v5103_v46  ;;  %v5104_v59 = vunpack.i.l.bf16 %v5103_v46 }
 0x531   :  { %v2653_v16 = vsel %vm2652_vm2, %v2644_v49, %v5104_v59  ;;  %v2654_v17 = vsel %vm2652_vm2, %v2645_v36, %v5105_v0 }
 0x536   :  { %v5113_v25 = vpop.permute.xlu0 %5112 }
 0x537   :  { %v5115_v56 = vunpack.i.h.bf16 %v5113_v25  ;;  %v5114_v42 = vunpack.i.l.bf16 %v5113_v25 }
 0x539   :  { %v2647_v53 = vsel %vm1244_vm0, %v6596_v60, %v5115_v56  ;;  %v2646_v57 = vsel %vm1244_vm0, %v6591_v62, %v5114_v42  ;;  %v2649_v62 = vsel %vm1244_vm0, %v6593_v43, %v5130_v30 }
 0x53e   :  { %v5108_v50 = vpop.permute.xlu1 %5107 }
 0x53f   :  { %v5110_v23 = vunpack.i.h.bf16 %v5108_v50  ;;  %v5109_v51 = vunpack.i.l.bf16 %v5108_v50 }
 0x541   :  { %v2662_v61 = vsel %vm2661_vm3, %v2653_v16, %v5109_v51  ;;  %v2663_v58 = vsel %vm2661_vm3, %v2654_v17, %v5110_v23  ;;  %v5158_v16 = vld [vmem:[#allocation11] ss:$0 sm:$0xff] }
 0x542   :  { %v2670_v27 = vpack.c.bf16 %v2663_v58, %v2662_v61 }
 0x544   :  { %2750 = vmatmul.bf16.vlgmr.msrb.gmra.mxu2 %v2670_v27 }
 0x55e   :  { %v5143_v41 = vpop.permute.xlu2 %5142 }
 0x55f   :  { %v5145_v12 = vunpack.i.h.bf16 %v5143_v41  ;;  %v5144_v43 = vunpack.i.l.bf16 %v5143_v41 }
 0x561   :  { %v2651_v0 = vsel %vm1244_vm0, %v6604_v22, %v5145_v12  ;;  %v2650_v59 = vsel %vm1244_vm0, %v6602_v29, %v5144_v43 }
 0x562   :  { %v5118_v45 = vpop.permute.xlu1 %5117 }
 0x563   :  { %v5120_v7 = vunpack.i.h.bf16 %v5118_v45  ;;  %v5119_v1 = vunpack.i.l.bf16 %v5118_v45 }
 0x565   :  { %v2655_v15 = vsel %vm2652_vm2, %v2646_v57, %v5119_v1  ;;  %v2656_v18 = vsel %vm2652_vm2, %v2647_v53, %v5120_v7 }
 0x574   :  { %v5123_v20 = vpop.permute.xlu0 %5122 }
 0x575   :  { %v5125_v34 = vunpack.i.h.bf16 %v5123_v20  ;;  %v5124_v5 = vunpack.i.l.bf16 %v5123_v20 }
 0x577   :  { %v2664_v26 = vsel %vm2661_vm3, %v2655_v15, %v5124_v5  ;;  %v2665_v14 = vsel %vm2661_vm3, %v2656_v18, %v5125_v34 }
 0x578   :  { %v2671_v31 = vpack.c.bf16 %v2665_v14, %v2664_v26 }
 0x57a   :  { %2755 = vmatmul.bf16.gmra.mxu2 %v2671_v31 }
 0x57e   :  { %v5133_v54 = vpop.permute.xlu1 %5132 }
 0x57f   :  { %v5135_v60 = vunpack.i.h.bf16 %v5133_v54  ;;  %v5134_v55 = vunpack.i.l.bf16 %v5133_v54 }
 0x581   :  { %v2657_v11 = vsel %vm2652_vm2, %v2648_v37, %v5134_v55  ;;  %v2658_v35 = vsel %vm2652_vm2, %v2649_v62, %v5135_v60 }
 0x586   :  { %v5148_v8 = vpop.permute.xlu1 %5147 }
 0x587   :  { %v5150_v46 = vunpack.i.h.bf16 %v5148_v8  ;;  %v5149_v40 = vunpack.i.l.bf16 %v5148_v8 }
 0x589   :  { %v2659_v50 = vsel %vm2652_vm2, %v2650_v59, %v5149_v40  ;;  %v2660_v36 = vsel %vm2652_vm2, %v2651_v0, %v5150_v46  ;;  %v4649_v40 = vld [vmem:[#allocation16 + $0xe0] sm:$0xf]  ;;  %v4651_v59 = vld [vmem:[#allocation16 + $0xf0] sm:$0xf0] }
 0x58e   :  { %v5138_v38 = vpop.permute.xlu0 %5137 }
 0x58f   :  { %v5140_v4 = vunpack.i.h.bf16 %v5138_v38  ;;  %v5139_v13 = vunpack.i.l.bf16 %v5138_v38 }
 0x591   :  { %v2667_v39 = vsel %vm2661_vm3, %v2658_v35, %v5140_v4  ;;  %v2666_v10 = vsel %vm2661_vm3, %v2657_v11, %v5139_v13 }
 0x592   :  { %v2672_v19 = vpack.c.bf16 %v2667_v39, %v2666_v10 }
 0x594   :  { %2760 = vmatmul.bf16.vlgmr.msrb.gmra.mxu3 %v2672_v19 }
 0x596   :  { %v5153_v63 = vpop.permute.xlu0 %5152 }
 0x597   :  { %v5155_v52 = vunpack.i.h.bf16 %v5153_v63  ;;  %v5154_v32 = vunpack.i.l.bf16 %v5153_v63 }
 0x599   :  { %v2668_v49 = vsel %vm2661_vm3, %v2659_v50, %v5154_v32  ;;  %v2669_v23 = vsel %vm2661_vm3, %v2660_v36, %v5155_v52  ;;  %v4853_v52 = vld [vmem:[#allocation16 + $0xec] sm:$0xf0]  ;;  %v4851_v32 = vld [vmem:[#allocation16 + $0xe4] sm:$0xf]  ;;  %v4657_v50 = vld [vmem:[#allocation16 + $0xe8] sm:$0xf] }
 0x59a   :  { %v2673_v51 = vpack.c.bf16 %v2669_v23, %v2668_v49  ;;  %v4650_v0 = vor.u32 %v4853_v52, %v4649_v40  ;;  %v4854_v36 = vld [vmem:[#allocation16 + $0xf4] sm:$0xf0]  ;;  %v4654_v49 = vor.u32 %v4851_v32, %v4651_v59  ;;  %v4585_v40 = vld [vmem:[#allocation16 + $0x60] sm:$0xf]  ;;  %v4837_v52 = vld [vmem:[#allocation16 + $0x6c] sm:$0xf0] }
 0x59b   :  { %v4658_v23 = vor.u32 %v4854_v36, %v4657_v50  ;;  %v4835_v32 = vld [vmem:[#allocation16 + $0x64] sm:$0xf]  ;;  %v4587_v59 = vld [vmem:[#allocation16 + $0x70] sm:$0xf0]  ;;  %v4593_v50 = vld [vmem:[#allocation16 + $0x68] sm:$0xf] }
 0x59c   :  { %3169 = vmatpush.bf16.msra.mxu3 %v4650_v0  ;;  %3198 = vmatpush.bf16.msrb.mxu0 %v4654_v49  ;;  %v4586_v0 = vor.u32 %v4837_v52, %v4585_v40  ;;  %v4838_v36 = vld [vmem:[#allocation16 + $0x74] sm:$0xf0]  ;;  %v4545_v40 = vld [vmem:[#allocation16 + $0x8] sm:$0xf] }
 0x59d   :  { %3227 = vmatpush.bf16.msra.mxu1 %v4658_v23  ;;  %v4590_v23 = vor.u32 %v4835_v32, %v4587_v59  ;;  %v4826_v52 = vld [vmem:[#allocation16 + $0x14] sm:$0xf0]  ;;  %v4824_v32 = vld [vmem:[#allocation16 + $0xc] sm:$0xf]  ;;  %v4547_v59 = vld [vmem:[#allocation16 + $0x18] sm:$0xf0] }
 0x5a4   :  { %2765 = vmatmul.bf16.gmra.mxu3 %v2673_v51  ;;  %v4852_v51 = vld [vmem:[#allocation16 + $0xec] sm:$0xf] }
 0x5c7   :  { %v2751_v17 = vpop.f32.mrf.mxu2 }
 0x5c8   :  { %v2752_v61 = vadd.f32 %v5158_v16, %v2751_v17 }
 0x5ca   :  { %v6646_v58 = vadd.f32 %v2752_v61, %v5889_v24  ;;  %v4633_v61 = vld [vmem:[#allocation16 + $0xc0] sm:$0xf] }
 0x5cc   :  { %2779 = vadd.xlane.f32.xlu2 %v6646_v58 }
 0x5cf   :  { %v2753_v22 = vpop.f32.mrf.mxu2 }
 0x5d0   :  { %v2754_v29 = vadd.f32 %v5158_v16, %v2753_v22  ;;  %v4849_v22 = vld [vmem:[#allocation16 + $0xcc] sm:$0xf0] }
 0x5d2   :  { %v6650_v27 = vadd.f32 %v2754_v29, %v5919_v21  ;;  %v4847_v29 = vld [vmem:[#allocation16 + $0xc4] sm:$0xf] }
 0x5d4   :  { %2781 = vadd.xlane.f32.xlu1 %v6650_v27 }
 0x5fd   :  { %v2756_v25 = vpop.f32.mrf.mxu2 }
 0x5fe   :  { %v2757_v45 = vadd.f32 %v5158_v16, %v2756_v25  ;;  %v4634_v25 = vor.u32 %v4849_v22, %v4633_v61 }
 0x600   :  { %v6654_v56 = vadd.f32 %v2757_v45, %v5879_v2  ;;  %v4635_v45 = vld [vmem:[#allocation16 + $0xd0] sm:$0xf0]  ;;  %3170 = vmatpush.bf16.msra.mxu3 %v4634_v25  ;;  %v4833_v25 = vld [vmem:[#allocation16 + $0x4c] sm:$0xf0] }
 0x602   :  { %2783 = vadd.xlane.f32.xlu0 %v6654_v56 }
 0x605   :  { %v2758_v42 = vpop.f32.mrf.mxu2 }
 0x606   :  { %v2759_v7 = vadd.f32 %v5158_v16, %v2758_v42  ;;  %v4641_v42 = vld [vmem:[#allocation16 + $0xc8] sm:$0xf] }
 0x608   :  { %v6658_v24 = vadd.f32 %v2759_v7, %v5909_v6  ;;  %v4850_v7 = vld [vmem:[#allocation16 + $0xd4] sm:$0xf0] }
 0x60a   :  { %2785 = vadd.xlane.f32.xlu2 %v6658_v24 }
 0x617   :  { %v2761_v1 = vpop.f32.mrf.mxu3 }
 0x618   :  { %v2762_v20 = vadd.f32 %v5158_v16, %v2761_v1  ;;  %v4638_v1 = vor.u32 %v4847_v29, %v4635_v45  ;;  %v4569_v29 = vld [vmem:[#allocation16 + $0x40] sm:$0xf]  ;;  %v4831_v45 = vld [vmem:[#allocation16 + $0x44] sm:$0xf] }
 0x61a   :  { %v6662_v21 = vadd.f32 %v2762_v20, %v5869_v44  ;;  %v4642_v20 = vor.u32 %v4850_v7, %v4641_v42  ;;  %3199 = vmatpush.bf16.msrb.mxu0 %v4638_v1  ;;  %v4570_v7 = vor.u32 %v4833_v25, %v4569_v29  ;;  %v4571_v1 = vld [vmem:[#allocation16 + $0x50] sm:$0xf0] }
 0x61c   :  { %2787 = vadd.xlane.f32.xlu1 %v6662_v21  ;;  %3228 = vmatpush.bf16.msra.mxu1 %v4642_v20  ;;  %v4577_v20 = vld [vmem:[#allocation16 + $0x48] sm:$0xf] }
 0x61f   :  { %v2763_v53 = vpop.f32.mrf.mxu3 }
 0x620   :  { %v2764_v57 = vadd.f32 %v5158_v16, %v2763_v53  ;;  %v4848_v53 = vld [vmem:[#allocation16 + $0xcc] sm:$0xf] }
 0x622   :  { %v6666_v2 = vadd.f32 %v2764_v57, %v5899_v47  ;;  %v4643_v57 = vld [vmem:[#allocation16 + $0xd8] sm:$0xf0] }
 0x624   :  { %2789 = vadd.xlane.f32.xlu2 %v6666_v2 }
 0x627   :  { %v2766_v34 = vpop.f32.mrf.mxu3 }
 0x628   :  { %v2767_v5 = vadd.f32 %v5158_v16, %v2766_v34  ;;  %v4646_v34 = vor.u32 %v4848_v53, %v4643_v57  ;;  %v4574_v53 = vor.u32 %v4831_v45, %v4571_v1  ;;  %v4834_v57 = vld [vmem:[#allocation16 + $0x54] sm:$0xf0] }
 0x62a   :  { %v6670_v6 = vadd.f32 %v2767_v5, %v5927_v28  ;;  %v4617_v5 = vld [vmem:[#allocation16 + $0xa0] sm:$0xf] }
 0x62c   :  { %2791 = vadd.xlane.f32.xlu2 %v6670_v6 }
 0x62f   :  { %v2768_v47 = vpop.f32.mrf.mxu3 }
 0x630   :  { %v2769_v31 = vadd.f32 %v5158_v16, %v2768_v47  ;;  %v4659_v16 = vld [vmem:[#allocation16 + $0xf8] sm:$0xf0]  ;;  %v4619_v47 = vld [vmem:[#allocation16 + $0xb0] sm:$0xf0] }
 0x631   :  { %v4662_v17 = vor.u32 %v4852_v51, %v4659_v16  ;;  %v4594_v51 = vor.u32 %v4838_v36, %v4593_v50  ;;  %v4836_v16 = vld [vmem:[#allocation16 + $0x6c] sm:$0xf] }
 0x632   :  { %v6684_v54 = vadd.f32 %v2769_v31, %v5950_v9  ;;  %v4846_v31 = vld [vmem:[#allocation16 + $0xb4] sm:$0xf0] }
 0x633   :  { %3256 = vmatpush.bf16.msra.mxu2 %v4662_v17  ;;  %v4595_v17 = vld [vmem:[#allocation16 + $0x78] sm:$0xf0] }
 0x634   :  { %v4598_v22 = vor.u32 %v4836_v16, %v4595_v17  ;;  %v4550_v16 = vor.u32 %v4824_v32, %v4547_v59 }
 0x637   :  { %3257 = vmatpush.bf16.msra.mxu2 %v4646_v34  ;;  %v4832_v34 = vld [vmem:[#allocation16 + $0x4c] sm:$0xf] }
 0x63f   :  { %v2780_v15 = vpop.xlane.xlu2 %2779 }
 0x640   :  { %v2795_v44 = vmul.f32 %v2780_v15, %v5932_v48  ;;  %v4845_v15 = vld [vmem:[#allocation16 + $0xac] sm:$0xf0] }
 0x642   :  { %v6675_v18 = vsub.f32 %v6646_v58, %v2795_v44  ;;  %v4843_v44 = vld [vmem:[#allocation16 + $0xa4] sm:$0xf] }
 0x644   :  { %v2811_v26 = vmul.f32 %v6675_v18, %v6675_v18 }
 0x646   :  { %2819 = vadd.xlane.f32.xlu0 %v2811_v26  ;;  %v4618_v26 = vor.u32 %v4845_v15, %v4617_v5  ;;  %v4579_v5 = vld [vmem:[#allocation16 + $0x58] sm:$0xf0]  ;;  %v4578_v15 = vor.u32 %v4834_v57, %v4577_v20 }
 0x647   :  { %v2782_v14 = vpop.xlane.xlu1 %2781 }
 0x648   :  { %v2796_v3 = vmul.f32 %v2782_v14, %v5932_v48  ;;  %v4625_v14 = vld [vmem:[#allocation16 + $0xa8] sm:$0xf]  ;;  %3171 = vmatpush.bf16.msra.mxu3 %v4618_v26  ;;  %v4553_v26 = vld [vmem:[#allocation16 + $0x20] sm:$0xf] }
 0x64a   :  { %v6681_v28 = vsub.f32 %v6650_v27, %v2796_v3  ;;  %v4622_v3 = vor.u32 %v4843_v44, %v4619_v47  ;;  %v4582_v44 = vor.u32 %v4832_v34, %v4579_v5  ;;  %v4829_v47 = vld [vmem:[#allocation16 + $0x2c] sm:$0xf0]  ;;  %v6732_v34 = vld [vmem:[#allocation13] ss:$0 sm:$0xff] }
 0x64c   :  { %v2812_v30 = vmul.f32 %v6681_v28, %v6681_v28  ;;  %3200 = vmatpush.bf16.msrb.mxu0 %v4622_v3  ;;  %v4555_v3 = vld [vmem:[#allocation16 + $0x30] sm:$0xf0] }
 0x64e   :  { %2821 = vadd.xlane.f32.xlu1 %v2812_v30  ;;  %2793 = vadd.xlane.f32.xlu0 %v6684_v54  ;;  %v4626_v30 = vor.u32 %v4846_v31, %v4625_v14  ;;  %v4827_v14 = vld [vmem:[#allocation16 + $0x24] sm:$0xf]  ;;  %v4554_v31 = vor.u32 %v4829_v47, %v4553_v26  ;;  %v6735_v26 = vld [vmem:[#allocation14] ss:$0 sm:$0xff] }
 0x650   :  { %3229 = vmatpush.bf16.msra.mxu1 %v4626_v30  ;;  %v4561_v30 = vld [vmem:[#allocation16 + $0x28] sm:$0xf] }
 0x675   :  { %v2784_v33 = vpop.xlane.xlu0 %2783 }
 0x676   :  { %v2797_v60 = vmul.f32 %v2784_v33, %v5932_v48  ;;  %v4844_v33 = vld [vmem:[#allocation16 + $0xac] sm:$0xf] }
 0x678   :  { %v6691_v55 = vsub.f32 %v6654_v56, %v2797_v60  ;;  %v4627_v60 = vld [vmem:[#allocation16 + $0xb8] sm:$0xf0] }
 0x67a   :  { %v2813_v38 = vmul.f32 %v6691_v55, %v6691_v55 }
 0x67c   :  { %2823 = vadd.xlane.f32.xlu1 %v2813_v38  ;;  %v4630_v38 = vor.u32 %v4844_v33, %v4627_v60  ;;  %v4830_v33 = vld [vmem:[#allocation16 + $0x34] sm:$0xf0]  ;;  %v4558_v60 = vor.u32 %v4827_v14, %v4555_v3 }
 0x67d   :  { %v2786_v62 = vpop.xlane.xlu2 %2785 }
 0x67e   :  { %v2798_v9 = vmul.f32 %v2786_v62, %v5932_v48  ;;  %v4601_v62 = vld [vmem:[#allocation16 + $0x80] sm:$0xf]  ;;  %3258 = vmatpush.bf16.msra.mxu2 %v4630_v38  ;;  %v4562_v38 = vor.u32 %v4830_v33, %v4561_v30 }
 0x680   :  { %v6697_v37 = vsub.f32 %v6658_v24, %v2798_v9  ;;  %v4841_v9 = vld [vmem:[#allocation16 + $0x8c] sm:$0xf0] }
 0x682   :  { %v2814_v4 = vmul.f32 %v6697_v37, %v6697_v37 }
 0x684   :  { %2825 = vadd.xlane.f32.xlu2 %v2814_v4  ;;  %v4839_v4 = vld [vmem:[#allocation16 + $0x84] sm:$0xf] }
 0x68f   :  { %v2788_v13 = vpop.xlane.xlu1 %2787 }
 0x690   :  { %v2799_v11 = vmul.f32 %v2788_v13, %v5932_v48  ;;  %v4602_v13 = vor.u32 %v4841_v9, %v4601_v62  ;;  %v4828_v62 = vld [vmem:[#allocation16 + $0x2c] sm:$0xf]  ;;  %v4563_v9 = vld [vmem:[#allocation16 + $0x38] sm:$0xf0] }
 0x692   :  { %v6703_v35 = vsub.f32 %v6662_v21, %v2799_v11  ;;  %v4603_v11 = vld [vmem:[#allocation16 + $0x90] sm:$0xf0]  ;;  %3172 = vmatpush.bf16.msra.mxu3 %v4602_v13 }
 0x694   :  { %v2815_v39 = vmul.f32 %v6703_v35, %v6703_v35 }
 0x696   :  { %2827 = vadd.xlane.f32.xlu0 %v2815_v39  ;;  %v4609_v39 = vld [vmem:[#allocation16 + $0x88] sm:$0xf]  ;;  %3173 = vmatpush.bf16.msra.mxu3 %v4586_v0 }
 0x697   :  { %v2790_v10 = vpop.xlane.xlu2 %2789 }
 0x698   :  { %v2800_v19 = vmul.f32 %v2790_v10, %v5932_v48  ;;  %v4842_v10 = vld [vmem:[#allocation16 + $0x94] sm:$0xf0] }
 0x69a   :  { %v6709_v41 = vsub.f32 %v6666_v2, %v2800_v19  ;;  %v4606_v19 = vor.u32 %v4839_v4, %v4603_v11  ;;  %3174 = vmatpush.bf16.msra.mxu3 %v4570_v7  ;;  %v4537_v4 = vld [vmem:[#allocation16] sm:$0xf] }
 0x69c   :  { %v2816_v8 = vmul.f32 %v6709_v41, %v6709_v41  ;;  %3201 = vmatpush.bf16.msrb.mxu0 %v4606_v19  ;;  %v4823_v19 = vld [vmem:[#allocation16 + $0x4] sm:$0xf] }
 0x69e   :  { %2829 = vadd.xlane.f32.xlu1 %v2816_v8  ;;  %v4610_v8 = vor.u32 %v4842_v10, %v4609_v39  ;;  %v4566_v39 = vor.u32 %v4828_v62, %v4563_v9  ;;  %v4825_v10 = vld [vmem:[#allocation16 + $0xc] sm:$0xf0]  ;;  %3175 = vmatpush.bf16.msra.mxu3 %v4554_v31 }
 0x69f   :  { %v2792_v63 = vpop.xlane.xlu2 %2791 }
 0x6a0   :  { %v2801_v12 = vmul.f32 %v2792_v63, %v5932_v48  ;;  %v4840_v63 = vld [vmem:[#allocation16 + $0x8c] sm:$0xf]  ;;  %3230 = vmatpush.bf16.msra.mxu1 %v4610_v8  ;;  %3202 = vmatpush.bf16.msrb.mxu0 %v4590_v23  ;;  %v4539_v8 = vld [vmem:[#allocation16 + $0x10] sm:$0xf0]  ;;  %v4546_v23 = vor.u32 %v4826_v52, %v4545_v40 }
 0x6a1   :  { %v4542_v0 = vor.u32 %v4823_v19, %v4539_v8 }
 0x6a2   :  { %v6715_v43 = vsub.f32 %v6670_v6, %v2801_v12  ;;  %v4611_v12 = vld [vmem:[#allocation16 + $0x98] sm:$0xf0] }
 0x6a4   :  { %v2817_v46 = vmul.f32 %v6715_v43, %v6715_v43  ;;  %3231 = vmatpush.bf16.msra.mxu1 %v4594_v51  ;;  %3203 = vmatpush.bf16.msrb.mxu0 %v4574_v53 }
 0x6a6   :  { %2831 = vadd.xlane.f32.xlu2 %v2817_v46  ;;  %v4614_v46 = vor.u32 %v4840_v63, %v4611_v12 }
 0x6a8   :  { %3259 = vmatpush.bf16.msra.mxu2 %v4614_v46  ;;  %3232 = vmatpush.bf16.msra.mxu1 %v4578_v15  ;;  %v4538_v46 = vor.u32 %v4825_v10, %v4537_v4 }
 0x6a9   :  { %3204 = vmatpush.bf16.msrb.mxu0 %v4558_v60 }
 0x6aa   :  { %3176 = vmatpush.bf16.msra.mxu3 %v4538_v46 }
 0x6ac   :  { %3260 = vmatpush.bf16.msra.mxu2 %v4598_v22  ;;  %3233 = vmatpush.bf16.msra.mxu1 %v4562_v38 }
 0x6ad   :  { %3205 = vmatpush.bf16.msrb.mxu0 %v4542_v0 }
 0x6b0   :  { %3261 = vmatpush.bf16.msra.mxu2 %v4582_v44  ;;  %3234 = vmatpush.bf16.msra.mxu1 %v4546_v23 }
 0x6b4   :  { %3262 = vmatpush.bf16.msra.mxu2 %v4566_v39 }
 0x6b8   :  { %3263 = vmatpush.bf16.msra.mxu2 %v4550_v16 }
 0x6b9   :  { %v2820_v49 = vpop.xlane.xlu0 %2819 }
 0x6ba   :  { %v2835_v61 = vmul.f32 %v2820_v49, %v5932_v48 }
 0x6bc   :  { %v6720_v42 = vadd.f32 1e-05, %v2835_v61 }
 0x6be   :  { %5308 = vrsqrt.f32 %v6720_v42  ;;  %vm2857_vm5 = vweird.f32 %v6720_v42 }
 0x6c1   :  { %v2822_v13 = vpop.xlane.xlu1 %2821  ;;  %v2794_v11 = vpop.xlane.xlu0 %2793 }
 0x6c2   :  { %v2836_v63 = vmul.f32 %v2822_v13, %v5932_v48  ;;  %v2802_v12 = vmul.f32 %v2794_v11, %v5932_v48 }
 0x6c4   :  { %v5309_v50 = vpop.eup %5308  ;;  %v2844_v36 = vadd.f32 1e-05, %v2836_v63  ;;  %v6726_v49 = vsub.f32 %v6684_v54, %v2802_v12 }
 0x6c5   :  { %v2852_v51 = vmul.f32 %v5309_v50, %v6720_v42  ;;  %vm2858_vm4 = vweird.f32 %v5309_v50 }
 0x6c6   :  { %5310 = vrsqrt.f32 %v2844_v36  ;;  %v2818_v17 = vmul.f32 %v6726_v49, %v6726_v49  ;;  %vm2859_vm6 = vmor %vm2857_vm5, %vm2858_vm4  ;;  %vm2867_vm8 = vweird.f32 %v2844_v36 }
 0x6c7   :  { %v2853_v61 = vmul.f32 %v5309_v50, %v2852_v51 }
 0x6c8   :  { %2833 = vadd.xlane.f32.xlu0 %v2818_v17 }
 0x6c9   :  { %v2854_v22 = vmul.f32 0.5, %v2853_v61 }
 0x6cb   :  { %v2855_v29 = vsub.f32 1.5, %v2854_v22 }
 0x6cc   :  { %v5311_v25 = vpop.eup %5310 }
 0x6cd   :  { %v2856_v45 = vmul.f32 %v5309_v50, %v2855_v29  ;;  %v2862_v7 = vmul.f32 %v5311_v25, %v2844_v36  ;;  %vm2868_vm7 = vweird.f32 %v5311_v25 }
 0x6ce   :  { %vm2869_vm9 = vmor %vm2867_vm8, %vm2868_vm7 }
 0x6cf   :  { %v2863_v1 = vmul.f32 %v5311_v25, %v2862_v7  ;;  %v2860_v20 = vsel %vm2859_vm6, %v5309_v50, %v2856_v45 }
 0x6d0   :  { %v2931_v5 = vmul.f32 %v2860_v20, %v6675_v18 }
 0x6d1   :  { %v2864_v53 = vmul.f32 0.5, %v2863_v1 }
 0x6d2   :  { %v2943_v47 = vmul.f32 %v6732_v34, %v2931_v5 }
 0x6d3   :  { %v2865_v57 = vsub.f32 1.5, %v2864_v53 }
 0x6d4   :  { %v2955_v31 = vadd.f32 %v6735_v26, %v2943_v47 }
 0x6d5   :  { %v2866_v15 = vmul.f32 %v5311_v25, %v2865_v57 }
 0x6d7   :  { %v2870_v44 = vsel %vm2869_vm9, %v5311_v25, %v2866_v15 }
 0x6d8   :  { %v2932_v42 = vmul.f32 %v2870_v44, %v6681_v28 }
 0x6da   :  { %v2944_v14 = vmul.f32 %v6732_v34, %v2932_v42 }
 0x6dc   :  { %v2956_v3 = vadd.f32 %v6735_v26, %v2944_v14 }
 0x6de   :  { %v2963_v30 = vpack.c.bf16 %v2956_v3, %v2955_v31 }
 0x6e0   :  { %3177 = vmatmul.bf16.vlgmr.msra.gmra.mxu3 %v2963_v30  ;;  %3206 = vmatmul.bf16.vlgmr.msrb.gmra.mxu0 %v2963_v30 }
 0x6e1   :  { %3235 = vmatmul.bf16.vlgmr.msra.gmra.mxu1 %v2963_v30  ;;  %3264 = vmatmul.bf16.vlgmr.msra.gmra.mxu2 %v2963_v30 }
 0x6ef   :  { %v2824_v18 = vpop.xlane.xlu1 %2823 }
 0x6f0   :  { %v2837_v33 = vmul.f32 %v2824_v18, %v5932_v48 }
 0x6f2   :  { %v2845_v60 = vadd.f32 1e-05, %v2837_v33 }
 0x6f4   :  { %5312 = vrsqrt.f32 %v2845_v60  ;;  %vm2877_vm11 = vweird.f32 %v2845_v60 }
 0x6f7   :  { %v2826_v38 = vpop.xlane.xlu2 %2825 }
 0x6f8   :  { %v2838_v62 = vmul.f32 %v2826_v38, %v5932_v48 }
 0x6fa   :  { %v5313_v28 = vpop.eup %5312  ;;  %v2846_v9 = vadd.f32 1e-05, %v2838_v62 }
 0x6fb   :  { %v2872_v4 = vmul.f32 %v5313_v28, %v2845_v60  ;;  %vm2878_vm10 = vweird.f32 %v5313_v28 }
 0x6fc   :  { %5314 = vrsqrt.f32 %v2846_v9  ;;  %vm2879_vm12 = vmor %vm2877_vm11, %vm2878_vm10  ;;  %vm2887_vm14 = vweird.f32 %v2846_v9 }
 0x6fd   :  { %v2873_v13 = vmul.f32 %v5313_v28, %v2872_v4 }
 0x6ff   :  { %v2874_v11 = vmul.f32 0.5, %v2873_v13 }
 0x701   :  { %v2875_v39 = vsub.f32 1.5, %v2874_v11 }
 0x702   :  { %v5315_v10 = vpop.eup %5314 }
 0x703   :  { %v2876_v19 = vmul.f32 %v5313_v28, %v2875_v39  ;;  %v2882_v8 = vmul.f32 %v5315_v10, %v2846_v9  ;;  %vm2888_vm13 = vweird.f32 %v5315_v10 }
 0x704   :  { %vm2889_vm15 = vmor %vm2887_vm14, %vm2888_vm13 }
 0x705   :  { %v2883_v63 = vmul.f32 %v5315_v10, %v2882_v8  ;;  %v2880_v12 = vsel %vm2879_vm12, %v5313_v28, %v2876_v19 }
 0x706   :  { %v2933_v52 = vmul.f32 %v2880_v12, %v6691_v55 }
 0x707   :  { %v2884_v46 = vmul.f32 0.5, %v2883_v63 }
 0x708   :  { %v2945_v51 = vmul.f32 %v6732_v34, %v2933_v52 }
 0x709   :  { %v2885_v40 = vsub.f32 1.5, %v2884_v46  ;;  %v2828_v32 = vpop.xlane.xlu0 %2827 }
 0x70a   :  { %v2839_v59 = vmul.f32 %v2828_v32, %v5932_v48  ;;  %v2957_v61 = vadd.f32 %v6735_v26, %v2945_v51 }
 0x70b   :  { %v2886_v0 = vmul.f32 %v5315_v10, %v2885_v40 }
 0x70c   :  { %v2847_v36 = vadd.f32 1e-05, %v2839_v59 }
 0x70d   :  { %v2890_v50 = vsel %vm2889_vm15, %v5315_v10, %v2886_v0 }
 0x70e   :  { %v2934_v23 = vmul.f32 %v2890_v50, %v6697_v37  ;;  %5316 = vrsqrt.f32 %v2847_v36  ;;  %vm2897_vm1 = vweird.f32 %v2847_v36 }
 0x710   :  { %v2946_v16 = vmul.f32 %v6732_v34, %v2934_v23 }
 0x711   :  { %v2830_v17 = vpop.xlane.xlu1 %2829 }
 0x712   :  { %v2958_v55 = vadd.f32 %v6735_v26, %v2946_v16  ;;  %v2840_v22 = vmul.f32 %v2830_v17, %v5932_v48 }
 0x714   :  { %v2964_v29 = vpack.c.bf16 %v2958_v55, %v2957_v61  ;;  %v5317_v25 = vpop.eup %5316  ;;  %v2848_v45 = vadd.f32 1e-05, %v2840_v22 }
 0x715   :  { %v2892_v7 = vmul.f32 %v5317_v25, %v2847_v36  ;;  %vm2898_vm0 = vweird.f32 %v5317_v25 }
 0x716   :  { %3182 = vmatmul.bf16.gmra.mxu3 %v2964_v29  ;;  %3211 = vmatmul.bf16.gmra.mxu0 %v2964_v29  ;;  %5318 = vrsqrt.f32 %v2848_v45  ;;  %vm2899_vm2 = vmor %vm2897_vm1, %vm2898_vm0  ;;  %vm2907_vm4 = vweird.f32 %v2848_v45 }
 0x717   :  { %3240 = vmatmul.bf16.gmra.mxu1 %v2964_v29  ;;  %3269 = vmatmul.bf16.gmra.mxu2 %v2964_v29  ;;  %v2893_v37 = vmul.f32 %v5317_v25, %v2892_v7 }
 0x719   :  { %v2894_v1 = vmul.f32 0.5, %v2893_v37  ;;  %v2832_v42 = vpop.xlane.xlu2 %2831 }
 0x71a   :  { %v2841_v30 = vmul.f32 %v2832_v42, %v5932_v48 }
 0x71b   :  { %v2895_v20 = vsub.f32 1.5, %v2894_v1 }
 0x71c   :  { %v5319_v53 = vpop.eup %5318  ;;  %v2849_v38 = vadd.f32 1e-05, %v2841_v30 }
 0x71d   :  { %v2896_v57 = vmul.f32 %v5317_v25, %v2895_v20  ;;  %v2902_v5 = vmul.f32 %v5319_v53, %v2848_v45  ;;  %vm2908_vm3 = vweird.f32 %v5319_v53 }
 0x71e   :  { %vm2909_vm5 = vmor %vm2907_vm4, %vm2908_vm3  ;;  %5320 = vrsqrt.f32 %v2849_v38  ;;  %vm2917_vm7 = vweird.f32 %v2849_v38 }
 0x71f   :  { %v2903_v15 = vmul.f32 %v5319_v53, %v2902_v5  ;;  %v2900_v44 = vsel %vm2899_vm2, %v5317_v25, %v2896_v57  ;;  %v4862_v57 = vld [vmem:[#allocation17 + $0x38] sm:$0xff] }
 0x720   :  { %v2935_v31 = vmul.f32 %v2900_v44, %v6703_v35  ;;  %v4870_v5 = vld [vmem:[#allocation17 + $0x78] sm:$0xff]  ;;  %4043 = vmatpush.bf16.msrb.mxu3 %v4862_v57 }
 0x721   :  { %v2904_v47 = vmul.f32 0.5, %v2903_v15  ;;  %v4878_v15 = vld [vmem:[#allocation17 + $0xb8] sm:$0xff]  ;;  %4072 = vmatpush.bf16.msra.mxu0 %v4870_v5  ;;  %v4859_v5 = vld [vmem:[#allocation17 + $0x20] sm:$0xff] }
 0x722   :  { %v2947_v60 = vmul.f32 %v6732_v34, %v2935_v31  ;;  %4101 = vmatpush.bf16.msrb.mxu1 %v4878_v15  ;;  %v4867_v15 = vld [vmem:[#allocation17 + $0x60] sm:$0xff] }
 0x723   :  { %v2905_v14 = vsub.f32 1.5, %v2904_v47  ;;  %v4886_v47 = vld [vmem:[#allocation17 + $0xf8] sm:$0xff] }
 0x724   :  { %v2959_v28 = vadd.f32 %v6735_v26, %v2947_v60  ;;  %v5321_v35 = vpop.eup %5320  ;;  %4130 = vmatpush.bf16.msrb.mxu2 %v4886_v47  ;;  %v4875_v47 = vld [vmem:[#allocation17 + $0xa0] sm:$0xff] }
 0x725   :  { %v2906_v3 = vmul.f32 %v5319_v53, %v2905_v14  ;;  %v2912_v13 = vmul.f32 %v5321_v35, %v2849_v38  ;;  %vm2918_vm6 = vweird.f32 %v5321_v35  ;;  %v4861_v38 = vld [vmem:[#allocation17 + $0x30] sm:$0xff] }
 0x726   :  { %vm2919_vm8 = vmor %vm2917_vm7, %vm2918_vm6  ;;  %4044 = vmatpush.bf16.msrb.mxu3 %v4861_v38  ;;  %v4866_v38 = vld [vmem:[#allocation17 + $0x58] sm:$0xff] }
 0x727   :  { %v2910_v18 = vsel %vm2909_vm5, %v5319_v53, %v2906_v3  ;;  %v2913_v11 = vmul.f32 %v5321_v35, %v2912_v13  ;;  %v4885_v13 = vld [vmem:[#allocation17 + $0xf0] sm:$0xff] }
 0x728   :  { %v2936_v33 = vmul.f32 %v2910_v18, %v6709_v41  ;;  %4131 = vmatpush.bf16.msrb.mxu2 %v4885_v13 }
 0x729   :  { %v2914_v19 = vmul.f32 0.5, %v2913_v11 }
 0x72a   :  { %v2948_v62 = vmul.f32 %v6732_v34, %v2936_v33 }
 0x72b   :  { %v2915_v8 = vsub.f32 1.5, %v2914_v19 }
 0x72c   :  { %v2960_v9 = vadd.f32 %v6735_v26, %v2948_v62  ;;  %v4869_v62 = vld [vmem:[#allocation17 + $0x70] sm:$0xff] }
 0x72d   :  { %v2916_v12 = vmul.f32 %v5321_v35, %v2915_v8  ;;  %4073 = vmatpush.bf16.msra.mxu0 %v4869_v62 }
 0x72e   :  { %v2965_v4 = vpack.c.bf16 %v2960_v9, %v2959_v28  ;;  %v4877_v28 = vld [vmem:[#allocation17 + $0xb0] sm:$0xff] }
 0x72f   :  { %v2920_v52 = vsel %vm2919_vm8, %v5321_v35, %v2916_v12  ;;  %4102 = vmatpush.bf16.msrb.mxu1 %v4877_v28  ;;  %v4874_v28 = vld [vmem:[#allocation17 + $0x98] sm:$0xff] }
 0x730   :  { %3187 = vmatmul.bf16.gmra.mxu3 %v2965_v4  ;;  %3216 = vmatmul.bf16.gmra.mxu0 %v2965_v4  ;;  %v2937_v59 = vmul.f32 %v2920_v52, %v6715_v43  ;;  %v2999_v43 = vld [vmem:[%s7082_s10] sm:$0xf]  ;;  %v4868_v52 = vld [vmem:[#allocation17 + $0x68] sm:$0xff] }
 0x731   :  { %3245 = vmatmul.bf16.gmra.mxu1 %v2965_v4  ;;  %3274 = vmatmul.bf16.gmra.mxu2 %v2965_v4  ;;  %v6769_v22 = vperm.slane %v2999_v43, 1  ;;  %v6771_v29 = vperm.slane %v2999_v43, 0  ;;  %v6775_v25 = vperm.slane %v2999_v43, 3 }
 0x732   :  { %v2949_v23 = vmul.f32 %v6732_v34, %v2937_v59  ;;  %4074 = vmatpush.bf16.msra.mxu0 %v4868_v52  ;;  %v4873_v52 = vld [vmem:[#allocation17 + $0x90] sm:$0xff] }
 0x734   :  { %v2961_v16 = vadd.f32 %v6735_v26, %v2949_v23 }
 0x736   :  { %4075 = vmatpush.bf16.msra.mxu0 %v4867_v15 }
 0x73a   :  { %4076 = vmatpush.bf16.msra.mxu0 %v4866_v38  ;;  %v4879_v38 = vld [vmem:[#allocation17 + $0xc0] sm:$0xff] }
 0x73b   :  { %v2834_v39 = vpop.xlane.xlu0 %2833 }
 0x73c   :  { %v2842_v41 = vmul.f32 %v2834_v39, %v5932_v48 }
 0x73e   :  { %v2850_v10 = vadd.f32 1e-05, %v2842_v41 }
 0x740   :  { %5322 = vrsqrt.f32 %v2850_v10  ;;  %vm2927_vm10 = vweird.f32 %v2850_v10 }
 0x746   :  { %v5323_v63 = vpop.eup %5322 }
 0x747   :  { %v2922_v46 = vmul.f32 %v5323_v63, %v2850_v10  ;;  %vm2928_vm9 = vweird.f32 %v5323_v63 }
 0x748   :  { %vm2929_vm11 = vmor %vm2927_vm10, %vm2928_vm9 }
 0x749   :  { %v2923_v40 = vmul.f32 %v5323_v63, %v2922_v46 }
 0x74b   :  { %v2924_v32 = vmul.f32 0.5, %v2923_v40  ;;  %v4860_v40 = vld [vmem:[#allocation17 + $0x28] sm:$0xff] }
 0x74c   :  { %4045 = vmatpush.bf16.msrb.mxu3 %v4860_v40 }
 0x74d   :  { %v2925_v0 = vsub.f32 1.5, %v2924_v32  ;;  %v4876_v32 = vld [vmem:[#allocation17 + $0xa8] sm:$0xff] }
 0x74e   :  { %4103 = vmatpush.bf16.msrb.mxu1 %v4876_v32  ;;  %v4881_v32 = vld [vmem:[#allocation17 + $0xd0] sm:$0xff] }
 0x74f   :  { %v2926_v50 = vmul.f32 %v5323_v63, %v2925_v0 }
 0x750   :  { %4046 = vmatpush.bf16.msrb.mxu3 %v4859_v5 }
 0x751   :  { %v2930_v48 = vsel %vm2929_vm11, %v5323_v63, %v2926_v50  ;;  %v4884_v50 = vld [vmem:[#allocation17 + $0xe8] sm:$0xff] }
 0x752   :  { %v2938_v36 = vmul.f32 %v2930_v48, %v6726_v49  ;;  %4132 = vmatpush.bf16.msrb.mxu2 %v4884_v50  ;;  %4104 = vmatpush.bf16.msrb.mxu1 %v4875_v47 }
 0x754   :  { %v2950_v51 = vmul.f32 %v6732_v34, %v2938_v36  ;;  %v6773_v34 = vperm.slane %v2999_v43, 2 }
 0x756   :  { %v2962_v17 = vadd.f32 %v6735_v26, %v2950_v51  ;;  %4105 = vmatpush.bf16.msrb.mxu1 %v4874_v28 }
 0x758   :  { %v2966_v61 = vpack.c.bf16 %v2962_v17, %v2961_v16 }
 0x75a   :  { %3192 = vmatmul.bf16.gmra.mxu3 %v2966_v61  ;;  %3221 = vmatmul.bf16.gmra.mxu0 %v2966_v61 }
 0x75b   :  { %3250 = vmatmul.bf16.gmra.mxu1 %v2966_v61  ;;  %3279 = vmatmul.bf16.gmra.mxu2 %v2966_v61 }
 0x75c   :  { %4106 = vmatpush.bf16.msrb.mxu1 %v4873_v52  ;;  %v5749_v52 = vmov 1065369472  }
 0x75d   :  { %v3207_v55 = vpop.f32.mrf.mxu0 }
 0x75e   :  { %v3236_v49 = vpop.f32.mrf.mxu1  ;;  %v3208_v45 = vadd.f32 %v3207_v55, %v6769_v22 }
 0x75f   :  { %v3237_v1 = vadd.f32 %v3236_v49, %v6773_v34 }
 0x763   :  { %v3178_v26 = vpop.f32.mrf.mxu3 }
 0x764   :  { %v3179_v7 = vadd.f32 %v3178_v26, %v6771_v29  ;;  %v3265_v37 = vpop.f32.mrf.mxu2 }
 0x765   :  { %v3266_v20 = vadd.f32 %v3265_v37, %v6775_v25  ;;  %v3209_v30 = vpop.f32.mrf.mxu0 }
 0x766   :  { %v6781_v53 = vpack.c.bf16 %v3208_v45, %v3179_v7  ;;  %v3238_v60 = vpop.f32.mrf.mxu1  ;;  %v3210_v39 = vadd.f32 %v3209_v30, %v6769_v22 }
 0x767   :  { %v6783_v44 = vpack.c.bf16 %v3266_v20, %v3237_v1  ;;  %v3239_v8 = vadd.f32 %v3238_v60, %v6773_v34  ;;  %v4858_v60 = vld [vmem:[#allocation17 + $0x18] sm:$0xff] }
 0x768   :  { %v3301_v42 = vunpack.c.l.bf16 %v6781_v53  ;;  %v3302_v14 = vunpack.c.h.bf16 %v6781_v53  ;;  %4047 = vmatpush.bf16.msrb.mxu3 %v4858_v60  ;;  %v4871_v60 = vld [vmem:[#allocation17 + $0x80] sm:$0xff] }
 0x769   :  { %v3303_v31 = vunpack.c.l.bf16 %v6783_v44  ;;  %v3304_v3 = vunpack.c.h.bf16 %v6783_v44 }
 0x76a   :  { %v3333_v18 = vmul.f32 1.703125, %v3301_v42  ;;  %v3334_v33 = vmul.f32 1.703125, %v3302_v14 }
 0x76b   :  { %v3335_v9 = vmul.f32 1.703125, %v3303_v31  ;;  %v3336_v4 = vmul.f32 1.703125, %v3304_v3  ;;  %v3180_v35 = vpop.f32.mrf.mxu3 }
 0x76c   :  { %v3365_v11 = vpack.c.bf16 %v3334_v33, %v3333_v18  ;;  %v3181_v41 = vadd.f32 %v3180_v35, %v6771_v29  ;;  %v3267_v10 = vpop.f32.mrf.mxu2  ;;  %v4883_v18 = vld [vmem:[#allocation17 + $0xe0] sm:$0xff] }
 0x76d   :  { %v3366_v19 = vpack.c.bf16 %v3336_v4, %v3335_v9  ;;  %v3268_v63 = vadd.f32 %v3267_v10, %v6775_v25  ;;  %4133 = vmatpush.bf16.msrb.mxu2 %v4883_v18  ;;  %v4882_v9 = vld [vmem:[#allocation17 + $0xd8] sm:$0xff]  ;;  %v4863_v18 = vld [vmem:[#allocation17 + $0x40] sm:$0xff] }
 0x76e   :  { %v3381_v12 = vxor.u32 2147516416, %v3365_v11  ;;  %v6801_v46 = vpack.c.bf16 %v3210_v39, %v3181_v41 }
 0x76f   :  { %v3382_v0 = vxor.u32 2147516416, %v3366_v19  ;;  %v6803_v59 = vpack.c.bf16 %v3268_v63, %v3239_v8  ;;  %v4857_v19 = vld [vmem:[#allocation17 + $0x10] sm:$0xff] }
 0x770   :  { %v3397_v48 = vunpack.c.l.bf16 %v3381_v12  ;;  %v3398_v36 = vunpack.c.h.bf16 %v3381_v12  ;;  %v3305_v23 = vunpack.c.l.bf16 %v6801_v46  ;;  %v3306_v51 = vunpack.c.h.bf16 %v6801_v46  ;;  %v4865_v8 = vld [vmem:[#allocation17 + $0x50] sm:$0xff]  ;;  %4048 = vmatpush.bf16.msrb.mxu3 %v4857_v19 }
 0x771   :  { %v3399_v16 = vunpack.c.l.bf16 %v3382_v0  ;;  %v3400_v17 = vunpack.c.h.bf16 %v3382_v0  ;;  %v3307_v61 = vunpack.c.l.bf16 %v6803_v59  ;;  %v3308_v43 = vunpack.c.h.bf16 %v6803_v59  ;;  %4134 = vmatpush.bf16.msrb.mxu2 %v4882_v9  ;;  %4077 = vmatpush.bf16.msra.mxu0 %v4865_v8 }
 0x772   :  { %v3429_v55 = vmul.f32 1.442695, %v3397_v48  ;;  %v3431_v49 = vmul.f32 1.442695, %v3398_v36  ;;  %v3337_v26 = vmul.f32 1.703125, %v3305_v23  ;;  %v3338_v45 = vmul.f32 1.703125, %v3306_v51 }
 0x773   :  { %v3433_v7 = vmul.f32 1.442695, %v3399_v16  ;;  %v3435_v37 = vmul.f32 1.442695, %v3400_v17  ;;  %v3339_v1 = vmul.f32 1.703125, %v3307_v61  ;;  %v3340_v20 = vmul.f32 1.703125, %v3308_v43 }
 0x774   :  { %5324 = vpow2.f32 %v3429_v55  ;;  %v3367_v57 = vpack.c.bf16 %v3338_v45, %v3337_v26  ;;  %v4856_v55 = vld [vmem:[#allocation17 + $0x8] sm:$0xff] }
 0x775   :  { %5326 = vpow2.f32 %v3431_v49  ;;  %v3368_v30 = vpack.c.bf16 %v3340_v20, %v3339_v1  ;;  %v4864_v49 = vld [vmem:[#allocation17 + $0x48] sm:$0xff]  ;;  %4135 = vmatpush.bf16.msrb.mxu2 %v4881_v32  ;;  %4049 = vmatpush.bf16.msrb.mxu3 %v4856_v55  ;;  %v6817_v32 = vunpack.c.h.bf16 %v5749_v52 }
 0x776   :  { %5328 = vpow2.f32 %v3433_v7  ;;  %v3383_v33 = vxor.u32 2147516416, %v3367_v57  ;;  %v4872_v26 = vld [vmem:[#allocation17 + $0x88] sm:$0xff]  ;;  %4078 = vmatpush.bf16.msra.mxu0 %v4864_v49 }
 0x777   :  { %5330 = vpow2.f32 %v3435_v37  ;;  %v3384_v62 = vxor.u32 2147516416, %v3368_v30  ;;  %v4880_v45 = vld [vmem:[#allocation17 + $0xc8] sm:$0xff]  ;;  %v4855_v30 = vld [vmem:[#allocation17] sm:$0xff]  ;;  %4107 = vmatpush.bf16.msrb.mxu1 %v4872_v26 }
 0x778   :  { %v3401_v4 = vunpack.c.l.bf16 %v3383_v33  ;;  %v3402_v35 = vunpack.c.h.bf16 %v3383_v33 }
 0x779   :  { %v3403_v13 = vunpack.c.l.bf16 %v3384_v62  ;;  %v3404_v11 = vunpack.c.h.bf16 %v3384_v62  ;;  %4136 = vmatpush.bf16.msrb.mxu2 %v4880_v45  ;;  %4050 = vmatpush.bf16.msrb.mxu3 %v4855_v30 }
 0x77a   :  { %v5325_v39 = vpop.eup %5324  ;;  %v3437_v41 = vmul.f32 1.442695, %v3401_v4  ;;  %v3439_v10 = vmul.f32 1.442695, %v3402_v35  ;;  %4079 = vmatpush.bf16.msra.mxu0 %v4863_v18 }
 0x77b   :  { %v5327_v63 = vpop.eup %5326  ;;  %v3441_v12 = vmul.f32 1.442695, %v3403_v13  ;;  %v3443_v40 = vmul.f32 1.442695, %v3404_v11  ;;  %4108 = vmatpush.bf16.msrb.mxu1 %v4871_v60 }
 0x77c   :  { %v5329_v0 = vpop.eup %5328  ;;  %v3493_v50 = vpack.c.bf16 %v5327_v63, %v5325_v39  ;;  %5332 = vpow2.f32 %v3437_v41 }
 0x77d   :  { %v5331_v48 = vpop.eup %5330  ;;  %5334 = vpow2.f32 %v3439_v10  ;;  %4137 = vmatpush.bf16.msrb.mxu2 %v4879_v38 }
 0x77e   :  { %v3509_v36 = vunpack.c.l.bf16 %v3493_v50  ;;  %v3510_v16 = vunpack.c.h.bf16 %v3493_v50  ;;  %v3494_v17 = vpack.c.bf16 %v5331_v48, %v5329_v0  ;;  %5336 = vpow2.f32 %v3441_v12 }
 0x77f   :  { %5338 = vpow2.f32 %v3443_v40  ;;  %v6819_v0 = vunpack.c.l.bf16 %v5749_v52 }
 0x780   :  { %v3541_v7 = vadd.f32 1.0, %v3509_v36  ;;  %v3542_v37 = vadd.f32 1.0, %v3510_v16  ;;  %v3511_v1 = vunpack.c.l.bf16 %v3494_v17  ;;  %v3512_v20 = vunpack.c.h.bf16 %v3494_v17 }
 0x782   :  { %v5333_v57 = vpop.eup %5332  ;;  %v3573_v5 = vpack.c.bf16 %v3542_v37, %v3541_v7  ;;  %v3543_v15 = vadd.f32 1.0, %v3511_v1  ;;  %v3544_v47 = vadd.f32 1.0, %v3512_v20 }
 0x783   :  { %v5335_v33 = vpop.eup %5334 }
 0x784   :  { %v5337_v62 = vpop.eup %5336  ;;  %v3591_v28 = vunpack.c.h.bf16 %v3573_v5  ;;  %v3592_v9 = vunpack.c.l.bf16 %v3573_v5  ;;  %v3574_v4 = vpack.c.bf16 %v3544_v47, %v3543_v15  ;;  %v3495_v35 = vpack.c.bf16 %v5335_v33, %v5333_v57 }
 0x785   :  { %v5339_v13 = vpop.eup %5338 }
 0x786   :  { %5340 = vrcp.f32 %v3591_v28  ;;  %v3598_v11 = vunpack.c.h.bf16 %v3574_v4  ;;  %v3599_v39 = vunpack.c.l.bf16 %v3574_v4  ;;  %v3513_v41 = vunpack.c.l.bf16 %v3495_v35 }
 0x787   :  { %5342 = vrcp.f32 %v3592_v9  ;;  %v3514_v10 = vunpack.c.h.bf16 %v3495_v35  ;;  %v3496_v19 = vpack.c.bf16 %v5339_v13, %v5337_v62 }
 0x788   :  { %5344 = vrcp.f32 %v3598_v11  ;;  %v3545_v8 = vadd.f32 1.0, %v3513_v41 }
 0x789   :  { %5346 = vrcp.f32 %v3599_v39  ;;  %v3546_v63 = vadd.f32 1.0, %v3514_v10  ;;  %v3515_v12 = vunpack.c.l.bf16 %v3496_v19  ;;  %v3516_v40 = vunpack.c.h.bf16 %v3496_v19 }
 0x78b   :  { %v3575_v50 = vpack.c.bf16 %v3546_v63, %v3545_v8  ;;  %v3547_v48 = vadd.f32 1.0, %v3515_v12  ;;  %v3548_v36 = vadd.f32 1.0, %v3516_v40 }
 0x78c   :  { %v5341_v16 = vpop.eup %5340 }
 0x78d   :  { %v5343_v17 = vpop.eup %5342  ;;  %v3605_v55 = vunpack.c.h.bf16 %v3575_v50  ;;  %v3606_v49 = vunpack.c.l.bf16 %v3575_v50  ;;  %v3576_v26 = vpack.c.bf16 %v3548_v36, %v3547_v48  ;;  %v3594_v7 = vmul.f32 %v5341_v16, %v6817_v32 }
 0x78e   :  { %v5345_v45 = vpop.eup %5344  ;;  %v3596_v37 = vmul.f32 %v5343_v17, %v6819_v0 }
 0x78f   :  { %v5347_v1 = vpop.eup %5346  ;;  %5348 = vrcp.f32 %v3605_v55  ;;  %v3612_v20 = vunpack.c.h.bf16 %v3576_v26  ;;  %v3613_v57 = vunpack.c.l.bf16 %v3576_v26  ;;  %v3601_v5 = vmul.f32 %v5345_v45, %v6817_v32 }
 0x790   :  { %v3603_v15 = vmul.f32 %v5347_v1, %v6819_v0  ;;  %5350 = vrcp.f32 %v3606_v49  ;;  %v3597_v47 = vpack.c.bf16 %v3594_v7, %v3596_v37 }
 0x791   :  { %5352 = vrcp.f32 %v3612_v20 }
 0x792   :  { %5354 = vrcp.f32 %v3613_v57  ;;  %v3604_v30 = vpack.c.bf16 %v3601_v5, %v3603_v15  ;;  %v3703_v38 = vunpack.c.l.bf16 %v3597_v47  ;;  %v3704_v13 = vunpack.c.h.bf16 %v3597_v47 }
 0x793   :  { %v3212_v18 = vpop.f32.mrf.mxu0 }
 0x794   :  { %v3241_v28 = vpop.f32.mrf.mxu1  ;;  %v3705_v11 = vunpack.c.l.bf16 %v3604_v30  ;;  %v3735_v8 = vmul.f32 %v3703_v38, %v3301_v42  ;;  %v3706_v63 = vunpack.c.h.bf16 %v3604_v30  ;;  %v3213_v12 = vadd.f32 %v3212_v18, %v6769_v22 }
 0x795   :  { %v5349_v33 = vpop.eup %5348  ;;  %v3736_v17 = vmul.f32 %v3704_v13, %v3302_v14  ;;  %v3242_v49 = vadd.f32 %v3241_v28, %v6773_v34 }
 0x796   :  { %v5351_v60 = vpop.eup %5350  ;;  %v3608_v62 = vmul.f32 %v5349_v33, %v6817_v32  ;;  %v3737_v55 = vmul.f32 %v3705_v11, %v3303_v31  ;;  %v3738_v1 = vmul.f32 %v3706_v63, %v3304_v3 }
 0x797   :  { %v5353_v9 = vpop.eup %5352  ;;  %v3610_v4 = vmul.f32 %v5351_v60, %v6819_v0 }
 0x798   :  { %v5355_v35 = vpop.eup %5354  ;;  %v3615_v39 = vmul.f32 %v5353_v9, %v6817_v32 }
 0x799   :  { %v3611_v41 = vpack.c.bf16 %v3608_v62, %v3610_v4  ;;  %v3617_v10 = vmul.f32 %v5355_v35, %v6819_v0  ;;  %v3183_v19 = vpop.f32.mrf.mxu3 }
 0x79a   :  { %v3184_v40 = vadd.f32 %v3183_v19, %v6771_v29  ;;  %v3270_v52 = vpop.f32.mrf.mxu2 }
 0x79b   :  { %v3707_v50 = vunpack.c.l.bf16 %v3611_v41  ;;  %v3708_v48 = vunpack.c.h.bf16 %v3611_v41  ;;  %v3618_v36 = vpack.c.bf16 %v3615_v39, %v3617_v10  ;;  %v3271_v16 = vadd.f32 %v3270_v52, %v6775_v25  ;;  %v3214_v20 = vpop.f32.mrf.mxu0 }
 0x79c   :  { %v6839_v42 = vpack.c.bf16 %v3213_v12, %v3184_v40  ;;  %v3243_v47 = vpop.f32.mrf.mxu1  ;;  %v3215_v33 = vadd.f32 %v3214_v20, %v6769_v22 }
 0x79d   :  { %v3739_v26 = vmul.f32 %v3707_v50, %v3305_v23  ;;  %v3740_v45 = vmul.f32 %v3708_v48, %v3306_v51  ;;  %v3709_v7 = vunpack.c.l.bf16 %v3618_v36  ;;  %v3710_v37 = vunpack.c.h.bf16 %v3618_v36 }
 0x79e   :  { %v3309_v53 = vunpack.c.l.bf16 %v6839_v42  ;;  %v3310_v14 = vunpack.c.h.bf16 %v6839_v42  ;;  %v6849_v31 = vpack.c.bf16 %v3271_v16, %v3242_v49  ;;  %v3244_v28 = vadd.f32 %v3243_v47, %v6773_v34 }
 0x79f   :  { %v3767_v57 = vpack.c.bf16 %v3739_v26, %v3735_v8  ;;  %v3768_v5 = vpack.c.bf16 %v3740_v45, %v3736_v17  ;;  %v3741_v23 = vmul.f32 %v3709_v7, %v3307_v61  ;;  %v3742_v46 = vmul.f32 %v3710_v37, %v3308_v43 }
 0x7a0   :  { %v3341_v51 = vmul.f32 1.703125, %v3309_v53  ;;  %v3342_v44 = vmul.f32 1.703125, %v3310_v14  ;;  %v3311_v3 = vunpack.c.l.bf16 %v6849_v31  ;;  %v3312_v15 = vunpack.c.h.bf16 %v6849_v31 }
 0x7a1   :  { %v3769_v30 = vpack.c.bf16 %v3741_v23, %v3737_v55  ;;  %v3770_v18 = vpack.c.bf16 %v3742_v46, %v3738_v1  ;;  %4051 = vmatmul.bf16.vlgmr.msrb.gmra.mxu3 %v3767_v57  ;;  %4080 = vmatmul.bf16.vlgmr.msra.gmra.mxu0 %v3768_v5  ;;  %v3185_v61 = vpop.f32.mrf.mxu3 }
 0x7a2   :  { %v3369_v59 = vpack.c.bf16 %v3342_v44, %v3341_v51  ;;  %v3343_v43 = vmul.f32 1.703125, %v3311_v3  ;;  %v3344_v60 = vmul.f32 1.703125, %v3312_v15  ;;  %v3186_v38 = vadd.f32 %v3185_v61, %v6771_v29  ;;  %v3272_v62 = vpop.f32.mrf.mxu2 }
 0x7a3   :  { %4109 = vmatmul.bf16.vlgmr.msrb.gmra.mxu1 %v3769_v30  ;;  %4138 = vmatmul.bf16.vlgmr.msrb.gmra.mxu2 %v3770_v18  ;;  %v3273_v9 = vadd.f32 %v3272_v62, %v6775_v25 }
 0x7a4   :  { %v3385_v4 = vxor.u32 2147516416, %v3369_v59  ;;  %v3370_v35 = vpack.c.bf16 %v3344_v60, %v3343_v43  ;;  %v6869_v13 = vpack.c.bf16 %v3215_v33, %v3186_v38 }
 0x7a5   :  { %v6871_v11 = vpack.c.bf16 %v3273_v9, %v3244_v28 }
 0x7a6   :  { %v3405_v39 = vunpack.c.l.bf16 %v3385_v4  ;;  %v3406_v41 = vunpack.c.h.bf16 %v3385_v4  ;;  %v3386_v10 = vxor.u32 2147516416, %v3370_v35  ;;  %v3313_v19 = vunpack.c.l.bf16 %v6869_v13 }
 0x7a7   :  { %v3314_v8 = vunpack.c.h.bf16 %v6869_v13  ;;  %v3315_v63 = vunpack.c.l.bf16 %v6871_v11  ;;  %v3316_v12 = vunpack.c.h.bf16 %v6871_v11 }
 0x7a8   :  { %v3445_v40 = vmul.f32 1.442695, %v3405_v39  ;;  %v3447_v52 = vmul.f32 1.442695, %v3406_v41  ;;  %v3407_v50 = vunpack.c.l.bf16 %v3386_v10  ;;  %v3408_v48 = vunpack.c.h.bf16 %v3386_v10 }
 0x7a9   :  { %v3345_v36 = vmul.f32 1.703125, %v3313_v19  ;;  %v3346_v16 = vmul.f32 1.703125, %v3314_v8  ;;  %v3347_v17 = vmul.f32 1.703125, %v3315_v63  ;;  %v3348_v55 = vmul.f32 1.703125, %v3316_v12 }
 0x7aa   :  { %5356 = vpow2.f32 %v3445_v40  ;;  %v3449_v49 = vmul.f32 1.442695, %v3407_v50  ;;  %v3451_v26 = vmul.f32 1.442695, %v3408_v48 }
 0x7ab   :  { %5358 = vpow2.f32 %v3447_v52  ;;  %v3371_v45 = vpack.c.bf16 %v3346_v16, %v3345_v36  ;;  %v3372_v7 = vpack.c.bf16 %v3348_v55, %v3347_v17 }
 0x7ac   :  { %5360 = vpow2.f32 %v3449_v49 }
 0x7ad   :  { %5362 = vpow2.f32 %v3451_v26  ;;  %v3387_v37 = vxor.u32 2147516416, %v3371_v45  ;;  %v3388_v1 = vxor.u32 2147516416, %v3372_v7  ;;  %v3217_v20 = vpop.f32.mrf.mxu0 }
 0x7ae   :  { %v3246_v51 = vpop.f32.mrf.mxu1  ;;  %v3218_v4 = vadd.f32 %v3217_v20, %v6769_v22 }
 0x7af   :  { %v3409_v57 = vunpack.c.l.bf16 %v3387_v37  ;;  %v3410_v5 = vunpack.c.h.bf16 %v3387_v37  ;;  %v3411_v23 = vunpack.c.l.bf16 %v3388_v1  ;;  %v3412_v46 = vunpack.c.h.bf16 %v3388_v1 }
 0x7b0   :  { %v5357_v44 = vpop.eup %5356  ;;  %v3247_v50 = vadd.f32 %v3246_v51, %v6773_v34 }
 0x7b1   :  { %v5359_v47 = vpop.eup %5358  ;;  %v3453_v30 = vmul.f32 1.442695, %v3409_v57  ;;  %v3455_v18 = vmul.f32 1.442695, %v3410_v5  ;;  %v3457_v33 = vmul.f32 1.442695, %v3411_v23 }
 0x7b2   :  { %v5361_v61 = vpop.eup %5360  ;;  %v3497_v59 = vpack.c.bf16 %v5359_v47, %v5357_v44  ;;  %v3459_v60 = vmul.f32 1.442695, %v3412_v46 }
 0x7b3   :  { %v5363_v43 = vpop.eup %5362  ;;  %5364 = vpow2.f32 %v3453_v30  ;;  %v3188_v9 = vpop.f32.mrf.mxu3 }
 0x7b4   :  { %v3517_v38 = vunpack.c.l.bf16 %v3497_v59  ;;  %v3518_v62 = vunpack.c.h.bf16 %v3497_v59  ;;  %v3498_v28 = vpack.c.bf16 %v5363_v43, %v5361_v61  ;;  %5366 = vpow2.f32 %v3455_v18  ;;  %v3275_v39 = vpop.f32.mrf.mxu2 }
 0x7b5   :  { %5368 = vpow2.f32 %v3457_v33  ;;  %v3189_v35 = vadd.f32 %v3188_v9, %v6771_v29  ;;  %v3276_v36 = vadd.f32 %v3275_v39, %v6775_v25  ;;  %v3219_v16 = vpop.f32.mrf.mxu0 }
 0x7b6   :  { %v3549_v41 = vadd.f32 1.0, %v3517_v38  ;;  %v3550_v10 = vadd.f32 1.0, %v3518_v62  ;;  %v3519_v40 = vunpack.c.l.bf16 %v3498_v28  ;;  %v3520_v52 = vunpack.c.h.bf16 %v3498_v28  ;;  %v3248_v1 = vpop.f32.mrf.mxu1 }
 0x7b7   :  { %5370 = vpow2.f32 %v3459_v60  ;;  %v6888_v48 = vpack.c.bf16 %v3218_v4, %v3189_v35  ;;  %v6893_v37 = vpack.c.bf16 %v3276_v36, %v3247_v50  ;;  %v3220_v57 = vadd.f32 %v3219_v16, %v6769_v22 }
 0x7b8   :  { %v3551_v17 = vadd.f32 1.0, %v3519_v40  ;;  %v3552_v55 = vadd.f32 1.0, %v3520_v52  ;;  %v3577_v49 = vpack.c.bf16 %v3550_v10, %v3549_v41  ;;  %v3249_v33 = vadd.f32 %v3248_v1, %v6773_v34 }
 0x7b9   :  { %v5365_v26 = vpop.eup %5364  ;;  %v3317_v45 = vunpack.c.l.bf16 %v6888_v48  ;;  %v3318_v7 = vunpack.c.h.bf16 %v6888_v48  ;;  %v3319_v30 = vunpack.c.l.bf16 %v6893_v37  ;;  %v3320_v18 = vunpack.c.h.bf16 %v6893_v37 }
 0x7ba   :  { %v5367_v20 = vpop.eup %5366  ;;  %v3619_v5 = vunpack.c.h.bf16 %v3577_v49  ;;  %v3620_v23 = vunpack.c.l.bf16 %v3577_v49  ;;  %v6903_v59 = vpack.c.bf16 %v3552_v55, %v3551_v17 }
 0x7bb   :  { %v5369_v46 = vpop.eup %5368  ;;  %v3499_v51 = vpack.c.bf16 %v5367_v20, %v5365_v26  ;;  %v3349_v44 = vmul.f32 1.703125, %v3317_v45  ;;  %v3350_v47 = vmul.f32 1.703125, %v3318_v7  ;;  %v3190_v61 = vpop.f32.mrf.mxu3  ;;  %v3351_v28 = vmul.f32 1.703125, %v3319_v30 }
 0x7bc   :  { %5372 = vrcp.f32 %v3619_v5  ;;  %v3277_v9 = vpop.f32.mrf.mxu2  ;;  %v3352_v35 = vmul.f32 1.703125, %v3320_v18  ;;  %v3191_v39 = vadd.f32 %v3190_v61, %v6771_v29  ;;  %v3626_v16 = vunpack.c.h.bf16 %v6903_v59 }
 0x7bd   :  { %v5371_v43 = vpop.eup %5370  ;;  %v3521_v60 = vunpack.c.l.bf16 %v3499_v51  ;;  %v3522_v38 = vunpack.c.h.bf16 %v3499_v51  ;;  %v3373_v62 = vpack.c.bf16 %v3350_v47, %v3349_v44  ;;  %v3278_v41 = vadd.f32 %v3277_v9, %v6775_v25 }
 0x7be   :  { %v3500_v4 = vpack.c.bf16 %v5371_v43, %v5369_v46  ;;  %5374 = vrcp.f32 %v3620_v23  ;;  %v3374_v50 = vpack.c.bf16 %v3352_v35, %v3351_v28  ;;  %v6911_v36 = vpack.c.bf16 %v3220_v57, %v3191_v39 }
 0x7bf   :  { %v3553_v10 = vadd.f32 1.0, %v3521_v60  ;;  %v3554_v40 = vadd.f32 1.0, %v3522_v38  ;;  %v3389_v52 = vxor.u32 2147516416, %v3373_v62  ;;  %v6914_v26 = vpack.c.bf16 %v3278_v41, %v3249_v33 }
 0x7c0   :  { %v3523_v17 = vunpack.c.l.bf16 %v3500_v4  ;;  %v3524_v20 = vunpack.c.h.bf16 %v3500_v4  ;;  %v3390_v5 = vxor.u32 2147516416, %v3374_v50  ;;  %v3321_v46 = vunpack.c.l.bf16 %v6911_v36 }
 0x7c1   :  { %v3413_v55 = vunpack.c.l.bf16 %v3389_v52  ;;  %v3414_v49 = vunpack.c.h.bf16 %v3389_v52  ;;  %v3579_v51 = vpack.c.bf16 %v3554_v40, %v3553_v10  ;;  %v3322_v23 = vunpack.c.h.bf16 %v6911_v36 }
 0x7c2   :  { %v5373_v1 = vpop.eup %5372  ;;  %v3323_v57 = vunpack.c.l.bf16 %v6914_v26  ;;  %v3415_v61 = vunpack.c.l.bf16 %v3390_v5  ;;  %v3416_v43 = vunpack.c.h.bf16 %v3390_v5  ;;  %v3353_v60 = vmul.f32 1.703125, %v3321_v46 }
 0x7c3   :  { %v3461_v44 = vmul.f32 1.442695, %v3413_v55  ;;  %v3463_v47 = vmul.f32 1.442695, %v3414_v49  ;;  %v7086_v33 = vunpack.c.h.bf16 %v6914_v26  ;;  %v3555_v62 = vadd.f32 1.0, %v3523_v17 }
 0x7c4   :  { %v5375_v38 = vpop.eup %5374  ;;  %v3354_v28 = vmul.f32 1.703125, %v3322_v23  ;;  %v3355_v9 = vmul.f32 1.703125, %v3323_v57  ;;  %v3465_v4 = vmul.f32 1.442695, %v3415_v61  ;;  %v3467_v35 = vmul.f32 1.442695, %v3416_v43 }
 0x7c5   :  { %5376 = vpow2.f32 %v3461_v44  ;;  %v3356_v39 = vmul.f32 1.703125, %v7086_v33  ;;  %v3556_v41 = vadd.f32 1.0, %v3524_v20  ;;  %v3633_v40 = vunpack.c.h.bf16 %v3579_v51 }
 0x7c6   :  { %5378 = vpow2.f32 %v3463_v47  ;;  %v3375_v10 = vpack.c.bf16 %v3354_v28, %v3353_v60  ;;  %v3634_v52 = vunpack.c.l.bf16 %v3579_v51  ;;  %v3622_v17 = vmul.f32 %v5373_v1, %v6817_v32 }
 0x7c7   :  { %5380 = vpow2.f32 %v3465_v4  ;;  %v3376_v50 = vpack.c.bf16 %v3356_v39, %v3355_v9  ;;  %v3624_v55 = vmul.f32 %v5375_v38, %v6819_v0  ;;  %v3627_v44 = vunpack.c.l.bf16 %v6903_v59 }
 0x7c8   :  { %5382 = vpow2.f32 %v3467_v35  ;;  %v3391_v49 = vxor.u32 2147516416, %v3375_v10  ;;  %v3580_v20 = vpack.c.bf16 %v3556_v41, %v3555_v62 }
 0x7c9   :  { %v3392_v5 = vxor.u32 2147516416, %v3376_v50  ;;  %5384 = vrcp.f32 %v3633_v40  ;;  %v3625_v4 = vpack.c.bf16 %v3622_v17, %v3624_v55 }
 0x7ca   :  { %v3417_v61 = vunpack.c.l.bf16 %v3391_v49  ;;  %v3418_v43 = vunpack.c.h.bf16 %v3391_v49  ;;  %5386 = vrcp.f32 %v3634_v52  ;;  %v3640_v33 = vunpack.c.h.bf16 %v3580_v20 }
 0x7cb   :  { %v5377_v47 = vpop.eup %5376  ;;  %v3419_v28 = vunpack.c.l.bf16 %v3392_v5  ;;  %v3420_v51 = vunpack.c.h.bf16 %v3392_v5  ;;  %5388 = vrcp.f32 %v3626_v16  ;;  %v3711_v62 = vunpack.c.l.bf16 %v3625_v4 }
 0x7cc   :  { %v5379_v60 = vpop.eup %5378  ;;  %v3469_v1 = vmul.f32 1.442695, %v3417_v61  ;;  %v3471_v39 = vmul.f32 1.442695, %v3418_v43  ;;  %5390 = vrcp.f32 %v3627_v44  ;;  %v3641_v41 = vunpack.c.l.bf16 %v3580_v20 }
 0x7cd   :  { %v3501_v9 = vpack.c.bf16 %v5379_v60, %v5377_v47  ;;  %v5381_v38 = vpop.eup %5380  ;;  %v3473_v35 = vmul.f32 1.442695, %v3419_v28  ;;  %v3475_v10 = vmul.f32 1.442695, %v3420_v51  ;;  %v3712_v60 = vunpack.c.h.bf16 %v3625_v4 }
 0x7ce   :  { %v5383_v40 = vpop.eup %5382  ;;  %5392 = vpow2.f32 %v3469_v1 }
 0x7cf   :  { %v3525_v50 = vunpack.c.l.bf16 %v3501_v9  ;;  %v3526_v59 = vunpack.c.h.bf16 %v3501_v9  ;;  %v5385_v49 = vpop.eup %5384  ;;  %v3502_v52 = vpack.c.bf16 %v5383_v40, %v5381_v38  ;;  %5394 = vpow2.f32 %v3471_v39 }
 0x7d0   :  { %v5387_v5 = vpop.eup %5386  ;;  %5396 = vpow2.f32 %v3473_v35  ;;  %v3636_v55 = vmul.f32 %v5385_v49, %v6817_v32 }
 0x7d1   :  { %v3557_v17 = vadd.f32 1.0, %v3525_v50  ;;  %v3558_v16 = vadd.f32 1.0, %v3526_v59  ;;  %v5389_v47 = vpop.eup %5388  ;;  %v3527_v61 = vunpack.c.l.bf16 %v3502_v52  ;;  %v3528_v43 = vunpack.c.h.bf16 %v3502_v52 }
 0x7d2   :  { %5398 = vpow2.f32 %v3475_v10  ;;  %v3638_v44 = vmul.f32 %v5387_v5, %v6819_v0  ;;  %v3629_v28 = vmul.f32 %v5389_v47, %v6817_v32  ;;  %v5391_v9 = vpop.eup %5390  ;;  %v3743_v10 = vmul.f32 %v3711_v62, %v3309_v53 }
 0x7d3   :  { %5400 = vrcp.f32 %v3640_v33  ;;  %v3581_v51 = vpack.c.bf16 %v3558_v16, %v3557_v17  ;;  %v3559_v1 = vadd.f32 1.0, %v3527_v61  ;;  %v3560_v20 = vadd.f32 1.0, %v3528_v43 }
 0x7d4   :  { %v3639_v39 = vpack.c.bf16 %v3636_v55, %v3638_v44  ;;  %5402 = vrcp.f32 %v3641_v41  ;;  %v5393_v38 = vpop.eup %5392  ;;  %v3631_v35 = vmul.f32 %v5391_v9, %v6819_v0  ;;  %v3744_v33 = vmul.f32 %v3712_v60, %v3310_v14 }
 0x7d5   :  { %v3647_v40 = vunpack.c.h.bf16 %v3581_v51  ;;  %v3648_v50 = vunpack.c.l.bf16 %v3581_v51  ;;  %v5395_v59 = vpop.eup %5394  ;;  %v6943_v61 = vpack.c.bf16 %v3560_v20, %v3559_v1 }
 0x7d6   :  { %v3715_v49 = vunpack.c.l.bf16 %v3639_v39  ;;  %v3716_v4 = vunpack.c.h.bf16 %v3639_v39  ;;  %v5397_v52 = vpop.eup %5396  ;;  %v3503_v5 = vpack.c.bf16 %v5395_v59, %v5393_v38  ;;  %v3632_v17 = vpack.c.bf16 %v3629_v28, %v3631_v35 }
 0x7d7   :  { %5404 = vrcp.f32 %v3647_v40  ;;  %v3222_v47 = vpop.f32.mrf.mxu0 }
 0x7d8   :  { %v5399_v16 = vpop.eup %5398  ;;  %v3747_v41 = vmul.f32 %v3715_v49, %v3313_v19  ;;  %v3748_v55 = vmul.f32 %v3716_v4, %v3314_v8  ;;  %5406 = vrcp.f32 %v3648_v50  ;;  %v3529_v62 = vunpack.c.l.bf16 %v3503_v5  ;;  %v3251_v42 = vpop.f32.mrf.mxu1 }
 0x7d9   :  { %v5401_v53 = vpop.eup %5400  ;;  %v3530_v43 = vunpack.c.h.bf16 %v3503_v5  ;;  %v3504_v44 = vpack.c.bf16 %v5399_v16, %v5397_v52  ;;  %v3713_v51 = vunpack.c.l.bf16 %v3632_v17  ;;  %v3714_v39 = vunpack.c.h.bf16 %v3632_v17 }
 0x7da   :  { %v5403_v14 = vpop.eup %5402  ;;  %v3771_v60 = vpack.c.bf16 %v3747_v41, %v3743_v10  ;;  %v3772_v28 = vpack.c.bf16 %v3748_v55, %v3744_v33  ;;  %v3643_v9 = vmul.f32 %v5401_v53, %v6817_v32  ;;  %v3561_v19 = vadd.f32 1.0, %v3529_v62 }
 0x7db   :  { %v3562_v38 = vadd.f32 1.0, %v3530_v43  ;;  %v3531_v13 = vunpack.c.l.bf16 %v3504_v44  ;;  %v3645_v8 = vmul.f32 %v5403_v14, %v6819_v0  ;;  %v3223_v1 = vadd.f32 %v3222_v47, %v6769_v22 }
 0x7dc   :  { %4056 = vmatmul.bf16.gmra.mxu3 %v3771_v60  ;;  %4085 = vmatmul.bf16.gmra.mxu0 %v3772_v28  ;;  %v3532_v35 = vunpack.c.h.bf16 %v3504_v44  ;;  %v3745_v40 = vmul.f32 %v3713_v51, %v3311_v3  ;;  %v3746_v50 = vmul.f32 %v3714_v39, %v3312_v15  ;;  %v3252_v52 = vadd.f32 %v3251_v42, %v6773_v34 }
 0x7dd   :  { %v5405_v20 = vpop.eup %5404  ;;  %v3193_v59 = vpop.f32.mrf.mxu3  ;;  %v3583_v49 = vpack.c.bf16 %v3562_v38, %v3561_v19  ;;  %v3646_v4 = vpack.c.bf16 %v3643_v9, %v3645_v8  ;;  %v3654_v17 = vunpack.c.h.bf16 %v6943_v61  ;;  %v3563_v31 = vadd.f32 1.0, %v3531_v13 }
 0x7de   :  { %v5407_v10 = vpop.eup %5406  ;;  %v3194_v5 = vadd.f32 %v3193_v59, %v6771_v29  ;;  %v3280_v33 = vpop.f32.mrf.mxu2  ;;  %v3650_v41 = vmul.f32 %v5405_v20, %v6817_v32  ;;  %v3564_v62 = vadd.f32 1.0, %v3532_v35  ;;  %v3655_v13 = vunpack.c.l.bf16 %v6943_v61 }
 0x7df   :  { %v3281_v16 = vadd.f32 %v3280_v33, %v6775_v25  ;;  %v3652_v3 = vmul.f32 %v5407_v10, %v6819_v0  ;;  %v3661_v55 = vunpack.c.h.bf16 %v3583_v49  ;;  %v3717_v15 = vunpack.c.l.bf16 %v3646_v4  ;;  %v3224_v28 = vpop.f32.mrf.mxu0 }
 0x7e0   :  { %v3718_v47 = vunpack.c.h.bf16 %v3646_v4  ;;  %v6958_v53 = vpack.c.bf16 %v3223_v1, %v3194_v5  ;;  %v3662_v44 = vunpack.c.l.bf16 %v3583_v49  ;;  %v3253_v19 = vpop.f32.mrf.mxu1  ;;  %v3225_v35 = vadd.f32 %v3224_v28, %v6769_v22 }
 0x7e1   :  { %v6960_v43 = vpack.c.bf16 %v3281_v16, %v3252_v52  ;;  %5408 = vrcp.f32 %v3661_v55  ;;  %v3749_v51 = vmul.f32 %v3717_v15, %v3315_v63  ;;  %v3653_v38 = vpack.c.bf16 %v3650_v41, %v3652_v3 }
 0x7e2   :  { %v3750_v42 = vmul.f32 %v3718_v47, %v3316_v12  ;;  %v3325_v14 = vunpack.c.l.bf16 %v6958_v53  ;;  %v3326_v60 = vunpack.c.h.bf16 %v6958_v53  ;;  %5410 = vrcp.f32 %v3662_v44 }
 0x7e3   :  { %v3327_v9 = vunpack.c.l.bf16 %v6960_v43  ;;  %v3328_v39 = vunpack.c.h.bf16 %v6960_v43  ;;  %v3773_v8 = vpack.c.bf16 %v3749_v51, %v3745_v40  ;;  %v3254_v40 = vadd.f32 %v3253_v19, %v6773_v34 }
 0x7e4   :  { %v3774_v1 = vpack.c.bf16 %v3750_v42, %v3746_v50  ;;  %v3357_v63 = vmul.f32 1.703125, %v3325_v14  ;;  %v3358_v11 = vmul.f32 1.703125, %v3326_v60  ;;  %v3719_v5 = vunpack.c.l.bf16 %v3653_v38 }
 0x7e5   :  { %v3359_v12 = vmul.f32 1.703125, %v3327_v9  ;;  %v3360_v20 = vmul.f32 1.703125, %v3328_v39  ;;  %v3195_v59 = vpop.f32.mrf.mxu3  ;;  %4114 = vmatmul.bf16.gmra.mxu1 %v3773_v8  ;;  %v3720_v33 = vunpack.c.h.bf16 %v3653_v38  ;;  %v3584_v22 = vpack.c.bf16 %v3564_v62, %v3563_v31 }
 0x7e6   :  { %4143 = vmatmul.bf16.gmra.mxu2 %v3774_v1  ;;  %v3377_v61 = vpack.c.bf16 %v3358_v11, %v3357_v63  ;;  %v3196_v50 = vadd.f32 %v3195_v59, %v6771_v29  ;;  %v3282_v49 = vpop.f32.mrf.mxu2  ;;  %5412 = vrcp.f32 %v3654_v17 }
 0x7e7   :  { %v5409_v10 = vpop.eup %5408  ;;  %v3378_v4 = vpack.c.bf16 %v3360_v20, %v3359_v12  ;;  %v3283_v52 = vadd.f32 %v3282_v49, %v6775_v25  ;;  %5414 = vrcp.f32 %v3655_v13 }
 0x7e8   :  { %v3393_v16 = vxor.u32 2147516416, %v3377_v61  ;;  %v6983_v41 = vpack.c.bf16 %v3225_v35, %v3196_v50  ;;  %v3664_v15 = vmul.f32 %v5409_v10, %v6817_v32  ;;  %v5411_v25 = vpop.eup %5410  ;;  %v3751_v61 = vmul.f32 %v3719_v5, %v3317_v45 }
 0x7e9   :  { %v3394_v3 = vxor.u32 2147516416, %v3378_v4  ;;  %v6985_v55 = vpack.c.bf16 %v3283_v52, %v3254_v40  ;;  %v3666_v20 = vmul.f32 %v5411_v25, %v6819_v0  ;;  %v3668_v40 = vunpack.c.h.bf16 %v3584_v22 }
 0x7ea   :  { %v3421_v34 = vunpack.c.l.bf16 %v3393_v16  ;;  %v3422_v29 = vunpack.c.h.bf16 %v3393_v16  ;;  %v3329_v47 = vunpack.c.l.bf16 %v6983_v41  ;;  %v3330_v44 = vunpack.c.h.bf16 %v6983_v41 }
 0x7eb   :  { %v3423_v51 = vunpack.c.l.bf16 %v3394_v3  ;;  %v3424_v42 = vunpack.c.h.bf16 %v3394_v3  ;;  %v3331_v28 = vunpack.c.l.bf16 %v6985_v55  ;;  %v3332_v31 = vunpack.c.h.bf16 %v6985_v55 }
 0x7ec   :  { %v3477_v17 = vmul.f32 1.442695, %v3421_v34  ;;  %v3479_v62 = vmul.f32 1.442695, %v3422_v29  ;;  %v3361_v19 = vmul.f32 1.703125, %v3329_v47  ;;  %v3362_v38 = vmul.f32 1.703125, %v3330_v44  ;;  %v5413_v11 = vpop.eup %5412 }
 0x7ed   :  { %v3481_v13 = vmul.f32 1.442695, %v3423_v51  ;;  %v3483_v8 = vmul.f32 1.442695, %v3424_v42  ;;  %v3363_v1 = vmul.f32 1.703125, %v3331_v28  ;;  %v3364_v63 = vmul.f32 1.703125, %v3332_v31  ;;  %v5415_v35 = vpop.eup %5414 }
 0x7ee   :  { %5416 = vpow2.f32 %v3477_v17  ;;  %v3379_v12 = vpack.c.bf16 %v3362_v38, %v3361_v19  ;;  %v3667_v49 = vpack.c.bf16 %v3664_v15, %v3666_v20  ;;  %v3752_v10 = vmul.f32 %v3720_v33, %v3318_v7 }
 0x7ef   :  { %5418 = vpow2.f32 %v3479_v62  ;;  %v3380_v59 = vpack.c.bf16 %v3364_v63, %v3363_v1  ;;  %v3657_v52 = vmul.f32 %v5413_v11, %v6817_v32  ;;  %v3669_v16 = vunpack.c.l.bf16 %v3584_v22 }
 0x7f0   :  { %5420 = vpow2.f32 %v3481_v13  ;;  %v3395_v50 = vxor.u32 2147516416, %v3379_v12  ;;  %v3723_v29 = vunpack.c.l.bf16 %v3667_v49  ;;  %v3724_v25 = vunpack.c.h.bf16 %v3667_v49 }
 0x7f1   :  { %5422 = vpow2.f32 %v3483_v8  ;;  %v3396_v4 = vxor.u32 2147516416, %v3380_v59  ;;  %v3659_v45 = vmul.f32 %v5415_v35, %v6819_v0 }
 0x7f2   :  { %v3425_v3 = vunpack.c.l.bf16 %v3395_v50  ;;  %v3426_v34 = vunpack.c.h.bf16 %v3395_v50  ;;  %5424 = vrcp.f32 %v3668_v40  ;;  %v3755_v48 = vmul.f32 %v3723_v29, %v3321_v46 }
 0x7f3   :  { %v3427_v51 = vunpack.c.l.bf16 %v3396_v4  ;;  %v3428_v42 = vunpack.c.h.bf16 %v3396_v4  ;;  %v3756_v7 = vmul.f32 %v3724_v25, %v3322_v23  ;;  %5426 = vrcp.f32 %v3669_v16 }
 0x7f4   :  { %v5417_v5 = vpop.eup %5416  ;;  %v3485_v17 = vmul.f32 1.442695, %v3425_v3  ;;  %v3487_v15 = vmul.f32 1.442695, %v3426_v34  ;;  %v3775_v13 = vpack.c.bf16 %v3755_v48, %v3751_v61  ;;  %v3660_v63 = vpack.c.bf16 %v3657_v52, %v3659_v45 }
 0x7f5   :  { %v5419_v33 = vpop.eup %5418  ;;  %v3489_v22 = vmul.f32 1.442695, %v3427_v51  ;;  %v3491_v62 = vmul.f32 1.442695, %v3428_v42  ;;  %v3776_v8 = vpack.c.bf16 %v3756_v7, %v3752_v10 }
 0x7f6   :  { %v5421_v19 = vpop.eup %5420  ;;  %v3505_v38 = vpack.c.bf16 %v5419_v33, %v5417_v5  ;;  %5428 = vpow2.f32 %v3485_v17  ;;  %4061 = vmatmul.bf16.gmra.mxu3 %v3775_v13  ;;  %v3721_v61 = vunpack.c.l.bf16 %v3660_v63  ;;  %v3722_v5 = vunpack.c.h.bf16 %v3660_v63 }
 0x7f7   :  { %v5423_v1 = vpop.eup %5422  ;;  %5430 = vpow2.f32 %v3487_v15  ;;  %4090 = vmatmul.bf16.gmra.mxu0 %v3776_v8  ;;  %v7089_v63 = vunpack.c.h.bf16 %v6914_v26 }
 0x7f8   :  { %v3533_v11 = vunpack.c.l.bf16 %v3505_v38  ;;  %v3534_v12 = vunpack.c.h.bf16 %v3505_v38  ;;  %v3506_v20 = vpack.c.bf16 %v5423_v1, %v5421_v19  ;;  %5432 = vpow2.f32 %v3489_v22  ;;  %v5425_v36 = vpop.eup %5424 }
 0x7f9   :  { %5434 = vpow2.f32 %v3491_v62  ;;  %v5427_v40 = vpop.eup %5426  ;;  %v3671_v50 = vmul.f32 %v5425_v36, %v6817_v32  ;;  %v3753_v45 = vmul.f32 %v3721_v61, %v3319_v30  ;;  %v3754_v30 = vmul.f32 %v3722_v5, %v3320_v18 }
 0x7fa   :  { %v3565_v46 = vadd.f32 1.0, %v3533_v11  ;;  %v3566_v23 = vadd.f32 1.0, %v3534_v12  ;;  %v3535_v35 = vunpack.c.l.bf16 %v3506_v20  ;;  %v3536_v59 = vunpack.c.h.bf16 %v3506_v20 }
 0x7fb   :  { %v3673_v52 = vmul.f32 %v5427_v40, %v6819_v0 }
 0x7fc   :  { %v5429_v49 = vpop.eup %5428  ;;  %v3567_v10 = vadd.f32 1.0, %v3535_v35  ;;  %v3568_v4 = vadd.f32 1.0, %v3536_v59  ;;  %v3585_v16 = vpack.c.bf16 %v3566_v23, %v3565_v46 }
 0x7fd   :  { %v5431_v3 = vpop.eup %5430  ;;  %v3674_v25 = vpack.c.bf16 %v3671_v50, %v3673_v52 }
 0x7fe   :  { %v5433_v34 = vpop.eup %5432  ;;  %v3507_v29 = vpack.c.bf16 %v5431_v3, %v5429_v49  ;;  %v3675_v51 = vunpack.c.h.bf16 %v3585_v16  ;;  %v3676_v17 = vunpack.c.l.bf16 %v3585_v16  ;;  %v3586_v15 = vpack.c.bf16 %v3568_v4, %v3567_v10 }
 0x7ff   :  { %v5435_v42 = vpop.eup %5434  ;;  %v3725_v22 = vunpack.c.l.bf16 %v3674_v25  ;;  %v3726_v62 = vunpack.c.h.bf16 %v3674_v25 }
 0x800   :  { %v3537_v48 = vunpack.c.l.bf16 %v3507_v29  ;;  %v3538_v7 = vunpack.c.h.bf16 %v3507_v29  ;;  %v3508_v33 = vpack.c.bf16 %v5435_v42, %v5433_v34  ;;  %5436 = vrcp.f32 %v3675_v51 }
 0x801   :  { %v3682_v19 = vunpack.c.h.bf16 %v3586_v15  ;;  %v3683_v38 = vunpack.c.l.bf16 %v3586_v15  ;;  %v3757_v12 = vmul.f32 %v3725_v22, %v3323_v57  ;;  %v3758_v20 = vmul.f32 %v3726_v62, %v7089_v63 }
 0x802   :  { %v3569_v13 = vadd.f32 1.0, %v3537_v48  ;;  %v3570_v8 = vadd.f32 1.0, %v3538_v7  ;;  %v3539_v1 = vunpack.c.l.bf16 %v3508_v33  ;;  %v3540_v11 = vunpack.c.h.bf16 %v3508_v33 }
 0x803   :  { %5438 = vrcp.f32 %v3676_v17  ;;  %v3777_v35 = vpack.c.bf16 %v3757_v12, %v3753_v45  ;;  %v3778_v59 = vpack.c.bf16 %v3758_v20, %v3754_v30 }
 0x804   :  { %v3571_v36 = vadd.f32 1.0, %v3539_v1  ;;  %v3572_v46 = vadd.f32 1.0, %v3540_v11  ;;  %v3587_v23 = vpack.c.bf16 %v3570_v8, %v3569_v13  ;;  %5440 = vrcp.f32 %v3682_v19 }
 0x805   :  { %5442 = vrcp.f32 %v3683_v38  ;;  %4119 = vmatmul.bf16.gmra.mxu1 %v3777_v35  ;;  %4148 = vmatmul.bf16.gmra.mxu2 %v3778_v59 }
 0x806   :  { %v3689_v40 = vunpack.c.h.bf16 %v3587_v23  ;;  %v3690_v50 = vunpack.c.l.bf16 %v3587_v23  ;;  %v3588_v61 = vpack.c.bf16 %v3572_v46, %v3571_v36  ;;  %v5437_v49 = vpop.eup %5436 }
 0x807   :  { %v3678_v26 = vmul.f32 %v5437_v49, %v6817_v32 }
 0x808   :  { %5444 = vrcp.f32 %v3689_v40  ;;  %v3696_v37 = vunpack.c.h.bf16 %v3588_v61  ;;  %v3697_v18 = vunpack.c.l.bf16 %v3588_v61 }
 0x809   :  { %v5439_v57 = vpop.eup %5438  ;;  %5446 = vrcp.f32 %v3690_v50 }
 0x80a   :  { %v5441_v10 = vpop.eup %5440  ;;  %v3680_v4 = vmul.f32 %v5439_v57, %v6819_v0  ;;  %5448 = vrcp.f32 %v3696_v37 }
 0x80b   :  { %v5443_v52 = vpop.eup %5442  ;;  %v3685_v16 = vmul.f32 %v5441_v10, %v6817_v32  ;;  %5450 = vrcp.f32 %v3697_v18 }
 0x80c   :  { %v3687_v3 = vmul.f32 %v5443_v52, %v6819_v0  ;;  %v3681_v34 = vpack.c.bf16 %v3678_v26, %v3680_v4 }
 0x80e   :  { %v5445_v29 = vpop.eup %5444  ;;  %v3688_v42 = vpack.c.bf16 %v3685_v16, %v3687_v3  ;;  %v3727_v15 = vunpack.c.l.bf16 %v3681_v34  ;;  %v3728_v48 = vunpack.c.h.bf16 %v3681_v34 }
 0x80f   :  { %v5447_v25 = vpop.eup %5446  ;;  %v3692_v51 = vmul.f32 %v5445_v29, %v6817_v32 }
 0x810   :  { %v5449_v45 = vpop.eup %5448  ;;  %v3694_v5 = vmul.f32 %v5447_v25, %v6819_v0  ;;  %v3729_v62 = vunpack.c.l.bf16 %v3688_v42  ;;  %v3730_v19 = vunpack.c.h.bf16 %v3688_v42  ;;  %v3759_v1 = vmul.f32 %v3727_v15, %v3325_v14 }
 0x811   :  { %v5451_v17 = vpop.eup %5450  ;;  %v3699_v7 = vmul.f32 %v5449_v45, %v6817_v32  ;;  %v3760_v11 = vmul.f32 %v3728_v48, %v3326_v60 }
 0x812   :  { %v3695_v33 = vpack.c.bf16 %v3692_v51, %v3694_v5  ;;  %v3701_v22 = vmul.f32 %v5451_v17, %v6819_v0  ;;  %v3761_v0 = vmul.f32 %v3729_v62, %v3327_v9  ;;  %v3762_v20 = vmul.f32 %v3730_v19, %v3328_v39  ;;  %v7048_v9 = vld [vmem:[%s7084_s12] ss:$0 sm:$0xff]  ;;  %s5750_s12 = smov [#allocation19]  }
 0x813   :  { %s4355_s22 = sshll.u32 %s5750_s12, 4  ;;  %s4356_s22 = int_to_ptr.vmem [resolvable:$true] %s4355_s22 }
 0x814   :  { %v3731_v38 = vunpack.c.l.bf16 %v3695_v33  ;;  %v3732_v13 = vunpack.c.h.bf16 %v3695_v33  ;;  %v3702_v8 = vpack.c.bf16 %v3699_v7, %v3701_v22 }
 0x816   :  { %v3763_v12 = vmul.f32 %v3731_v38, %v3329_v47  ;;  %v3764_v32 = vmul.f32 %v3732_v13, %v3330_v44  ;;  %v3733_v30 = vunpack.c.l.bf16 %v3702_v8  ;;  %v3734_v63 = vunpack.c.h.bf16 %v3702_v8 }
 0x818   :  { %v3779_v36 = vpack.c.bf16 %v3763_v12, %v3759_v1  ;;  %v3780_v46 = vpack.c.bf16 %v3764_v32, %v3760_v11  ;;  %v3765_v53 = vmul.f32 %v3733_v30, %v3331_v28  ;;  %v3766_v14 = vmul.f32 %v3734_v63, %v3332_v31 }
 0x81a   :  { %4066 = vmatmul.bf16.gmra.mxu3 %v3779_v36  ;;  %4095 = vmatmul.bf16.gmra.mxu0 %v3780_v46  ;;  %v3781_v60 = vpack.c.bf16 %v3765_v53, %v3761_v0  ;;  %v3782_v41 = vpack.c.bf16 %v3766_v14, %v3762_v20 }
 0x81c   :  { %4124 = vmatmul.bf16.gmra.mxu1 %v3781_v60  ;;  %4153 = vmatmul.bf16.gmra.mxu2 %v3782_v41 }
 0x81e   :  { %v4081_v39 = vpop.f32.mrf.mxu0 }
 0x820   :  { %v4110_v44 = vpop.f32.mrf.mxu1 }
 0x824   :  { %v4052_v43 = vpop.f32.mrf.mxu3 }
 0x825   :  { %v4053_v47 = vadd.f32 %v7048_v9, %v4052_v43 }
 0x826   :  { %v4139_v55 = vpop.f32.mrf.mxu2  ;;  %v4083_v37 = vpop.f32.mrf.mxu0 }
 0x827   :  { %v4082_v28 = vadd.f32 %v4081_v39, %v4053_v47 }
 0x828   :  { %v4112_v10 = vpop.f32.mrf.mxu1 }
 0x829   :  { %v4111_v23 = vadd.f32 %v4110_v44, %v4082_v28 }
 0x82b   :  { %v4140_v31 = vadd.f32 %v4139_v55, %v4111_v23 }
 0x82c   :  { %v4054_v35 = vpop.f32.mrf.mxu3 }
 0x82d   :  { %v4159_v59 = vadd.f32 %v4140_v31, %v6646_v58  ;;  %v4055_v40 = vadd.f32 %v7048_v9, %v4054_v35 }
 0x82e   :  { %v4141_v3 = vpop.f32.mrf.mxu2 }
 0x82f   :  { %v4169_v50 = vrot.slane %v4159_v59, 1  ;;  %v4170_v61 = vrot.slane %v4159_v59, 2  ;;  %v4171_v49 = vrot.slane %v4159_v59, 3  ;;  %4197 = vst [vmem:[#allocation19] sm:$0x1] %v4159_v59  ;;  %v4172_v18 = vrot.slane %v4159_v59, 4 }
 0x830   :  { %v4084_v57 = vadd.f32 %v4083_v37, %v4055_v40  ;;  %v4173_v26 = vrot.slane %v4159_v59, 5  ;;  %v4174_v4 = vrot.slane %v4159_v59, 6  ;;  %v4175_v16 = vrot.slane %v4159_v59, 7 }
 0x831   :  { %4198 = vst [vmem:[#allocation19 + $0x4] sm:$0x1] %v4169_v50 }
 0x832   :  { %4199 = vst [vmem:[#allocation19 + $0x8] sm:$0x1] %v4170_v61  ;;  %v4113_v52 = vadd.f32 %v4112_v10, %v4084_v57 }
 0x833   :  { %4200 = vst [vmem:[#allocation19 + $0xc] sm:$0x1] %v4171_v49 }
 0x834   :  { %4201 = vst [vmem:[#allocation19 + $0x10] sm:$0x1] %v4172_v18  ;;  %v4142_v58 = vadd.f32 %v4141_v3, %v4113_v52 }
 0x835   :  { %4202 = vst [vmem:[#allocation19 + $0x14] sm:$0x1] %v4173_v26 }
 0x836   :  { %4203 = vst [vmem:[#allocation19 + $0x18] sm:$0x1] %v4174_v4  ;;  %v4160_v34 = vadd.f32 %v4142_v58, %v6650_v27 }
 0x837   :  { %4204 = vst [vmem:[#allocation19 + $0x1c] sm:$0x1] %v4175_v16 }
 0x838   :  { %v4176_v29 = vrot.slane %v4160_v34, 1  ;;  %v4177_v25 = vrot.slane %v4160_v34, 2  ;;  %v4178_v51 = vrot.slane %v4160_v34, 3  ;;  %4205 = vst [vmem:[#allocation19 + $0x20] sm:$0x1] %v4160_v34  ;;  %v4179_v42 = vrot.slane %v4160_v34, 4 }
 0x839   :  { %v4180_v45 = vrot.slane %v4160_v34, 5  ;;  %v4181_v5 = vrot.slane %v4160_v34, 6  ;;  %v4182_v17 = vrot.slane %v4160_v34, 7 }
 0x83a   :  { %4206 = vst [vmem:[#allocation19 + $0x24] sm:$0x1] %v4176_v29 }
 0x83b   :  { %4207 = vst [vmem:[#allocation19 + $0x28] sm:$0x1] %v4177_v25 }
 0x83c   :  { %4208 = vst [vmem:[#allocation19 + $0x2c] sm:$0x1] %v4178_v51 }
 0x83d   :  { %4209 = vst [vmem:[#allocation19 + $0x30] sm:$0x1] %v4179_v42 }
 0x83e   :  { %4210 = vst [vmem:[#allocation19 + $0x34] sm:$0x1] %v4180_v45 }
 0x83f   :  { %4211 = vst [vmem:[#allocation19 + $0x38] sm:$0x1] %v4181_v5 }
 0x840   :  { %4212 = vst [vmem:[#allocation19 + $0x3c] sm:$0x1] %v4182_v17 }
 0x859   :  { %v4086_v15 = vpop.f32.mrf.mxu0 }
 0x85f   :  { %v4057_v48 = vpop.f32.mrf.mxu3 }
 0x860   :  { %v4058_v27 = vadd.f32 %v7048_v9, %v4057_v48 }
 0x861   :  { %v4088_v13 = vpop.f32.mrf.mxu0 }
 0x862   :  { %v4087_v7 = vadd.f32 %v4086_v15, %v4058_v27  ;;  %v4115_v33 = vpop.f32.mrf.mxu1 }
 0x864   :  { %v4116_v22 = vadd.f32 %v4115_v33, %v4087_v7 }
 0x867   :  { %v4059_v62 = vpop.f32.mrf.mxu3 }
 0x868   :  { %v4060_v19 = vadd.f32 %v7048_v9, %v4059_v62 }
 0x869   :  { %v4144_v38 = vpop.f32.mrf.mxu2 }
 0x86a   :  { %v4145_v8 = vadd.f32 %v4144_v38, %v4116_v22  ;;  %v4089_v1 = vadd.f32 %v4088_v13, %v4060_v19  ;;  %v4117_v12 = vpop.f32.mrf.mxu1 }
 0x86c   :  { %v4161_v11 = vadd.f32 %v4145_v8, %v6654_v56  ;;  %v4118_v0 = vadd.f32 %v4117_v12, %v4089_v1 }
 0x86e   :  { %v4215_v32 = vrot.slane %v4161_v11, 1  ;;  %v4216_v30 = vrot.slane %v4161_v11, 2  ;;  %v4217_v63 = vrot.slane %v4161_v11, 3  ;;  %4243 = vst [vmem:[#allocation19 + $0x1] sm:$0x1] %v4161_v11  ;;  %v4218_v20 = vrot.slane %v4161_v11, 4 }
 0x86f   :  { %v4219_v36 = vrot.slane %v4161_v11, 5  ;;  %v4220_v46 = vrot.slane %v4161_v11, 6  ;;  %v4221_v14 = vrot.slane %v4161_v11, 7 }
 0x870   :  { %4244 = vst [vmem:[#allocation19 + $0x5] sm:$0x1] %v4215_v32 }
 0x871   :  { %4245 = vst [vmem:[#allocation19 + $0x9] sm:$0x1] %v4216_v30  ;;  %v4146_v53 = vpop.f32.mrf.mxu2 }
 0x872   :  { %4246 = vst [vmem:[#allocation19 + $0xd] sm:$0x1] %v4217_v63  ;;  %v4147_v60 = vadd.f32 %v4146_v53, %v4118_v0 }
 0x873   :  { %4247 = vst [vmem:[#allocation19 + $0x11] sm:$0x1] %v4218_v20 }
 0x874   :  { %4248 = vst [vmem:[#allocation19 + $0x15] sm:$0x1] %v4219_v36  ;;  %v4162_v41 = vadd.f32 %v4147_v60, %v6658_v24  ;;  %v4091_v31 = vpop.f32.mrf.mxu0 }
 0x875   :  { %4249 = vst [vmem:[#allocation19 + $0x19] sm:$0x1] %v4220_v46 }
 0x876   :  { %4250 = vst [vmem:[#allocation19 + $0x1d] sm:$0x1] %v4221_v14  ;;  %v4222_v56 = vrot.slane %v4162_v41, 1  ;;  %v4223_v43 = vrot.slane %v4162_v41, 2  ;;  %v4224_v39 = vrot.slane %v4162_v41, 3  ;;  %v4225_v47 = vrot.slane %v4162_v41, 4 }
 0x877   :  { %4251 = vst [vmem:[#allocation19 + $0x21] sm:$0x1] %v4162_v41  ;;  %v4226_v44 = vrot.slane %v4162_v41, 5  ;;  %v4227_v28 = vrot.slane %v4162_v41, 6  ;;  %v4228_v23 = vrot.slane %v4162_v41, 7 }
 0x878   :  { %4252 = vst [vmem:[#allocation19 + $0x25] sm:$0x1] %v4222_v56 }
 0x879   :  { %4253 = vst [vmem:[#allocation19 + $0x29] sm:$0x1] %v4223_v43  ;;  %v4062_v55 = vpop.f32.mrf.mxu3 }
 0x87a   :  { %4254 = vst [vmem:[#allocation19 + $0x2d] sm:$0x1] %v4224_v39  ;;  %v4063_v24 = vadd.f32 %v7048_v9, %v4062_v55 }
 0x87b   :  { %4255 = vst [vmem:[#allocation19 + $0x31] sm:$0x1] %v4225_v47 }
 0x87c   :  { %4256 = vst [vmem:[#allocation19 + $0x35] sm:$0x1] %v4226_v44  ;;  %v4092_v35 = vadd.f32 %v4091_v31, %v4063_v24  ;;  %v4093_v37 = vpop.f32.mrf.mxu0 }
 0x87d   :  { %4257 = vst [vmem:[#allocation19 + $0x39] sm:$0x1] %v4227_v28 }
 0x87e   :  { %4258 = vst [vmem:[#allocation19 + $0x3d] sm:$0x1] %v4228_v23 }
 0x881   :  { %v4064_v40 = vpop.f32.mrf.mxu3 }
 0x882   :  { %v4120_v59 = vpop.f32.mrf.mxu1  ;;  %v4065_v61 = vadd.f32 %v7048_v9, %v4064_v40 }
 0x883   :  { %v4121_v50 = vadd.f32 %v4120_v59, %v4092_v35 }
 0x884   :  { %v4094_v57 = vadd.f32 %v4093_v37, %v4065_v61 }
 0x888   :  { %v4149_v49 = vpop.f32.mrf.mxu2 }
 0x889   :  { %v4150_v18 = vadd.f32 %v4149_v49, %v4121_v50 }
 0x88a   :  { %v4122_v10 = vpop.f32.mrf.mxu1 }
 0x88b   :  { %v4163_v26 = vadd.f32 %v4150_v18, %v6662_v21  ;;  %v4123_v3 = vadd.f32 %v4122_v10, %v4094_v57 }
 0x88d   :  { %v4261_v4 = vrot.slane %v4163_v26, 1  ;;  %v4262_v52 = vrot.slane %v4163_v26, 2  ;;  %v4263_v16 = vrot.slane %v4163_v26, 3  ;;  %4289 = vst [vmem:[#allocation19 + $0x2] sm:$0x1] %v4163_v26  ;;  %v4264_v58 = vrot.slane %v4163_v26, 4 }
 0x88e   :  { %v4265_v34 = vrot.slane %v4163_v26, 5  ;;  %v4266_v29 = vrot.slane %v4163_v26, 6  ;;  %v4267_v51 = vrot.slane %v4163_v26, 7 }
 0x88f   :  { %4290 = vst [vmem:[#allocation19 + $0x6] sm:$0x1] %v4261_v4 }
 0x890   :  { %4291 = vst [vmem:[#allocation19 + $0xa] sm:$0x1] %v4262_v52  ;;  %v4151_v25 = vpop.f32.mrf.mxu2 }
 0x891   :  { %4292 = vst [vmem:[#allocation19 + $0xe] sm:$0x1] %v4263_v16  ;;  %v4152_v42 = vadd.f32 %v4151_v25, %v4123_v3 }
 0x892   :  { %4293 = vst [vmem:[#allocation19 + $0x12] sm:$0x1] %v4264_v58 }
 0x893   :  { %4294 = vst [vmem:[#allocation19 + $0x16] sm:$0x1] %v4265_v34  ;;  %v4164_v45 = vadd.f32 %v4152_v42, %v6666_v2 }
 0x894   :  { %4295 = vst [vmem:[#allocation19 + $0x1a] sm:$0x1] %v4266_v29 }
 0x895   :  { %4296 = vst [vmem:[#allocation19 + $0x1e] sm:$0x1] %v4267_v51  ;;  %v4268_v21 = vrot.slane %v4164_v45, 1  ;;  %v4269_v5 = vrot.slane %v4164_v45, 2  ;;  %v4270_v17 = vrot.slane %v4164_v45, 3  ;;  %v4271_v15 = vrot.slane %v4164_v45, 4 }
 0x896   :  { %4297 = vst [vmem:[#allocation19 + $0x22] sm:$0x1] %v4164_v45  ;;  %v4272_v48 = vrot.slane %v4164_v45, 5  ;;  %v4273_v27 = vrot.slane %v4164_v45, 6  ;;  %v4274_v7 = vrot.slane %v4164_v45, 7 }
 0x897   :  { %4298 = vst [vmem:[#allocation19 + $0x26] sm:$0x1] %v4268_v21  ;;  %v4096_v22 = vpop.f32.mrf.mxu0 }
 0x898   :  { %4299 = vst [vmem:[#allocation19 + $0x2a] sm:$0x1] %v4269_v5 }
 0x899   :  { %4300 = vst [vmem:[#allocation19 + $0x2e] sm:$0x1] %v4270_v17  ;;  %v4125_v62 = vpop.f32.mrf.mxu1 }
 0x89a   :  { %4301 = vst [vmem:[#allocation19 + $0x32] sm:$0x1] %v4271_v15 }
 0x89b   :  { %4302 = vst [vmem:[#allocation19 + $0x36] sm:$0x1] %v4272_v48 }
 0x89c   :  { %4303 = vst [vmem:[#allocation19 + $0x3a] sm:$0x1] %v4273_v27 }
 0x89d   :  { %v4067_v33 = vpop.f32.mrf.mxu3  ;;  %4304 = vst [vmem:[#allocation19 + $0x3e] sm:$0x1] %v4274_v7 }
 0x89e   :  { %v4068_v2 = vadd.f32 %v7048_v9, %v4067_v33 }
 0x89f   :  { %v4154_v13 = vpop.f32.mrf.mxu2  ;;  %v4098_v0 = vpop.f32.mrf.mxu0 }
 0x8a0   :  { %v4097_v19 = vadd.f32 %v4096_v22, %v4068_v2 }
 0x8a1   :  { %v4127_v53 = vpop.f32.mrf.mxu1 }
 0x8a2   :  { %v4126_v38 = vadd.f32 %v4125_v62, %v4097_v19 }
 0x8a4   :  { %v4155_v8 = vadd.f32 %v4154_v13, %v4126_v38 }
 0x8a5   :  { %v4069_v1 = vpop.f32.mrf.mxu3 }
 0x8a6   :  { %v4165_v11 = vadd.f32 %v4155_v8, %v6670_v6  ;;  %v4070_v12 = vadd.f32 %v7048_v9, %v4069_v1 }
 0x8a7   :  { %v4156_v56 = vpop.f32.mrf.mxu2 }
 0x8a8   :  { %v4307_v32 = vrot.slane %v4165_v11, 1  ;;  %v4308_v30 = vrot.slane %v4165_v11, 2  ;;  %v4309_v63 = vrot.slane %v4165_v11, 3  ;;  %4335 = vst [vmem:[#allocation19 + $0x3] sm:$0x1] %v4165_v11  ;;  %v4310_v20 = vrot.slane %v4165_v11, 4 }
 0x8a9   :  { %v4099_v36 = vadd.f32 %v4098_v0, %v4070_v12  ;;  %v4311_v46 = vrot.slane %v4165_v11, 5  ;;  %v4312_v14 = vrot.slane %v4165_v11, 6  ;;  %v4313_v41 = vrot.slane %v4165_v11, 7 }
 0x8aa   :  { %4336 = vst [vmem:[#allocation19 + $0x7] sm:$0x1] %v4307_v32 }
 0x8ab   :  { %4337 = vst [vmem:[#allocation19 + $0xb] sm:$0x1] %v4308_v30  ;;  %v4128_v60 = vadd.f32 %v4127_v53, %v4099_v36 }
 0x8ac   :  { %4338 = vst [vmem:[#allocation19 + $0xf] sm:$0x1] %v4309_v63 }
 0x8ad   :  { %4339 = vst [vmem:[#allocation19 + $0x13] sm:$0x1] %v4310_v20  ;;  %v4157_v6 = vadd.f32 %v4156_v56, %v4128_v60 }
 0x8ae   :  { %4340 = vst [vmem:[#allocation19 + $0x17] sm:$0x1] %v4311_v46 }
 0x8af   :  { %4341 = vst [vmem:[#allocation19 + $0x1b] sm:$0x1] %v4312_v14  ;;  %v4166_v9 = vadd.f32 %v4157_v6, %v6684_v54 }
 0x8b0   :  { %4342 = vst [vmem:[#allocation19 + $0x1f] sm:$0x1] %v4313_v41 }
 0x8b1   :  { %v4314_v43 = vrot.slane %v4166_v9, 1  ;;  %v4315_v39 = vrot.slane %v4166_v9, 2  ;;  %v4316_v47 = vrot.slane %v4166_v9, 3  ;;  %4343 = vst [vmem:[#allocation19 + $0x23] sm:$0x1] %v4166_v9  ;;  %v4317_v44 = vrot.slane %v4166_v9, 4 }
 0x8b2   :  { %v4318_v28 = vrot.slane %v4166_v9, 5  ;;  %v4319_v23 = vrot.slane %v4166_v9, 6  ;;  %v4320_v55 = vrot.slane %v4166_v9, 7 }
 0x8b3   :  { %4344 = vst [vmem:[#allocation19 + $0x27] sm:$0x1] %v4314_v43 }
 0x8b4   :  { %4345 = vst [vmem:[#allocation19 + $0x2b] sm:$0x1] %v4315_v39 }
 0x8b5   :  { %4346 = vst [vmem:[#allocation19 + $0x2f] sm:$0x1] %v4316_v47 }
 0x8b6   :  { %4347 = vst [vmem:[#allocation19 + $0x33] sm:$0x1] %v4317_v44 }
 0x8b7   :  { %4348 = vst [vmem:[#allocation19 + $0x37] sm:$0x1] %v4318_v28 }
 0x8b8   :  { %4349 = vst [vmem:[#allocation19 + $0x3b] sm:$0x1] %v4319_v23 }
 0x8b9   :  { %4350 = vst [vmem:[#allocation19 + $0x3f] sm:$0x1] %v4320_v55 }
 0x8ba   :  { %4363 = dma.vmem_to_hbm [thread:$0]  %s4356_s22, 1024, %s4358_s24, [#allocation4], %s5737_s18, %s5737_s18, %s5738_s8  }
 0x8bb   :  { %5728 = dma.done.wait [#allocation4], 1024  }
 0x8bc   :  { %5729 = vsyncadd [#allocation4], 4294966272 }
 0x8bd   :  { %4368 = vsyncpa [#allocation3], 1 }
 0x8be   :  { %4369 = vsyncpa [#allocation6], 1 }
 0x8bf   :  { %4370 = vsyncpa [#allocation9], 1 }
 0x8c0   :  { %4371 = vsyncpa [#allocation12], 1 }
 0x8c1   :  { %4372 = vsyncpa [#allocation15], 1 }
 0x8c2   :  { %4373 = vsyncpa [#allocation18], 1 }
 0x8c3   :  { %4374 = vsyncpa [#allocation4], 1 }

// kernel: tpu_custom_call.1
= control target key start
LH: loop header
LB: loop body
LE: loop exit
PB: predicated region body
PF: predicated region fallthrough
CT: control target
= control target key end

     0   :  { %18 = vsyncpa [#allocation3], 0  ;;  %s7072_s0 = inlined_call_operand.hbm [shape: f32[16,4,128], index: 0, kind: input, shape index: {}]   ;;  %s7073_s1 = inlined_call_operand.hbm [shape: f32[1,128], index: 1, kind: input, shape index: {}]   ;;  %s7074_s2 = inlined_call_operand.hbm [shape: f32[1,128], index: 2, kind: input, shape index: {}]   ;;  %s7075_s3 = inlined_call_operand.hbm [shape: bf16[128,384], index: 3, kind: input, shape index: {}]   ;;  %s7076_s4 = inlined_call_operand.vmem [shape: f32[1,384], index: 4, kind: input, shape index: {}]   ;;  %s7077_s5 = inlined_call_operand.hbm [shape: bf16[128,128], index: 5, kind: input, shape index: {}]   ;;  %s7078_s6 = inlined_call_operand.hbm [shape: f32[1,128], index: 6, kind: input, shape index: {}]   ;;  %s7079_s7 = inlined_call_operand.hbm [shape: f32[1,128], index: 7, kind: input, shape index: {}]   ;;  %s7080_s8 = inlined_call_operand.hbm [shape: f32[1,128], index: 8, kind: input, shape index: {}]   ;;  %s7081_s9 = inlined_call_operand.hbm [shape: bf16[128,512], index: 9, kind: input, shape index: {}]   ;;  %s7082_s10 = inlined_call_operand.vmem [shape: f32[1,512], index: 10, kind: input, shape index: {}]   ;;  %s7083_s11 = inlined_call_operand.hbm [shape: bf16[512,128], index: 11, kind: input, shape index: {}]   ;;  %s7084_s12 = inlined_call_operand.vmem [shape: f32[1,128], index: 12, kind: input, shape index: {}]   ;;  %s7085_s13 = inlined_call_operand.hbm [shape: f32[16,4,128], index: 13, kind: output, shape index: {}]  }
   0x1   :  { %19 = vsyncpa [#allocation6], 0 }
   0x2   :  { %20 = vsyncpa [#allocation9], 0 }
   0x3   :  { %21 = vsyncpa [#allocation12], 0 }
   0x4   :  { %22 = vsyncpa [#allocation15], 0 }
   0x5   :  { %23 = vsyncpa [#allocation18], 0  ;;  %s43_s27 = sshll.u32 %s7073_s1, 4  ;;  %s44_s27 = int_to_ptr.hbm [resolvable:$true] %s43_s27 }
   0x6   :  { %24 = vsyncpa [#allocation4], 0  ;;  %s5730_s28 = smov [#allocation5]   ;;  %s64_s15 = sshll.u32 %s7075_s3, 4  ;;  %s65_s15 = int_to_ptr.hbm [resolvable:$true] %s64_s15 }
   0x7   :  { %s45_s29 = sshll.u32 %s5730_s28, 4  ;;  %s5731_s16 = smov [#allocation8]   ;;  %s46_s29 = int_to_ptr.vmem [resolvable:$true] %s45_s29 }
   0x8   :  { %48 = dma.hbm_to_vmem [thread:$0]  %s44_s27, 16, %s46_s29, [#allocation6]  }
   0x9   :  { %s66_s17 = sshll.u32 %s5731_s16, 4  ;;  %s5732_s18 = smov 192   ;;  %s67_s17 = int_to_ptr.vmem [resolvable:$true] %s66_s17 }
   0xa   :  { %s5733_s19 = smov 12   ;;  %s93_s1 = sshll.u32 %s7078_s6, 4  ;;  %s94_s1 = int_to_ptr.hbm [resolvable:$true] %s93_s1 }
   0xb   :  { %72 = dma.hbm_to_vmem [thread:$0]  %s65_s15, 3072, %s67_s17, [#allocation9], %s5732_s18, %s5732_s18, %s5733_s19  }
   0xc   :  { %s5734_s22 = smov [#allocation11]   ;;  %s115_s3 = sshll.u32 %s7080_s8, 4  ;;  %s116_s3 = int_to_ptr.hbm [resolvable:$true] %s115_s3 }
   0xd   :  { %s95_s23 = sshll.u32 %s5734_s22, 4  ;;  %s5735_s26 = smov [#allocation14]   ;;  %s96_s23 = int_to_ptr.vmem [resolvable:$true] %s95_s23 }
   0xe   :  { %98 = dma.hbm_to_vmem [thread:$0]  %s94_s1, 16, %s96_s23, [#allocation12]  }
   0xf   :  { %s117_s27 = sshll.u32 %s5735_s26, 4  ;;  %s29_s30 = sshll.u32 %s7072_s0, 4  ;;  %s118_s27 = int_to_ptr.vmem [resolvable:$true] %s117_s27  ;;  %s30_s30 = int_to_ptr.hbm [resolvable:$true] %s29_s30 }
  0x10   :  { %120 = dma.hbm_to_vmem [thread:$0]  %s116_s3, 16, %s118_s27, [#allocation15]  }
  0x11   :  { %s5736_s6 = smov [#allocation2]   ;;  %s54_s17 = sshll.u32 %s7074_s2, 4  ;;  %s55_s17 = int_to_ptr.hbm [resolvable:$true] %s54_s17 }
  0x12   :  { %s31_s14 = sshll.u32 %s5736_s6, 4  ;;  %s5737_s18 = smov 64   ;;  %s32_s14 = int_to_ptr.vmem [resolvable:$true] %s31_s14 }
  0x13   :  { %s5738_s8 = smov 4   ;;  %s5739_s19 = smov [#allocation7]  }
  0x14   :  { %37 = dma.hbm_to_vmem [thread:$0]  %s30_s30, 1024, %s32_s14, [#allocation3], %s5737_s18, %s5737_s18, %s5738_s8  }
  0x15   :  { %s56_s20 = sshll.u32 %s5739_s19, 4  ;;  %s79_s1 = sshll.u32 %s7077_s5, 4  ;;  %s57_s20 = int_to_ptr.vmem [resolvable:$true] %s56_s20  ;;  %s80_s1 = int_to_ptr.hbm [resolvable:$true] %s79_s1 }
  0x16   :  { %59 = dma.hbm_to_vmem [thread:$0]  %s55_s17, 16, %s57_s20, [#allocation6]  }
  0x17   :  { %s104_s2 = sshll.u32 %s7079_s7, 4  ;;  %s5740_s24 = smov [#allocation10]   ;;  %s105_s2 = int_to_ptr.hbm [resolvable:$true] %s104_s2 }
  0x18   :  { %s81_s25 = sshll.u32 %s5740_s24, 4  ;;  %s5741_s3 = smov [#allocation13]   ;;  %s82_s25 = int_to_ptr.vmem [resolvable:$true] %s81_s25 }
  0x19   :  { %87 = dma.hbm_to_vmem [thread:$0]  %s80_s1, 1024, %s82_s25, [#allocation9], %s5737_s18, %s5737_s18, %s5738_s8  }
  0x1a   :  { %s106_s26 = sshll.u32 %s5741_s3, 4  ;;  %s125_s5 = sshll.u32 %s7081_s9, 4  ;;  %s107_s26 = int_to_ptr.vmem [resolvable:$true] %s106_s26  ;;  %s126_s5 = int_to_ptr.hbm [resolvable:$true] %s125_s5 }
  0x1b   :  { %109 = dma.hbm_to_vmem [thread:$0]  %s105_s2, 16, %s107_s26, [#allocation12]  }
  0x1c   :  { %s5742_s29 = smov [#allocation16]   ;;  %s140_s14 = sshll.u32 %s7083_s11, 4  ;;  %s141_s14 = int_to_ptr.hbm [resolvable:$true] %s140_s14 }
  0x1d   :  { %s127_s30 = sshll.u32 %s5742_s29, 4  ;;  %s5743_s15 = smov 256   ;;  %s128_s30 = int_to_ptr.vmem [resolvable:$true] %s127_s30 }
  0x1e   :  { %s5744_s16 = smov 16   ;;  %s5745_s17 = smov [#allocation17]  }
  0x1f   :  { %133 = dma.hbm_to_vmem [thread:$0]  %s126_s5, 4096, %s128_s30, [#allocation15], %s5743_s15, %s5743_s15, %s5744_s16  }
  0x20   :  { %s142_s19 = sshll.u32 %s5745_s17, 4  ;;  %s143_s19 = int_to_ptr.vmem [resolvable:$true] %s142_s19 }
  0x21   :  { %148 = dma.hbm_to_vmem [thread:$0]  %s141_s14, 4096, %s143_s19, [#allocation18], %s5737_s18, %s5737_s18, %s5738_s8  }
  0x22   :  { %5716 = dma.done.wait [#allocation3], 1024  }
  0x23   :  { %5717 = vsyncadd [#allocation3], 4294966272 }
  0x24   :  { %5718 = dma.done.wait [#allocation6], 32  }
  0x25   :  { %5719 = vsyncadd [#allocation6], 4294967264 }
  0x26   :  { %5720 = dma.done.wait [#allocation9], 4096  }
  0x27   :  { %5721 = vsyncadd [#allocation9], 4294963200 }
  0x28   :  { %5722 = dma.done.wait [#allocation12], 32  }
  0x29   :  { %5723 = vsyncadd [#allocation12], 4294967264 }
  0x2a   :  { %5724 = dma.done.wait [#allocation15], 4112  }
  0x2b   :  { %5725 = vsyncadd [#allocation15], 4294963184 }
  0x2c   :  { %5726 = dma.done.wait [#allocation18], 4096  }
  0x2d   :  { %5727 = vsyncadd [#allocation18], 4294963200  ;;  %vm274_vm0 = vcmask 1041409   ;;  %vm277_vm1 = vcmask 1042434   ;;  %vm280_vm2 = vcmask 1043459   ;;  %vm283_vm3 = vcmask 1044484  }
  0x2e   :  { %vm286_vm4 = vcmask 1045509   ;;  %vm289_vm5 = vcmask 1046534   ;;  %v225_v0 = vld [vmem:[#allocation2 + $0x2] sm:$0x1]  ;;  %v226_v1 = vld [vmem:[#allocation2 + $0x6] sm:$0x1] }
  0x2f   :  { %v227_v2 = vld [vmem:[#allocation2 + $0xa] sm:$0x1]  ;;  %v228_v3 = vld [vmem:[#allocation2 + $0xe] sm:$0x1]  ;;  %v229_v4 = vld [vmem:[#allocation2 + $0x12] sm:$0x1] }
  0x30   :  { %v230_v5 = vld [vmem:[#allocation2 + $0x16] sm:$0x1]  ;;  %v231_v6 = vld [vmem:[#allocation2 + $0x1a] sm:$0x1]  ;;  %v232_v7 = vld [vmem:[#allocation2 + $0x1e] sm:$0x1] }
  0x31   :  { %v372_v8 = vrot.slane %v226_v1, 7  ;;  %v374_v9 = vrot.slane %v227_v2, 6  ;;  %vm292_vm6 = vcmask 1047559   ;;  %v376_v10 = vrot.slane %v228_v3, 5  ;;  %v209_v13 = vld [vmem:[#allocation2 + $0x1] sm:$0x1] }
  0x32   :  { %v378_v11 = vrot.slane %v229_v4, 4  ;;  %v380_v12 = vrot.slane %v230_v5, 3  ;;  %v382_v15 = vrot.slane %v231_v6, 2  ;;  %v384_v16 = vrot.slane %v232_v7, 1  ;;  %v210_v17 = vld [vmem:[#allocation2 + $0x5] sm:$0x1] }
  0x33   :  { %v373_v14 = vsel %vm274_vm0, %v372_v8, %v225_v0  ;;  %v211_v18 = vld [vmem:[#allocation2 + $0x9] sm:$0x1]  ;;  %v212_v20 = vld [vmem:[#allocation2 + $0xd] sm:$0x1]  ;;  %v213_v21 = vld [vmem:[#allocation2 + $0x11] sm:$0x1] }
  0x34   :  { %v375_v19 = vsel %vm277_vm1, %v374_v9, %v373_v14  ;;  %v214_v22 = vld [vmem:[#allocation2 + $0x15] sm:$0x1]  ;;  %v215_v24 = vld [vmem:[#allocation2 + $0x19] sm:$0x1]  ;;  %v216_v25 = vld [vmem:[#allocation2 + $0x1d] sm:$0x1] }
  0x35   :  { %v377_v23 = vsel %vm280_vm2, %v376_v10, %v375_v19  ;;  %v326_v26 = vrot.slane %v210_v17, 7  ;;  %v328_v27 = vrot.slane %v211_v18, 6  ;;  %v330_v29 = vrot.slane %v212_v20, 5  ;;  %v193_v32 = vld [vmem:[#allocation2] sm:$0x1]  ;;  %s5748_s20 = smov 32  }
  0x36   :  { %v379_v28 = vsel %vm283_vm3, %v378_v11, %v377_v23  ;;  %v332_v30 = vrot.slane %v213_v21, 4  ;;  %v334_v31 = vrot.slane %v214_v22, 3  ;;  %v336_v35 = vrot.slane %v215_v24, 2  ;;  %v194_v37 = vld [vmem:[#allocation2 + $0x4] sm:$0x1]  ;;  %s4357_s24 = sshll.u32 %s7085_s13, 4  ;;  %s4358_s24 = int_to_ptr.hbm [resolvable:$true] %s4357_s24 }
  0x37   :  { %v381_v33 = vsel %vm286_vm4, %v380_v12, %v379_v28  ;;  %v327_v34 = vsel %vm274_vm0, %v326_v26, %v209_v13  ;;  %v338_v36 = vrot.slane %v216_v25, 1  ;;  %v195_v38 = vld [vmem:[#allocation2 + $0x8] sm:$0x1]  ;;  %v196_v41 = vld [vmem:[#allocation2 + $0xc] sm:$0x1]  ;;  %v273_v48 = vrot.slane %v194_v37, 7 }
  0x38   :  { %v383_v39 = vsel %vm289_vm5, %v382_v15, %v381_v33  ;;  %v329_v40 = vsel %vm277_vm1, %v328_v27, %v327_v34  ;;  %v197_v42 = vld [vmem:[#allocation2 + $0x10] sm:$0x1]  ;;  %v198_v43 = vld [vmem:[#allocation2 + $0x14] sm:$0x1]  ;;  %v199_v46 = vld [vmem:[#allocation2 + $0x18] sm:$0x1] }
  0x39   :  { %v5869_v44 = vsel %vm292_vm6, %v384_v16, %v383_v39  ;;  %v331_v45 = vsel %vm280_vm2, %v330_v29, %v329_v40  ;;  %v200_v47 = vld [vmem:[#allocation2 + $0x1c] sm:$0x1]  ;;  %v276_v49 = vrot.slane %v195_v38, 6  ;;  %v279_v51 = vrot.slane %v196_v41, 5  ;;  %v233_v54 = vld [vmem:[#allocation2 + $0x22] sm:$0x1] }
  0x3a   :  { %456 = vadd.xlane.f32.xlu2 %v5869_v44  ;;  %v333_v50 = vsel %vm283_vm3, %v332_v30, %v331_v45  ;;  %v282_v52 = vrot.slane %v197_v42, 4  ;;  %v285_v53 = vrot.slane %v198_v43, 3  ;;  %v275_v56 = vsel %vm274_vm0, %v273_v48, %v193_v32  ;;  %v234_v59 = vld [vmem:[#allocation2 + $0x26] sm:$0x1]  ;;  %v235_v60 = vld [vmem:[#allocation2 + $0x2a] sm:$0x1] }
  0x3b   :  { %v335_v55 = vsel %vm286_vm4, %v334_v31, %v333_v50  ;;  %v288_v57 = vrot.slane %v199_v46, 2  ;;  %v291_v58 = vrot.slane %v200_v47, 1  ;;  %v278_v62 = vsel %vm277_vm1, %v276_v49, %v275_v56  ;;  %v236_v63 = vld [vmem:[#allocation2 + $0x2e] sm:$0x1]  ;;  %v237_v0 = vld [vmem:[#allocation2 + $0x32] sm:$0x1] }
  0x3c   :  { %v337_v61 = vsel %vm289_vm5, %v336_v35, %v335_v55  ;;  %v238_v1 = vld [vmem:[#allocation2 + $0x36] sm:$0x1]  ;;  %v281_v3 = vsel %vm280_vm2, %v279_v51, %v278_v62  ;;  %v239_v4 = vld [vmem:[#allocation2 + $0x3a] sm:$0x1]  ;;  %v240_v5 = vld [vmem:[#allocation2 + $0x3e] sm:$0x1] }
  0x3d   :  { %v5879_v2 = vsel %vm292_vm6, %v338_v36, %v337_v61  ;;  %v386_v6 = vrot.slane %v234_v59, 7  ;;  %v388_v7 = vrot.slane %v235_v60, 6  ;;  %v284_v8 = vsel %vm283_vm3, %v282_v52, %v281_v3  ;;  %v217_v12 = vld [vmem:[#allocation2 + $0x21] sm:$0x1]  ;;  %v218_v17 = vld [vmem:[#allocation2 + $0x25] sm:$0x1] }
  0x3e   :  { %452 = vadd.xlane.f32.xlu1 %v5879_v2  ;;  %v390_v9 = vrot.slane %v236_v63, 5  ;;  %v392_v10 = vrot.slane %v237_v0, 4  ;;  %v394_v11 = vrot.slane %v238_v1, 3  ;;  %v287_v13 = vsel %vm286_vm4, %v285_v53, %v284_v8  ;;  %v219_v18 = vld [vmem:[#allocation2 + $0x29] sm:$0x1] }
  0x3f   :  { %v387_v14 = vsel %vm274_vm0, %v386_v6, %v233_v54  ;;  %v396_v15 = vrot.slane %v239_v4, 2  ;;  %v398_v16 = vrot.slane %v240_v5, 1  ;;  %v290_v19 = vsel %vm289_vm5, %v288_v57, %v287_v13  ;;  %v220_v21 = vld [vmem:[#allocation2 + $0x2d] sm:$0x1]  ;;  %v221_v22 = vld [vmem:[#allocation2 + $0x31] sm:$0x1] }
  0x40   :  { %v389_v20 = vsel %vm277_vm1, %v388_v7, %v387_v14  ;;  %v222_v23 = vld [vmem:[#allocation2 + $0x35] sm:$0x1]  ;;  %v5889_v24 = vsel %vm292_vm6, %v291_v58, %v290_v19  ;;  %v223_v26 = vld [vmem:[#allocation2 + $0x39] sm:$0x1]  ;;  %v224_v27 = vld [vmem:[#allocation2 + $0x3d] sm:$0x1] }
  0x41   :  { %v391_v25 = vsel %vm280_vm2, %v390_v9, %v389_v20  ;;  %v340_v28 = vrot.slane %v218_v17, 7  ;;  %v342_v29 = vrot.slane %v219_v18, 6  ;;  %448 = vadd.xlane.f32.xlu0 %v5889_v24  ;;  %v344_v31 = vrot.slane %v220_v21, 5  ;;  %v201_v34 = vld [vmem:[#allocation2 + $0x20] sm:$0x1] }
  0x42   :  { %v393_v30 = vsel %vm283_vm3, %v392_v10, %v391_v25  ;;  %v346_v32 = vrot.slane %v221_v22, 4  ;;  %v348_v33 = vrot.slane %v222_v23, 3  ;;  %v350_v37 = vrot.slane %v223_v26, 2  ;;  %v202_v39 = vld [vmem:[#allocation2 + $0x24] sm:$0x1] }
  0x43   :  { %v395_v35 = vsel %vm286_vm4, %v394_v11, %v393_v30  ;;  %v341_v36 = vsel %vm274_vm0, %v340_v28, %v217_v12  ;;  %v352_v38 = vrot.slane %v224_v27, 1  ;;  %v203_v40 = vld [vmem:[#allocation2 + $0x28] sm:$0x1]  ;;  %v204_v43 = vld [vmem:[#allocation2 + $0x2c] sm:$0x1]  ;;  %v294_v51 = vrot.slane %v202_v39, 7 }
  0x44   :  { %v397_v41 = vsel %vm289_vm5, %v396_v15, %v395_v35  ;;  %v343_v42 = vsel %vm277_vm1, %v342_v29, %v341_v36  ;;  %v205_v45 = vld [vmem:[#allocation2 + $0x30] sm:$0x1]  ;;  %v206_v46 = vld [vmem:[#allocation2 + $0x34] sm:$0x1]  ;;  %v207_v49 = vld [vmem:[#allocation2 + $0x38] sm:$0x1] }
  0x45   :  { %v5899_v47 = vsel %vm292_vm6, %v398_v16, %v397_v41  ;;  %v345_v48 = vsel %vm280_vm2, %v344_v31, %v343_v42  ;;  %v208_v50 = vld [vmem:[#allocation2 + $0x3c] sm:$0x1]  ;;  %v296_v52 = vrot.slane %v203_v40, 6  ;;  %v298_v54 = vrot.slane %v204_v43, 5  ;;  %v241_v57 = vld [vmem:[#allocation2 + $0x3] sm:$0x1] }
  0x46   :  { %458 = vadd.xlane.f32.xlu2 %v5899_v47  ;;  %v347_v53 = vsel %vm283_vm3, %v346_v32, %v345_v48  ;;  %v300_v55 = vrot.slane %v205_v45, 4  ;;  %v302_v56 = vrot.slane %v206_v46, 3  ;;  %v295_v59 = vsel %vm274_vm0, %v294_v51, %v201_v34  ;;  %v242_v62 = vld [vmem:[#allocation2 + $0x7] sm:$0x1]  ;;  %v243_v63 = vld [vmem:[#allocation2 + $0xb] sm:$0x1] }
  0x47   :  { %v349_v58 = vsel %vm286_vm4, %v348_v33, %v347_v53  ;;  %v304_v60 = vrot.slane %v207_v49, 2  ;;  %v306_v61 = vrot.slane %v208_v50, 1  ;;  %v297_v1 = vsel %vm277_vm1, %v296_v52, %v295_v59  ;;  %v244_v3 = vld [vmem:[#allocation2 + $0xf] sm:$0x1]  ;;  %v245_v4 = vld [vmem:[#allocation2 + $0x13] sm:$0x1] }
  0x48   :  { %v351_v0 = vsel %vm289_vm5, %v350_v37, %v349_v58  ;;  %v246_v5 = vld [vmem:[#allocation2 + $0x17] sm:$0x1]  ;;  %v299_v7 = vsel %vm280_vm2, %v298_v54, %v297_v1  ;;  %v247_v8 = vld [vmem:[#allocation2 + $0x1b] sm:$0x1]  ;;  %v418_v9 = vrot.slane %v242_v62, 7  ;;  %v420_v10 = vrot.slane %v243_v63, 6 }
  0x49   :  { %v5909_v6 = vsel %vm292_vm6, %v352_v38, %v351_v0  ;;  %v301_v11 = vsel %vm283_vm3, %v300_v55, %v299_v7  ;;  %v248_v12 = vld [vmem:[#allocation2 + $0x1f] sm:$0x1]  ;;  %v422_v13 = vrot.slane %v244_v3, 5  ;;  %v424_v14 = vrot.slane %v245_v4, 4  ;;  %v250_v33 = vld [vmem:[#allocation2 + $0x27] sm:$0x1] }
  0x4a   :  { %454 = vadd.xlane.f32.xlu1 %v5909_v6  ;;  %v303_v15 = vsel %vm286_vm4, %v302_v56, %v301_v11  ;;  %v419_v16 = vsel %vm274_vm0, %v418_v9, %v241_v57  ;;  %v426_v17 = vrot.slane %v246_v5, 3  ;;  %v428_v20 = vrot.slane %v247_v8, 2  ;;  %v251_v35 = vld [vmem:[#allocation2 + $0x2b] sm:$0x1]  ;;  %v249_v37 = vld [vmem:[#allocation2 + $0x23] sm:$0x1] }
  0x4b   :  { %v305_v18 = vsel %vm289_vm5, %v304_v60, %v303_v15  ;;  %v421_v19 = vsel %vm277_vm1, %v420_v10, %v419_v16  ;;  %v430_v23 = vrot.slane %v248_v12, 1  ;;  %v5746_v29 = vmov 128.0   ;;  %v252_v38 = vld [vmem:[#allocation2 + $0x2f] sm:$0x1]  ;;  %v253_v43 = vld [vmem:[#allocation2 + $0x33] sm:$0x1] }
  0x4c   :  { %v5919_v21 = vsel %vm292_vm6, %v306_v61, %v305_v18  ;;  %v423_v22 = vsel %vm280_vm2, %v422_v13, %v421_v19  ;;  %5162 = vrcp.f32 %v5746_v29  ;;  %v432_v36 = vrot.slane %v250_v33, 7  ;;  %v254_v50 = vld [vmem:[#allocation2 + $0x37] sm:$0x1]  ;;  %v255_v55 = vld [vmem:[#allocation2 + $0x3b] sm:$0x1] }
  0x4d   :  { %450 = vadd.xlane.f32.xlu0 %v5919_v21  ;;  %v425_v25 = vsel %vm283_vm3, %v424_v14, %v423_v22  ;;  %v434_v39 = vrot.slane %v251_v35, 6  ;;  %v436_v45 = vrot.slane %v252_v38, 5  ;;  %v438_v51 = vrot.slane %v253_v43, 4  ;;  %v256_v60 = vld [vmem:[#allocation2 + $0x3f] sm:$0x1] }
  0x4e   :  { %v427_v26 = vsel %vm286_vm4, %v426_v17, %v425_v25  ;;  %v433_v41 = vsel %vm274_vm0, %v432_v36, %v249_v37  ;;  %v440_v56 = vrot.slane %v254_v50, 3  ;;  %v442_v61 = vrot.slane %v255_v55, 2  ;;  %v4461_v29 = vld [vmem:[#allocation8 + $0xa8] sm:$0xf]  ;;  %v4463_v33 = vld [vmem:[#allocation8 + $0xb4] sm:$0xf0] }
  0x4f   :  { %v429_v27 = vsel %vm289_vm5, %v428_v20, %v427_v26  ;;  %v435_v46 = vsel %vm277_vm1, %v434_v39, %v433_v41  ;;  %v444_v1 = vrot.slane %v256_v60, 1  ;;  %v4814_v35 = vld [vmem:[#allocation8 + $0xb8] sm:$0xf0]  ;;  %v4449_v38 = vld [vmem:[#allocation8 + $0x90] sm:$0xf] }
  0x50   :  { %v5927_v28 = vsel %vm292_vm6, %v430_v23, %v429_v27  ;;  %v437_v53 = vsel %vm280_vm2, %v436_v45, %v435_v46  ;;  %v4810_v39 = vld [vmem:[#allocation8 + $0x98] sm:$0xf0]  ;;  %v4457_v43 = vld [vmem:[#allocation8 + $0x98] sm:$0xf]  ;;  %v4811_v45 = vld [vmem:[#allocation8 + $0xa0] sm:$0xf0] }
  0x51   :  { %460 = vadd.xlane.f32.xlu2 %v5927_v28  ;;  %v439_v58 = vsel %vm283_vm3, %v438_v51, %v437_v53  ;;  %v4450_v41 = vor.u32 %v4810_v39, %v4449_v38  ;;  %v4437_v50 = vld [vmem:[#allocation8 + $0x78] sm:$0xf]  ;;  %v4807_v51 = vld [vmem:[#allocation8 + $0x80] sm:$0xf0]  ;;  %v4445_v55 = vld [vmem:[#allocation8 + $0x80] sm:$0xf] }
  0x52   :  { %v5163_v30 = vpop.eup %5162  ;;  %v441_v63 = vsel %vm286_vm4, %v440_v56, %v439_v58  ;;  %v4438_v53 = vor.u32 %v4807_v51, %v4437_v50  ;;  %v4808_v56 = vld [vmem:[#allocation8 + $0x88] sm:$0xf0]  ;;  %v4425_v60 = vld [vmem:[#allocation8 + $0x60] sm:$0xf]  ;;  %v4795_v38 = vld [vmem:[#allocation8 + $0x20] sm:$0xf0] }
  0x53   :  { %v465_v31 = vmul.f32 128.0, %v5163_v30  ;;  %vm469_vm7 = vweird.f32 %v5163_v30  ;;  %v443_v4 = vsel %vm289_vm5, %v442_v61, %v441_v63  ;;  %v4804_v61 = vld [vmem:[#allocation8 + $0x68] sm:$0xf0]  ;;  %v4794_v39 = vld [vmem:[#allocation8 + $0x1c] sm:$0xf] }
  0x54   :  { %v5950_v9 = vsel %vm292_vm6, %v444_v1, %v443_v4  ;;  %v4426_v63 = vor.u32 %v4804_v61, %v4425_v60  ;;  %v4433_v1 = vld [vmem:[#allocation8 + $0x68] sm:$0xf]  ;;  %v4377_v50 = vld [vmem:[#allocation8] sm:$0xf]  ;;  %v4792_v51 = vld [vmem:[#allocation8 + $0x8] sm:$0xf0] }
  0x55   :  { %v466_v32 = vsub.f32 1.0, %v465_v31  ;;  %v4812_v31 = vld [vmem:[#allocation8 + $0xac] sm:$0xf] }
  0x56   :  { %v4466_v36 = vor.u32 %v4812_v31, %v4463_v33  ;;  %v4409_v31 = vld [vmem:[#allocation8 + $0x38] sm:$0xf] }
  0x57   :  { %v467_v34 = vmul.f32 %v5163_v30, %v466_v32 }
  0x58   :  { %840 = vmatpush.bf16.msra.mxu1 %v4466_v36 }
  0x59   :  { %v468_v40 = vadd.f32 %v5163_v30, %v467_v34  ;;  %v4469_v34 = vld [vmem:[#allocation8 + $0xb0] sm:$0xf] }
  0x5a   :  { %v4470_v37 = vor.u32 %v4814_v35, %v4469_v34 }
  0x5b   :  { %v5932_v48 = vsel %vm469_vm7, %v5163_v30, %v468_v40  ;;  %v4813_v30 = vld [vmem:[#allocation8 + $0xb0] sm:$0xf0] }
  0x5c   :  { %v4462_v32 = vor.u32 %v4813_v30, %v4461_v29  ;;  %869 = vmatpush.bf16.msra.mxu2 %v4470_v37  ;;  %v4809_v40 = vld [vmem:[#allocation8 + $0x94] sm:$0xf]  ;;  %v4403_v30 = vld [vmem:[#allocation8 + $0x3c] sm:$0xf0]  ;;  %v4389_v37 = vld [vmem:[#allocation8 + $0x18] sm:$0xf] }
  0x5e   :  { %811 = vmatpush.bf16.msra.mxu0 %v4462_v32  ;;  %v4799_v32 = vld [vmem:[#allocation8 + $0x40] sm:$0xf0] }
  0x5f   :  { %v4410_v34 = vor.u32 %v4799_v32, %v4409_v31 }
  0x62   :  { %812 = vmatpush.bf16.msra.mxu0 %v4450_v41  ;;  %v4391_v41 = vld [vmem:[#allocation8 + $0x24] sm:$0xf0] }
  0x66   :  { %813 = vmatpush.bf16.msra.mxu0 %v4438_v53  ;;  %v4378_v53 = vor.u32 %v4792_v51, %v4377_v50 }
  0x6a   :  { %814 = vmatpush.bf16.msra.mxu0 %v4426_v63 }
  0xad   :  { %v457_v42 = vpop.xlane.xlu2 %456 }
  0xae   :  { %v475_v5 = vmul.f32 %v5932_v48, %v457_v42  ;;  %v4451_v42 = vld [vmem:[#allocation8 + $0x9c] sm:$0xf0] }
  0xaf   :  { %v4454_v46 = vor.u32 %v4809_v40, %v4451_v42  ;;  %v4390_v40 = vor.u32 %v4795_v38, %v4389_v37  ;;  %v4397_v42 = vld [vmem:[#allocation8 + $0x20] sm:$0xf] }
  0xb0   :  { %v5956_v12 = vsub.f32 %v5869_v44, %v475_v5 }
  0xb1   :  { %v453_v49 = vpop.xlane.xlu1 %452  ;;  %841 = vmatpush.bf16.msra.mxu1 %v4454_v46  ;;  %v4394_v46 = vor.u32 %v4794_v39, %v4391_v41 }
  0xb2   :  { %v473_v13 = vmul.f32 %v5932_v48, %v453_v49  ;;  %v491_v20 = vmul.f32 %v5956_v12, %v5956_v12  ;;  %v4458_v49 = vor.u32 %v4811_v45, %v4457_v43  ;;  %v4796_v43 = vld [vmem:[#allocation8 + $0x28] sm:$0xf0] }
  0xb4   :  { %v449_v52 = vpop.xlane.xlu0 %448  ;;  %v5967_v18 = vsub.f32 %v5879_v2, %v473_v13  ;;  %870 = vmatpush.bf16.msra.mxu2 %v4458_v49  ;;  %v4398_v49 = vor.u32 %v4796_v43, %v4397_v42 }
  0xb5   :  { %v471_v54 = vmul.f32 %v5932_v48, %v449_v52  ;;  %v4806_v52 = vld [vmem:[#allocation8 + $0x7c] sm:$0xf] }
  0xb6   :  { %v489_v25 = vmul.f32 %v5967_v18, %v5967_v18 }
  0xb7   :  { %v5937_v57 = vsub.f32 %v5889_v24, %v471_v54  ;;  %v4439_v54 = vld [vmem:[#allocation8 + $0x84] sm:$0xf0] }
  0xb8   :  { %v4442_v58 = vor.u32 %v4806_v52, %v4439_v54  ;;  %v4791_v52 = vld [vmem:[#allocation8 + $0x4] sm:$0xf]  ;;  %v4379_v54 = vld [vmem:[#allocation8 + $0xc] sm:$0xf0] }
  0xb9   :  { %v487_v59 = vmul.f32 %v5937_v57, %v5937_v57  ;;  %v459_v62 = vpop.xlane.xlu2 %458 }
  0xba   :  { %v476_v23 = vmul.f32 %v5932_v48, %v459_v62  ;;  %842 = vmatpush.bf16.msra.mxu1 %v4442_v58  ;;  %v4803_v62 = vld [vmem:[#allocation8 + $0x64] sm:$0xf]  ;;  %v4382_v58 = vor.u32 %v4791_v52, %v4379_v54 }
  0xbb   :  { %495 = vadd.xlane.f32.xlu0 %v487_v59  ;;  %v4446_v59 = vor.u32 %v4808_v56, %v4445_v55  ;;  %v4385_v55 = vld [vmem:[#allocation8 + $0x8] sm:$0xf]  ;;  %v4793_v56 = vld [vmem:[#allocation8 + $0x10] sm:$0xf0] }
  0xbc   :  { %v5980_v26 = vsub.f32 %v5899_v47, %v476_v23  ;;  %v4401_v23 = vld [vmem:[#allocation8 + $0x30] sm:$0xf] }
  0xbd   :  { %v455_v0 = vpop.xlane.xlu1 %454  ;;  %871 = vmatpush.bf16.msra.mxu2 %v4446_v59  ;;  %v4386_v59 = vor.u32 %v4793_v56, %v4385_v55  ;;  %v6012_v55 = vld [vmem:[#allocation7] ss:$0 sm:$0xff] }
  0xbe   :  { %v474_v3 = vmul.f32 %v5932_v48, %v455_v0  ;;  %v492_v27 = vmul.f32 %v5980_v26, %v5980_v26  ;;  %v4427_v0 = vld [vmem:[#allocation8 + $0x6c] sm:$0xf0] }
  0xbf   :  { %v4430_v4 = vor.u32 %v4803_v62, %v4427_v0 }
  0xc0   :  { %v5947_v7 = vsub.f32 %v5909_v6, %v474_v3  ;;  %v451_v8 = vpop.xlane.xlu0 %450  ;;  %v4805_v3 = vld [vmem:[#allocation8 + $0x70] sm:$0xf0] }
  0xc1   :  { %v472_v10 = vmul.f32 %v5932_v48, %v451_v8  ;;  %v4434_v5 = vor.u32 %v4805_v3, %v4433_v1  ;;  %843 = vmatpush.bf16.msra.mxu1 %v4430_v4  ;;  %v4413_v8 = vld [vmem:[#allocation8 + $0x48] sm:$0xf] }
  0xc2   :  { %v490_v11 = vmul.f32 %v5947_v7, %v5947_v7 }
  0xc3   :  { %v5960_v14 = vsub.f32 %v5919_v21, %v472_v10  ;;  %462 = vadd.xlane.f32.xlu0 %v5950_v9  ;;  %872 = vmatpush.bf16.msra.mxu2 %v4434_v5  ;;  %v4801_v10 = vld [vmem:[#allocation8 + $0x50] sm:$0xf0] }
  0xc4   :  { %501 = vadd.xlane.f32.xlu2 %v490_v11  ;;  %v461_v15 = vpop.xlane.xlu2 %460  ;;  %v4800_v11 = vld [vmem:[#allocation8 + $0x4c] sm:$0xf]  ;;  %v4414_v13 = vor.u32 %v4801_v10, %v4413_v8 }
  0xc5   :  { %v488_v16 = vmul.f32 %v5960_v14, %v5960_v14  ;;  %v477_v17 = vmul.f32 %v5932_v48, %v461_v15  ;;  %v4415_v15 = vld [vmem:[#allocation8 + $0x54] sm:$0xf0] }
  0xc6   :  { %815 = vmatpush.bf16.msra.mxu0 %v4414_v13 }
  0xc7   :  { %497 = vadd.xlane.f32.xlu1 %v488_v16  ;;  %v5970_v19 = vsub.f32 %v5927_v28, %v477_v17  ;;  %v4421_v16 = vld [vmem:[#allocation8 + $0x50] sm:$0xf]  ;;  %v4802_v17 = vld [vmem:[#allocation8 + $0x58] sm:$0xf0] }
  0xc9   :  { %v493_v22 = vmul.f32 %v5970_v19, %v5970_v19 }
  0xcb   :  { %503 = vadd.xlane.f32.xlu0 %v491_v20  ;;  %v4418_v20 = vor.u32 %v4800_v11, %v4415_v15 }
  0xcc   :  { %507 = vadd.xlane.f32.xlu2 %v493_v22  ;;  %v4422_v22 = vor.u32 %v4802_v17, %v4421_v16 }
  0xcd   :  { %844 = vmatpush.bf16.msra.mxu1 %v4418_v20 }
  0xce   :  { %873 = vmatpush.bf16.msra.mxu2 %v4422_v22 }
  0xcf   :  { %499 = vadd.xlane.f32.xlu1 %v489_v25  ;;  %v4798_v25 = vld [vmem:[#allocation8 + $0x38] sm:$0xf0] }
  0xd0   :  { %v4402_v29 = vor.u32 %v4798_v25, %v4401_v23 }
  0xd2   :  { %816 = vmatpush.bf16.msra.mxu0 %v4402_v29  ;;  %874 = vmatpush.bf16.msra.mxu2 %v4410_v34 }
  0xd6   :  { %817 = vmatpush.bf16.msra.mxu0 %v4390_v40  ;;  %875 = vmatpush.bf16.msra.mxu2 %v4398_v49 }
  0xd7   :  { %505 = vadd.xlane.f32.xlu1 %v492_v27  ;;  %v4797_v27 = vld [vmem:[#allocation8 + $0x34] sm:$0xf] }
  0xd8   :  { %v4406_v33 = vor.u32 %v4797_v27, %v4403_v30 }
  0xda   :  { %845 = vmatpush.bf16.msra.mxu1 %v4406_v33  ;;  %818 = vmatpush.bf16.msra.mxu0 %v4378_v53 }
  0xdb   :  { %876 = vmatpush.bf16.msra.mxu2 %v4386_v59 }
  0xde   :  { %846 = vmatpush.bf16.msra.mxu1 %v4394_v46 }
  0xe2   :  { %847 = vmatpush.bf16.msra.mxu1 %v4382_v58 }
 0x12e   :  { %v496_v35 = vpop.xlane.xlu0 %495 }
 0x12f   :  { %v511_v36 = vmul.f32 %v496_v35, %v5932_v48 }
 0x131   :  { %v519_v45 = vadd.f32 1e-05, %v511_v36 }
 0x133   :  { %5164 = vrsqrt.f32 %v519_v45  ;;  %vm533_vm9 = vweird.f32 %v519_v45 }
 0x136   :  { %v463_v61 = vpop.xlane.xlu0 %462 }
 0x137   :  { %v502_v60 = vpop.xlane.xlu2 %501  ;;  %v478_v63 = vmul.f32 %v5932_v48, %v463_v61 }
 0x138   :  { %v514_v62 = vmul.f32 %v502_v60, %v5932_v48 }
 0x139   :  { %v5165_v0 = vpop.eup %5164  ;;  %v5990_v3 = vsub.f32 %v5950_v9, %v478_v63 }
 0x13a   :  { %v5987_v1 = vadd.f32 1e-05, %v514_v62  ;;  %v528_v4 = vmul.f32 %v5165_v0, %v519_v45  ;;  %v498_v5 = vpop.xlane.xlu1 %497  ;;  %vm534_vm8 = vweird.f32 %v5165_v0  ;;  %v6008_v45 = vld [vmem:[#allocation5] ss:$0 sm:$0xff] }
 0x13b   :  { %v512_v8 = vmul.f32 %v498_v5, %v5932_v48  ;;  %v494_v10 = vmul.f32 %v5990_v3, %v5990_v3  ;;  %vm535_vm10 = vmor %vm533_vm9, %vm534_vm8 }
 0x13c   :  { %v529_v11 = vmul.f32 %v5165_v0, %v528_v4  ;;  %5166 = vrsqrt.f32 %v5987_v1  ;;  %vm563_vm0 = vweird.f32 %v5987_v1 }
 0x13d   :  { %v520_v13 = vadd.f32 1e-05, %v512_v8  ;;  %509 = vadd.xlane.f32.xlu0 %v494_v10 }
 0x13e   :  { %v530_v15 = vmul.f32 0.5, %v529_v11  ;;  %v504_v20 = vpop.xlane.xlu0 %503 }
 0x13f   :  { %5168 = vrsqrt.f32 %v520_v13  ;;  %v515_v29 = vmul.f32 %v504_v20, %v5932_v48  ;;  %vm543_vm11 = vweird.f32 %v520_v13 }
 0x140   :  { %v531_v16 = vsub.f32 1.5, %v530_v15 }
 0x141   :  { %v6002_v34 = vadd.f32 1e-05, %v515_v29 }
 0x142   :  { %v500_v17 = vpop.xlane.xlu1 %499  ;;  %v5996_v22 = vpop.eup %5166  ;;  %v532_v30 = vmul.f32 %v5165_v0, %v531_v16 }
 0x143   :  { %v513_v23 = vmul.f32 %v500_v17, %v5932_v48  ;;  %v558_v31 = vmul.f32 %v5996_v22, %v5987_v1  ;;  %vm564_vm1 = vweird.f32 %v5996_v22  ;;  %vm573_vm6 = vweird.f32 %v6002_v34 }
 0x144   :  { %v536_v35 = vsel %vm535_vm10, %v5165_v0, %v532_v30  ;;  %vm565_vm3 = vmor %vm563_vm0, %vm564_vm1  ;;  %vm1244_vm0 = vcmask 261120   ;;  %vm1715_vm1 = vcmask 130048  }
 0x145   :  { %v5169_v25 = vpop.eup %5168  ;;  %v521_v27 = vadd.f32 1e-05, %v513_v23  ;;  %v559_v36 = vmul.f32 %v5996_v22, %v558_v31  ;;  %v607_v42 = vmul.f32 %v536_v35, %v5937_v57 }
 0x146   :  { %v538_v32 = vmul.f32 %v5169_v25, %v520_v13  ;;  %vm544_vm12 = vweird.f32 %v5169_v25 }
 0x147   :  { %5170 = vrsqrt.f32 %v521_v27  ;;  %vm545_vm13 = vmor %vm543_vm11, %vm544_vm12  ;;  %v560_v46 = vmul.f32 0.5, %v559_v36  ;;  %v619_v54 = vmul.f32 %v6008_v45, %v607_v42  ;;  %vm553_vm14 = vweird.f32 %v521_v27  ;;  %v508_v42 = vpop.xlane.xlu2 %507 }
 0x148   :  { %v539_v33 = vmul.f32 %v5169_v25, %v538_v32  ;;  %5172 = vrsqrt.f32 %v6002_v34 }
 0x149   :  { %v561_v56 = vsub.f32 1.5, %v560_v46 }
 0x14a   :  { %v540_v37 = vmul.f32 0.5, %v539_v33  ;;  %v506_v38 = vpop.xlane.xlu1 %505 }
 0x14b   :  { %v516_v39 = vmul.f32 %v506_v38, %v5932_v48  ;;  %v562_v0 = vmul.f32 %v5996_v22, %v561_v56 }
 0x14c   :  { %v541_v40 = vsub.f32 1.5, %v540_v37 }
 0x14d   :  { %v5171_v41 = vpop.eup %5170  ;;  %v524_v43 = vadd.f32 1e-05, %v516_v39  ;;  %v566_v13 = vsel %vm565_vm3, %v5996_v22, %v562_v0  ;;  %vm2661_vm3 = vcmask 785408  }
 0x14e   :  { %v542_v49 = vmul.f32 %v5169_v25, %v541_v40  ;;  %v548_v50 = vmul.f32 %v5171_v41, %v521_v27  ;;  %vm554_vm15 = vweird.f32 %v5171_v41  ;;  %v5173_v58 = vpop.eup %5172  ;;  %v610_v20 = vmul.f32 %v566_v13, %v5947_v7 }
 0x14f   :  { %5174 = vrsqrt.f32 %v524_v43  ;;  %vm6017_vm2 = vmor %vm553_vm14, %vm554_vm15  ;;  %v568_v5 = vmul.f32 %v5173_v58, %v6002_v34  ;;  %vm583_vm4 = vweird.f32 %v524_v43  ;;  %vm574_vm7 = vweird.f32 %v5173_v58 }
 0x150   :  { %v546_v51 = vsel %vm545_vm13, %v5169_v25, %v542_v49  ;;  %v549_v52 = vmul.f32 %v5171_v41, %v548_v50  ;;  %v622_v29 = vmul.f32 %v6008_v45, %v610_v20  ;;  %vm575_vm9 = vmor %vm573_vm6, %vm574_vm7 }
 0x151   :  { %v608_v53 = vmul.f32 %v546_v51, %v5960_v14  ;;  %v631_v14 = vadd.f32 %v6012_v55, %v619_v54  ;;  %v569_v15 = vmul.f32 %v5173_v58, %v568_v5 }
 0x152   :  { %v550_v57 = vmul.f32 0.5, %v549_v52 }
 0x153   :  { %v620_v59 = vmul.f32 %v6008_v45, %v608_v53  ;;  %v570_v23 = vmul.f32 0.5, %v569_v15 }
 0x154   :  { %v551_v60 = vsub.f32 1.5, %v550_v57 }
 0x155   :  { %v5175_v61 = vpop.eup %5174  ;;  %v632_v63 = vadd.f32 %v6012_v55, %v620_v59  ;;  %v571_v30 = vsub.f32 1.5, %v570_v23 }
 0x156   :  { %v552_v4 = vmul.f32 %v5171_v41, %v551_v60  ;;  %v578_v8 = vmul.f32 %v5175_v61, %v524_v43  ;;  %vm584_vm5 = vweird.f32 %v5175_v61  ;;  %v517_v43 = vmul.f32 %v508_v42, %v5932_v48 }
 0x157   :  { %v639_v1 = vpack.c.bf16 %v632_v63, %v631_v14  ;;  %vm585_vm8 = vmor %vm583_vm4, %vm584_vm5  ;;  %v572_v32 = vmul.f32 %v5173_v58, %v571_v30 }
 0x158   :  { %v556_v10 = vsel %vm6017_vm2, %v5171_v41, %v552_v4  ;;  %v579_v11 = vmul.f32 %v5175_v61, %v578_v8  ;;  %v525_v46 = vadd.f32 1e-05, %v517_v43  ;;  %vm2652_vm2 = vcmask 523264  }
 0x159   :  { %819 = vmatmul.bf16.vlgmr.msra.gmra.mxu0 %v639_v1  ;;  %848 = vmatmul.bf16.vlgmr.msra.gmra.mxu1 %v639_v1  ;;  %v609_v16 = vmul.f32 %v556_v10, %v5967_v18  ;;  %v634_v18 = vadd.f32 %v6012_v55, %v622_v29  ;;  %v576_v35 = vsel %vm575_vm9, %v5173_v58, %v572_v32 }
 0x15a   :  { %877 = vmatmul.bf16.vlgmr.msra.gmra.mxu2 %v639_v1  ;;  %v580_v17 = vmul.f32 0.5, %v579_v11  ;;  %v611_v37 = vmul.f32 %v576_v35, %v5956_v12  ;;  %5176 = vrsqrt.f32 %v525_v46  ;;  %vm593_vm10 = vweird.f32 %v525_v46 }
 0x15b   :  { %v621_v25 = vmul.f32 %v6008_v45, %v609_v16 }
 0x15c   :  { %v581_v27 = vsub.f32 1.5, %v580_v17  ;;  %v623_v34 = vmul.f32 %v6008_v45, %v611_v37 }
 0x15d   :  { %v633_v31 = vadd.f32 %v6012_v55, %v621_v25 }
 0x15e   :  { %v582_v22 = vmul.f32 %v5175_v61, %v581_v27  ;;  %v635_v40 = vadd.f32 %v6012_v55, %v623_v34 }
 0x15f   :  { %v640_v7 = vpack.c.bf16 %v634_v18, %v633_v31 }
 0x160   :  { %v586_v33 = vsel %vm585_vm8, %v5175_v61, %v582_v22 }
 0x161   :  { %v612_v36 = vmul.f32 %v586_v33, %v5980_v26  ;;  %v5177_v26 = vpop.eup %5176 }
 0x162   :  { %v588_v49 = vmul.f32 %v5177_v26, %v525_v46  ;;  %vm594_vm11 = vweird.f32 %v5177_v26 }
 0x163   :  { %v624_v38 = vmul.f32 %v6008_v45, %v612_v36  ;;  %vm595_vm12 = vmor %vm593_vm10, %vm594_vm11 }
 0x164   :  { %v589_v12 = vmul.f32 %v5177_v26, %v588_v49 }
 0x165   :  { %v636_v39 = vadd.f32 %v6012_v55, %v624_v38 }
 0x166   :  { %v590_v53 = vmul.f32 0.5, %v589_v12 }
 0x167   :  { %v641_v41 = vpack.c.bf16 %v636_v39, %v635_v40 }
 0x168   :  { %v591_v54 = vsub.f32 1.5, %v590_v53 }
 0x169   :  { %824 = vmatmul.bf16.gmra.mxu0 %v640_v7  ;;  %853 = vmatmul.bf16.gmra.mxu1 %v640_v7 }
 0x16a   :  { %882 = vmatmul.bf16.gmra.mxu2 %v640_v7  ;;  %v592_v57 = vmul.f32 %v5177_v26, %v591_v54 }
 0x16c   :  { %v596_v60 = vsel %vm595_vm12, %v5177_v26, %v592_v57 }
 0x16d   :  { %v613_v14 = vmul.f32 %v596_v60, %v5970_v19  ;;  %v675_v19 = vld [vmem:[%s7076_s4] sm:$0x7]  ;;  %s5747_s4 = smov 96  }
 0x16e   :  { %v6052_v16 = vperm.slane %v675_v19, 1  ;;  %v6057_v20 = vperm.slane %v675_v19, 2 }
 0x16f   :  { %v625_v5 = vmul.f32 %v6008_v45, %v613_v14 }
 0x171   :  { %v637_v1 = vadd.f32 %v6012_v55, %v625_v5 }
 0x179   :  { %829 = vmatmul.bf16.gmra.mxu0 %v641_v41  ;;  %858 = vmatmul.bf16.gmra.mxu1 %v641_v41 }
 0x17a   :  { %887 = vmatmul.bf16.gmra.mxu2 %v641_v41 }
 0x1b0   :  { %v510_v50 = vpop.xlane.xlu0 %509 }
 0x1b1   :  { %v518_v51 = vmul.f32 %v510_v50, %v5932_v48 }
 0x1b3   :  { %v526_v52 = vadd.f32 1e-05, %v518_v51 }
 0x1b5   :  { %5178 = vrsqrt.f32 %v526_v52  ;;  %vm603_vm14 = vweird.f32 %v526_v52 }
 0x1bb   :  { %v5179_v56 = vpop.eup %5178 }
 0x1bc   :  { %v598_v58 = vmul.f32 %v5179_v56, %v526_v52  ;;  %vm604_vm13 = vweird.f32 %v5179_v56 }
 0x1bd   :  { %vm605_vm15 = vmor %vm603_vm14, %vm604_vm13 }
 0x1be   :  { %v599_v59 = vmul.f32 %v5179_v56, %v598_v58 }
 0x1c0   :  { %v600_v61 = vmul.f32 0.5, %v599_v59 }
 0x1c2   :  { %v601_v62 = vsub.f32 1.5, %v600_v61 }
 0x1c4   :  { %v602_v63 = vmul.f32 %v5179_v56, %v601_v62 }
 0x1c6   :  { %v606_v0 = vsel %vm605_vm15, %v5179_v56, %v602_v63 }
 0x1c7   :  { %v614_v4 = vmul.f32 %v606_v0, %v5990_v3  ;;  %v6054_v3 = vperm.slane %v675_v19, 0 }
 0x1c9   :  { %v626_v8 = vmul.f32 %v6008_v45, %v614_v4 }
 0x1cb   :  { %v638_v10 = vadd.f32 %v6012_v55, %v626_v8 }
 0x1cd   :  { %v642_v11 = vpack.c.bf16 %v638_v10, %v637_v1 }
 0x1cf   :  { %834 = vmatmul.bf16.gmra.mxu0 %v642_v11  ;;  %863 = vmatmul.bf16.gmra.mxu1 %v642_v11 }
 0x1d0   :  { %892 = vmatmul.bf16.gmra.mxu2 %v642_v11 }
 0x1d6   :  { %v820_v13 = vpop.f32.mrf.mxu0  ;;  %v849_v15 = vpop.f32.mrf.mxu1 }
 0x1d7   :  { %v850_v45 = vadd.f32 %v849_v15, %v6052_v16  ;;  %v821_v25 = vadd.f32 %v820_v13, %v6054_v3 }
 0x1d9   :  { %v1090_v30 = vpack.c.bf16 %v850_v45, %v850_v45  ;;  %v978_v41 = vpack.c.bf16 %v821_v25, %v821_v25 }
 0x1db   :  { %v1241_v7 = vunpack.c.l.b16 %v1090_v30  ;;  %v1236_v51 = vunpack.c.l.b16 %v978_v41 }
 0x1dd   :  { %v878_v17 = vpop.f32.mrf.mxu2 }
 0x1de   :  { %v822_v55 = vpop.f32.mrf.mxu0  ;;  %v851_v23 = vpop.f32.mrf.mxu1  ;;  %v879_v18 = vadd.f32 %v878_v17, %v6057_v20 }
 0x1df   :  { %v823_v27 = vadd.f32 %v822_v55, %v6054_v3  ;;  %v852_v29 = vadd.f32 %v851_v23, %v6052_v16 }
 0x1e0   :  { %v1202_v36 = vpack.c.bf16 %v879_v18, %v879_v18 }
 0x1e1   :  { %v4916_v31 = vpack.i.bf16 %v852_v29, %v850_v45  ;;  %v4921_v22 = vpack.i.bf16 %v823_v27, %v821_v25  ;;  %v1091_v32 = vpack.c.bf16 %v852_v29, %v852_v29  ;;  %v979_v37 = vpack.c.bf16 %v823_v27, %v823_v27 }
 0x1e2   :  { %v6068_v46 = vunpack.c.l.b16 %v1202_v36 }
 0x1e3   :  { %4917 = vrot.lane.b32.xlu1 %v4916_v31, %s5747_s4  ;;  %4922 = vrot.lane.b32.xlu2 %v4921_v22, %s5747_s4  ;;  %v1242_v33 = vunpack.c.l.b16 %v1091_v32  ;;  %v1237_v49 = vunpack.c.l.b16 %v979_v37 }
 0x1e4   :  { %4932 = vrot.lane.b32.xlu0 %v4921_v22, %s5737_s18 }
 0x1e5   :  { %v880_v35 = vpop.f32.mrf.mxu2  ;;  %v1243_v40 = vpack.c.b16 %v1242_v33, %v1241_v7  ;;  %v1238_v57 = vpack.c.b16 %v1237_v49, %v1236_v51 }
 0x1e6   :  { %v881_v38 = vadd.f32 %v880_v35, %v6057_v20  ;;  %v825_v34 = vpop.f32.mrf.mxu0  ;;  %v854_v39 = vpop.f32.mrf.mxu1 }
 0x1e7   :  { %v1249_v43 = vsel %vm1244_vm0, %v1243_v40, 0  ;;  %v855_v50 = vadd.f32 %v854_v39, %v6052_v16  ;;  %v826_v58 = vadd.f32 %v825_v34, %v6054_v3 }
 0x1e8   :  { %v1203_v42 = vpack.c.bf16 %v881_v38, %v881_v38  ;;  %1258 = vmatpush.bf16.xpose.msrb.mxu0 %v1249_v43  ;;  %v4946_v26 = vpack.i.bf16 %v881_v38, %v879_v18 }
 0x1e9   :  { %v1092_v61 = vpack.c.bf16 %v855_v50, %v855_v50  ;;  %v980_v17 = vpack.c.bf16 %v826_v58, %v826_v58 }
 0x1ea   :  { %v6070_v12 = vunpack.c.l.b16 %v1203_v42 }
 0x1eb   :  { %4937 = vrot.lane.b32.xlu1 %v4916_v31, %s5748_s20  ;;  %4927 = vrot.lane.b32.xlu2 %v4916_v31, %s5737_s18  ;;  %v1272_v4 = vunpack.c.l.b16 %v1092_v61  ;;  %v1267_v31 = vunpack.c.l.b16 %v980_v17 }
 0x1ec   :  { %4947 = vrot.lane.b32.xlu0 %v4946_v26, %s5747_s4  ;;  %v2109_v52 = vpack.c.b16 %v6070_v12, %v6068_v46 }
 0x1ed   :  { %v883_v53 = vpop.f32.mrf.mxu2 }
 0x1ee   :  { %v827_v54 = vpop.f32.mrf.mxu0  ;;  %v856_v56 = vpop.f32.mrf.mxu1  ;;  %v884_v0 = vadd.f32 %v883_v53, %v6057_v20 }
 0x1ef   :  { %v828_v59 = vadd.f32 %v827_v54, %v6054_v3  ;;  %v857_v60 = vadd.f32 %v856_v56, %v6052_v16  ;;  %4471 = vmatmul.msk.bf16.vlgmr.msrb.gmra.mxu0 %vm1244_vm0, %v1238_v57 }
 0x1f0   :  { %v1204_v11 = vpack.c.bf16 %v884_v0, %v884_v0 }
 0x1f1   :  { %v4956_v62 = vpack.i.bf16 %v828_v59, %v826_v58  ;;  %v4951_v14 = vpack.i.bf16 %v857_v60, %v855_v50  ;;  %v1093_v63 = vpack.c.bf16 %v857_v60, %v857_v60  ;;  %v981_v10 = vpack.c.bf16 %v828_v59, %v828_v59 }
 0x1f2   :  { %v6090_v27 = vunpack.c.l.b16 %v1204_v11 }
 0x1f3   :  { %4957 = vrot.lane.b32.xlu1 %v4956_v62, %s5747_s4  ;;  %4942 = vrot.lane.b32.xlu2 %v4921_v22, %s5748_s20  ;;  %v1273_v5 = vunpack.c.l.b16 %v1093_v63  ;;  %v1268_v25 = vunpack.c.l.b16 %v981_v10 }
 0x1f4   :  { %4952 = vrot.lane.b32.xlu0 %v4951_v14, %s5747_s4 }
 0x1f5   :  { %v885_v8 = vpop.f32.mrf.mxu2  ;;  %v1274_v1 = vpack.c.b16 %v1273_v5, %v1272_v4  ;;  %v1269_v32 = vpack.c.b16 %v1268_v25, %v1267_v31 }
 0x1f6   :  { %v886_v19 = vadd.f32 %v885_v8, %v6057_v20  ;;  %v830_v13 = vpop.f32.mrf.mxu0  ;;  %v859_v15 = vpop.f32.mrf.mxu1 }
 0x1f7   :  { %v1279_v45 = vsel %vm1244_vm0, %v1274_v1, 0  ;;  %v860_v30 = vadd.f32 %v859_v15, %v6052_v16  ;;  %v831_v39 = vadd.f32 %v830_v13, %v6054_v3 }
 0x1f8   :  { %v1205_v55 = vpack.c.bf16 %v886_v19, %v886_v19  ;;  %1288 = vmatpush.bf16.xpose.msra.mxu3 %v1279_v45  ;;  %v6088_v23 = vpack.i.bf16 %v886_v19, %v884_v0 }
 0x1f9   :  { %v1094_v36 = vpack.c.bf16 %v860_v30, %v860_v30  ;;  %v982_v53 = vpack.c.bf16 %v831_v39, %v831_v39 }
 0x1fa   :  { %v6092_v29 = vunpack.c.l.b16 %v1205_v55 }
 0x1fb   :  { %4972 = vrot.lane.b32.xlu1 %v4946_v26, %s5748_s20  ;;  %4962 = vrot.lane.b32.xlu2 %v4951_v14, %s5737_s18  ;;  %v1302_v40 = vunpack.c.l.b16 %v1094_v36  ;;  %v1297_v61 = vunpack.c.l.b16 %v982_v53 }
 0x1fc   :  { %4977 = vrot.lane.b32.xlu0 %v4956_v62, %s5737_s18  ;;  %v2137_v22 = vpack.c.b16 %v6092_v29, %v6090_v27 }
 0x1fd   :  { %v888_v18 = vpop.f32.mrf.mxu2 }
 0x1fe   :  { %v832_v7 = vpop.f32.mrf.mxu0  ;;  %v861_v33 = vpop.f32.mrf.mxu1  ;;  %v889_v34 = vadd.f32 %v888_v18, %v6057_v20 }
 0x1ff   :  { %v862_v35 = vadd.f32 %v861_v33, %v6052_v16  ;;  %4472 = vmatmul.msk.bf16.vlgmr.msra.gmra.mxu3 %vm1244_vm0, %v1269_v32  ;;  %v833_v37 = vadd.f32 %v832_v7, %v6054_v3 }
 0x200   :  { %v1206_v50 = vpack.c.bf16 %v889_v34, %v889_v34 }
 0x201   :  { %v1095_v38 = vpack.c.bf16 %v862_v35, %v862_v35  ;;  %v983_v42 = vpack.c.bf16 %v833_v37, %v833_v37  ;;  %v5006_v58 = vpack.i.bf16 %v833_v37, %v831_v39  ;;  %v5001_v63 = vpack.i.bf16 %v862_v35, %v860_v30 }
 0x203   :  { %4987 = vrot.lane.b32.xlu1 %v4956_v62, %s5748_s20  ;;  %4967 = vrot.lane.b32.xlu2 %v4946_v26, %s5737_s18  ;;  %v1303_v41 = vunpack.c.l.b16 %v1095_v38  ;;  %v1298_v59 = vunpack.c.l.b16 %v983_v42  ;;  %v6112_v26 = vunpack.c.l.b16 %v1206_v50 }
 0x204   :  { %4982 = vrot.lane.b32.xlu0 %v4951_v14, %s5748_s20 }
 0x205   :  { %v890_v43 = vpop.f32.mrf.mxu2  ;;  %v1304_v49 = vpack.c.b16 %v1303_v41, %v1302_v40  ;;  %v1299_v14 = vpack.c.b16 %v1298_v59, %v1297_v61 }
 0x206   :  { %v891_v51 = vadd.f32 %v890_v43, %v6057_v20 }
 0x207   :  { %v1309_v54 = vsel %vm1244_vm0, %v1304_v49, 0 }
 0x208   :  { %v1207_v56 = vpack.c.bf16 %v891_v51, %v891_v51  ;;  %1318 = vmatpush.bf16.xpose.msrb.mxu3 %v1309_v54  ;;  %v6110_v57 = vpack.i.bf16 %v891_v51, %v889_v34 }
 0x20a   :  { %v6114_v60 = vunpack.c.l.b16 %v1207_v56 }
 0x20b   :  { %4992 = vrot.lane.b32.xlu1 %v6088_v23, %s5747_s4  ;;  %5007 = vrot.lane.b32.xlu2 %v5006_v58, %s5747_s4 }
 0x20c   :  { %4997 = vrot.lane.b32.xlu0 %v6088_v23, %s5737_s18  ;;  %v2165_v62 = vpack.c.b16 %v6114_v60, %v6112_v26 }
 0x20f   :  { %4473 = vmatmul.msk.bf16.vlgmr.msrb.gmra.mxu3 %vm1244_vm0, %v1299_v14 }
 0x213   :  { %5002 = vrot.lane.b32.xlu1 %v5001_v63, %s5747_s4  ;;  %5012 = vrot.lane.b32.xlu2 %v5001_v63, %s5737_s18 }
 0x214   :  { %5017 = vrot.lane.b32.xlu0 %v5006_v58, %s5737_s18 }
 0x21b   :  { %5022 = vrot.lane.b32.xlu1 %v5001_v63, %s5748_s20  ;;  %5027 = vrot.lane.b32.xlu2 %v5006_v58, %s5748_s20 }
 0x223   :  { %5032 = vrot.lane.b32.xlu2 %v6110_v57, %s5747_s4 }
 0x23d   :  { %v6131_v0 = vpop.permute.xlu2 %4922 }
 0x245   :  { %v4928_v4 = vpop.permute.xlu2 %4927 }
 0x246   :  { %v4930_v5 = vunpack.i.h.bf16 %v4928_v4  ;;  %v4929_v8 = vunpack.i.l.bf16 %v4928_v4 }
 0x248   :  { %v1107_v1 = vpack.c.bf16 %v4930_v5, %v4930_v5  ;;  %v1106_v10 = vpack.c.bf16 %v4929_v8, %v4929_v8 }
 0x24a   :  { %v1483_v11 = vunpack.c.l.b16 %v1107_v1  ;;  %v1482_v19 = vunpack.c.l.b16 %v1106_v10 }
 0x24c   :  { %v1484_v13 = vpack.c.b16 %v1483_v11, %v1482_v19  ;;  %v835_v15 = vpop.f32.mrf.mxu0  ;;  %v864_v45 = vpop.f32.mrf.mxu1 }
 0x24d   :  { %v4943_v55 = vpop.permute.xlu2 %4942  ;;  %v865_v32 = vadd.f32 %v864_v45, %v6052_v16  ;;  %v836_v43 = vadd.f32 %v835_v15, %v6054_v3 }
 0x24e   :  { %v1489_v17 = vsel %vm1244_vm0, %v1484_v13, 0  ;;  %v4945_v59 = vunpack.i.h.bf16 %v4943_v55  ;;  %v4944_v1 = vunpack.i.l.bf16 %v4943_v55 }
 0x24f   :  { %1498 = vmatpush.bf16.xpose.msrb.mxu2 %v1489_v17  ;;  %v1096_v49 = vpack.c.bf16 %v865_v32, %v865_v32 }
 0x250   :  { %v1003_v17 = vpack.c.bf16 %v4945_v59, %v4945_v59 }
 0x251   :  { %v1332_v10 = vunpack.c.l.b16 %v1096_v49 }
 0x253   :  { %v893_v25 = vpop.f32.mrf.mxu2 }
 0x254   :  { %v866_v30 = vpop.f32.mrf.mxu1  ;;  %v837_v18 = vpop.f32.mrf.mxu0  ;;  %v6151_v55 = vadd.f32 %v893_v25, %v6057_v20 }
 0x255   :  { %v4918_v31 = vpop.permute.xlu1 %4917  ;;  %v867_v38 = vadd.f32 %v866_v30, %v6052_v16  ;;  %v838_v40 = vadd.f32 %v837_v18, %v6054_v3  ;;  %v6140_v61 = vpop.permute.xlu2 %4962  ;;  %v984_v30 = vpack.c.bf16 %v836_v43, %v836_v43 }
 0x256   :  { %v4920_v7 = vunpack.i.h.bf16 %v4918_v31  ;;  %v4919_v33 = vunpack.i.l.bf16 %v4918_v31  ;;  %v4933_v35 = vpop.permute.xlu0 %4932 }
 0x257   :  { %v4935_v36 = vunpack.i.h.bf16 %v4933_v35  ;;  %v4934_v37 = vunpack.i.l.bf16 %v4933_v35  ;;  %v5046_v53 = vpack.i.bf16 %v867_v38, %v865_v32  ;;  %v6138_v58 = vpack.i.bf16 %v838_v40, %v836_v43 }
 0x258   :  { %v1099_v34 = vpack.c.bf16 %v4920_v7, %v4920_v7  ;;  %v1098_v39 = vpack.c.bf16 %v4919_v33, %v4919_v33  ;;  %v1097_v63 = vpack.c.bf16 %v867_v38, %v867_v38  ;;  %v985_v13 = vpack.c.bf16 %v838_v40, %v838_v40 }
 0x259   :  { %v995_v41 = vpack.c.bf16 %v4935_v36, %v4935_v36  ;;  %v994_v42 = vpack.c.bf16 %v4934_v37, %v4934_v37  ;;  %5047 = vrot.lane.b32.xlu2 %v5046_v53, %s5737_s18  ;;  %5037 = vrot.lane.b32.xlu0 %v5046_v53, %s5747_s4  ;;  %v1002_v36 = vpack.c.bf16 %v4944_v1, %v4944_v1 }
 0x25a   :  { %v1363_v54 = vunpack.c.l.b16 %v1099_v34  ;;  %v1362_v56 = vunpack.c.l.b16 %v1098_v39  ;;  %5042 = vrot.lane.b32.xlu1 %v6138_v58, %s5747_s4  ;;  %v1333_v11 = vunpack.c.l.b16 %v1097_v63  ;;  %v1328_v38 = vunpack.c.l.b16 %v985_v13 }
 0x25b   :  { %v1478_v50 = vunpack.c.l.b16 %v995_v41  ;;  %v1477_v51 = vunpack.c.l.b16 %v994_v42  ;;  %v895_v8 = vpop.f32.mrf.mxu2  ;;  %v1327_v42 = vunpack.c.l.b16 %v984_v30 }
 0x25c   :  { %v1364_v19 = vpack.c.b16 %v1363_v54, %v1362_v56  ;;  %v6148_v31 = vadd.f32 %v895_v8, %v6057_v20  ;;  %v1334_v18 = vpack.c.b16 %v1333_v11, %v1332_v10  ;;  %v1598_v54 = vunpack.c.l.b16 %v1003_v17 }
 0x25d   :  { %v1479_v16 = vpack.c.b16 %v1478_v50, %v1477_v51  ;;  %v4938_v14 = vpop.permute.xlu1 %4937  ;;  %v1597_v56 = vunpack.c.l.b16 %v1002_v36  ;;  %v6165_v59 = vpop.permute.xlu2 %4967  ;;  %v4925_v10 = vunpack.i.h.bf16 %v6131_v0  ;;  %v4924_v11 = vunpack.i.l.bf16 %v6131_v0 }
 0x25e   :  { %v4940_v4 = vunpack.i.h.bf16 %v4938_v14  ;;  %v4939_v3 = vunpack.i.l.bf16 %v4938_v14  ;;  %v4948_v5 = vpop.permute.xlu0 %4947  ;;  %v1339_v37 = vsel %vm1244_vm0, %v1334_v18, 0  ;;  %v1369_v39 = vsel %vm1244_vm0, %v1364_v19, 0 }
 0x25f   :  { %4479 = vmatmul.msk.bf16.vlgmr.msrb.gmra.mxu2 %vm1244_vm0, %v1479_v16  ;;  %v4950_v33 = vunpack.i.h.bf16 %v4948_v5  ;;  %v4949_v35 = vunpack.i.l.bf16 %v4948_v5  ;;  %1348 = vmatpush.bf16.xpose.msra.mxu3 %v1339_v37  ;;  %v6161_v41 = vpack.i.bf16 %v6148_v31, %v6151_v55  ;;  %v1329_v16 = vpack.c.b16 %v1328_v38, %v1327_v42 }
 0x260   :  { %v1115_v15 = vpack.c.bf16 %v4940_v4, %v4940_v4  ;;  %v1114_v45 = vpack.c.bf16 %v4939_v3, %v4939_v3  ;;  %v4965_v4 = vunpack.i.h.bf16 %v6140_v61  ;;  %v4964_v5 = vunpack.i.l.bf16 %v6140_v61 }
 0x261   :  { %5052 = vrot.lane.b32.xlu0 %v6138_v58, %s5737_s18  ;;  %v1211_v20 = vpack.c.bf16 %v4950_v33, %v4950_v33  ;;  %v1210_v25 = vpack.c.bf16 %v4949_v35, %v4949_v35  ;;  %v1599_v19 = vpack.c.b16 %v1598_v54, %v1597_v56  ;;  %v987_v17 = vpack.c.bf16 %v4925_v10, %v4925_v10 }
 0x262   :  { %v1603_v32 = vunpack.c.l.b16 %v1115_v15  ;;  %v1602_v7 = vunpack.c.l.b16 %v1114_v45  ;;  %5057 = vrot.lane.b32.xlu1 %v5046_v53, %s5748_s20  ;;  %v1108_v61 = vpack.c.bf16 %v4964_v5, %v4964_v5  ;;  %v986_v30 = vpack.c.bf16 %v4924_v11, %v4924_v11 }
 0x263   :  { %v2220_v53 = vunpack.c.l.b16 %v1211_v20  ;;  %v2219_v3 = vunpack.c.l.b16 %v1210_v25 }
 0x264   :  { %v1604_v34 = vpack.c.b16 %v1603_v32, %v1602_v7  ;;  %v1512_v32 = vunpack.c.l.b16 %v1108_v61  ;;  %v1358_v7 = vunpack.c.l.b16 %v987_v17  ;;  %v1357_v33 = vunpack.c.l.b16 %v986_v30 }
 0x265   :  { %v6155_v40 = vpop.permute.xlu1 %4957  ;;  %v2221_v46 = vpack.c.b16 %v2220_v53, %v2219_v3  ;;  %v5008_v0 = vpop.permute.xlu2 %5007 }
 0x266   :  { %v4953_v43 = vpop.permute.xlu0 %4952  ;;  %v1609_v51 = vsel %vm1244_vm0, %v1604_v34, 0  ;;  %4474 = vmatmul.msk.bf16.vlgmr.msra.gmra.mxu3 %vm1244_vm0, %v1329_v16  ;;  %v1359_v37 = vpack.c.b16 %v1358_v7, %v1357_v33  ;;  %v4960_v20 = vunpack.i.h.bf16 %v6155_v40  ;;  %v4959_v25 = vunpack.i.l.bf16 %v6155_v40 }
 0x267   :  { %1378 = vmatpush.bf16.xpose.msrb.mxu3 %v1369_v39  ;;  %v4955_v49 = vunpack.i.h.bf16 %v4953_v43  ;;  %v4954_v50 = vunpack.i.l.bf16 %v4953_v43  ;;  %1618 = vmatpush.bf16.xpose.msra.mxu2 %v1609_v51  ;;  %v5010_v61 = vunpack.i.h.bf16 %v5008_v0 }
 0x268   :  { %v989_v56 = vpack.c.bf16 %v4960_v20, %v4960_v20  ;;  %v988_v16 = vpack.c.bf16 %v4959_v25, %v4959_v25 }
 0x269   :  { %v1101_v14 = vpack.c.bf16 %v4955_v49, %v4955_v49  ;;  %v1100_v63 = vpack.c.bf16 %v4954_v50, %v4954_v50  ;;  %5062 = vrot.lane.b32.xlu0 %v6138_v58, %s5748_s20 }
 0x26b   :  { %v1393_v8 = vunpack.c.l.b16 %v1101_v14  ;;  %v1392_v1 = vunpack.c.l.b16 %v1100_v63 }
 0x26c   :  { %v6191_v14 = vpop.f32.mrf.mxu0 }
 0x26d   :  { %v1394_v13 = vpack.c.b16 %v1393_v8, %v1392_v1  ;;  %v6175_v15 = vpop.permute.xlu1 %4972  ;;  %v5013_v42 = vpop.permute.xlu2 %5012  ;;  %v1388_v8 = vunpack.c.l.b16 %v989_v56  ;;  %v1387_v1 = vunpack.c.l.b16 %v988_v16  ;;  %v1716_v10 = vsel %vm1715_vm1, %v6191_v14, -inf }
 0x26e   :  { %v6179_v12 = vpop.permute.xlu0 %4977  ;;  %v5015_v49 = vunpack.i.h.bf16 %v5013_v42  ;;  %v5014_v50 = vunpack.i.l.bf16 %v5013_v42 }
 0x26f   :  { %2121 = vmatpush.bf16.msrb.mxu2 %v2109_v52  ;;  %v1109_v52 = vpack.c.bf16 %v4965_v4, %v4965_v4  ;;  %v1399_v45 = vsel %vm1244_vm0, %v1394_v13, 0  ;;  %v4979_v20 = vunpack.i.l.bf16 %v6179_v12 }
 0x270   :  { %4483 = vmatmul.msk.bf16.vlgmr.msra.gmra.mxu2 %vm1244_vm0, %v1599_v19  ;;  %1408 = vmatpush.bf16.xpose.msra.mxu3 %v1399_v45  ;;  %v1111_v4 = vpack.c.bf16 %v5015_v49, %v5015_v49  ;;  %v1110_v53 = vpack.c.bf16 %v5014_v50, %v5014_v50  ;;  %v5009_v45 = vunpack.i.l.bf16 %v5008_v0  ;;  %v4980_v0 = vunpack.i.h.bf16 %v6179_v12 }
 0x271   :  { %v1513_v18 = vunpack.c.l.b16 %v1109_v52 }
 0x272   :  { %v1543_v13 = vunpack.c.l.b16 %v1111_v4  ;;  %v997_v12 = vpack.c.bf16 %v4980_v0, %v4980_v0 }
 0x273   :  { %2233 = vmatpush.bf16.msra.mxu2 %v2221_v46  ;;  %v1514_v58 = vpack.c.b16 %v1513_v18, %v1512_v32  ;;  %v1542_v46 = vunpack.c.l.b16 %v1110_v53  ;;  %v1389_v18 = vpack.c.b16 %v1388_v8, %v1387_v1  ;;  %v996_v8 = vpack.c.bf16 %v4979_v20, %v4979_v20 }
 0x275   :  { %v6183_v35 = vpop.permute.xlu1 %4987  ;;  %v1519_v39 = vsel %vm1244_vm0, %v1514_v58, 0  ;;  %v1544_v58 = vpack.c.b16 %v1543_v13, %v1542_v46  ;;  %v1508_v13 = vunpack.c.l.b16 %v997_v12  ;;  %v1507_v46 = vunpack.c.l.b16 %v996_v8 }
 0x276   :  { %v4983_v36 = vpop.permute.xlu0 %4982  ;;  %4475 = vmatmul.msk.bf16.vlgmr.msrb.gmra.mxu3 %vm1244_vm0, %v1359_v37 }
 0x277   :  { %v4985_v38 = vunpack.i.h.bf16 %v4983_v36  ;;  %v4984_v34 = vunpack.i.l.bf16 %v4983_v36  ;;  %v1549_v16 = vsel %vm1244_vm0, %v1544_v58, 0  ;;  %v5028_v58 = vpop.permute.xlu2 %5027 }
 0x278   :  { %1528 = vmatpush.bf16.xpose.msrb.mxu3 %v1519_v39  ;;  %v6203_v39 = vpop.f32.mrf.mxu0 }
 0x279   :  { %v1117_v51 = vpack.c.bf16 %v4985_v38, %v4985_v38  ;;  %v1116_v54 = vpack.c.bf16 %v4984_v34, %v4984_v34  ;;  %v991_v38 = vpack.c.bf16 %v5010_v61, %v5010_v61  ;;  %v990_v34 = vpack.c.bf16 %v5009_v45, %v5009_v45 }
 0x27a   :  { %v1719_v56 = vsel %vm1715_vm1, %v6203_v39, -inf }
 0x27b   :  { %v1633_v3 = vunpack.c.l.b16 %v1117_v51  ;;  %v1632_v5 = vunpack.c.l.b16 %v1116_v54  ;;  %v1418_v4 = vunpack.c.l.b16 %v991_v38  ;;  %v1417_v53 = vunpack.c.l.b16 %v990_v34 }
 0x27c   :  { %v4990_v34 = vunpack.i.h.bf16 %v6183_v35 }
 0x27d   :  { %v6189_v43 = vpop.permute.xlu1 %4992  ;;  %v1634_v52 = vpack.c.b16 %v1633_v3, %v1632_v5 }
 0x27e   :  { %v6199_v36 = vpop.permute.xlu0 %4997  ;;  %v4995_v0 = vunpack.i.h.bf16 %v6189_v43  ;;  %v4994_v20 = vunpack.i.l.bf16 %v6189_v43  ;;  %v5030_v43 = vunpack.i.h.bf16 %v5028_v58 }
 0x27f   :  { %v1639_v37 = vsel %vm1244_vm0, %v1634_v52, 0 }
 0x282   :  { %v6193_v63 = vpop.f32.mrf.mxu3  ;;  %1717 = vmax.xlane.f32.xlu2 %v1716_v10 }
 0x283   :  { %v1722_v45 = vsel %vm1715_vm1, %v6193_v63, -inf }
 0x285   :  { %v5003_v40 = vpop.permute.xlu1 %5002 }
 0x286   :  { %v5005_v11 = vunpack.i.h.bf16 %v5003_v40  ;;  %v5004_v19 = vunpack.i.l.bf16 %v5003_v40  ;;  %4476 = vmatmul.msk.bf16.vlgmr.msra.gmra.mxu3 %vm1244_vm0, %v1389_v18  ;;  %v5018_v52 = vpop.permute.xlu0 %5017 }
 0x287   :  { %1648 = vmatpush.bf16.xpose.msra.mxu3 %v1639_v37  ;;  %v5019_v18 = vunpack.i.l.bf16 %v5018_v52 }
 0x288   :  { %v1103_v17 = vpack.c.bf16 %v5005_v11, %v5005_v11  ;;  %v1102_v30 = vpack.c.bf16 %v5004_v19, %v5004_v19  ;;  %v1419_v11 = vpack.c.b16 %v1418_v4, %v1417_v53 }
 0x289   :  { %v998_v38 = vpack.c.bf16 %v5019_v18, %v5019_v18 }
 0x28a   :  { %v1423_v32 = vunpack.c.l.b16 %v1103_v17  ;;  %v1422_v7 = vunpack.c.l.b16 %v1102_v30  ;;  %v6197_v33 = vpop.f32.mrf.mxu3  ;;  %v5020_v30 = vunpack.i.h.bf16 %v5018_v52 }
 0x28b   :  { %v1725_v49 = vsel %vm1715_vm1, %v6197_v33, -inf }
 0x28c   :  { %v1424_v42 = vpack.c.b16 %v1423_v32, %v1422_v7  ;;  %1726 = vmax.xlane.f32.xlu2 %v1725_v49  ;;  %1720 = vmax.xlane.f32.xlu1 %v1719_v56  ;;  %v1509_v32 = vpack.c.b16 %v1508_v13, %v1507_v46  ;;  %v999_v37 = vpack.c.bf16 %v5020_v30, %v5020_v30 }
 0x28d   :  { %v5023_v25 = vpop.permute.xlu1 %5022  ;;  %v1213_v56 = vpack.c.bf16 %v4995_v0, %v4995_v0 }
 0x28e   :  { %v5025_v50 = vunpack.i.h.bf16 %v5023_v25  ;;  %v5024_v51 = vunpack.i.l.bf16 %v5023_v25  ;;  %v1429_v54 = vsel %vm1244_vm0, %v1424_v42, 0  ;;  %v4989_v42 = vunpack.i.l.bf16 %v6183_v35  ;;  %v5033_v35 = vpop.permute.xlu2 %5032 }
 0x28f   :  { %1438 = vmatpush.bf16.xpose.msra.mxu0 %v1429_v54  ;;  %v1538_v49 = vunpack.c.l.b16 %v999_v37  ;;  %v2248_v4 = vunpack.c.l.b16 %v1213_v56  ;;  %v5035_v12 = vunpack.i.h.bf16 %v5033_v35  ;;  %v5034_v8 = vunpack.i.l.bf16 %v5033_v35 }
 0x290   :  { %v1119_v3 = vpack.c.bf16 %v5025_v50, %v5025_v50  ;;  %v1118_v5 = vpack.c.bf16 %v5024_v51, %v5024_v51  ;;  %v1537_v50 = vunpack.c.l.b16 %v998_v38  ;;  %v1005_v51 = vpack.c.bf16 %v4990_v34, %v4990_v34 }
 0x291   :  { %v1004_v54 = vpack.c.bf16 %v4989_v42, %v4989_v42  ;;  %v1214_v13 = vpack.c.bf16 %v5034_v8, %v5034_v8 }
 0x292   :  { %v1663_v1 = vunpack.c.l.b16 %v1119_v3  ;;  %v1662_v40 = vunpack.c.l.b16 %v1118_v5  ;;  %v6213_v10 = vpop.f32.mrf.mxu3  ;;  %v1539_v27 = vpack.c.b16 %v1538_v49, %v1537_v50  ;;  %v1628_v29 = vunpack.c.l.b16 %v1005_v51 }
 0x293   :  { %1723 = vmax.xlane.f32.xlu0 %v1722_v45  ;;  %v1728_v17 = vsel %vm1715_vm1, %v6213_v10, -inf  ;;  %v5029_v3 = vunpack.i.l.bf16 %v5028_v58  ;;  %v2275_v45 = vunpack.c.l.b16 %v1214_v13 }
 0x294   :  { %v1664_v19 = vpack.c.b16 %v1663_v1, %v1662_v40  ;;  %1729 = vmax.xlane.f32.xlu1 %v1728_v17  ;;  %v1007_v40 = vpack.c.bf16 %v5030_v43, %v5030_v43 }
 0x296   :  { %4477 = vmatmul.msk.bf16.vlgmr.msra.gmra.mxu0 %vm1244_vm0, %v1419_v11  ;;  %v1669_v61 = vsel %vm1244_vm0, %v1664_v19, 0  ;;  %4480 = vmatmul.msk.bf16.vlgmr.msrb.gmra.mxu3 %vm1244_vm0, %v1509_v32  ;;  %v1006_v11 = vpack.c.bf16 %v5029_v3, %v5029_v3  ;;  %v1215_v19 = vpack.c.bf16 %v5035_v12, %v5035_v12  ;;  %v1658_v46 = vunpack.c.l.b16 %v1007_v40 }
 0x297   :  { %1558 = vmatpush.bf16.xpose.msrb.mxu0 %v1549_v16  ;;  %2149 = vmatpush.bf16.msrb.mxu3 %v2137_v22  ;;  %v1212_v16 = vpack.c.bf16 %v4994_v20, %v4994_v20  ;;  %v1627_v22 = vunpack.c.l.b16 %v1004_v54 }
 0x298   :  { %v1657_v52 = vunpack.c.l.b16 %v1006_v11 }
 0x299   :  { %v2247_v53 = vunpack.c.l.b16 %v1212_v16  ;;  %v1629_v5 = vpack.c.b16 %v1628_v29, %v1627_v22 }
 0x29a   :  { %v6222_v7 = vpop.f32.mrf.mxu3  ;;  %v1659_v17 = vpack.c.b16 %v1658_v46, %v1657_v52 }
 0x29b   :  { %v1731_v25 = vsel %vm1715_vm1, %v6222_v7, -inf  ;;  %v2249_v1 = vpack.c.b16 %v2248_v4, %v2247_v53 }
 0x29c   :  { %1732 = vmax.xlane.f32.xlu0 %v1731_v25 }
 0x29f   :  { %1678 = vmatpush.bf16.xpose.msra.mxu0 %v1669_v61  ;;  %v2276_v61 = vunpack.c.l.b16 %v1215_v19 }
 0x2a1   :  { %v2277_v26 = vpack.c.b16 %v2276_v61, %v2275_v45 }
 0x2a6   :  { %4481 = vmatmul.msk.bf16.vlgmr.msrb.gmra.mxu0 %vm1244_vm0, %v1539_v27  ;;  %4484 = vmatmul.msk.bf16.vlgmr.msra.gmra.mxu3 %vm1244_vm0, %v1629_v5 }
 0x2a7   :  { %2177 = vmatpush.bf16.msrb.mxu0 %v2165_v62  ;;  %2261 = vmatpush.bf16.msra.mxu3 %v2249_v1 }
 0x2b3   :  { %v5048_v60 = vpop.permute.xlu2 %5047 }
 0x2b4   :  { %v5050_v62 = vunpack.i.h.bf16 %v5048_v60  ;;  %v5049_v30 = vunpack.i.l.bf16 %v5048_v60 }
 0x2b6   :  { %4485 = vmatmul.msk.bf16.vlgmr.msra.gmra.mxu0 %vm1244_vm0, %v1659_v17  ;;  %v1113_v18 = vpack.c.bf16 %v5050_v62, %v5050_v62  ;;  %v1112_v32 = vpack.c.bf16 %v5049_v30, %v5049_v30  ;;  %v1209_v62 = vpack.c.bf16 %v6148_v31, %v6148_v31  ;;  %v1208_v30 = vpack.c.bf16 %v6151_v55, %v6151_v55 }
 0x2b7   :  { %2289 = vmatpush.bf16.msra.mxu0 %v2277_v26 }
 0x2b8   :  { %v1573_v42 = vunpack.c.l.b16 %v1113_v18  ;;  %v1572_v0 = vunpack.c.l.b16 %v1112_v32 }
 0x2ba   :  { %v1574_v56 = vpack.c.b16 %v1573_v42, %v1572_v0 }
 0x2bc   :  { %v1579_v43 = vsel %vm1244_vm0, %v1574_v56, 0 }
 0x2cb   :  { %v5038_v58 = vpop.permute.xlu0 %5037 }
 0x2cc   :  { %v5043_v37 = vpop.permute.xlu1 %5042  ;;  %v5040_v38 = vunpack.i.h.bf16 %v5038_v58  ;;  %v5039_v34 = vunpack.i.l.bf16 %v5038_v58  ;;  %v2192_v58 = vunpack.c.l.b16 %v1209_v62 }
 0x2cd   :  { %v5045_v20 = vunpack.i.h.bf16 %v5043_v37  ;;  %v5044_v25 = vunpack.i.l.bf16 %v5043_v37  ;;  %v2191_v37 = vunpack.c.l.b16 %v1208_v30 }
 0x2ce   :  { %v1105_v49 = vpack.c.bf16 %v5040_v38, %v5040_v38  ;;  %v1104_v50 = vpack.c.bf16 %v5039_v34, %v5039_v34 }
 0x2cf   :  { %v993_v16 = vpack.c.bf16 %v5045_v20, %v5045_v20  ;;  %v992_v27 = vpack.c.bf16 %v5044_v25, %v5044_v25  ;;  %v2193_v20 = vpack.c.b16 %v2192_v58, %v2191_v37 }
 0x2d0   :  { %v1453_v51 = vunpack.c.l.b16 %v1105_v49  ;;  %v1452_v54 = vunpack.c.l.b16 %v1104_v50 }
 0x2d1   :  { %v1448_v3 = vunpack.c.l.b16 %v993_v16  ;;  %v1447_v5 = vunpack.c.l.b16 %v992_v27 }
 0x2d2   :  { %v1454_v29 = vpack.c.b16 %v1453_v51, %v1452_v54 }
 0x2d3   :  { %v1449_v11 = vpack.c.b16 %v1448_v3, %v1447_v5  ;;  %v5053_v13 = vpop.permute.xlu0 %5052 }
 0x2d4   :  { %v5058_v22 = vpop.permute.xlu1 %5057  ;;  %v1459_v4 = vsel %vm1244_vm0, %v1454_v29, 0  ;;  %v5055_v52 = vunpack.i.h.bf16 %v5053_v13  ;;  %v5054_v61 = vunpack.i.l.bf16 %v5053_v13 }
 0x2d5   :  { %v5060_v53 = vunpack.i.h.bf16 %v5058_v22  ;;  %v5059_v35 = vunpack.i.l.bf16 %v5058_v22  ;;  %1468 = vmatpush.bf16.xpose.msrb.mxu1 %v1459_v4 }
 0x2d6   :  { %v1001_v26 = vpack.c.bf16 %v5055_v52, %v5055_v52  ;;  %v1000_v60 = vpack.c.bf16 %v5054_v61, %v5054_v61 }
 0x2d7   :  { %v1121_v12 = vpack.c.bf16 %v5060_v53, %v5060_v53  ;;  %v1120_v8 = vpack.c.bf16 %v5059_v35, %v5059_v35 }
 0x2d8   :  { %v1568_v18 = vunpack.c.l.b16 %v1001_v26  ;;  %v1567_v32 = vunpack.c.l.b16 %v1000_v60 }
 0x2d9   :  { %v1693_v1 = vunpack.c.l.b16 %v1121_v12  ;;  %v1692_v40 = vunpack.c.l.b16 %v1120_v8 }
 0x2da   :  { %v1569_v38 = vpack.c.b16 %v1568_v18, %v1567_v32 }
 0x2db   :  { %v1694_v19 = vpack.c.b16 %v1693_v1, %v1692_v40  ;;  %v5063_v42 = vpop.permute.xlu0 %5062 }
 0x2dc   :  { %4478 = vmatmul.msk.bf16.vlgmr.msrb.gmra.mxu1 %vm1244_vm0, %v1449_v11  ;;  %v5065_v31 = vunpack.i.h.bf16 %v5063_v42  ;;  %v5064_v25 = vunpack.i.l.bf16 %v5063_v42 }
 0x2dd   :  { %1588 = vmatpush.bf16.xpose.msra.mxu1 %v1579_v43  ;;  %v1699_v46 = vsel %vm1244_vm0, %v1694_v19, 0 }
 0x2de   :  { %v1009_v55 = vpack.c.bf16 %v5065_v31, %v5065_v31  ;;  %v1008_v50 = vpack.c.bf16 %v5064_v25, %v5064_v25 }
 0x2e0   :  { %v1688_v27 = vunpack.c.l.b16 %v1009_v55  ;;  %v1687_v29 = vunpack.c.l.b16 %v1008_v50 }
 0x2e2   :  { %v6243_v45 = vpop.f32.mrf.mxu2  ;;  %v1689_v53 = vpack.c.b16 %v1688_v27, %v1687_v29 }
 0x2e3   :  { %v1764_v17 = vsel %vm1715_vm1, %v6243_v45, -inf }
 0x2e4   :  { %1765 = vmax.xlane.f32.xlu0 %v1764_v17 }
 0x2e5   :  { %1708 = vmatpush.bf16.xpose.msrb.mxu1 %v1699_v46 }
 0x2e9   :  { %v6251_v34 = vpop.f32.mrf.mxu3 }
 0x2ea   :  { %v1734_v0 = vsel %vm1715_vm1, %v6251_v34, -inf  ;;  %v6256_v49 = vpop.f32.mrf.mxu2 }
 0x2eb   :  { %1735 = vmax.xlane.f32.xlu2 %v1734_v0  ;;  %v1767_v56 = vsel %vm1715_vm1, %v6256_v49, -inf }
 0x2ec   :  { %4482 = vmatmul.msk.bf16.vlgmr.msra.gmra.mxu1 %vm1244_vm0, %v1569_v38 }
 0x2ed   :  { %2205 = vmatpush.bf16.msra.mxu1 %v2193_v20 }
 0x2f1   :  { %v6258_v51 = vpop.f32.mrf.mxu3 }
 0x2f2   :  { %v1737_v54 = vsel %vm1715_vm1, %v6258_v51, -inf }
 0x2f3   :  { %1738 = vmax.xlane.f32.xlu1 %v1737_v54  ;;  %1768 = vmax.xlane.f32.xlu2 %v1767_v56  ;;  %v6279_v11 = vpop.f32.mrf.mxu2 }
 0x2f4   :  { %v1788_v32 = vsel %vm1715_vm1, %v6279_v11, -inf }
 0x2f5   :  { %v1718_v16 = vpop.xlane.xlu2 %1717 }
 0x2f6   :  { %v1812_v22 = vsub.f32 %v6191_v14, %v1718_v16 }
 0x2f8   :  { %v1844_v4 = vmul.f32 1.442695, %v1812_v22 }
 0x2f9   :  { %v6265_v35 = vpop.f32.mrf.mxu3 }
 0x2fa   :  { %5180 = vpow2.f32 %v1844_v4  ;;  %v1740_v43 = vsel %vm1715_vm1, %v6265_v35, -inf }
 0x2fb   :  { %1741 = vmax.xlane.f32.xlu1 %v1740_v43  ;;  %v6291_v30 = vpop.f32.mrf.mxu2 }
 0x2fc   :  { %4486 = vmatmul.msk.bf16.vlgmr.msrb.gmra.mxu1 %vm1244_vm0, %v1689_v53  ;;  %v1791_v18 = vsel %vm1715_vm1, %v6291_v30, -inf }
 0x2ff   :  { %v1721_v3 = vpop.xlane.xlu1 %1720  ;;  %v1727_v19 = vpop.xlane.xlu2 %1726 }
 0x300   :  { %v6270_v5 = vpop.eup %5180  ;;  %v1813_v12 = vsub.f32 %v6203_v39, %v1721_v3  ;;  %v1815_v46 = vsub.f32 %v6197_v33, %v1727_v19 }
 0x301   :  { %v1908_v8 = vsel %vm1715_vm1, %v6270_v5, 0.0  ;;  %v6275_v1 = vpop.f32.mrf.mxu3 }
 0x302   :  { %v1846_v14 = vmul.f32 1.442695, %v1813_v12  ;;  %v1743_v40 = vsel %vm1715_vm1, %v6275_v1, -inf  ;;  %v1850_v60 = vmul.f32 1.442695, %v1815_v46 }
 0x303   :  { %1909 = vadd.xlane.f32.xlu1 %v1908_v8  ;;  %1744 = vmax.xlane.f32.xlu0 %v1743_v40 }
 0x304   :  { %5182 = vpow2.f32 %v1846_v14 }
 0x305   :  { %5184 = vpow2.f32 %v1850_v60 }
 0x306   :  { %v1724_v13 = vpop.xlane.xlu0 %1723 }
 0x307   :  { %v1814_v39 = vsub.f32 %v6193_v63, %v1724_v13  ;;  %v1730_v3 = vpop.xlane.xlu1 %1729 }
 0x309   :  { %v6285_v61 = vpop.f32.mrf.mxu3  ;;  %v1848_v62 = vmul.f32 1.442695, %v1814_v39 }
 0x30a   :  { %v6282_v52 = vpop.eup %5182  ;;  %v1746_v17 = vsel %vm1715_vm1, %v6285_v61, -inf }
 0x30b   :  { %v1911_v26 = vsel %vm1715_vm1, %v6282_v52, 0.0  ;;  %1747 = vmax.xlane.f32.xlu2 %v1746_v17  ;;  %5186 = vpow2.f32 %v1848_v62  ;;  %v6301_v58 = vpop.eup %5184 }
 0x30c   :  { %1912 = vadd.xlane.f32.xlu0 %v1911_v26  ;;  %v1917_v0 = vsel %vm1715_vm1, %v6301_v58, 0.0 }
 0x30f   :  { %v1733_v56 = vpop.xlane.xlu0 %1732 }
 0x310   :  { %v1817_v16 = vsub.f32 %v6222_v7, %v1733_v56  ;;  %v1816_v7 = vsub.f32 %v6213_v10, %v1730_v3 }
 0x311   :  { %v6293_v33 = vpop.f32.mrf.mxu3  ;;  %v6303_v37 = vpop.eup %5186 }
 0x312   :  { %v1749_v63 = vsel %vm1715_vm1, %v6293_v33, -inf  ;;  %v1914_v20 = vsel %vm1715_vm1, %v6303_v37, 0.0  ;;  %v1854_v29 = vmul.f32 1.442695, %v1817_v16  ;;  %v1852_v12 = vmul.f32 1.442695, %v1816_v7 }
 0x313   :  { %1750 = vmax.xlane.f32.xlu1 %v1749_v63  ;;  %1792 = vmax.xlane.f32.xlu2 %v1791_v18  ;;  %v6305_v38 = vpop.f32.mrf.mxu0 }
 0x314   :  { %1789 = vmax.xlane.f32.xlu0 %v1788_v32  ;;  %v1752_v31 = vsel %vm1715_vm1, %v6305_v38, -inf  ;;  %5188 = vpow2.f32 %v1854_v29 }
 0x315   :  { %5190 = vpow2.f32 %v1852_v12 }
 0x319   :  { %v6307_v42 = vpop.f32.mrf.mxu3 }
 0x31a   :  { %v1770_v50 = vsel %vm1715_vm1, %v6307_v42, -inf  ;;  %v6330_v53 = vpop.eup %5188 }
 0x31b   :  { %1918 = vadd.xlane.f32.xlu1 %v1917_v0  ;;  %1915 = vadd.xlane.f32.xlu2 %v1914_v20  ;;  %v6321_v54 = vpop.f32.mrf.mxu0  ;;  %v1923_v43 = vsel %vm1715_vm1, %v6330_v53, 0.0  ;;  %v6343_v13 = vpop.eup %5190 }
 0x31c   :  { %1753 = vmax.xlane.f32.xlu0 %v1752_v31  ;;  %v1755_v27 = vsel %vm1715_vm1, %v6321_v54, -inf  ;;  %v1920_v10 = vsel %vm1715_vm1, %v6343_v13, 0.0 }
 0x321   :  { %v6315_v25 = vpop.f32.mrf.mxu3 }
 0x322   :  { %v1773_v55 = vsel %vm1715_vm1, %v6315_v25, -inf }
 0x323   :  { %1774 = vmax.xlane.f32.xlu1 %v1773_v55  ;;  %1771 = vmax.xlane.f32.xlu2 %v1770_v50  ;;  %v6326_v22 = vpop.f32.mrf.mxu0 }
 0x324   :  { %v1776_v4 = vsel %vm1715_vm1, %v6326_v22, -inf }
 0x329   :  { %v6341_v19 = vpop.f32.mrf.mxu3 }
 0x32a   :  { %v1794_v20 = vsel %vm1715_vm1, %v6341_v19, -inf }
 0x32b   :  { %1756 = vmax.xlane.f32.xlu2 %v1755_v27  ;;  %v6339_v40 = vpop.f32.mrf.mxu0 }
 0x331   :  { %v6354_v63 = vpop.f32.mrf.mxu3 }
 0x332   :  { %v1797_v31 = vsel %vm1715_vm1, %v6354_v63, -inf }
 0x333   :  { %1777 = vmax.xlane.f32.xlu2 %v1776_v4  ;;  %v6352_v62 = vpop.f32.mrf.mxu0 }
 0x33b   :  { %1924 = vadd.xlane.f32.xlu2 %v1923_v43  ;;  %v6369_v29 = vpop.f32.mrf.mxu0  ;;  %v1779_v43 = vsel %vm1715_vm1, %v6339_v40, -inf }
 0x33c   :  { %v1803_v7 = vsel %vm1715_vm1, %v6369_v29, -inf }
 0x357   :  { %v1766_v18 = vpop.xlane.xlu0 %1765 }
 0x359   :  { %v6335_v8 = vpop.f32.mrf.mxu1 }
 0x35a   :  { %v1758_v14 = vsel %vm1715_vm1, %v6335_v8, -inf }
 0x35b   :  { %1759 = vmax.xlane.f32.xlu1 %v1758_v14 }
 0x35e   :  { %v1736_v46 = vpop.xlane.xlu2 %1735 }
 0x35f   :  { %v1818_v39 = vsub.f32 %v6251_v34, %v1736_v46  ;;  %v1828_v34 = vsub.f32 %v6243_v45, %v1766_v18 }
 0x361   :  { %v6346_v17 = vpop.f32.mrf.mxu1  ;;  %v1856_v60 = vmul.f32 1.442695, %v1818_v39  ;;  %v1876_v50 = vmul.f32 1.442695, %v1828_v34 }
 0x362   :  { %v1761_v26 = vsel %vm1715_vm1, %v6346_v17, -inf }
 0x363   :  { %1921 = vadd.xlane.f32.xlu1 %v1920_v10  ;;  %1762 = vmax.xlane.f32.xlu0 %v1761_v26  ;;  %5192 = vpow2.f32 %v1856_v60  ;;  %v1800_v60 = vsel %vm1715_vm1, %v6352_v62, -inf }
 0x364   :  { %5194 = vpow2.f32 %v1876_v50 }
 0x366   :  { %v1739_v32 = vpop.xlane.xlu1 %1738  ;;  %v1769_v56 = vpop.xlane.xlu2 %1768 }
 0x367   :  { %v1819_v45 = vsub.f32 %v6258_v51, %v1739_v32  ;;  %v1829_v4 = vsub.f32 %v6256_v49, %v1769_v56  ;;  %v4970_v56 = vunpack.i.h.bf16 %v6165_v59 }
 0x369   :  { %v6356_v0 = vpop.f32.mrf.mxu1  ;;  %v6365_v16 = vpop.eup %5192  ;;  %v1858_v12 = vmul.f32 1.442695, %v1819_v45  ;;  %v1878_v14 = vmul.f32 1.442695, %v1829_v4  ;;  %v4969_v4 = vunpack.i.l.bf16 %v6165_v59 }
 0x36a   :  { %v1782_v55 = vsel %vm1715_vm1, %v6356_v0, -inf  ;;  %v1926_v3 = vsel %vm1715_vm1, %v6365_v16, 0.0  ;;  %v6381_v49 = vpop.eup %5194 }
 0x36b   :  { %1795 = vmax.xlane.f32.xlu1 %v1794_v20  ;;  %1798 = vmax.xlane.f32.xlu0 %v1797_v31  ;;  %5196 = vpow2.f32 %v1858_v12  ;;  %v1956_v32 = vsel %vm1715_vm1, %v6381_v49, 0.0 }
 0x36c   :  { %1783 = vmax.xlane.f32.xlu2 %v1782_v55  ;;  %5198 = vpow2.f32 %v1878_v14 }
 0x36e   :  { %v6367_v27 = vpop.xlane.xlu1 %1741 }
 0x371   :  { %v6379_v46 = vpop.f32.mrf.mxu1  ;;  %v6390_v34 = vpop.eup %5196 }
 0x372   :  { %v1785_v18 = vsel %vm1715_vm1, %v6379_v46, -inf  ;;  %v6392_v20 = vpop.eup %5198 }
 0x373   :  { %1780 = vmax.xlane.f32.xlu1 %v1779_v43  ;;  %1927 = vadd.xlane.f32.xlu0 %v1926_v3  ;;  %v1959_v3 = vsel %vm1715_vm1, %v6392_v20, 0.0 }
 0x374   :  { %1804 = vmax.xlane.f32.xlu2 %v1803_v7  ;;  %v1929_v7 = vsel %vm1715_vm1, %v6390_v34, 0.0 }
 0x376   :  { %v1910_v51 = vpop.xlane.xlu1 %1909  ;;  %v1745_v39 = vpop.xlane.xlu0 %1744 }
 0x377   :  { %v1821_v10 = vsub.f32 %v6275_v1, %v1745_v39  ;;  %5200 = vrcp.f32 %v1910_v51  ;;  %v1219_v51 = vpack.c.bf16 %v4970_v56, %v4970_v56  ;;  %v1218_v39 = vpack.c.bf16 %v4969_v4, %v4969_v4 }
 0x379   :  { %v1862_v26 = vmul.f32 1.442695, %v1821_v10  ;;  %v6406_v14 = vpop.f32.mrf.mxu1  ;;  %v1820_v10 = vsub.f32 %v6265_v35, %v6367_v27  ;;  %v2331_v56 = vunpack.c.l.b16 %v1218_v39 }
 0x37a   :  { %v1806_v35 = vsel %vm1715_vm1, %v6406_v14, -inf }
 0x37b   :  { %1801 = vmax.xlane.f32.xlu1 %v1800_v60  ;;  %1786 = vmax.xlane.f32.xlu0 %v1785_v18  ;;  %5202 = vpow2.f32 %v1862_v26 }
 0x37c   :  { %1957 = vadd.xlane.f32.xlu2 %v1956_v32 }
 0x37d   :  { %v5201_v55 = vpop.eup %5200 }
 0x37e   :  { %v1748_v1 = vpop.xlane.xlu2 %1747  ;;  %v2036_v12 = vmul.f32 %v5201_v55, %v6270_v5 }
 0x37f   :  { %v1913_v31 = vpop.xlane.xlu0 %1912  ;;  %v1822_v50 = vsub.f32 %v6285_v61, %v1748_v1 }
 0x380   :  { %5204 = vrcp.f32 %v1913_v31  ;;  %v2068_v26 = vpack.c.bf16 %v2036_v12, %v2036_v12  ;;  %v2332_v31 = vunpack.c.l.b16 %v1219_v51 }
 0x381   :  { %v6396_v45 = vpop.eup %5202  ;;  %v1864_v43 = vmul.f32 1.442695, %v1822_v50 }
 0x382   :  { %v1935_v61 = vsel %vm1715_vm1, %v6396_v45, 0.0  ;;  %v2102_v27 = vunpack.c.l.b16 %v2068_v26 }
 0x383   :  { %1960 = vadd.xlane.f32.xlu1 %v1959_v3  ;;  %1930 = vadd.xlane.f32.xlu0 %v1929_v7  ;;  %5206 = vpow2.f32 %v1864_v43  ;;  %v1860_v3 = vmul.f32 1.442695, %v1820_v10 }
 0x384   :  { %1936 = vadd.xlane.f32.xlu2 %v1935_v61  ;;  %v2333_v61 = vpack.c.b16 %v2332_v31, %v2331_v56 }
 0x386   :  { %v5205_v59 = vpop.eup %5204  ;;  %v1751_v18 = vpop.xlane.xlu1 %1750 }
 0x387   :  { %v2037_v60 = vmul.f32 %v5205_v59, %v6282_v52  ;;  %v1793_v5 = vpop.xlane.xlu2 %1792  ;;  %v1823_v32 = vsub.f32 %v6293_v33, %v1751_v18  ;;  %v1790_v1 = vpop.xlane.xlu0 %1789 }
 0x388   :  { %v1836_v50 = vsub.f32 %v6279_v11, %v1790_v1  ;;  %v6419_v11 = vpop.f32.mrf.mxu1  ;;  %v1837_v10 = vsub.f32 %v6291_v30, %v1793_v5  ;;  %v4999_v1 = vunpack.i.l.bf16 %v6199_v36 }
 0x389   :  { %v2069_v55 = vpack.c.bf16 %v2037_v60, %v2037_v60  ;;  %v6413_v43 = vpop.eup %5206  ;;  %v1866_v4 = vmul.f32 1.442695, %v1823_v32  ;;  %v1809_v18 = vsel %vm1715_vm1, %v6419_v11, -inf  ;;  %v5000_v32 = vunpack.i.h.bf16 %v6199_v36 }
 0x38a   :  { %v1892_v52 = vmul.f32 1.442695, %v1836_v50  ;;  %v1938_v33 = vsel %vm1715_vm1, %v6413_v43, 0.0  ;;  %v1220_v36 = vpack.c.bf16 %v4999_v1, %v4999_v1 }
 0x38b   :  { %v2103_v7 = vunpack.c.l.b16 %v2069_v55  ;;  %1807 = vmax.xlane.f32.xlu0 %v1806_v35  ;;  %5208 = vpow2.f32 %v1866_v4  ;;  %v1221_v4 = vpack.c.bf16 %v5000_v32, %v5000_v32 }
 0x38c   :  { %1939 = vadd.xlane.f32.xlu2 %v1938_v33  ;;  %5210 = vpow2.f32 %v1892_v52 }
 0x38d   :  { %v2104_v12 = vpack.c.b16 %v2103_v7, %v2102_v27  ;;  %5212 = vpow2.f32 %v1860_v3 }
 0x38e   :  { %v1919_v51 = vpop.xlane.xlu1 %1918 }
 0x38f   :  { %v1916_v59 = vpop.xlane.xlu2 %1915  ;;  %4487 = vmatmul.msk.bf16.vlgmr.msrb.gmra.mxu2 %vm1715_vm1, %v2104_v12  ;;  %5214 = vrcp.f32 %v1919_v51  ;;  %v1754_v39 = vpop.xlane.xlu0 %1753 }
 0x390   :  { %2345 = vmatpush.bf16.msrb.mxu2 %v2333_v61  ;;  %5216 = vrcp.f32 %v1916_v59  ;;  %v1824_v26 = vsub.f32 %v6305_v38, %v1754_v39  ;;  %v1894_v38 = vmul.f32 1.442695, %v1837_v10  ;;  %v2360_v59 = vunpack.c.l.b16 %v1221_v4 }
 0x391   :  { %v6424_v60 = vpop.eup %5208  ;;  %v2359_v39 = vunpack.c.l.b16 %v1220_v36 }
 0x392   :  { %v1868_v31 = vmul.f32 1.442695, %v1824_v26  ;;  %v1941_v55 = vsel %vm1715_vm1, %v6424_v60, 0.0  ;;  %v6432_v50 = vpop.eup %5210 }
 0x393   :  { %1810 = vmax.xlane.f32.xlu0 %v1809_v18  ;;  %1942 = vadd.xlane.f32.xlu1 %v1941_v55  ;;  %v6434_v30 = vpop.eup %5212  ;;  %v1980_v5 = vsel %vm1715_vm1, %v6432_v50, 0.0 }
 0x394   :  { %5218 = vpow2.f32 %v1868_v31  ;;  %1981 = vadd.xlane.f32.xlu2 %v1980_v5  ;;  %v1932_v61 = vsel %vm1715_vm1, %v6434_v30, 0.0 }
 0x395   :  { %v5215_v56 = vpop.eup %5214  ;;  %5220 = vpow2.f32 %v1894_v38 }
 0x396   :  { %v5217_v3 = vpop.eup %5216  ;;  %v2039_v35 = vmul.f32 %v5215_v56, %v6301_v58  ;;  %v1775_v36 = vpop.xlane.xlu1 %1774 }
 0x397   :  { %v1772_v27 = vpop.xlane.xlu2 %1771  ;;  %v2038_v7 = vmul.f32 %v5217_v3, %v6303_v37 }
 0x398   :  { %v2071_v52 = vpack.c.bf16 %v2039_v35, %v2039_v35  ;;  %v1830_v33 = vsub.f32 %v6307_v42, %v1772_v27  ;;  %v2361_v42 = vpack.c.b16 %v2360_v59, %v2359_v39  ;;  %v1831_v35 = vsub.f32 %v6315_v25, %v1775_v36 }
 0x399   :  { %v2070_v12 = vpack.c.bf16 %v2038_v7, %v2038_v7 }
 0x39a   :  { %v6443_v51 = vpop.eup %5218  ;;  %v2131_v10 = vunpack.c.l.b16 %v2071_v52  ;;  %v1880_v18 = vmul.f32 1.442695, %v1830_v33  ;;  %v1882_v52 = vmul.f32 1.442695, %v1831_v35 }
 0x39b   :  { %1933 = vadd.xlane.f32.xlu0 %v1932_v61  ;;  %v2130_v26 = vunpack.c.l.b16 %v2070_v12  ;;  %v1944_v58 = vsel %vm1715_vm1, %v6443_v51, 0.0  ;;  %v6447_v32 = vpop.eup %5220 }
 0x39c   :  { %1945 = vadd.xlane.f32.xlu1 %v1944_v58  ;;  %5222 = vpow2.f32 %v1880_v18  ;;  %v1983_v38 = vsel %vm1715_vm1, %v6447_v32, 0.0 }
 0x39d   :  { %v2132_v37 = vpack.c.b16 %v2131_v10, %v2130_v26 }
 0x39f   :  { %v1757_v1 = vpop.xlane.xlu2 %1756  ;;  %4488 = vmatmul.msk.bf16.vlgmr.msrb.gmra.mxu3 %vm1715_vm1, %v2132_v37 }
 0x3a0   :  { %v1825_v31 = vsub.f32 %v6321_v54, %v1757_v1  ;;  %2373 = vmatpush.bf16.msrb.mxu3 %v2361_v42 }
 0x3a2   :  { %v1870_v55 = vmul.f32 1.442695, %v1825_v31  ;;  %v6453_v5 = vpop.eup %5222 }
 0x3a3   :  { %1984 = vadd.xlane.f32.xlu0 %v1983_v38  ;;  %v1962_v3 = vsel %vm1715_vm1, %v6453_v5, 0.0 }
 0x3a4   :  { %5224 = vpow2.f32 %v1870_v55 }
 0x3a7   :  { %v1778_v54 = vpop.xlane.xlu2 %1777 }
 0x3a8   :  { %v1832_v33 = vsub.f32 %v6326_v22, %v1778_v54 }
 0x3aa   :  { %v6455_v56 = vpop.eup %5224  ;;  %v1884_v39 = vmul.f32 1.442695, %v1832_v33 }
 0x3ab   :  { %v1947_v4 = vsel %vm1715_vm1, %v6455_v56, 0.0  ;;  %1963 = vadd.xlane.f32.xlu0 %v1962_v3 }
 0x3ac   :  { %1948 = vadd.xlane.f32.xlu2 %v1947_v4 }
 0x3af   :  { %v1925_v27 = vpop.xlane.xlu2 %1924 }
 0x3b0   :  { %5226 = vrcp.f32 %v1925_v27 }
 0x3b1   :  { %5228 = vpow2.f32 %v1882_v52 }
 0x3b5   :  { %5072 = vrot.lane.b32.xlu1 %v6161_v41, %s5747_s4 }
 0x3b6   :  { %v5227_v59 = vpop.eup %5226 }
 0x3b7   :  { %v6473_v26 = vpop.eup %5228 }
 0x3b8   :  { %v1965_v31 = vsel %vm1715_vm1, %v6473_v26, 0.0 }
 0x3bf   :  { %5077 = vrot.lane.b32.xlu0 %v6110_v57, %s5737_s18 }
 0x3c4   :  { %5067 = vrot.lane.b32.xlu2 %v6088_v23, %s5748_s20  ;;  %v2041_v23 = vmul.f32 %v5227_v59, %v6330_v53 }
 0x3c6   :  { %v2073_v25 = vpack.c.bf16 %v2041_v23, %v2041_v23 }
 0x3c7   :  { %5082 = vrot.lane.b32.xlu0 %v6161_v41, %s5737_s18 }
 0x3ce   :  { %v1760_v7 = vpop.xlane.xlu1 %1759 }
 0x3cf   :  { %v1826_v10 = vsub.f32 %v6335_v8, %v1760_v7  ;;  %v2159_v8 = vunpack.c.l.b16 %v2073_v25 }
 0x3d1   :  { %v1872_v1 = vmul.f32 1.442695, %v1826_v10 }
 0x3d6   :  { %v1922_v12 = vpop.xlane.xlu1 %1921  ;;  %v1763_v61 = vpop.xlane.xlu0 %1762 }
 0x3d7   :  { %5230 = vrcp.f32 %v1922_v12 }
 0x3d8   :  { %5232 = vpow2.f32 %v1884_v39 }
 0x3d9   :  { %5234 = vpow2.f32 %v1872_v1 }
 0x3dd   :  { %v5231_v58 = vpop.eup %5230 }
 0x3de   :  { %v2040_v18 = vmul.f32 %v5231_v58, %v6343_v13  ;;  %v1796_v37 = vpop.xlane.xlu1 %1795  ;;  %v1799_v42 = vpop.xlane.xlu0 %1798 }
 0x3df   :  { %v1838_v22 = vsub.f32 %v6341_v19, %v1796_v37  ;;  %v1839_v55 = vsub.f32 %v6354_v63, %v1799_v42  ;;  %v1784_v53 = vpop.xlane.xlu2 %1783  ;;  %1966 = vadd.xlane.f32.xlu1 %v1965_v31  ;;  %v6481_v36 = vpop.eup %5232  ;;  %v1827_v63 = vsub.f32 %v6346_v17, %v1763_v61 }
 0x3e0   :  { %v2072_v38 = vpack.c.bf16 %v2040_v18, %v2040_v18  ;;  %v1834_v13 = vsub.f32 %v6356_v0, %v1784_v53  ;;  %v1968_v52 = vsel %vm1715_vm1, %v6481_v36, 0.0  ;;  %v6487_v12 = vpop.eup %5234 }
 0x3e1   :  { %v1898_v4 = vmul.f32 1.442695, %v1839_v55  ;;  %v1896_v54 = vmul.f32 1.442695, %v1838_v22  ;;  %v1874_v59 = vmul.f32 1.442695, %v1827_v63 }
 0x3e2   :  { %v2158_v3 = vunpack.c.l.b16 %v2072_v38  ;;  %v1888_v7 = vmul.f32 1.442695, %v1834_v13  ;;  %v1950_v23 = vsel %vm1715_vm1, %v6487_v12, 0.0 }
 0x3e3   :  { %5236 = vpow2.f32 %v1898_v4 }
 0x3e4   :  { %v2160_v35 = vpack.c.b16 %v2159_v8, %v2158_v3  ;;  %5238 = vpow2.f32 %v1896_v54 }
 0x3e5   :  { %5240 = vpow2.f32 %v1888_v7 }
 0x3e6   :  { %v1781_v19 = vpop.xlane.xlu1 %1780  ;;  %v1928_v27 = vpop.xlane.xlu0 %1927  ;;  %4489 = vmatmul.msk.bf16.vlgmr.msrb.gmra.mxu0 %vm1715_vm1, %v2160_v35  ;;  %5242 = vpow2.f32 %v1874_v59 }
 0x3e7   :  { %v1805_v33 = vpop.xlane.xlu2 %1804  ;;  %1969 = vadd.xlane.f32.xlu1 %v1968_v52  ;;  %v1833_v25 = vsub.f32 %v6339_v40, %v1781_v19  ;;  %5244 = vrcp.f32 %v1928_v27 }
 0x3e8   :  { %v1841_v0 = vsub.f32 %v6369_v29, %v1805_v33 }
 0x3e9   :  { %v6490_v39 = vpop.eup %5236  ;;  %v1886_v31 = vmul.f32 1.442695, %v1833_v25 }
 0x3ea   :  { %v6494_v10 = vpop.eup %5238  ;;  %v1902_v17 = vmul.f32 1.442695, %v1841_v0  ;;  %v1989_v29 = vsel %vm1715_vm1, %v6490_v39, 0.0 }
 0x3eb   :  { %v1986_v42 = vsel %vm1715_vm1, %v6494_v10, 0.0  ;;  %v6504_v1 = vpop.eup %5240 }
 0x3ec   :  { %5246 = vpow2.f32 %v1902_v17  ;;  %v1974_v40 = vsel %vm1715_vm1, %v6504_v1, 0.0 }
 0x3ed   :  { %1951 = vadd.xlane.f32.xlu2 %v1950_v23 }
 0x3ee   :  { %v1802_v61 = vpop.xlane.xlu1 %1801  ;;  %v1787_v58 = vpop.xlane.xlu0 %1786 }
 0x3ef   :  { %v1840_v18 = vsub.f32 %v6352_v62, %v1802_v61  ;;  %v6500_v37 = vpop.xlane.xlu2 %1957  ;;  %1990 = vadd.xlane.f32.xlu1 %v1989_v29  ;;  %v6508_v62 = vpop.eup %5242  ;;  %v1835_v38 = vsub.f32 %v6379_v46, %v1787_v58 }
 0x3f0   :  { %v5245_v53 = vpop.eup %5244  ;;  %v1953_v4 = vsel %vm1715_vm1, %v6508_v62, 0.0 }
 0x3f1   :  { %v1900_v22 = vmul.f32 1.442695, %v1840_v18  ;;  %1987 = vadd.xlane.f32.xlu0 %v1986_v42  ;;  %v2042_v35 = vmul.f32 %v5245_v53, %v6365_v16  ;;  %v1890_v19 = vmul.f32 1.442695, %v1835_v38 }
 0x3f2   :  { %v6511_v3 = vpop.eup %5246 }
 0x3f3   :  { %5248 = vpow2.f32 %v1900_v22  ;;  %v1995_v46 = vsel %vm1715_vm1, %v6511_v3, 0.0  ;;  %v2074_v52 = vpack.c.bf16 %v2042_v35, %v2042_v35 }
 0x3f4   :  { %5250 = vpow2.f32 %v1886_v31 }
 0x3f5   :  { %1975 = vadd.xlane.f32.xlu2 %v1974_v40  ;;  %v2186_v58 = vunpack.c.l.b16 %v2074_v52 }
 0x3f6   :  { %v1931_v55 = vpop.xlane.xlu0 %1930  ;;  %v1961_v33 = vpop.xlane.xlu1 %1960 }
 0x3f7   :  { %v1937_v8 = vpop.xlane.xlu2 %1936  ;;  %5252 = vrcp.f32 %v1931_v55 }
 0x3f8   :  { %5254 = vpow2.f32 %v1890_v19 }
 0x3f9   :  { %v6515_v54 = vpop.eup %5248  ;;  %1954 = vadd.xlane.f32.xlu0 %v1953_v4 }
 0x3fa   :  { %v1992_v13 = vsel %vm1715_vm1, %v6515_v54, 0.0  ;;  %v6522_v27 = vpop.eup %5250 }
 0x3fb   :  { %1993 = vadd.xlane.f32.xlu1 %v1992_v13  ;;  %v1971_v16 = vsel %vm1715_vm1, %v6522_v27, 0.0 }
 0x3fd   :  { %1996 = vadd.xlane.f32.xlu2 %v1995_v46  ;;  %v5253_v63 = vpop.eup %5252 }
 0x3fe   :  { %v1808_v7 = vpop.xlane.xlu0 %1807  ;;  %v2043_v0 = vmul.f32 %v5253_v63, %v6390_v34  ;;  %v6528_v18 = vpop.eup %5254  ;;  %v4974_v63 = vunpack.i.l.bf16 %v6175_v15 }
 0x3ff   :  { %v1842_v59 = vsub.f32 %v6406_v14, %v1808_v7  ;;  %v1940_v23 = vpop.xlane.xlu2 %1939  ;;  %v1977_v31 = vsel %vm1715_vm1, %v6528_v18, 0.0 }
 0x400   :  { %v2075_v17 = vpack.c.bf16 %v2043_v0, %v2043_v0  ;;  %5256 = vrcp.f32 %v1940_v23 }
 0x401   :  { %v1904_v61 = vmul.f32 1.442695, %v1842_v59  ;;  %1972 = vadd.xlane.f32.xlu0 %v1971_v16  ;;  %v1226_v16 = vpack.c.bf16 %v4974_v63, %v4974_v63 }
 0x402   :  { %v2187_v25 = vunpack.c.l.b16 %v2075_v17 }
 0x403   :  { %5258 = vpow2.f32 %v1904_v61 }
 0x404   :  { %v2188_v29 = vpack.c.b16 %v2187_v25, %v2186_v58 }
 0x406   :  { %v1811_v42 = vpop.xlane.xlu0 %1810  ;;  %v1943_v22 = vpop.xlane.xlu1 %1942  ;;  %4490 = vmatmul.msk.bf16.vlgmr.msra.gmra.mxu1 %vm1715_vm1, %v2188_v29 }
 0x407   :  { %v1843_v34 = vsub.f32 %v6419_v11, %v1811_v42  ;;  %v5257_v14 = vpop.eup %5256  ;;  %5260 = vrcp.f32 %v1943_v22  ;;  %v2443_v42 = vunpack.c.l.b16 %v1226_v16 }
 0x408   :  { %5262 = vrcp.f32 %v1937_v8  ;;  %v2046_v38 = vmul.f32 %v5257_v14, %v6413_v43  ;;  %v4975_v8 = vunpack.i.h.bf16 %v6175_v15  ;;  %v1982_v15 = vpop.xlane.xlu2 %1981 }
 0x409   :  { %v6534_v40 = vpop.eup %5258  ;;  %v1906_v55 = vmul.f32 1.442695, %v1843_v34  ;;  %1978 = vadd.xlane.f32.xlu0 %v1977_v31 }
 0x40a   :  { %v1998_v53 = vsel %vm1715_vm1, %v6534_v40, 0.0  ;;  %v2078_v35 = vpack.c.bf16 %v2046_v38, %v2046_v38  ;;  %v1227_v23 = vpack.c.bf16 %v4975_v8, %v4975_v8 }
 0x40b   :  { %5264 = vpow2.f32 %v1906_v55  ;;  %1999 = vadd.xlane.f32.xlu2 %v1998_v53 }
 0x40c   :  { %v2242_v0 = vunpack.c.l.b16 %v2078_v35  ;;  %v2444_v29 = vunpack.c.l.b16 %v1227_v23 }
 0x40d   :  { %v5261_v4 = vpop.eup %5260 }
 0x40e   :  { %v1934_v13 = vpop.xlane.xlu0 %1933  ;;  %v5263_v11 = vpop.eup %5262  ;;  %v2047_v19 = vmul.f32 %v5261_v4, %v6424_v60  ;;  %v2445_v31 = vpack.c.b16 %v2444_v29, %v2443_v42 }
 0x40f   :  { %5266 = vrcp.f32 %v1934_v13  ;;  %v2045_v52 = vmul.f32 %v5263_v11, %v6396_v45  ;;  %v1946_v25 = vpop.xlane.xlu1 %1945 }
 0x410   :  { %v2079_v7 = vpack.c.bf16 %v2047_v19, %v2047_v19  ;;  %5268 = vrcp.f32 %v1961_v33 }
 0x411   :  { %v6540_v46 = vpop.eup %5264  ;;  %v2077_v61 = vpack.c.bf16 %v2045_v52, %v2045_v52  ;;  %5270 = vrcp.f32 %v6500_v37 }
 0x412   :  { %v2001_v43 = vsel %vm1715_vm1, %v6540_v46, 0.0  ;;  %v2243_v59 = vunpack.c.l.b16 %v2079_v7  ;;  %5272 = vrcp.f32 %v1946_v25 }
 0x413   :  { %2002 = vadd.xlane.f32.xlu2 %v2001_v43  ;;  %v2215_v22 = vunpack.c.l.b16 %v2077_v61 }
 0x414   :  { %5087 = vrot.lane.b32.xlu1 %v6110_v57, %s5748_s20  ;;  %v2244_v17 = vpack.c.b16 %v2243_v59, %v2242_v0 }
 0x415   :  { %v5267_v60 = vpop.eup %5266 }
 0x416   :  { %v2044_v58 = vmul.f32 %v5267_v60, %v6434_v30  ;;  %4492 = vmatmul.msk.bf16.vlgmr.msra.gmra.mxu3 %vm1715_vm1, %v2244_v17  ;;  %v5269_v14 = vpop.eup %5268  ;;  %v1985_v33 = vpop.xlane.xlu0 %1984 }
 0x417   :  { %v5271_v30 = vpop.eup %5270  ;;  %v2053_v38 = vmul.f32 %v5269_v14, %v6392_v20 }
 0x418   :  { %v2076_v45 = vpack.c.bf16 %v2044_v58, %v2044_v58  ;;  %v5273_v53 = vpop.eup %5272  ;;  %v2052_v37 = vmul.f32 %v5271_v30, %v6381_v49 }
 0x419   :  { %v2048_v4 = vmul.f32 %v5273_v53, %v6443_v51  ;;  %v2085_v13 = vpack.c.bf16 %v2053_v38, %v2053_v38 }
 0x41a   :  { %v2214_v57 = vunpack.c.l.b16 %v2076_v45  ;;  %v2084_v35 = vpack.c.bf16 %v2052_v37, %v2052_v37 }
 0x41b   :  { %v2080_v19 = vpack.c.bf16 %v2048_v4, %v2048_v4  ;;  %v2327_v63 = vunpack.c.l.b16 %v2085_v13 }
 0x41c   :  { %v2216_v34 = vpack.c.b16 %v2215_v22, %v2214_v57  ;;  %v2326_v49 = vunpack.c.l.b16 %v2084_v35 }
 0x41d   :  { %5092 = vrot.lane.b32.xlu0 %v6161_v41, %s5748_s20  ;;  %v2270_v16 = vunpack.c.l.b16 %v2080_v19 }
 0x41e   :  { %4491 = vmatmul.msk.bf16.vlgmr.msra.gmra.mxu2 %vm1715_vm1, %v2216_v34  ;;  %v1964_v20 = vpop.xlane.xlu0 %1963  ;;  %v2328_v25 = vpack.c.b16 %v2327_v63, %v2326_v49 }
 0x41f   :  { %v1949_v55 = vpop.xlane.xlu2 %1948  ;;  %2457 = vmatpush.bf16.msra.mxu2 %v2445_v31 }
 0x420   :  { %5274 = vrcp.f32 %v1949_v55 }
 0x421   :  { %5276 = vrcp.f32 %v1985_v33 }
 0x422   :  { %5278 = vrcp.f32 %v1982_v15 }
 0x423   :  { %5280 = vrcp.f32 %v1964_v20 }
 0x426   :  { %v5275_v11 = vpop.eup %5274 }
 0x427   :  { %v2049_v41 = vmul.f32 %v5275_v11, %v6455_v56  ;;  %v5068_v8 = vpop.permute.xlu2 %5067  ;;  %v5073_v43 = vpop.permute.xlu1 %5072 }
 0x428   :  { %v5070_v7 = vunpack.i.h.bf16 %v5068_v8  ;;  %v5069_v52 = vunpack.i.l.bf16 %v5068_v8  ;;  %v5075_v59 = vunpack.i.h.bf16 %v5073_v43  ;;  %v5074_v60 = vunpack.i.l.bf16 %v5073_v43  ;;  %v5277_v29 = vpop.eup %5276 }
 0x429   :  { %v2081_v0 = vpack.c.bf16 %v2049_v41, %v2049_v41  ;;  %v5279_v15 = vpop.eup %5278  ;;  %v2061_v31 = vmul.f32 %v5277_v29, %v6447_v32 }
 0x42a   :  { %v1229_v23 = vpack.c.bf16 %v5070_v7, %v5070_v7  ;;  %v1228_v51 = vpack.c.bf16 %v5069_v52, %v5069_v52  ;;  %v1217_v61 = vpack.c.bf16 %v5075_v59, %v5075_v59  ;;  %v1216_v58 = vpack.c.bf16 %v5074_v60, %v5074_v60 }
 0x42b   :  { %v2271_v17 = vunpack.c.l.b16 %v2081_v0  ;;  %v2060_v33 = vmul.f32 %v5279_v15, %v6432_v50  ;;  %v2093_v38 = vpack.c.bf16 %v2061_v31, %v2061_v31 }
 0x42c   :  { %v2472_v45 = vunpack.c.l.b16 %v1229_v23  ;;  %v2471_v56 = vunpack.c.l.b16 %v1228_v51  ;;  %v2304_v22 = vunpack.c.l.b16 %v1217_v61  ;;  %v2303_v57 = vunpack.c.l.b16 %v1216_v58  ;;  %v5281_v23 = vpop.eup %5280 }
 0x42d   :  { %v2272_v42 = vpack.c.b16 %v2271_v17, %v2270_v16  ;;  %v2092_v13 = vpack.c.bf16 %v2060_v33, %v2060_v33  ;;  %v2439_v19 = vunpack.c.l.b16 %v2093_v38  ;;  %v2054_v51 = vmul.f32 %v5281_v23, %v6453_v5 }
 0x42e   :  { %v2473_v34 = vpack.c.b16 %v2472_v45, %v2471_v56  ;;  %4495 = vmatmul.msk.bf16.vlgmr.msrb.gmra.mxu2 %vm1715_vm1, %v2328_v25  ;;  %v2305_v14 = vpack.c.b16 %v2304_v22, %v2303_v57 }
 0x42f   :  { %4493 = vmatmul.msk.bf16.vlgmr.msra.gmra.mxu0 %vm1715_vm1, %v2272_v42  ;;  %v2438_v63 = vunpack.c.l.b16 %v2092_v13  ;;  %v2086_v17 = vpack.c.bf16 %v2054_v51, %v2054_v51 }
 0x430   :  { %2485 = vmatpush.bf16.msra.mxu3 %v2473_v34  ;;  %2317 = vmatpush.bf16.msrb.mxu1 %v2305_v14 }
 0x431   :  { %v5078_v30 = vpop.permute.xlu0 %5077  ;;  %v2440_v32 = vpack.c.b16 %v2439_v19, %v2438_v63  ;;  %v2354_v45 = vunpack.c.l.b16 %v2086_v17 }
 0x432   :  { %v5080_v55 = vunpack.i.h.bf16 %v5078_v30  ;;  %v5079_v53 = vunpack.i.l.bf16 %v5078_v30 }
 0x434   :  { %v1223_v37 = vpack.c.bf16 %v5080_v55, %v5080_v55  ;;  %v1222_v4 = vpack.c.bf16 %v5079_v53, %v5079_v53 }
 0x436   :  { %v2388_v11 = vunpack.c.l.b16 %v1223_v37  ;;  %v2387_v35 = vunpack.c.l.b16 %v1222_v4 }
 0x438   :  { %v2389_v41 = vpack.c.b16 %v2388_v11, %v2387_v35 }
 0x439   :  { %v5083_v8 = vpop.permute.xlu0 %5082 }
 0x43a   :  { %v5085_v7 = vunpack.i.h.bf16 %v5083_v8  ;;  %v5084_v52 = vunpack.i.l.bf16 %v5083_v8  ;;  %2401 = vmatpush.bf16.msrb.mxu0 %v2389_v41 }
 0x43c   :  { %v1225_v43 = vpack.c.bf16 %v5085_v7, %v5085_v7  ;;  %v1224_v0 = vpack.c.bf16 %v5084_v52, %v5084_v52 }
 0x43e   :  { %v2416_v59 = vunpack.c.l.b16 %v1225_v43  ;;  %v2415_v50 = vunpack.c.l.b16 %v1224_v0  ;;  %4499 = vmatmul.msk.bf16.vlgmr.msra.gmra.mxu2 %vm1715_vm1, %v2440_v32 }
 0x440   :  { %v2417_v60 = vpack.c.b16 %v2416_v59, %v2415_v50 }
 0x442   :  { %2429 = vmatpush.bf16.msra.mxu1 %v2417_v60 }
 0x452   :  { %v1967_v49 = vpop.xlane.xlu1 %1966 }
 0x453   :  { %5282 = vrcp.f32 %v1967_v49 }
 0x459   :  { %v5283_v16 = vpop.eup %5282 }
 0x45a   :  { %v2055_v61 = vmul.f32 %v5283_v16, %v6473_v26  ;;  %v1970_v58 = vpop.xlane.xlu1 %1969 }
 0x45c   :  { %v2087_v25 = vpack.c.bf16 %v2055_v61, %v2055_v61 }
 0x45e   :  { %v2355_v56 = vunpack.c.l.b16 %v2087_v25 }
 0x460   :  { %v2356_v29 = vpack.c.b16 %v2355_v56, %v2354_v45  ;;  %v1952_v42 = vpop.xlane.xlu2 %1951 }
 0x462   :  { %v1991_v22 = vpop.xlane.xlu1 %1990  ;;  %4496 = vmatmul.msk.bf16.vlgmr.msrb.gmra.mxu3 %vm1715_vm1, %v2356_v29 }
 0x463   :  { %5284 = vrcp.f32 %v1991_v22 }
 0x464   :  { %v1988_v20 = vpop.xlane.xlu0 %1987 }
 0x465   :  { %5286 = vrcp.f32 %v1988_v20 }
 0x466   :  { %5288 = vrcp.f32 %v1952_v42 }
 0x468   :  { %v1976_v26 = vpop.xlane.xlu2 %1975 }
 0x469   :  { %v5285_v57 = vpop.eup %5284 }
 0x46a   :  { %v2063_v5 = vmul.f32 %v5285_v57, %v6490_v39 }
 0x46b   :  { %v5287_v34 = vpop.eup %5286 }
 0x46c   :  { %v2062_v15 = vmul.f32 %v5287_v34, %v6494_v10  ;;  %v1955_v14 = vpop.xlane.xlu0 %1954  ;;  %v5289_v31 = vpop.eup %5288  ;;  %v2095_v30 = vpack.c.bf16 %v2063_v5, %v2063_v5 }
 0x46d   :  { %5290 = vrcp.f32 %v1955_v14  ;;  %v2050_v55 = vmul.f32 %v5289_v31, %v6487_v12 }
 0x46e   :  { %v2094_v33 = vpack.c.bf16 %v2062_v15, %v2062_v15  ;;  %5292 = vrcp.f32 %v1970_v58  ;;  %v2467_v53 = vunpack.c.l.b16 %v2095_v30  ;;  %v1994_v12 = vpop.xlane.xlu1 %1993 }
 0x46f   :  { %v2082_v13 = vpack.c.bf16 %v2050_v55, %v2050_v55 }
 0x470   :  { %v2466_v38 = vunpack.c.l.b16 %v2094_v33  ;;  %v1997_v19 = vpop.xlane.xlu2 %1996 }
 0x471   :  { %v2298_v8 = vunpack.c.l.b16 %v2082_v13 }
 0x472   :  { %v2468_v37 = vpack.c.b16 %v2467_v53, %v2466_v38  ;;  %v6582_v53 = vpop.f32.mrf.mxu2 }
 0x473   :  { %v5291_v4 = vpop.eup %5290 }
 0x474   :  { %v2051_v11 = vmul.f32 %v5291_v4, %v6508_v62  ;;  %v1973_v35 = vpop.xlane.xlu0 %1972  ;;  %4500 = vmatmul.msk.bf16.vlgmr.msra.gmra.mxu3 %vm1715_vm1, %v2468_v37  ;;  %v5293_v39 = vpop.eup %5292 }
 0x475   :  { %5294 = vrcp.f32 %v1973_v35  ;;  %v2056_v41 = vmul.f32 %v5293_v39, %v6481_v36 }
 0x476   :  { %v2083_v10 = vpack.c.bf16 %v2051_v11, %v2051_v11  ;;  %5296 = vrcp.f32 %v1976_v26 }
 0x477   :  { %5298 = vrcp.f32 %v1994_v12  ;;  %v2088_v32 = vpack.c.bf16 %v2056_v41, %v2056_v41 }
 0x478   :  { %v2299_v63 = vunpack.c.l.b16 %v2083_v10  ;;  %5300 = vrcp.f32 %v1997_v19 }
 0x479   :  { %v2382_v60 = vunpack.c.l.b16 %v2088_v32 }
 0x47a   :  { %v2300_v7 = vpack.c.b16 %v2299_v63, %v2298_v8 }
 0x47b   :  { %v5295_v52 = vpop.eup %5294 }
 0x47c   :  { %v2057_v62 = vmul.f32 %v5295_v52, %v6522_v27  ;;  %v1979_v43 = vpop.xlane.xlu0 %1978  ;;  %4494 = vmatmul.msk.bf16.vlgmr.msrb.gmra.mxu1 %vm1715_vm1, %v2300_v7  ;;  %v5297_v0 = vpop.eup %5296 }
 0x47d   :  { %5302 = vrcp.f32 %v1979_v43  ;;  %v2058_v36 = vmul.f32 %v5297_v0, %v6504_v1  ;;  %v5299_v23 = vpop.eup %5298  ;;  %v6586_v7 = vpop.f32.mrf.mxu2 }
 0x47e   :  { %v2089_v59 = vpack.c.bf16 %v2057_v62, %v2057_v62  ;;  %v2000_v50 = vpop.xlane.xlu2 %1999  ;;  %v5301_v51 = vpop.eup %5300  ;;  %v2064_v27 = vmul.f32 %v5299_v23, %v6515_v54 }
 0x47f   :  { %v2090_v61 = vpack.c.bf16 %v2058_v36, %v2058_v36  ;;  %v2065_v25 = vmul.f32 %v5301_v51, %v6511_v3  ;;  %5304 = vrcp.f32 %v2000_v50  ;;  %v6588_v52 = vpop.f32.mrf.mxu0  ;;  %v6591_v62 = vpop.f32.mrf.mxu3 }
 0x480   :  { %v2383_v49 = vunpack.c.l.b16 %v2089_v59  ;;  %v2096_v5 = vpack.c.bf16 %v2064_v27, %v2064_v27 }
 0x481   :  { %v2410_v22 = vunpack.c.l.b16 %v2090_v61  ;;  %v2097_v15 = vpack.c.bf16 %v2065_v25, %v2065_v25 }
 0x482   :  { %v2384_v16 = vpack.c.b16 %v2383_v49, %v2382_v60  ;;  %v2494_v30 = vunpack.c.l.b16 %v2096_v5 }
 0x483   :  { %v5303_v17 = vpop.eup %5302  ;;  %v2495_v33 = vunpack.c.l.b16 %v2097_v15 }
 0x484   :  { %v2059_v58 = vmul.f32 %v5303_v17, %v6528_v18  ;;  %4497 = vmatmul.msk.bf16.vlgmr.msrb.gmra.mxu0 %vm1715_vm1, %v2384_v16 }
 0x485   :  { %v5305_v31 = vpop.eup %5304  ;;  %v2496_v11 = vpack.c.b16 %v2495_v33, %v2494_v30  ;;  %v4820_v33 = vld [vmem:[#allocation10 + $0x28] sm:$0xff] }
 0x486   :  { %v2091_v45 = vpack.c.bf16 %v2059_v58, %v2059_v58  ;;  %v5088_v56 = vpop.permute.xlu1 %5087  ;;  %v2003_v29 = vpop.xlane.xlu2 %2002  ;;  %v2066_v37 = vmul.f32 %v5305_v31, %v6534_v40  ;;  %v4821_v31 = vld [vmem:[#allocation10 + $0x30] sm:$0xff] }
 0x487   :  { %v5090_v42 = vunpack.i.h.bf16 %v5088_v56  ;;  %v5089_v1 = vunpack.i.l.bf16 %v5088_v56  ;;  %5306 = vrcp.f32 %v2003_v29  ;;  %v6593_v43 = vpop.f32.mrf.mxu0  ;;  %v6596_v60 = vpop.f32.mrf.mxu3 }
 0x488   :  { %v2411_v20 = vunpack.c.l.b16 %v2091_v45  ;;  %v2098_v19 = vpack.c.bf16 %v2066_v37, %v2066_v37  ;;  %v6602_v29 = vpop.f32.mrf.mxu1 }
 0x489   :  { %v1231_v57 = vpack.c.bf16 %v5090_v42, %v5090_v42  ;;  %v1230_v34 = vpack.c.bf16 %v5089_v1, %v5089_v1 }
 0x48a   :  { %v2412_v18 = vpack.c.b16 %v2411_v20, %v2410_v22 }
 0x48b   :  { %v2500_v26 = vunpack.c.l.b16 %v1231_v57  ;;  %v2499_v14 = vunpack.c.l.b16 %v1230_v34 }
 0x48c   :  { %4498 = vmatmul.msk.bf16.vlgmr.msra.gmra.mxu1 %vm1715_vm1, %v2412_v18 }
 0x48d   :  { %v5307_v3 = vpop.eup %5306  ;;  %v2501_v54 = vpack.c.b16 %v2500_v26, %v2499_v14  ;;  %v4822_v14 = vld [vmem:[#allocation10 + $0x38] sm:$0xff] }
 0x48e   :  { %v2067_v55 = vmul.f32 %v5307_v3, %v6540_v46  ;;  %v2522_v46 = vunpack.c.l.b16 %v2098_v19  ;;  %2742 = vmatpush.bf16.msrb.mxu2 %v4822_v14  ;;  %4887 = vmatpush.bf16.msrb.mxu3 %v4822_v14  ;;  %v4816_v19 = vld [vmem:[#allocation10 + $0x8] sm:$0xff] }
 0x48f   :  { %v5093_v38 = vpop.permute.xlu0 %5092  ;;  %2513 = vmatpush.bf16.msra.mxu0 %v2501_v54 }
 0x490   :  { %v5095_v4 = vunpack.i.h.bf16 %v5093_v38  ;;  %v5094_v13 = vunpack.i.l.bf16 %v5093_v38  ;;  %v2099_v35 = vpack.c.bf16 %v2067_v55, %v2067_v55  ;;  %v6604_v22 = vpop.f32.mrf.mxu1  ;;  %v4819_v38 = vld [vmem:[#allocation10 + $0x20] sm:$0xff] }
 0x492   :  { %v1233_v39 = vpack.c.bf16 %v5095_v4, %v5095_v4  ;;  %v1232_v10 = vpack.c.bf16 %v5094_v13, %v5094_v13  ;;  %v2523_v63 = vunpack.c.l.b16 %v2099_v35  ;;  %2743 = vmatpush.bf16.msrb.mxu2 %v4821_v31  ;;  %4888 = vmatpush.bf16.msrb.mxu3 %v4821_v31  ;;  %v4818_v13 = vld [vmem:[#allocation10 + $0x18] sm:$0xff]  ;;  %v4817_v35 = vld [vmem:[#allocation10 + $0x10] sm:$0xff] }
 0x494   :  { %v2528_v41 = vunpack.c.l.b16 %v1233_v39  ;;  %v2527_v8 = vunpack.c.l.b16 %v1232_v10  ;;  %4501 = vmatmul.msk.bf16.vlgmr.msra.gmra.mxu0 %vm1715_vm1, %v2496_v11  ;;  %v2524_v40 = vpack.c.b16 %v2523_v63, %v2522_v46  ;;  %v4815_v63 = vld [vmem:[#allocation10] sm:$0xff] }
 0x496   :  { %v2529_v12 = vpack.c.b16 %v2528_v41, %v2527_v8  ;;  %2744 = vmatpush.bf16.msrb.mxu2 %v4820_v33  ;;  %4889 = vmatpush.bf16.msrb.mxu3 %v4820_v33 }
 0x498   :  { %2541 = vmatpush.bf16.msrb.mxu1 %v2529_v12 }
 0x499   :  { %v2263_v23 = vpop.f32.mrf.mxu3 }
 0x49a   :  { %2745 = vmatpush.bf16.msrb.mxu2 %v4819_v38  ;;  %4890 = vmatpush.bf16.msrb.mxu3 %v4819_v38 }
 0x49c   :  { %4502 = vmatmul.msk.bf16.vlgmr.msrb.gmra.mxu1 %vm1715_vm1, %v2524_v40 }
 0x49e   :  { %2746 = vmatpush.bf16.msrb.mxu2 %v4818_v13  ;;  %4891 = vmatpush.bf16.msrb.mxu3 %v4818_v13 }
 0x4a1   :  { %v2235_v32 = vpop.f32.mrf.mxu2  ;;  %v2265_v61 = vpop.f32.mrf.mxu3 }
 0x4a2   :  { %v5111_v27 = vpack.i.bf16 %v2265_v61, %v2263_v23  ;;  %2747 = vmatpush.bf16.msrb.mxu2 %v4817_v35  ;;  %4892 = vmatpush.bf16.msrb.mxu3 %v4817_v35 }
 0x4a6   :  { %2748 = vmatpush.bf16.msrb.mxu2 %v4816_v19  ;;  %4893 = vmatpush.bf16.msrb.mxu3 %v4816_v19 }
 0x4a9   :  { %v2237_v0 = vpop.f32.mrf.mxu2 }
 0x4aa   :  { %v5096_v59 = vpack.i.bf16 %v2237_v0, %v2235_v32  ;;  %2749 = vmatpush.bf16.msrb.mxu2 %v4815_v63  ;;  %4894 = vmatpush.bf16.msrb.mxu3 %v4815_v63 }
 0x4ac   :  { %v2291_v50 = vpop.f32.mrf.mxu0  ;;  %5097 = vrot.lane.b32.xlu2 %v5096_v59, %s5748_s20 }
 0x4b1   :  { %v2347_v36 = vpop.f32.mrf.mxu2 }
 0x4b4   :  { %v2293_v49 = vpop.f32.mrf.mxu0 }
 0x4b5   :  { %v5126_v51 = vpack.i.bf16 %v2293_v49, %v2291_v50 }
 0x4b7   :  { %5127 = vrot.lane.b32.xlu2 %v5126_v51, %s5748_s20 }
 0x4b9   :  { %v2349_v16 = vpop.f32.mrf.mxu2 }
 0x4ba   :  { %v5101_v17 = vpack.i.bf16 %v2349_v16, %v2347_v36 }
 0x4bc   :  { %5102 = vrot.lane.b32.xlu0 %v5101_v17, %s5737_s18 }
 0x4c1   :  { %v2459_v58 = vpop.f32.mrf.mxu2 }
 0x4c4   :  { %5112 = vrot.lane.b32.xlu0 %v5111_v27, %s5748_s20 }
 0x4c9   :  { %v2461_v25 = vpop.f32.mrf.mxu2 }
 0x4ca   :  { %v5106_v45 = vpack.i.bf16 %v2461_v25, %v2459_v58 }
 0x4cc   :  { %5107 = vrot.lane.b32.xlu1 %v5106_v45, %s5747_s4 }
 0x4e5   :  { %v2375_v56 = vpop.f32.mrf.mxu3 }
 0x4ed   :  { %v2377_v42 = vpop.f32.mrf.mxu3 }
 0x4ee   :  { %v5116_v1 = vpack.i.bf16 %v2377_v42, %v2375_v56 }
 0x4f0   :  { %5117 = vrot.lane.b32.xlu1 %v5116_v1, %s5737_s18 }
 0x4f7   :  { %v2487_v20 = vpop.f32.mrf.mxu3 }
 0x4f9   :  { %v2319_v57 = vpop.f32.mrf.mxu1 }
 0x4ff   :  { %v2489_v34 = vpop.f32.mrf.mxu3 }
 0x500   :  { %v5121_v5 = vpack.i.bf16 %v2489_v34, %v2487_v20 }
 0x501   :  { %v2321_v15 = vpop.f32.mrf.mxu1  ;;  %v2403_v18 = vpop.f32.mrf.mxu0 }
 0x502   :  { %v5141_v26 = vpack.i.bf16 %v2321_v15, %v2319_v57  ;;  %5122 = vrot.lane.b32.xlu0 %v5121_v5, %s5747_s4 }
 0x504   :  { %5142 = vrot.lane.b32.xlu2 %v5141_v26, %s5748_s20 }
 0x506   :  { %v5098_v12 = vpop.permute.xlu2 %5097 }
 0x507   :  { %v5100_v40 = vunpack.i.h.bf16 %v5098_v12  ;;  %v5099_v32 = vunpack.i.l.bf16 %v5098_v12 }
 0x509   :  { %v2405_v3 = vpop.f32.mrf.mxu0  ;;  %v2431_v54 = vpop.f32.mrf.mxu1  ;;  %v2645_v36 = vsel %vm1244_vm0, %v6586_v7, %v5100_v40  ;;  %v2644_v49 = vsel %vm1244_vm0, %v6582_v53, %v5099_v32 }
 0x50a   :  { %v5131_v30 = vpack.i.bf16 %v2405_v3, %v2403_v18 }
 0x50c   :  { %5132 = vrot.lane.b32.xlu1 %v5131_v30, %s5737_s18 }
 0x511   :  { %v2433_v55 = vpop.f32.mrf.mxu1  ;;  %v2515_v4 = vpop.f32.mrf.mxu0 }
 0x512   :  { %v5146_v37 = vpack.i.bf16 %v2433_v55, %v2431_v54  ;;  %v5128_v3 = vpop.permute.xlu2 %5127 }
 0x513   :  { %v5130_v30 = vunpack.i.h.bf16 %v5128_v3  ;;  %v5129_v33 = vunpack.i.l.bf16 %v5128_v3 }
 0x514   :  { %5147 = vrot.lane.b32.xlu1 %v5146_v37, %s5737_s18 }
 0x515   :  { %v2648_v37 = vsel %vm1244_vm0, %v6588_v52, %v5129_v33 }
 0x519   :  { %v2543_v11 = vpop.f32.mrf.mxu1  ;;  %v2517_v39 = vpop.f32.mrf.mxu0 }
 0x51a   :  { %v5136_v10 = vpack.i.bf16 %v2517_v39, %v2515_v4 }
 0x51c   :  { %5137 = vrot.lane.b32.xlu0 %v5136_v10, %s5747_s4 }
 0x521   :  { %v2545_v41 = vpop.f32.mrf.mxu1 }
 0x522   :  { %v5151_v8 = vpack.i.bf16 %v2545_v41, %v2543_v11 }
 0x524   :  { %5152 = vrot.lane.b32.xlu0 %v5151_v8, %s5747_s4 }
 0x52e   :  { %v5103_v46 = vpop.permute.xlu0 %5102 }
 0x52f   :  { %v5105_v0 = vunpack.i.h.bf16 %v5103_v46  ;;  %v5104_v59 = vunpack.i.l.bf16 %v5103_v46 }
 0x531   :  { %v2653_v16 = vsel %vm2652_vm2, %v2644_v49, %v5104_v59  ;;  %v2654_v17 = vsel %vm2652_vm2, %v2645_v36, %v5105_v0 }
 0x536   :  { %v5113_v25 = vpop.permute.xlu0 %5112 }
 0x537   :  { %v5115_v56 = vunpack.i.h.bf16 %v5113_v25  ;;  %v5114_v42 = vunpack.i.l.bf16 %v5113_v25 }
 0x539   :  { %v2647_v53 = vsel %vm1244_vm0, %v6596_v60, %v5115_v56  ;;  %v2646_v57 = vsel %vm1244_vm0, %v6591_v62, %v5114_v42  ;;  %v2649_v62 = vsel %vm1244_vm0, %v6593_v43, %v5130_v30 }
 0x53e   :  { %v5108_v50 = vpop.permute.xlu1 %5107 }
 0x53f   :  { %v5110_v23 = vunpack.i.h.bf16 %v5108_v50  ;;  %v5109_v51 = vunpack.i.l.bf16 %v5108_v50 }
 0x541   :  { %v2662_v61 = vsel %vm2661_vm3, %v2653_v16, %v5109_v51  ;;  %v2663_v58 = vsel %vm2661_vm3, %v2654_v17, %v5110_v23  ;;  %v5158_v16 = vld [vmem:[#allocation11] ss:$0 sm:$0xff] }
 0x542   :  { %v2670_v27 = vpack.c.bf16 %v2663_v58, %v2662_v61 }
 0x544   :  { %2750 = vmatmul.bf16.vlgmr.msrb.gmra.mxu2 %v2670_v27 }
 0x55e   :  { %v5143_v41 = vpop.permute.xlu2 %5142 }
 0x55f   :  { %v5145_v12 = vunpack.i.h.bf16 %v5143_v41  ;;  %v5144_v43 = vunpack.i.l.bf16 %v5143_v41 }
 0x561   :  { %v2651_v0 = vsel %vm1244_vm0, %v6604_v22, %v5145_v12  ;;  %v2650_v59 = vsel %vm1244_vm0, %v6602_v29, %v5144_v43 }
 0x562   :  { %v5118_v45 = vpop.permute.xlu1 %5117 }
 0x563   :  { %v5120_v7 = vunpack.i.h.bf16 %v5118_v45  ;;  %v5119_v1 = vunpack.i.l.bf16 %v5118_v45 }
 0x565   :  { %v2655_v15 = vsel %vm2652_vm2, %v2646_v57, %v5119_v1  ;;  %v2656_v18 = vsel %vm2652_vm2, %v2647_v53, %v5120_v7 }
 0x574   :  { %v5123_v20 = vpop.permute.xlu0 %5122 }
 0x575   :  { %v5125_v34 = vunpack.i.h.bf16 %v5123_v20  ;;  %v5124_v5 = vunpack.i.l.bf16 %v5123_v20 }
 0x577   :  { %v2664_v26 = vsel %vm2661_vm3, %v2655_v15, %v5124_v5  ;;  %v2665_v14 = vsel %vm2661_vm3, %v2656_v18, %v5125_v34 }
 0x578   :  { %v2671_v31 = vpack.c.bf16 %v2665_v14, %v2664_v26 }
 0x57a   :  { %2755 = vmatmul.bf16.gmra.mxu2 %v2671_v31 }
 0x57e   :  { %v5133_v54 = vpop.permute.xlu1 %5132 }
 0x57f   :  { %v5135_v60 = vunpack.i.h.bf16 %v5133_v54  ;;  %v5134_v55 = vunpack.i.l.bf16 %v5133_v54 }
 0x581   :  { %v2657_v11 = vsel %vm2652_vm2, %v2648_v37, %v5134_v55  ;;  %v2658_v35 = vsel %vm2652_vm2, %v2649_v62, %v5135_v60 }
 0x586   :  { %v5148_v8 = vpop.permute.xlu1 %5147 }
 0x587   :  { %v5150_v46 = vunpack.i.h.bf16 %v5148_v8  ;;  %v5149_v40 = vunpack.i.l.bf16 %v5148_v8 }
 0x589   :  { %v2659_v50 = vsel %vm2652_vm2, %v2650_v59, %v5149_v40  ;;  %v2660_v36 = vsel %vm2652_vm2, %v2651_v0, %v5150_v46  ;;  %v4649_v40 = vld [vmem:[#allocation16 + $0xe0] sm:$0xf]  ;;  %v4651_v59 = vld [vmem:[#allocation16 + $0xf0] sm:$0xf0] }
 0x58e   :  { %v5138_v38 = vpop.permute.xlu0 %5137 }
 0x58f   :  { %v5140_v4 = vunpack.i.h.bf16 %v5138_v38  ;;  %v5139_v13 = vunpack.i.l.bf16 %v5138_v38 }
 0x591   :  { %v2667_v39 = vsel %vm2661_vm3, %v2658_v35, %v5140_v4  ;;  %v2666_v10 = vsel %vm2661_vm3, %v2657_v11, %v5139_v13 }
 0x592   :  { %v2672_v19 = vpack.c.bf16 %v2667_v39, %v2666_v10 }
 0x594   :  { %2760 = vmatmul.bf16.vlgmr.msrb.gmra.mxu3 %v2672_v19 }
 0x596   :  { %v5153_v63 = vpop.permute.xlu0 %5152 }
 0x597   :  { %v5155_v52 = vunpack.i.h.bf16 %v5153_v63  ;;  %v5154_v32 = vunpack.i.l.bf16 %v5153_v63 }
 0x599   :  { %v2668_v49 = vsel %vm2661_vm3, %v2659_v50, %v5154_v32  ;;  %v2669_v23 = vsel %vm2661_vm3, %v2660_v36, %v5155_v52  ;;  %v4853_v52 = vld [vmem:[#allocation16 + $0xec] sm:$0xf0]  ;;  %v4851_v32 = vld [vmem:[#allocation16 + $0xe4] sm:$0xf]  ;;  %v4657_v50 = vld [vmem:[#allocation16 + $0xe8] sm:$0xf] }
 0x59a   :  { %v2673_v51 = vpack.c.bf16 %v2669_v23, %v2668_v49  ;;  %v4650_v0 = vor.u32 %v4853_v52, %v4649_v40  ;;  %v4854_v36 = vld [vmem:[#allocation16 + $0xf4] sm:$0xf0]  ;;  %v4654_v49 = vor.u32 %v4851_v32, %v4651_v59  ;;  %v4585_v40 = vld [vmem:[#allocation16 + $0x60] sm:$0xf]  ;;  %v4837_v52 = vld [vmem:[#allocation16 + $0x6c] sm:$0xf0] }
 0x59b   :  { %v4658_v23 = vor.u32 %v4854_v36, %v4657_v50  ;;  %v4835_v32 = vld [vmem:[#allocation16 + $0x64] sm:$0xf]  ;;  %v4587_v59 = vld [vmem:[#allocation16 + $0x70] sm:$0xf0]  ;;  %v4593_v50 = vld [vmem:[#allocation16 + $0x68] sm:$0xf] }
 0x59c   :  { %3169 = vmatpush.bf16.msra.mxu3 %v4650_v0  ;;  %3198 = vmatpush.bf16.msrb.mxu0 %v4654_v49  ;;  %v4586_v0 = vor.u32 %v4837_v52, %v4585_v40  ;;  %v4838_v36 = vld [vmem:[#allocation16 + $0x74] sm:$0xf0]  ;;  %v4545_v40 = vld [vmem:[#allocation16 + $0x8] sm:$0xf] }
 0x59d   :  { %3227 = vmatpush.bf16.msra.mxu1 %v4658_v23  ;;  %v4590_v23 = vor.u32 %v4835_v32, %v4587_v59  ;;  %v4826_v52 = vld [vmem:[#allocation16 + $0x14] sm:$0xf0]  ;;  %v4824_v32 = vld [vmem:[#allocation16 + $0xc] sm:$0xf]  ;;  %v4547_v59 = vld [vmem:[#allocation16 + $0x18] sm:$0xf0] }
 0x5a4   :  { %2765 = vmatmul.bf16.gmra.mxu3 %v2673_v51  ;;  %v4852_v51 = vld [vmem:[#allocation16 + $0xec] sm:$0xf] }
 0x5c7   :  { %v2751_v17 = vpop.f32.mrf.mxu2 }
 0x5c8   :  { %v2752_v61 = vadd.f32 %v5158_v16, %v2751_v17 }
 0x5ca   :  { %v6646_v58 = vadd.f32 %v2752_v61, %v5889_v24  ;;  %v4633_v61 = vld [vmem:[#allocation16 + $0xc0] sm:$0xf] }
 0x5cc   :  { %2779 = vadd.xlane.f32.xlu2 %v6646_v58 }
 0x5cf   :  { %v2753_v22 = vpop.f32.mrf.mxu2 }
 0x5d0   :  { %v2754_v29 = vadd.f32 %v5158_v16, %v2753_v22  ;;  %v4849_v22 = vld [vmem:[#allocation16 + $0xcc] sm:$0xf0] }
 0x5d2   :  { %v6650_v27 = vadd.f32 %v2754_v29, %v5919_v21  ;;  %v4847_v29 = vld [vmem:[#allocation16 + $0xc4] sm:$0xf] }
 0x5d4   :  { %2781 = vadd.xlane.f32.xlu1 %v6650_v27 }
 0x5fd   :  { %v2756_v25 = vpop.f32.mrf.mxu2 }
 0x5fe   :  { %v2757_v45 = vadd.f32 %v5158_v16, %v2756_v25  ;;  %v4634_v25 = vor.u32 %v4849_v22, %v4633_v61 }
 0x600   :  { %v6654_v56 = vadd.f32 %v2757_v45, %v5879_v2  ;;  %v4635_v45 = vld [vmem:[#allocation16 + $0xd0] sm:$0xf0]  ;;  %3170 = vmatpush.bf16.msra.mxu3 %v4634_v25  ;;  %v4833_v25 = vld [vmem:[#allocation16 + $0x4c] sm:$0xf0] }
 0x602   :  { %2783 = vadd.xlane.f32.xlu0 %v6654_v56 }
 0x605   :  { %v2758_v42 = vpop.f32.mrf.mxu2 }
 0x606   :  { %v2759_v7 = vadd.f32 %v5158_v16, %v2758_v42  ;;  %v4641_v42 = vld [vmem:[#allocation16 + $0xc8] sm:$0xf] }
 0x608   :  { %v6658_v24 = vadd.f32 %v2759_v7, %v5909_v6  ;;  %v4850_v7 = vld [vmem:[#allocation16 + $0xd4] sm:$0xf0] }
 0x60a   :  { %2785 = vadd.xlane.f32.xlu2 %v6658_v24 }
 0x617   :  { %v2761_v1 = vpop.f32.mrf.mxu3 }
 0x618   :  { %v2762_v20 = vadd.f32 %v5158_v16, %v2761_v1  ;;  %v4638_v1 = vor.u32 %v4847_v29, %v4635_v45  ;;  %v4569_v29 = vld [vmem:[#allocation16 + $0x40] sm:$0xf]  ;;  %v4831_v45 = vld [vmem:[#allocation16 + $0x44] sm:$0xf] }
 0x61a   :  { %v6662_v21 = vadd.f32 %v2762_v20, %v5869_v44  ;;  %v4642_v20 = vor.u32 %v4850_v7, %v4641_v42  ;;  %3199 = vmatpush.bf16.msrb.mxu0 %v4638_v1  ;;  %v4570_v7 = vor.u32 %v4833_v25, %v4569_v29  ;;  %v4571_v1 = vld [vmem:[#allocation16 + $0x50] sm:$0xf0] }
 0x61c   :  { %2787 = vadd.xlane.f32.xlu1 %v6662_v21  ;;  %3228 = vmatpush.bf16.msra.mxu1 %v4642_v20  ;;  %v4577_v20 = vld [vmem:[#allocation16 + $0x48] sm:$0xf] }
 0x61f   :  { %v2763_v53 = vpop.f32.mrf.mxu3 }
 0x620   :  { %v2764_v57 = vadd.f32 %v5158_v16, %v2763_v53  ;;  %v4848_v53 = vld [vmem:[#allocation16 + $0xcc] sm:$0xf] }
 0x622   :  { %v6666_v2 = vadd.f32 %v2764_v57, %v5899_v47  ;;  %v4643_v57 = vld [vmem:[#allocation16 + $0xd8] sm:$0xf0] }
 0x624   :  { %2789 = vadd.xlane.f32.xlu2 %v6666_v2 }
 0x627   :  { %v2766_v34 = vpop.f32.mrf.mxu3 }
 0x628   :  { %v2767_v5 = vadd.f32 %v5158_v16, %v2766_v34  ;;  %v4646_v34 = vor.u32 %v4848_v53, %v4643_v57  ;;  %v4574_v53 = vor.u32 %v4831_v45, %v4571_v1  ;;  %v4834_v57 = vld [vmem:[#allocation16 + $0x54] sm:$0xf0] }
 0x62a   :  { %v6670_v6 = vadd.f32 %v2767_v5, %v5927_v28  ;;  %v4617_v5 = vld [vmem:[#allocation16 + $0xa0] sm:$0xf] }
 0x62c   :  { %2791 = vadd.xlane.f32.xlu2 %v6670_v6 }
 0x62f   :  { %v2768_v47 = vpop.f32.mrf.mxu3 }
 0x630   :  { %v2769_v31 = vadd.f32 %v5158_v16, %v2768_v47  ;;  %v4659_v16 = vld [vmem:[#allocation16 + $0xf8] sm:$0xf0]  ;;  %v4619_v47 = vld [vmem:[#allocation16 + $0xb0] sm:$0xf0] }
 0x631   :  { %v4662_v17 = vor.u32 %v4852_v51, %v4659_v16  ;;  %v4594_v51 = vor.u32 %v4838_v36, %v4593_v50  ;;  %v4836_v16 = vld [vmem:[#allocation16 + $0x6c] sm:$0xf] }
 0x632   :  { %v6684_v54 = vadd.f32 %v2769_v31, %v5950_v9  ;;  %v4846_v31 = vld [vmem:[#allocation16 + $0xb4] sm:$0xf0] }
 0x633   :  { %3256 = vmatpush.bf16.msra.mxu2 %v4662_v17  ;;  %v4595_v17 = vld [vmem:[#allocation16 + $0x78] sm:$0xf0] }
 0x634   :  { %v4598_v22 = vor.u32 %v4836_v16, %v4595_v17  ;;  %v4550_v16 = vor.u32 %v4824_v32, %v4547_v59 }
 0x637   :  { %3257 = vmatpush.bf16.msra.mxu2 %v4646_v34  ;;  %v4832_v34 = vld [vmem:[#allocation16 + $0x4c] sm:$0xf] }
 0x63f   :  { %v2780_v15 = vpop.xlane.xlu2 %2779 }
 0x640   :  { %v2795_v44 = vmul.f32 %v2780_v15, %v5932_v48  ;;  %v4845_v15 = vld [vmem:[#allocation16 + $0xac] sm:$0xf0] }
 0x642   :  { %v6675_v18 = vsub.f32 %v6646_v58, %v2795_v44  ;;  %v4843_v44 = vld [vmem:[#allocation16 + $0xa4] sm:$0xf] }
 0x644   :  { %v2811_v26 = vmul.f32 %v6675_v18, %v6675_v18 }
 0x646   :  { %2819 = vadd.xlane.f32.xlu0 %v2811_v26  ;;  %v4618_v26 = vor.u32 %v4845_v15, %v4617_v5  ;;  %v4579_v5 = vld [vmem:[#allocation16 + $0x58] sm:$0xf0]  ;;  %v4578_v15 = vor.u32 %v4834_v57, %v4577_v20 }
 0x647   :  { %v2782_v14 = vpop.xlane.xlu1 %2781 }
 0x648   :  { %v2796_v3 = vmul.f32 %v2782_v14, %v5932_v48  ;;  %v4625_v14 = vld [vmem:[#allocation16 + $0xa8] sm:$0xf]  ;;  %3171 = vmatpush.bf16.msra.mxu3 %v4618_v26  ;;  %v4553_v26 = vld [vmem:[#allocation16 + $0x20] sm:$0xf] }
 0x64a   :  { %v6681_v28 = vsub.f32 %v6650_v27, %v2796_v3  ;;  %v4622_v3 = vor.u32 %v4843_v44, %v4619_v47  ;;  %v4582_v44 = vor.u32 %v4832_v34, %v4579_v5  ;;  %v4829_v47 = vld [vmem:[#allocation16 + $0x2c] sm:$0xf0]  ;;  %v6732_v34 = vld [vmem:[#allocation13] ss:$0 sm:$0xff] }
 0x64c   :  { %v2812_v30 = vmul.f32 %v6681_v28, %v6681_v28  ;;  %3200 = vmatpush.bf16.msrb.mxu0 %v4622_v3  ;;  %v4555_v3 = vld [vmem:[#allocation16 + $0x30] sm:$0xf0] }
 0x64e   :  { %2821 = vadd.xlane.f32.xlu1 %v2812_v30  ;;  %2793 = vadd.xlane.f32.xlu0 %v6684_v54  ;;  %v4626_v30 = vor.u32 %v4846_v31, %v4625_v14  ;;  %v4827_v14 = vld [vmem:[#allocation16 + $0x24] sm:$0xf]  ;;  %v4554_v31 = vor.u32 %v4829_v47, %v4553_v26  ;;  %v6735_v26 = vld [vmem:[#allocation14] ss:$0 sm:$0xff] }
 0x650   :  { %3229 = vmatpush.bf16.msra.mxu1 %v4626_v30  ;;  %v4561_v30 = vld [vmem:[#allocation16 + $0x28] sm:$0xf] }
 0x675   :  { %v2784_v33 = vpop.xlane.xlu0 %2783 }
 0x676   :  { %v2797_v60 = vmul.f32 %v2784_v33, %v5932_v48  ;;  %v4844_v33 = vld [vmem:[#allocation16 + $0xac] sm:$0xf] }
 0x678   :  { %v6691_v55 = vsub.f32 %v6654_v56, %v2797_v60  ;;  %v4627_v60 = vld [vmem:[#allocation16 + $0xb8] sm:$0xf0] }
 0x67a   :  { %v2813_v38 = vmul.f32 %v6691_v55, %v6691_v55 }
 0x67c   :  { %2823 = vadd.xlane.f32.xlu1 %v2813_v38  ;;  %v4630_v38 = vor.u32 %v4844_v33, %v4627_v60  ;;  %v4830_v33 = vld [vmem:[#allocation16 + $0x34] sm:$0xf0]  ;;  %v4558_v60 = vor.u32 %v4827_v14, %v4555_v3 }
 0x67d   :  { %v2786_v62 = vpop.xlane.xlu2 %2785 }
 0x67e   :  { %v2798_v9 = vmul.f32 %v2786_v62, %v5932_v48  ;;  %v4601_v62 = vld [vmem:[#allocation16 + $0x80] sm:$0xf]  ;;  %3258 = vmatpush.bf16.msra.mxu2 %v4630_v38  ;;  %v4562_v38 = vor.u32 %v4830_v33, %v4561_v30 }
 0x680   :  { %v6697_v37 = vsub.f32 %v6658_v24, %v2798_v9  ;;  %v4841_v9 = vld [vmem:[#allocation16 + $0x8c] sm:$0xf0] }
 0x682   :  { %v2814_v4 = vmul.f32 %v6697_v37, %v6697_v37 }
 0x684   :  { %2825 = vadd.xlane.f32.xlu2 %v2814_v4  ;;  %v4839_v4 = vld [vmem:[#allocation16 + $0x84] sm:$0xf] }
 0x68f   :  { %v2788_v13 = vpop.xlane.xlu1 %2787 }
 0x690   :  { %v2799_v11 = vmul.f32 %v2788_v13, %v5932_v48  ;;  %v4602_v13 = vor.u32 %v4841_v9, %v4601_v62  ;;  %v4828_v62 = vld [vmem:[#allocation16 + $0x2c] sm:$0xf]  ;;  %v4563_v9 = vld [vmem:[#allocation16 + $0x38] sm:$0xf0] }
 0x692   :  { %v6703_v35 = vsub.f32 %v6662_v21, %v2799_v11  ;;  %v4603_v11 = vld [vmem:[#allocation16 + $0x90] sm:$0xf0]  ;;  %3172 = vmatpush.bf16.msra.mxu3 %v4602_v13 }
 0x694   :  { %v2815_v39 = vmul.f32 %v6703_v35, %v6703_v35 }
 0x696   :  { %2827 = vadd.xlane.f32.xlu0 %v2815_v39  ;;  %v4609_v39 = vld [vmem:[#allocation16 + $0x88] sm:$0xf]  ;;  %3173 = vmatpush.bf16.msra.mxu3 %v4586_v0 }
 0x697   :  { %v2790_v10 = vpop.xlane.xlu2 %2789 }
 0x698   :  { %v2800_v19 = vmul.f32 %v2790_v10, %v5932_v48  ;;  %v4842_v10 = vld [vmem:[#allocation16 + $0x94] sm:$0xf0] }
 0x69a   :  { %v6709_v41 = vsub.f32 %v6666_v2, %v2800_v19  ;;  %v4606_v19 = vor.u32 %v4839_v4, %v4603_v11  ;;  %3174 = vmatpush.bf16.msra.mxu3 %v4570_v7  ;;  %v4537_v4 = vld [vmem:[#allocation16] sm:$0xf] }
 0x69c   :  { %v2816_v8 = vmul.f32 %v6709_v41, %v6709_v41  ;;  %3201 = vmatpush.bf16.msrb.mxu0 %v4606_v19  ;;  %v4823_v19 = vld [vmem:[#allocation16 + $0x4] sm:$0xf] }
 0x69e   :  { %2829 = vadd.xlane.f32.xlu1 %v2816_v8  ;;  %v4610_v8 = vor.u32 %v4842_v10, %v4609_v39  ;;  %v4566_v39 = vor.u32 %v4828_v62, %v4563_v9  ;;  %v4825_v10 = vld [vmem:[#allocation16 + $0xc] sm:$0xf0]  ;;  %3175 = vmatpush.bf16.msra.mxu3 %v4554_v31 }
 0x69f   :  { %v2792_v63 = vpop.xlane.xlu2 %2791 }
 0x6a0   :  { %v2801_v12 = vmul.f32 %v2792_v63, %v5932_v48  ;;  %v4840_v63 = vld [vmem:[#allocation16 + $0x8c] sm:$0xf]  ;;  %3230 = vmatpush.bf16.msra.mxu1 %v4610_v8  ;;  %3202 = vmatpush.bf16.msrb.mxu0 %v4590_v23  ;;  %v4539_v8 = vld [vmem:[#allocation16 + $0x10] sm:$0xf0]  ;;  %v4546_v23 = vor.u32 %v4826_v52, %v4545_v40 }
 0x6a1   :  { %v4542_v0 = vor.u32 %v4823_v19, %v4539_v8 }
 0x6a2   :  { %v6715_v43 = vsub.f32 %v6670_v6, %v2801_v12  ;;  %v4611_v12 = vld [vmem:[#allocation16 + $0x98] sm:$0xf0] }
 0x6a4   :  { %v2817_v46 = vmul.f32 %v6715_v43, %v6715_v43  ;;  %3231 = vmatpush.bf16.msra.mxu1 %v4594_v51  ;;  %3203 = vmatpush.bf16.msrb.mxu0 %v4574_v53 }
 0x6a6   :  { %2831 = vadd.xlane.f32.xlu2 %v2817_v46  ;;  %v4614_v46 = vor.u32 %v4840_v63, %v4611_v12 }
 0x6a8   :  { %3259 = vmatpush.bf16.msra.mxu2 %v4614_v46  ;;  %3232 = vmatpush.bf16.msra.mxu1 %v4578_v15  ;;  %v4538_v46 = vor.u32 %v4825_v10, %v4537_v4 }
 0x6a9   :  { %3204 = vmatpush.bf16.msrb.mxu0 %v4558_v60 }
 0x6aa   :  { %3176 = vmatpush.bf16.msra.mxu3 %v4538_v46 }
 0x6ac   :  { %3260 = vmatpush.bf16.msra.mxu2 %v4598_v22  ;;  %3233 = vmatpush.bf16.msra.mxu1 %v4562_v38 }
 0x6ad   :  { %3205 = vmatpush.bf16.msrb.mxu0 %v4542_v0 }
 0x6b0   :  { %3261 = vmatpush.bf16.msra.mxu2 %v4582_v44  ;;  %3234 = vmatpush.bf16.msra.mxu1 %v4546_v23 }
 0x6b4   :  { %3262 = vmatpush.bf16.msra.mxu2 %v4566_v39 }
 0x6b8   :  { %3263 = vmatpush.bf16.msra.mxu2 %v4550_v16 }
 0x6b9   :  { %v2820_v49 = vpop.xlane.xlu0 %2819 }
 0x6ba   :  { %v2835_v61 = vmul.f32 %v2820_v49, %v5932_v48 }
 0x6bc   :  { %v6720_v42 = vadd.f32 1e-05, %v2835_v61 }
 0x6be   :  { %5308 = vrsqrt.f32 %v6720_v42  ;;  %vm2857_vm5 = vweird.f32 %v6720_v42 }
 0x6c1   :  { %v2822_v13 = vpop.xlane.xlu1 %2821  ;;  %v2794_v11 = vpop.xlane.xlu0 %2793 }
 0x6c2   :  { %v2836_v63 = vmul.f32 %v2822_v13, %v5932_v48  ;;  %v2802_v12 = vmul.f32 %v2794_v11, %v5932_v48 }
 0x6c4   :  { %v5309_v50 = vpop.eup %5308  ;;  %v2844_v36 = vadd.f32 1e-05, %v2836_v63  ;;  %v6726_v49 = vsub.f32 %v6684_v54, %v2802_v12 }
 0x6c5   :  { %v2852_v51 = vmul.f32 %v5309_v50, %v6720_v42  ;;  %vm2858_vm4 = vweird.f32 %v5309_v50 }
 0x6c6   :  { %5310 = vrsqrt.f32 %v2844_v36  ;;  %v2818_v17 = vmul.f32 %v6726_v49, %v6726_v49  ;;  %vm2859_vm6 = vmor %vm2857_vm5, %vm2858_vm4  ;;  %vm2867_vm8 = vweird.f32 %v2844_v36 }
 0x6c7   :  { %v2853_v61 = vmul.f32 %v5309_v50, %v2852_v51 }
 0x6c8   :  { %2833 = vadd.xlane.f32.xlu0 %v2818_v17 }
 0x6c9   :  { %v2854_v22 = vmul.f32 0.5, %v2853_v61 }
 0x6cb   :  { %v2855_v29 = vsub.f32 1.5, %v2854_v22 }
 0x6cc   :  { %v5311_v25 = vpop.eup %5310 }
 0x6cd   :  { %v2856_v45 = vmul.f32 %v5309_v50, %v2855_v29  ;;  %v2862_v7 = vmul.f32 %v5311_v25, %v2844_v36  ;;  %vm2868_vm7 = vweird.f32 %v5311_v25 }
 0x6ce   :  { %vm2869_vm9 = vmor %vm2867_vm8, %vm2868_vm7 }
 0x6cf   :  { %v2863_v1 = vmul.f32 %v5311_v25, %v2862_v7  ;;  %v2860_v20 = vsel %vm2859_vm6, %v5309_v50, %v2856_v45 }
 0x6d0   :  { %v2931_v5 = vmul.f32 %v2860_v20, %v6675_v18 }
 0x6d1   :  { %v2864_v53 = vmul.f32 0.5, %v2863_v1 }
 0x6d2   :  { %v2943_v47 = vmul.f32 %v6732_v34, %v2931_v5 }
 0x6d3   :  { %v2865_v57 = vsub.f32 1.5, %v2864_v53 }
 0x6d4   :  { %v2955_v31 = vadd.f32 %v6735_v26, %v2943_v47 }
 0x6d5   :  { %v2866_v15 = vmul.f32 %v5311_v25, %v2865_v57 }
 0x6d7   :  { %v2870_v44 = vsel %vm2869_vm9, %v5311_v25, %v2866_v15 }
 0x6d8   :  { %v2932_v42 = vmul.f32 %v2870_v44, %v6681_v28 }
 0x6da   :  { %v2944_v14 = vmul.f32 %v6732_v34, %v2932_v42 }
 0x6dc   :  { %v2956_v3 = vadd.f32 %v6735_v26, %v2944_v14 }
 0x6de   :  { %v2963_v30 = vpack.c.bf16 %v2956_v3, %v2955_v31 }
 0x6e0   :  { %3177 = vmatmul.bf16.vlgmr.msra.gmra.mxu3 %v2963_v30  ;;  %3206 = vmatmul.bf16.vlgmr.msrb.gmra.mxu0 %v2963_v30 }
 0x6e1   :  { %3235 = vmatmul.bf16.vlgmr.msra.gmra.mxu1 %v2963_v30  ;;  %3264 = vmatmul.bf16.vlgmr.msra.gmra.mxu2 %v2963_v30 }
 0x6ef   :  { %v2824_v18 = vpop.xlane.xlu1 %2823 }
 0x6f0   :  { %v2837_v33 = vmul.f32 %v2824_v18, %v5932_v48 }
 0x6f2   :  { %v2845_v60 = vadd.f32 1e-05, %v2837_v33 }
 0x6f4   :  { %5312 = vrsqrt.f32 %v2845_v60  ;;  %vm2877_vm11 = vweird.f32 %v2845_v60 }
 0x6f7   :  { %v2826_v38 = vpop.xlane.xlu2 %2825 }
 0x6f8   :  { %v2838_v62 = vmul.f32 %v2826_v38, %v5932_v48 }
 0x6fa   :  { %v5313_v28 = vpop.eup %5312  ;;  %v2846_v9 = vadd.f32 1e-05, %v2838_v62 }
 0x6fb   :  { %v2872_v4 = vmul.f32 %v5313_v28, %v2845_v60  ;;  %vm2878_vm10 = vweird.f32 %v5313_v28 }
 0x6fc   :  { %5314 = vrsqrt.f32 %v2846_v9  ;;  %vm2879_vm12 = vmor %vm2877_vm11, %vm2878_vm10  ;;  %vm2887_vm14 = vweird.f32 %v2846_v9 }
 0x6fd   :  { %v2873_v13 = vmul.f32 %v5313_v28, %v2872_v4 }
 0x6ff   :  { %v2874_v11 = vmul.f32 0.5, %v2873_v13 }
 0x701   :  { %v2875_v39 = vsub.f32 1.5, %v2874_v11 }
 0x702   :  { %v5315_v10 = vpop.eup %5314 }
 0x703   :  { %v2876_v19 = vmul.f32 %v5313_v28, %v2875_v39  ;;  %v2882_v8 = vmul.f32 %v5315_v10, %v2846_v9  ;;  %vm2888_vm13 = vweird.f32 %v5315_v10 }
 0x704   :  { %vm2889_vm15 = vmor %vm2887_vm14, %vm2888_vm13 }
 0x705   :  { %v2883_v63 = vmul.f32 %v5315_v10, %v2882_v8  ;;  %v2880_v12 = vsel %vm2879_vm12, %v5313_v28, %v2876_v19 }
 0x706   :  { %v2933_v52 = vmul.f32 %v2880_v12, %v6691_v55 }
 0x707   :  { %v2884_v46 = vmul.f32 0.5, %v2883_v63 }
 0x708   :  { %v2945_v51 = vmul.f32 %v6732_v34, %v2933_v52 }
 0x709   :  { %v2885_v40 = vsub.f32 1.5, %v2884_v46  ;;  %v2828_v32 = vpop.xlane.xlu0 %2827 }
 0x70a   :  { %v2839_v59 = vmul.f32 %v2828_v32, %v5932_v48  ;;  %v2957_v61 = vadd.f32 %v6735_v26, %v2945_v51 }
 0x70b   :  { %v2886_v0 = vmul.f32 %v5315_v10, %v2885_v40 }
 0x70c   :  { %v2847_v36 = vadd.f32 1e-05, %v2839_v59 }
 0x70d   :  { %v2890_v50 = vsel %vm2889_vm15, %v5315_v10, %v2886_v0 }
 0x70e   :  { %v2934_v23 = vmul.f32 %v2890_v50, %v6697_v37  ;;  %5316 = vrsqrt.f32 %v2847_v36  ;;  %vm2897_vm1 = vweird.f32 %v2847_v36 }
 0x710   :  { %v2946_v16 = vmul.f32 %v6732_v34, %v2934_v23 }
 0x711   :  { %v2830_v17 = vpop.xlane.xlu1 %2829 }
 0x712   :  { %v2958_v55 = vadd.f32 %v6735_v26, %v2946_v16  ;;  %v2840_v22 = vmul.f32 %v2830_v17, %v5932_v48 }
 0x714   :  { %v2964_v29 = vpack.c.bf16 %v2958_v55, %v2957_v61  ;;  %v5317_v25 = vpop.eup %5316  ;;  %v2848_v45 = vadd.f32 1e-05, %v2840_v22 }
 0x715   :  { %v2892_v7 = vmul.f32 %v5317_v25, %v2847_v36  ;;  %vm2898_vm0 = vweird.f32 %v5317_v25 }
 0x716   :  { %3182 = vmatmul.bf16.gmra.mxu3 %v2964_v29  ;;  %3211 = vmatmul.bf16.gmra.mxu0 %v2964_v29  ;;  %5318 = vrsqrt.f32 %v2848_v45  ;;  %vm2899_vm2 = vmor %vm2897_vm1, %vm2898_vm0  ;;  %vm2907_vm4 = vweird.f32 %v2848_v45 }
 0x717   :  { %3240 = vmatmul.bf16.gmra.mxu1 %v2964_v29  ;;  %3269 = vmatmul.bf16.gmra.mxu2 %v2964_v29  ;;  %v2893_v37 = vmul.f32 %v5317_v25, %v2892_v7 }
 0x719   :  { %v2894_v1 = vmul.f32 0.5, %v2893_v37  ;;  %v2832_v42 = vpop.xlane.xlu2 %2831 }
 0x71a   :  { %v2841_v30 = vmul.f32 %v2832_v42, %v5932_v48 }
 0x71b   :  { %v2895_v20 = vsub.f32 1.5, %v2894_v1 }
 0x71c   :  { %v5319_v53 = vpop.eup %5318  ;;  %v2849_v38 = vadd.f32 1e-05, %v2841_v30 }
 0x71d   :  { %v2896_v57 = vmul.f32 %v5317_v25, %v2895_v20  ;;  %v2902_v5 = vmul.f32 %v5319_v53, %v2848_v45  ;;  %vm2908_vm3 = vweird.f32 %v5319_v53 }
 0x71e   :  { %vm2909_vm5 = vmor %vm2907_vm4, %vm2908_vm3  ;;  %5320 = vrsqrt.f32 %v2849_v38  ;;  %vm2917_vm7 = vweird.f32 %v2849_v38 }
 0x71f   :  { %v2903_v15 = vmul.f32 %v5319_v53, %v2902_v5  ;;  %v2900_v44 = vsel %vm2899_vm2, %v5317_v25, %v2896_v57  ;;  %v4862_v57 = vld [vmem:[#allocation17 + $0x38] sm:$0xff] }
 0x720   :  { %v2935_v31 = vmul.f32 %v2900_v44, %v6703_v35  ;;  %v4870_v5 = vld [vmem:[#allocation17 + $0x78] sm:$0xff]  ;;  %4043 = vmatpush.bf16.msrb.mxu3 %v4862_v57 }
 0x721   :  { %v2904_v47 = vmul.f32 0.5, %v2903_v15  ;;  %v4878_v15 = vld [vmem:[#allocation17 + $0xb8] sm:$0xff]  ;;  %4072 = vmatpush.bf16.msra.mxu0 %v4870_v5  ;;  %v4859_v5 = vld [vmem:[#allocation17 + $0x20] sm:$0xff] }
 0x722   :  { %v2947_v60 = vmul.f32 %v6732_v34, %v2935_v31  ;;  %4101 = vmatpush.bf16.msrb.mxu1 %v4878_v15  ;;  %v4867_v15 = vld [vmem:[#allocation17 + $0x60] sm:$0xff] }
 0x723   :  { %v2905_v14 = vsub.f32 1.5, %v2904_v47  ;;  %v4886_v47 = vld [vmem:[#allocation17 + $0xf8] sm:$0xff] }
 0x724   :  { %v2959_v28 = vadd.f32 %v6735_v26, %v2947_v60  ;;  %v5321_v35 = vpop.eup %5320  ;;  %4130 = vmatpush.bf16.msrb.mxu2 %v4886_v47  ;;  %v4875_v47 = vld [vmem:[#allocation17 + $0xa0] sm:$0xff] }
 0x725   :  { %v2906_v3 = vmul.f32 %v5319_v53, %v2905_v14  ;;  %v2912_v13 = vmul.f32 %v5321_v35, %v2849_v38  ;;  %vm2918_vm6 = vweird.f32 %v5321_v35  ;;  %v4861_v38 = vld [vmem:[#allocation17 + $0x30] sm:$0xff] }
 0x726   :  { %vm2919_vm8 = vmor %vm2917_vm7, %vm2918_vm6  ;;  %4044 = vmatpush.bf16.msrb.mxu3 %v4861_v38  ;;  %v4866_v38 = vld [vmem:[#allocation17 + $0x58] sm:$0xff] }
 0x727   :  { %v2910_v18 = vsel %vm2909_vm5, %v5319_v53, %v2906_v3  ;;  %v2913_v11 = vmul.f32 %v5321_v35, %v2912_v13  ;;  %v4885_v13 = vld [vmem:[#allocation17 + $0xf0] sm:$0xff] }
 0x728   :  { %v2936_v33 = vmul.f32 %v2910_v18, %v6709_v41  ;;  %4131 = vmatpush.bf16.msrb.mxu2 %v4885_v13 }
 0x729   :  { %v2914_v19 = vmul.f32 0.5, %v2913_v11 }
 0x72a   :  { %v2948_v62 = vmul.f32 %v6732_v34, %v2936_v33 }
 0x72b   :  { %v2915_v8 = vsub.f32 1.5, %v2914_v19 }
 0x72c   :  { %v2960_v9 = vadd.f32 %v6735_v26, %v2948_v62  ;;  %v4869_v62 = vld [vmem:[#allocation17 + $0x70] sm:$0xff] }
 0x72d   :  { %v2916_v12 = vmul.f32 %v5321_v35, %v2915_v8  ;;  %4073 = vmatpush.bf16.msra.mxu0 %v4869_v62 }
 0x72e   :  { %v2965_v4 = vpack.c.bf16 %v2960_v9, %v2959_v28  ;;  %v4877_v28 = vld [vmem:[#allocation17 + $0xb0] sm:$0xff] }
 0x72f   :  { %v2920_v52 = vsel %vm2919_vm8, %v5321_v35, %v2916_v12  ;;  %4102 = vmatpush.bf16.msrb.mxu1 %v4877_v28  ;;  %v4874_v28 = vld [vmem:[#allocation17 + $0x98] sm:$0xff] }
 0x730   :  { %3187 = vmatmul.bf16.gmra.mxu3 %v2965_v4  ;;  %3216 = vmatmul.bf16.gmra.mxu0 %v2965_v4  ;;  %v2937_v59 = vmul.f32 %v2920_v52, %v6715_v43  ;;  %v2999_v43 = vld [vmem:[%s7082_s10] sm:$0xf]  ;;  %v4868_v52 = vld [vmem:[#allocation17 + $0x68] sm:$0xff] }
 0x731   :  { %3245 = vmatmul.bf16.gmra.mxu1 %v2965_v4  ;;  %3274 = vmatmul.bf16.gmra.mxu2 %v2965_v4  ;;  %v6769_v22 = vperm.slane %v2999_v43, 1  ;;  %v6771_v29 = vperm.slane %v2999_v43, 0  ;;  %v6775_v25 = vperm.slane %v2999_v43, 3 }
 0x732   :  { %v2949_v23 = vmul.f32 %v6732_v34, %v2937_v59  ;;  %4074 = vmatpush.bf16.msra.mxu0 %v4868_v52  ;;  %v4873_v52 = vld [vmem:[#allocation17 + $0x90] sm:$0xff] }
 0x734   :  { %v2961_v16 = vadd.f32 %v6735_v26, %v2949_v23 }
 0x736   :  { %4075 = vmatpush.bf16.msra.mxu0 %v4867_v15 }
 0x73a   :  { %4076 = vmatpush.bf16.msra.mxu0 %v4866_v38  ;;  %v4879_v38 = vld [vmem:[#allocation17 + $0xc0] sm:$0xff] }
 0x73b   :  { %v2834_v39 = vpop.xlane.xlu0 %2833 }
 0x73c   :  { %v2842_v41 = vmul.f32 %v2834_v39, %v5932_v48 }
 0x73e   :  { %v2850_v10 = vadd.f32 1e-05, %v2842_v41 }
 0x740   :  { %5322 = vrsqrt.f32 %v2850_v10  ;;  %vm2927_vm10 = vweird.f32 %v2850_v10 }
 0x746   :  { %v5323_v63 = vpop.eup %5322 }
 0x747   :  { %v2922_v46 = vmul.f32 %v5323_v63, %v2850_v10  ;;  %vm2928_vm9 = vweird.f32 %v5323_v63 }
 0x748   :  { %vm2929_vm11 = vmor %vm2927_vm10, %vm2928_vm9 }
 0x749   :  { %v2923_v40 = vmul.f32 %v5323_v63, %v2922_v46 }
 0x74b   :  { %v2924_v32 = vmul.f32 0.5, %v2923_v40  ;;  %v4860_v40 = vld [vmem:[#allocation17 + $0x28] sm:$0xff] }
 0x74c   :  { %4045 = vmatpush.bf16.msrb.mxu3 %v4860_v40 }
 0x74d   :  { %v2925_v0 = vsub.f32 1.5, %v2924_v32  ;;  %v4876_v32 = vld [vmem:[#allocation17 + $0xa8] sm:$0xff] }
 0x74e   :  { %4103 = vmatpush.bf16.msrb.mxu1 %v4876_v32  ;;  %v4881_v32 = vld [vmem:[#allocation17 + $0xd0] sm:$0xff] }
 0x74f   :  { %v2926_v50 = vmul.f32 %v5323_v63, %v2925_v0 }
 0x750   :  { %4046 = vmatpush.bf16.msrb.mxu3 %v4859_v5 }
 0x751   :  { %v2930_v48 = vsel %vm2929_vm11, %v5323_v63, %v2926_v50  ;;  %v4884_v50 = vld [vmem:[#allocation17 + $0xe8] sm:$0xff] }
 0x752   :  { %v2938_v36 = vmul.f32 %v2930_v48, %v6726_v49  ;;  %4132 = vmatpush.bf16.msrb.mxu2 %v4884_v50  ;;  %4104 = vmatpush.bf16.msrb.mxu1 %v4875_v47 }
 0x754   :  { %v2950_v51 = vmul.f32 %v6732_v34, %v2938_v36  ;;  %v6773_v34 = vperm.slane %v2999_v43, 2 }
 0x756   :  { %v2962_v17 = vadd.f32 %v6735_v26, %v2950_v51  ;;  %4105 = vmatpush.bf16.msrb.mxu1 %v4874_v28 }
 0x758   :  { %v2966_v61 = vpack.c.bf16 %v2962_v17, %v2961_v16 }
 0x75a   :  { %3192 = vmatmul.bf16.gmra.mxu3 %v2966_v61  ;;  %3221 = vmatmul.bf16.gmra.mxu0 %v2966_v61 }
 0x75b   :  { %3250 = vmatmul.bf16.gmra.mxu1 %v2966_v61  ;;  %3279 = vmatmul.bf16.gmra.mxu2 %v2966_v61 }
 0x75c   :  { %4106 = vmatpush.bf16.msrb.mxu1 %v4873_v52  ;;  %v5749_v52 = vmov 1065369472  }
 0x75d   :  { %v3207_v55 = vpop.f32.mrf.mxu0 }
 0x75e   :  { %v3236_v49 = vpop.f32.mrf.mxu1  ;;  %v3208_v45 = vadd.f32 %v3207_v55, %v6769_v22 }
 0x75f   :  { %v3237_v1 = vadd.f32 %v3236_v49, %v6773_v34 }
 0x763   :  { %v3178_v26 = vpop.f32.mrf.mxu3 }
 0x764   :  { %v3179_v7 = vadd.f32 %v3178_v26, %v6771_v29  ;;  %v3265_v37 = vpop.f32.mrf.mxu2 }
 0x765   :  { %v3266_v20 = vadd.f32 %v3265_v37, %v6775_v25  ;;  %v3209_v30 = vpop.f32.mrf.mxu0 }
 0x766   :  { %v6781_v53 = vpack.c.bf16 %v3208_v45, %v3179_v7  ;;  %v3238_v60 = vpop.f32.mrf.mxu1  ;;  %v3210_v39 = vadd.f32 %v3209_v30, %v6769_v22 }
 0x767   :  { %v6783_v44 = vpack.c.bf16 %v3266_v20, %v3237_v1  ;;  %v3239_v8 = vadd.f32 %v3238_v60, %v6773_v34  ;;  %v4858_v60 = vld [vmem:[#allocation17 + $0x18] sm:$0xff] }
 0x768   :  { %v3301_v42 = vunpack.c.l.bf16 %v6781_v53  ;;  %v3302_v14 = vunpack.c.h.bf16 %v6781_v53  ;;  %4047 = vmatpush.bf16.msrb.mxu3 %v4858_v60  ;;  %v4871_v60 = vld [vmem:[#allocation17 + $0x80] sm:$0xff] }
 0x769   :  { %v3303_v31 = vunpack.c.l.bf16 %v6783_v44  ;;  %v3304_v3 = vunpack.c.h.bf16 %v6783_v44 }
 0x76a   :  { %v3333_v18 = vmul.f32 1.703125, %v3301_v42  ;;  %v3334_v33 = vmul.f32 1.703125, %v3302_v14 }
 0x76b   :  { %v3335_v9 = vmul.f32 1.703125, %v3303_v31  ;;  %v3336_v4 = vmul.f32 1.703125, %v3304_v3  ;;  %v3180_v35 = vpop.f32.mrf.mxu3 }
 0x76c   :  { %v3365_v11 = vpack.c.bf16 %v3334_v33, %v3333_v18  ;;  %v3181_v41 = vadd.f32 %v3180_v35, %v6771_v29  ;;  %v3267_v10 = vpop.f32.mrf.mxu2  ;;  %v4883_v18 = vld [vmem:[#allocation17 + $0xe0] sm:$0xff] }
 0x76d   :  { %v3366_v19 = vpack.c.bf16 %v3336_v4, %v3335_v9  ;;  %v3268_v63 = vadd.f32 %v3267_v10, %v6775_v25  ;;  %4133 = vmatpush.bf16.msrb.mxu2 %v4883_v18  ;;  %v4882_v9 = vld [vmem:[#allocation17 + $0xd8] sm:$0xff]  ;;  %v4863_v18 = vld [vmem:[#allocation17 + $0x40] sm:$0xff] }
 0x76e   :  { %v3381_v12 = vxor.u32 2147516416, %v3365_v11  ;;  %v6801_v46 = vpack.c.bf16 %v3210_v39, %v3181_v41 }
 0x76f   :  { %v3382_v0 = vxor.u32 2147516416, %v3366_v19  ;;  %v6803_v59 = vpack.c.bf16 %v3268_v63, %v3239_v8  ;;  %v4857_v19 = vld [vmem:[#allocation17 + $0x10] sm:$0xff] }
 0x770   :  { %v3397_v48 = vunpack.c.l.bf16 %v3381_v12  ;;  %v3398_v36 = vunpack.c.h.bf16 %v3381_v12  ;;  %v3305_v23 = vunpack.c.l.bf16 %v6801_v46  ;;  %v3306_v51 = vunpack.c.h.bf16 %v6801_v46  ;;  %v4865_v8 = vld [vmem:[#allocation17 + $0x50] sm:$0xff]  ;;  %4048 = vmatpush.bf16.msrb.mxu3 %v4857_v19 }
 0x771   :  { %v3399_v16 = vunpack.c.l.bf16 %v3382_v0  ;;  %v3400_v17 = vunpack.c.h.bf16 %v3382_v0  ;;  %v3307_v61 = vunpack.c.l.bf16 %v6803_v59  ;;  %v3308_v43 = vunpack.c.h.bf16 %v6803_v59  ;;  %4134 = vmatpush.bf16.msrb.mxu2 %v4882_v9  ;;  %4077 = vmatpush.bf16.msra.mxu0 %v4865_v8 }
 0x772   :  { %v3429_v55 = vmul.f32 1.442695, %v3397_v48  ;;  %v3431_v49 = vmul.f32 1.442695, %v3398_v36  ;;  %v3337_v26 = vmul.f32 1.703125, %v3305_v23  ;;  %v3338_v45 = vmul.f32 1.703125, %v3306_v51 }
 0x773   :  { %v3433_v7 = vmul.f32 1.442695, %v3399_v16  ;;  %v3435_v37 = vmul.f32 1.442695, %v3400_v17  ;;  %v3339_v1 = vmul.f32 1.703125, %v3307_v61  ;;  %v3340_v20 = vmul.f32 1.703125, %v3308_v43 }
 0x774   :  { %5324 = vpow2.f32 %v3429_v55  ;;  %v3367_v57 = vpack.c.bf16 %v3338_v45, %v3337_v26  ;;  %v4856_v55 = vld [vmem:[#allocation17 + $0x8] sm:$0xff] }
 0x775   :  { %5326 = vpow2.f32 %v3431_v49  ;;  %v3368_v30 = vpack.c.bf16 %v3340_v20, %v3339_v1  ;;  %v4864_v49 = vld [vmem:[#allocation17 + $0x48] sm:$0xff]  ;;  %4135 = vmatpush.bf16.msrb.mxu2 %v4881_v32  ;;  %4049 = vmatpush.bf16.msrb.mxu3 %v4856_v55  ;;  %v6817_v32 = vunpack.c.h.bf16 %v5749_v52 }
 0x776   :  { %5328 = vpow2.f32 %v3433_v7  ;;  %v3383_v33 = vxor.u32 2147516416, %v3367_v57  ;;  %v4872_v26 = vld [vmem:[#allocation17 + $0x88] sm:$0xff]  ;;  %4078 = vmatpush.bf16.msra.mxu0 %v4864_v49 }
 0x777   :  { %5330 = vpow2.f32 %v3435_v37  ;;  %v3384_v62 = vxor.u32 2147516416, %v3368_v30  ;;  %v4880_v45 = vld [vmem:[#allocation17 + $0xc8] sm:$0xff]  ;;  %v4855_v30 = vld [vmem:[#allocation17] sm:$0xff]  ;;  %4107 = vmatpush.bf16.msrb.mxu1 %v4872_v26 }
 0x778   :  { %v3401_v4 = vunpack.c.l.bf16 %v3383_v33  ;;  %v3402_v35 = vunpack.c.h.bf16 %v3383_v33 }
 0x779   :  { %v3403_v13 = vunpack.c.l.bf16 %v3384_v62  ;;  %v3404_v11 = vunpack.c.h.bf16 %v3384_v62  ;;  %4136 = vmatpush.bf16.msrb.mxu2 %v4880_v45  ;;  %4050 = vmatpush.bf16.msrb.mxu3 %v4855_v30 }
 0x77a   :  { %v5325_v39 = vpop.eup %5324  ;;  %v3437_v41 = vmul.f32 1.442695, %v3401_v4  ;;  %v3439_v10 = vmul.f32 1.442695, %v3402_v35  ;;  %4079 = vmatpush.bf16.msra.mxu0 %v4863_v18 }
 0x77b   :  { %v5327_v63 = vpop.eup %5326  ;;  %v3441_v12 = vmul.f32 1.442695, %v3403_v13  ;;  %v3443_v40 = vmul.f32 1.442695, %v3404_v11  ;;  %4108 = vmatpush.bf16.msrb.mxu1 %v4871_v60 }
 0x77c   :  { %v5329_v0 = vpop.eup %5328  ;;  %v3493_v50 = vpack.c.bf16 %v5327_v63, %v5325_v39  ;;  %5332 = vpow2.f32 %v3437_v41 }
 0x77d   :  { %v5331_v48 = vpop.eup %5330  ;;  %5334 = vpow2.f32 %v3439_v10  ;;  %4137 = vmatpush.bf16.msrb.mxu2 %v4879_v38 }
 0x77e   :  { %v3509_v36 = vunpack.c.l.bf16 %v3493_v50  ;;  %v3510_v16 = vunpack.c.h.bf16 %v3493_v50  ;;  %v3494_v17 = vpack.c.bf16 %v5331_v48, %v5329_v0  ;;  %5336 = vpow2.f32 %v3441_v12 }
 0x77f   :  { %5338 = vpow2.f32 %v3443_v40  ;;  %v6819_v0 = vunpack.c.l.bf16 %v5749_v52 }
 0x780   :  { %v3541_v7 = vadd.f32 1.0, %v3509_v36  ;;  %v3542_v37 = vadd.f32 1.0, %v3510_v16  ;;  %v3511_v1 = vunpack.c.l.bf16 %v3494_v17  ;;  %v3512_v20 = vunpack.c.h.bf16 %v3494_v17 }
 0x782   :  { %v5333_v57 = vpop.eup %5332  ;;  %v3573_v5 = vpack.c.bf16 %v3542_v37, %v3541_v7  ;;  %v3543_v15 = vadd.f32 1.0, %v3511_v1  ;;  %v3544_v47 = vadd.f32 1.0, %v3512_v20 }
 0x783   :  { %v5335_v33 = vpop.eup %5334 }
 0x784   :  { %v5337_v62 = vpop.eup %5336  ;;  %v3591_v28 = vunpack.c.h.bf16 %v3573_v5  ;;  %v3592_v9 = vunpack.c.l.bf16 %v3573_v5  ;;  %v3574_v4 = vpack.c.bf16 %v3544_v47, %v3543_v15  ;;  %v3495_v35 = vpack.c.bf16 %v5335_v33, %v5333_v57 }
 0x785   :  { %v5339_v13 = vpop.eup %5338 }
 0x786   :  { %5340 = vrcp.f32 %v3591_v28  ;;  %v3598_v11 = vunpack.c.h.bf16 %v3574_v4  ;;  %v3599_v39 = vunpack.c.l.bf16 %v3574_v4  ;;  %v3513_v41 = vunpack.c.l.bf16 %v3495_v35 }
 0x787   :  { %5342 = vrcp.f32 %v3592_v9  ;;  %v3514_v10 = vunpack.c.h.bf16 %v3495_v35  ;;  %v3496_v19 = vpack.c.bf16 %v5339_v13, %v5337_v62 }
 0x788   :  { %5344 = vrcp.f32 %v3598_v11  ;;  %v3545_v8 = vadd.f32 1.0, %v3513_v41 }
 0x789   :  { %5346 = vrcp.f32 %v3599_v39  ;;  %v3546_v63 = vadd.f32 1.0, %v3514_v10  ;;  %v3515_v12 = vunpack.c.l.bf16 %v3496_v19  ;;  %v3516_v40 = vunpack.c.h.bf16 %v3496_v19 }
 0x78b   :  { %v3575_v50 = vpack.c.bf16 %v3546_v63, %v3545_v8  ;;  %v3547_v48 = vadd.f32 1.0, %v3515_v12  ;;  %v3548_v36 = vadd.f32 1.0, %v3516_v40 }
 0x78c   :  { %v5341_v16 = vpop.eup %5340 }
 0x78d   :  { %v5343_v17 = vpop.eup %5342  ;;  %v3605_v55 = vunpack.c.h.bf16 %v3575_v50  ;;  %v3606_v49 = vunpack.c.l.bf16 %v3575_v50  ;;  %v3576_v26 = vpack.c.bf16 %v3548_v36, %v3547_v48  ;;  %v3594_v7 = vmul.f32 %v5341_v16, %v6817_v32 }
 0x78e   :  { %v5345_v45 = vpop.eup %5344  ;;  %v3596_v37 = vmul.f32 %v5343_v17, %v6819_v0 }
 0x78f   :  { %v5347_v1 = vpop.eup %5346  ;;  %5348 = vrcp.f32 %v3605_v55  ;;  %v3612_v20 = vunpack.c.h.bf16 %v3576_v26  ;;  %v3613_v57 = vunpack.c.l.bf16 %v3576_v26  ;;  %v3601_v5 = vmul.f32 %v5345_v45, %v6817_v32 }
 0x790   :  { %v3603_v15 = vmul.f32 %v5347_v1, %v6819_v0  ;;  %5350 = vrcp.f32 %v3606_v49  ;;  %v3597_v47 = vpack.c.bf16 %v3594_v7, %v3596_v37 }
 0x791   :  { %5352 = vrcp.f32 %v3612_v20 }
 0x792   :  { %5354 = vrcp.f32 %v3613_v57  ;;  %v3604_v30 = vpack.c.bf16 %v3601_v5, %v3603_v15  ;;  %v3703_v38 = vunpack.c.l.bf16 %v3597_v47  ;;  %v3704_v13 = vunpack.c.h.bf16 %v3597_v47 }
 0x793   :  { %v3212_v18 = vpop.f32.mrf.mxu0 }
 0x794   :  { %v3241_v28 = vpop.f32.mrf.mxu1  ;;  %v3705_v11 = vunpack.c.l.bf16 %v3604_v30  ;;  %v3735_v8 = vmul.f32 %v3703_v38, %v3301_v42  ;;  %v3706_v63 = vunpack.c.h.bf16 %v3604_v30  ;;  %v3213_v12 = vadd.f32 %v3212_v18, %v6769_v22 }
 0x795   :  { %v5349_v33 = vpop.eup %5348  ;;  %v3736_v17 = vmul.f32 %v3704_v13, %v3302_v14  ;;  %v3242_v49 = vadd.f32 %v3241_v28, %v6773_v34 }
 0x796   :  { %v5351_v60 = vpop.eup %5350  ;;  %v3608_v62 = vmul.f32 %v5349_v33, %v6817_v32  ;;  %v3737_v55 = vmul.f32 %v3705_v11, %v3303_v31  ;;  %v3738_v1 = vmul.f32 %v3706_v63, %v3304_v3 }
 0x797   :  { %v5353_v9 = vpop.eup %5352  ;;  %v3610_v4 = vmul.f32 %v5351_v60, %v6819_v0 }
 0x798   :  { %v5355_v35 = vpop.eup %5354  ;;  %v3615_v39 = vmul.f32 %v5353_v9, %v6817_v32 }
 0x799   :  { %v3611_v41 = vpack.c.bf16 %v3608_v62, %v3610_v4  ;;  %v3617_v10 = vmul.f32 %v5355_v35, %v6819_v0  ;;  %v3183_v19 = vpop.f32.mrf.mxu3 }
 0x79a   :  { %v3184_v40 = vadd.f32 %v3183_v19, %v6771_v29  ;;  %v3270_v52 = vpop.f32.mrf.mxu2 }
 0x79b   :  { %v3707_v50 = vunpack.c.l.bf16 %v3611_v41  ;;  %v3708_v48 = vunpack.c.h.bf16 %v3611_v41  ;;  %v3618_v36 = vpack.c.bf16 %v3615_v39, %v3617_v10  ;;  %v3271_v16 = vadd.f32 %v3270_v52, %v6775_v25  ;;  %v3214_v20 = vpop.f32.mrf.mxu0 }
 0x79c   :  { %v6839_v42 = vpack.c.bf16 %v3213_v12, %v3184_v40  ;;  %v3243_v47 = vpop.f32.mrf.mxu1  ;;  %v3215_v33 = vadd.f32 %v3214_v20, %v6769_v22 }
 0x79d   :  { %v3739_v26 = vmul.f32 %v3707_v50, %v3305_v23  ;;  %v3740_v45 = vmul.f32 %v3708_v48, %v3306_v51  ;;  %v3709_v7 = vunpack.c.l.bf16 %v3618_v36  ;;  %v3710_v37 = vunpack.c.h.bf16 %v3618_v36 }
 0x79e   :  { %v3309_v53 = vunpack.c.l.bf16 %v6839_v42  ;;  %v3310_v14 = vunpack.c.h.bf16 %v6839_v42  ;;  %v6849_v31 = vpack.c.bf16 %v3271_v16, %v3242_v49  ;;  %v3244_v28 = vadd.f32 %v3243_v47, %v6773_v34 }
 0x79f   :  { %v3767_v57 = vpack.c.bf16 %v3739_v26, %v3735_v8  ;;  %v3768_v5 = vpack.c.bf16 %v3740_v45, %v3736_v17  ;;  %v3741_v23 = vmul.f32 %v3709_v7, %v3307_v61  ;;  %v3742_v46 = vmul.f32 %v3710_v37, %v3308_v43 }
 0x7a0   :  { %v3341_v51 = vmul.f32 1.703125, %v3309_v53  ;;  %v3342_v44 = vmul.f32 1.703125, %v3310_v14  ;;  %v3311_v3 = vunpack.c.l.bf16 %v6849_v31  ;;  %v3312_v15 = vunpack.c.h.bf16 %v6849_v31 }
 0x7a1   :  { %v3769_v30 = vpack.c.bf16 %v3741_v23, %v3737_v55  ;;  %v3770_v18 = vpack.c.bf16 %v3742_v46, %v3738_v1  ;;  %4051 = vmatmul.bf16.vlgmr.msrb.gmra.mxu3 %v3767_v57  ;;  %4080 = vmatmul.bf16.vlgmr.msra.gmra.mxu0 %v3768_v5  ;;  %v3185_v61 = vpop.f32.mrf.mxu3 }
 0x7a2   :  { %v3369_v59 = vpack.c.bf16 %v3342_v44, %v3341_v51  ;;  %v3343_v43 = vmul.f32 1.703125, %v3311_v3  ;;  %v3344_v60 = vmul.f32 1.703125, %v3312_v15  ;;  %v3186_v38 = vadd.f32 %v3185_v61, %v6771_v29  ;;  %v3272_v62 = vpop.f32.mrf.mxu2 }
 0x7a3   :  { %4109 = vmatmul.bf16.vlgmr.msrb.gmra.mxu1 %v3769_v30  ;;  %4138 = vmatmul.bf16.vlgmr.msrb.gmra.mxu2 %v3770_v18  ;;  %v3273_v9 = vadd.f32 %v3272_v62, %v6775_v25 }
 0x7a4   :  { %v3385_v4 = vxor.u32 2147516416, %v3369_v59  ;;  %v3370_v35 = vpack.c.bf16 %v3344_v60, %v3343_v43  ;;  %v6869_v13 = vpack.c.bf16 %v3215_v33, %v3186_v38 }
 0x7a5   :  { %v6871_v11 = vpack.c.bf16 %v3273_v9, %v3244_v28 }
 0x7a6   :  { %v3405_v39 = vunpack.c.l.bf16 %v3385_v4  ;;  %v3406_v41 = vunpack.c.h.bf16 %v3385_v4  ;;  %v3386_v10 = vxor.u32 2147516416, %v3370_v35  ;;  %v3313_v19 = vunpack.c.l.bf16 %v6869_v13 }
 0x7a7   :  { %v3314_v8 = vunpack.c.h.bf16 %v6869_v13  ;;  %v3315_v63 = vunpack.c.l.bf16 %v6871_v11  ;;  %v3316_v12 = vunpack.c.h.bf16 %v6871_v11 }
 0x7a8   :  { %v3445_v40 = vmul.f32 1.442695, %v3405_v39  ;;  %v3447_v52 = vmul.f32 1.442695, %v3406_v41  ;;  %v3407_v50 = vunpack.c.l.bf16 %v3386_v10  ;;  %v3408_v48 = vunpack.c.h.bf16 %v3386_v10 }
 0x7a9   :  { %v3345_v36 = vmul.f32 1.703125, %v3313_v19  ;;  %v3346_v16 = vmul.f32 1.703125, %v3314_v8  ;;  %v3347_v17 = vmul.f32 1.703125, %v3315_v63  ;;  %v3348_v55 = vmul.f32 1.703125, %v3316_v12 }
 0x7aa   :  { %5356 = vpow2.f32 %v3445_v40  ;;  %v3449_v49 = vmul.f32 1.442695, %v3407_v50  ;;  %v3451_v26 = vmul.f32 1.442695, %v3408_v48 }
 0x7ab   :  { %5358 = vpow2.f32 %v3447_v52  ;;  %v3371_v45 = vpack.c.bf16 %v3346_v16, %v3345_v36  ;;  %v3372_v7 = vpack.c.bf16 %v3348_v55, %v3347_v17 }
 0x7ac   :  { %5360 = vpow2.f32 %v3449_v49 }
 0x7ad   :  { %5362 = vpow2.f32 %v3451_v26  ;;  %v3387_v37 = vxor.u32 2147516416, %v3371_v45  ;;  %v3388_v1 = vxor.u32 2147516416, %v3372_v7  ;;  %v3217_v20 = vpop.f32.mrf.mxu0 }
 0x7ae   :  { %v3246_v51 = vpop.f32.mrf.mxu1  ;;  %v3218_v4 = vadd.f32 %v3217_v20, %v6769_v22 }
 0x7af   :  { %v3409_v57 = vunpack.c.l.bf16 %v3387_v37  ;;  %v3410_v5 = vunpack.c.h.bf16 %v3387_v37  ;;  %v3411_v23 = vunpack.c.l.bf16 %v3388_v1  ;;  %v3412_v46 = vunpack.c.h.bf16 %v3388_v1 }
 0x7b0   :  { %v5357_v44 = vpop.eup %5356  ;;  %v3247_v50 = vadd.f32 %v3246_v51, %v6773_v34 }
 0x7b1   :  { %v5359_v47 = vpop.eup %5358  ;;  %v3453_v30 = vmul.f32 1.442695, %v3409_v57  ;;  %v3455_v18 = vmul.f32 1.442695, %v3410_v5  ;;  %v3457_v33 = vmul.f32 1.442695, %v3411_v23 }
 0x7b2   :  { %v5361_v61 = vpop.eup %5360  ;;  %v3497_v59 = vpack.c.bf16 %v5359_v47, %v5357_v44  ;;  %v3459_v60 = vmul.f32 1.442695, %v3412_v46 }
 0x7b3   :  { %v5363_v43 = vpop.eup %5362  ;;  %5364 = vpow2.f32 %v3453_v30  ;;  %v3188_v9 = vpop.f32.mrf.mxu3 }
 0x7b4   :  { %v3517_v38 = vunpack.c.l.bf16 %v3497_v59  ;;  %v3518_v62 = vunpack.c.h.bf16 %v3497_v59  ;;  %v3498_v28 = vpack.c.bf16 %v5363_v43, %v5361_v61  ;;  %5366 = vpow2.f32 %v3455_v18  ;;  %v3275_v39 = vpop.f32.mrf.mxu2 }
 0x7b5   :  { %5368 = vpow2.f32 %v3457_v33  ;;  %v3189_v35 = vadd.f32 %v3188_v9, %v6771_v29  ;;  %v3276_v36 = vadd.f32 %v3275_v39, %v6775_v25  ;;  %v3219_v16 = vpop.f32.mrf.mxu0 }
 0x7b6   :  { %v3549_v41 = vadd.f32 1.0, %v3517_v38  ;;  %v3550_v10 = vadd.f32 1.0, %v3518_v62  ;;  %v3519_v40 = vunpack.c.l.bf16 %v3498_v28  ;;  %v3520_v52 = vunpack.c.h.bf16 %v3498_v28  ;;  %v3248_v1 = vpop.f32.mrf.mxu1 }
 0x7b7   :  { %5370 = vpow2.f32 %v3459_v60  ;;  %v6888_v48 = vpack.c.bf16 %v3218_v4, %v3189_v35  ;;  %v6893_v37 = vpack.c.bf16 %v3276_v36, %v3247_v50  ;;  %v3220_v57 = vadd.f32 %v3219_v16, %v6769_v22 }
 0x7b8   :  { %v3551_v17 = vadd.f32 1.0, %v3519_v40  ;;  %v3552_v55 = vadd.f32 1.0, %v3520_v52  ;;  %v3577_v49 = vpack.c.bf16 %v3550_v10, %v3549_v41  ;;  %v3249_v33 = vadd.f32 %v3248_v1, %v6773_v34 }
 0x7b9   :  { %v5365_v26 = vpop.eup %5364  ;;  %v3317_v45 = vunpack.c.l.bf16 %v6888_v48  ;;  %v3318_v7 = vunpack.c.h.bf16 %v6888_v48  ;;  %v3319_v30 = vunpack.c.l.bf16 %v6893_v37  ;;  %v3320_v18 = vunpack.c.h.bf16 %v6893_v37 }
 0x7ba   :  { %v5367_v20 = vpop.eup %5366  ;;  %v3619_v5 = vunpack.c.h.bf16 %v3577_v49  ;;  %v3620_v23 = vunpack.c.l.bf16 %v3577_v49  ;;  %v6903_v59 = vpack.c.bf16 %v3552_v55, %v3551_v17 }
 0x7bb   :  { %v5369_v46 = vpop.eup %5368  ;;  %v3499_v51 = vpack.c.bf16 %v5367_v20, %v5365_v26  ;;  %v3349_v44 = vmul.f32 1.703125, %v3317_v45  ;;  %v3350_v47 = vmul.f32 1.703125, %v3318_v7  ;;  %v3190_v61 = vpop.f32.mrf.mxu3  ;;  %v3351_v28 = vmul.f32 1.703125, %v3319_v30 }
 0x7bc   :  { %5372 = vrcp.f32 %v3619_v5  ;;  %v3277_v9 = vpop.f32.mrf.mxu2  ;;  %v3352_v35 = vmul.f32 1.703125, %v3320_v18  ;;  %v3191_v39 = vadd.f32 %v3190_v61, %v6771_v29  ;;  %v3626_v16 = vunpack.c.h.bf16 %v6903_v59 }
 0x7bd   :  { %v5371_v43 = vpop.eup %5370  ;;  %v3521_v60 = vunpack.c.l.bf16 %v3499_v51  ;;  %v3522_v38 = vunpack.c.h.bf16 %v3499_v51  ;;  %v3373_v62 = vpack.c.bf16 %v3350_v47, %v3349_v44  ;;  %v3278_v41 = vadd.f32 %v3277_v9, %v6775_v25 }
 0x7be   :  { %v3500_v4 = vpack.c.bf16 %v5371_v43, %v5369_v46  ;;  %5374 = vrcp.f32 %v3620_v23  ;;  %v3374_v50 = vpack.c.bf16 %v3352_v35, %v3351_v28  ;;  %v6911_v36 = vpack.c.bf16 %v3220_v57, %v3191_v39 }
 0x7bf   :  { %v3553_v10 = vadd.f32 1.0, %v3521_v60  ;;  %v3554_v40 = vadd.f32 1.0, %v3522_v38  ;;  %v3389_v52 = vxor.u32 2147516416, %v3373_v62  ;;  %v6914_v26 = vpack.c.bf16 %v3278_v41, %v3249_v33 }
 0x7c0   :  { %v3523_v17 = vunpack.c.l.bf16 %v3500_v4  ;;  %v3524_v20 = vunpack.c.h.bf16 %v3500_v4  ;;  %v3390_v5 = vxor.u32 2147516416, %v3374_v50  ;;  %v3321_v46 = vunpack.c.l.bf16 %v6911_v36 }
 0x7c1   :  { %v3413_v55 = vunpack.c.l.bf16 %v3389_v52  ;;  %v3414_v49 = vunpack.c.h.bf16 %v3389_v52  ;;  %v3579_v51 = vpack.c.bf16 %v3554_v40, %v3553_v10  ;;  %v3322_v23 = vunpack.c.h.bf16 %v6911_v36 }
 0x7c2   :  { %v5373_v1 = vpop.eup %5372  ;;  %v3323_v57 = vunpack.c.l.bf16 %v6914_v26  ;;  %v3415_v61 = vunpack.c.l.bf16 %v3390_v5  ;;  %v3416_v43 = vunpack.c.h.bf16 %v3390_v5  ;;  %v3353_v60 = vmul.f32 1.703125, %v3321_v46 }
 0x7c3   :  { %v3461_v44 = vmul.f32 1.442695, %v3413_v55  ;;  %v3463_v47 = vmul.f32 1.442695, %v3414_v49  ;;  %v7086_v33 = vunpack.c.h.bf16 %v6914_v26  ;;  %v3555_v62 = vadd.f32 1.0, %v3523_v17 }
 0x7c4   :  { %v5375_v38 = vpop.eup %5374  ;;  %v3354_v28 = vmul.f32 1.703125, %v3322_v23  ;;  %v3355_v9 = vmul.f32 1.703125, %v3323_v57  ;;  %v3465_v4 = vmul.f32 1.442695, %v3415_v61  ;;  %v3467_v35 = vmul.f32 1.442695, %v3416_v43 }
 0x7c5   :  { %5376 = vpow2.f32 %v3461_v44  ;;  %v3356_v39 = vmul.f32 1.703125, %v7086_v33  ;;  %v3556_v41 = vadd.f32 1.0, %v3524_v20  ;;  %v3633_v40 = vunpack.c.h.bf16 %v3579_v51 }
 0x7c6   :  { %5378 = vpow2.f32 %v3463_v47  ;;  %v3375_v10 = vpack.c.bf16 %v3354_v28, %v3353_v60  ;;  %v3634_v52 = vunpack.c.l.bf16 %v3579_v51  ;;  %v3622_v17 = vmul.f32 %v5373_v1, %v6817_v32 }
 0x7c7   :  { %5380 = vpow2.f32 %v3465_v4  ;;  %v3376_v50 = vpack.c.bf16 %v3356_v39, %v3355_v9  ;;  %v3624_v55 = vmul.f32 %v5375_v38, %v6819_v0  ;;  %v3627_v44 = vunpack.c.l.bf16 %v6903_v59 }
 0x7c8   :  { %5382 = vpow2.f32 %v3467_v35  ;;  %v3391_v49 = vxor.u32 2147516416, %v3375_v10  ;;  %v3580_v20 = vpack.c.bf16 %v3556_v41, %v3555_v62 }
 0x7c9   :  { %v3392_v5 = vxor.u32 2147516416, %v3376_v50  ;;  %5384 = vrcp.f32 %v3633_v40  ;;  %v3625_v4 = vpack.c.bf16 %v3622_v17, %v3624_v55 }
 0x7ca   :  { %v3417_v61 = vunpack.c.l.bf16 %v3391_v49  ;;  %v3418_v43 = vunpack.c.h.bf16 %v3391_v49  ;;  %5386 = vrcp.f32 %v3634_v52  ;;  %v3640_v33 = vunpack.c.h.bf16 %v3580_v20 }
 0x7cb   :  { %v5377_v47 = vpop.eup %5376  ;;  %v3419_v28 = vunpack.c.l.bf16 %v3392_v5  ;;  %v3420_v51 = vunpack.c.h.bf16 %v3392_v5  ;;  %5388 = vrcp.f32 %v3626_v16  ;;  %v3711_v62 = vunpack.c.l.bf16 %v3625_v4 }
 0x7cc   :  { %v5379_v60 = vpop.eup %5378  ;;  %v3469_v1 = vmul.f32 1.442695, %v3417_v61  ;;  %v3471_v39 = vmul.f32 1.442695, %v3418_v43  ;;  %5390 = vrcp.f32 %v3627_v44  ;;  %v3641_v41 = vunpack.c.l.bf16 %v3580_v20 }
 0x7cd   :  { %v3501_v9 = vpack.c.bf16 %v5379_v60, %v5377_v47  ;;  %v5381_v38 = vpop.eup %5380  ;;  %v3473_v35 = vmul.f32 1.442695, %v3419_v28  ;;  %v3475_v10 = vmul.f32 1.442695, %v3420_v51  ;;  %v3712_v60 = vunpack.c.h.bf16 %v3625_v4 }
 0x7ce   :  { %v5383_v40 = vpop.eup %5382  ;;  %5392 = vpow2.f32 %v3469_v1 }
 0x7cf   :  { %v3525_v50 = vunpack.c.l.bf16 %v3501_v9  ;;  %v3526_v59 = vunpack.c.h.bf16 %v3501_v9  ;;  %v5385_v49 = vpop.eup %5384  ;;  %v3502_v52 = vpack.c.bf16 %v5383_v40, %v5381_v38  ;;  %5394 = vpow2.f32 %v3471_v39 }
 0x7d0   :  { %v5387_v5 = vpop.eup %5386  ;;  %5396 = vpow2.f32 %v3473_v35  ;;  %v3636_v55 = vmul.f32 %v5385_v49, %v6817_v32 }
 0x7d1   :  { %v3557_v17 = vadd.f32 1.0, %v3525_v50  ;;  %v3558_v16 = vadd.f32 1.0, %v3526_v59  ;;  %v5389_v47 = vpop.eup %5388  ;;  %v3527_v61 = vunpack.c.l.bf16 %v3502_v52  ;;  %v3528_v43 = vunpack.c.h.bf16 %v3502_v52 }
 0x7d2   :  { %5398 = vpow2.f32 %v3475_v10  ;;  %v3638_v44 = vmul.f32 %v5387_v5, %v6819_v0  ;;  %v3629_v28 = vmul.f32 %v5389_v47, %v6817_v32  ;;  %v5391_v9 = vpop.eup %5390  ;;  %v3743_v10 = vmul.f32 %v3711_v62, %v3309_v53 }
 0x7d3   :  { %5400 = vrcp.f32 %v3640_v33  ;;  %v3581_v51 = vpack.c.bf16 %v3558_v16, %v3557_v17  ;;  %v3559_v1 = vadd.f32 1.0, %v3527_v61  ;;  %v3560_v20 = vadd.f32 1.0, %v3528_v43 }
 0x7d4   :  { %v3639_v39 = vpack.c.bf16 %v3636_v55, %v3638_v44  ;;  %5402 = vrcp.f32 %v3641_v41  ;;  %v5393_v38 = vpop.eup %5392  ;;  %v3631_v35 = vmul.f32 %v5391_v9, %v6819_v0  ;;  %v3744_v33 = vmul.f32 %v3712_v60, %v3310_v14 }
 0x7d5   :  { %v3647_v40 = vunpack.c.h.bf16 %v3581_v51  ;;  %v3648_v50 = vunpack.c.l.bf16 %v3581_v51  ;;  %v5395_v59 = vpop.eup %5394  ;;  %v6943_v61 = vpack.c.bf16 %v3560_v20, %v3559_v1 }
 0x7d6   :  { %v3715_v49 = vunpack.c.l.bf16 %v3639_v39  ;;  %v3716_v4 = vunpack.c.h.bf16 %v3639_v39  ;;  %v5397_v52 = vpop.eup %5396  ;;  %v3503_v5 = vpack.c.bf16 %v5395_v59, %v5393_v38  ;;  %v3632_v17 = vpack.c.bf16 %v3629_v28, %v3631_v35 }
 0x7d7   :  { %5404 = vrcp.f32 %v3647_v40  ;;  %v3222_v47 = vpop.f32.mrf.mxu0 }
 0x7d8   :  { %v5399_v16 = vpop.eup %5398  ;;  %v3747_v41 = vmul.f32 %v3715_v49, %v3313_v19  ;;  %v3748_v55 = vmul.f32 %v3716_v4, %v3314_v8  ;;  %5406 = vrcp.f32 %v3648_v50  ;;  %v3529_v62 = vunpack.c.l.bf16 %v3503_v5  ;;  %v3251_v42 = vpop.f32.mrf.mxu1 }
 0x7d9   :  { %v5401_v53 = vpop.eup %5400  ;;  %v3530_v43 = vunpack.c.h.bf16 %v3503_v5  ;;  %v3504_v44 = vpack.c.bf16 %v5399_v16, %v5397_v52  ;;  %v3713_v51 = vunpack.c.l.bf16 %v3632_v17  ;;  %v3714_v39 = vunpack.c.h.bf16 %v3632_v17 }
 0x7da   :  { %v5403_v14 = vpop.eup %5402  ;;  %v3771_v60 = vpack.c.bf16 %v3747_v41, %v3743_v10  ;;  %v3772_v28 = vpack.c.bf16 %v3748_v55, %v3744_v33  ;;  %v3643_v9 = vmul.f32 %v5401_v53, %v6817_v32  ;;  %v3561_v19 = vadd.f32 1.0, %v3529_v62 }
 0x7db   :  { %v3562_v38 = vadd.f32 1.0, %v3530_v43  ;;  %v3531_v13 = vunpack.c.l.bf16 %v3504_v44  ;;  %v3645_v8 = vmul.f32 %v5403_v14, %v6819_v0  ;;  %v3223_v1 = vadd.f32 %v3222_v47, %v6769_v22 }
 0x7dc   :  { %4056 = vmatmul.bf16.gmra.mxu3 %v3771_v60  ;;  %4085 = vmatmul.bf16.gmra.mxu0 %v3772_v28  ;;  %v3532_v35 = vunpack.c.h.bf16 %v3504_v44  ;;  %v3745_v40 = vmul.f32 %v3713_v51, %v3311_v3  ;;  %v3746_v50 = vmul.f32 %v3714_v39, %v3312_v15  ;;  %v3252_v52 = vadd.f32 %v3251_v42, %v6773_v34 }
 0x7dd   :  { %v5405_v20 = vpop.eup %5404  ;;  %v3193_v59 = vpop.f32.mrf.mxu3  ;;  %v3583_v49 = vpack.c.bf16 %v3562_v38, %v3561_v19  ;;  %v3646_v4 = vpack.c.bf16 %v3643_v9, %v3645_v8  ;;  %v3654_v17 = vunpack.c.h.bf16 %v6943_v61  ;;  %v3563_v31 = vadd.f32 1.0, %v3531_v13 }
 0x7de   :  { %v5407_v10 = vpop.eup %5406  ;;  %v3194_v5 = vadd.f32 %v3193_v59, %v6771_v29  ;;  %v3280_v33 = vpop.f32.mrf.mxu2  ;;  %v3650_v41 = vmul.f32 %v5405_v20, %v6817_v32  ;;  %v3564_v62 = vadd.f32 1.0, %v3532_v35  ;;  %v3655_v13 = vunpack.c.l.bf16 %v6943_v61 }
 0x7df   :  { %v3281_v16 = vadd.f32 %v3280_v33, %v6775_v25  ;;  %v3652_v3 = vmul.f32 %v5407_v10, %v6819_v0  ;;  %v3661_v55 = vunpack.c.h.bf16 %v3583_v49  ;;  %v3717_v15 = vunpack.c.l.bf16 %v3646_v4  ;;  %v3224_v28 = vpop.f32.mrf.mxu0 }
 0x7e0   :  { %v3718_v47 = vunpack.c.h.bf16 %v3646_v4  ;;  %v6958_v53 = vpack.c.bf16 %v3223_v1, %v3194_v5  ;;  %v3662_v44 = vunpack.c.l.bf16 %v3583_v49  ;;  %v3253_v19 = vpop.f32.mrf.mxu1  ;;  %v3225_v35 = vadd.f32 %v3224_v28, %v6769_v22 }
 0x7e1   :  { %v6960_v43 = vpack.c.bf16 %v3281_v16, %v3252_v52  ;;  %5408 = vrcp.f32 %v3661_v55  ;;  %v3749_v51 = vmul.f32 %v3717_v15, %v3315_v63  ;;  %v3653_v38 = vpack.c.bf16 %v3650_v41, %v3652_v3 }
 0x7e2   :  { %v3750_v42 = vmul.f32 %v3718_v47, %v3316_v12  ;;  %v3325_v14 = vunpack.c.l.bf16 %v6958_v53  ;;  %v3326_v60 = vunpack.c.h.bf16 %v6958_v53  ;;  %5410 = vrcp.f32 %v3662_v44 }
 0x7e3   :  { %v3327_v9 = vunpack.c.l.bf16 %v6960_v43  ;;  %v3328_v39 = vunpack.c.h.bf16 %v6960_v43  ;;  %v3773_v8 = vpack.c.bf16 %v3749_v51, %v3745_v40  ;;  %v3254_v40 = vadd.f32 %v3253_v19, %v6773_v34 }
 0x7e4   :  { %v3774_v1 = vpack.c.bf16 %v3750_v42, %v3746_v50  ;;  %v3357_v63 = vmul.f32 1.703125, %v3325_v14  ;;  %v3358_v11 = vmul.f32 1.703125, %v3326_v60  ;;  %v3719_v5 = vunpack.c.l.bf16 %v3653_v38 }
 0x7e5   :  { %v3359_v12 = vmul.f32 1.703125, %v3327_v9  ;;  %v3360_v20 = vmul.f32 1.703125, %v3328_v39  ;;  %v3195_v59 = vpop.f32.mrf.mxu3  ;;  %4114 = vmatmul.bf16.gmra.mxu1 %v3773_v8  ;;  %v3720_v33 = vunpack.c.h.bf16 %v3653_v38  ;;  %v3584_v22 = vpack.c.bf16 %v3564_v62, %v3563_v31 }
 0x7e6   :  { %4143 = vmatmul.bf16.gmra.mxu2 %v3774_v1  ;;  %v3377_v61 = vpack.c.bf16 %v3358_v11, %v3357_v63  ;;  %v3196_v50 = vadd.f32 %v3195_v59, %v6771_v29  ;;  %v3282_v49 = vpop.f32.mrf.mxu2  ;;  %5412 = vrcp.f32 %v3654_v17 }
 0x7e7   :  { %v5409_v10 = vpop.eup %5408  ;;  %v3378_v4 = vpack.c.bf16 %v3360_v20, %v3359_v12  ;;  %v3283_v52 = vadd.f32 %v3282_v49, %v6775_v25  ;;  %5414 = vrcp.f32 %v3655_v13 }
 0x7e8   :  { %v3393_v16 = vxor.u32 2147516416, %v3377_v61  ;;  %v6983_v41 = vpack.c.bf16 %v3225_v35, %v3196_v50  ;;  %v3664_v15 = vmul.f32 %v5409_v10, %v6817_v32  ;;  %v5411_v25 = vpop.eup %5410  ;;  %v3751_v61 = vmul.f32 %v3719_v5, %v3317_v45 }
 0x7e9   :  { %v3394_v3 = vxor.u32 2147516416, %v3378_v4  ;;  %v6985_v55 = vpack.c.bf16 %v3283_v52, %v3254_v40  ;;  %v3666_v20 = vmul.f32 %v5411_v25, %v6819_v0  ;;  %v3668_v40 = vunpack.c.h.bf16 %v3584_v22 }
 0x7ea   :  { %v3421_v34 = vunpack.c.l.bf16 %v3393_v16  ;;  %v3422_v29 = vunpack.c.h.bf16 %v3393_v16  ;;  %v3329_v47 = vunpack.c.l.bf16 %v6983_v41  ;;  %v3330_v44 = vunpack.c.h.bf16 %v6983_v41 }
 0x7eb   :  { %v3423_v51 = vunpack.c.l.bf16 %v3394_v3  ;;  %v3424_v42 = vunpack.c.h.bf16 %v3394_v3  ;;  %v3331_v28 = vunpack.c.l.bf16 %v6985_v55  ;;  %v3332_v31 = vunpack.c.h.bf16 %v6985_v55 }
 0x7ec   :  { %v3477_v17 = vmul.f32 1.442695, %v3421_v34  ;;  %v3479_v62 = vmul.f32 1.442695, %v3422_v29  ;;  %v3361_v19 = vmul.f32 1.703125, %v3329_v47  ;;  %v3362_v38 = vmul.f32 1.703125, %v3330_v44  ;;  %v5413_v11 = vpop.eup %5412 }
 0x7ed   :  { %v3481_v13 = vmul.f32 1.442695, %v3423_v51  ;;  %v3483_v8 = vmul.f32 1.442695, %v3424_v42  ;;  %v3363_v1 = vmul.f32 1.703125, %v3331_v28  ;;  %v3364_v63 = vmul.f32 1.703125, %v3332_v31  ;;  %v5415_v35 = vpop.eup %5414 }
 0x7ee   :  { %5416 = vpow2.f32 %v3477_v17  ;;  %v3379_v12 = vpack.c.bf16 %v3362_v38, %v3361_v19  ;;  %v3667_v49 = vpack.c.bf16 %v3664_v15, %v3666_v20  ;;  %v3752_v10 = vmul.f32 %v3720_v33, %v3318_v7 }
 0x7ef   :  { %5418 = vpow2.f32 %v3479_v62  ;;  %v3380_v59 = vpack.c.bf16 %v3364_v63, %v3363_v1  ;;  %v3657_v52 = vmul.f32 %v5413_v11, %v6817_v32  ;;  %v3669_v16 = vunpack.c.l.bf16 %v3584_v22 }
 0x7f0   :  { %5420 = vpow2.f32 %v3481_v13  ;;  %v3395_v50 = vxor.u32 2147516416, %v3379_v12  ;;  %v3723_v29 = vunpack.c.l.bf16 %v3667_v49  ;;  %v3724_v25 = vunpack.c.h.bf16 %v3667_v49 }
 0x7f1   :  { %5422 = vpow2.f32 %v3483_v8  ;;  %v3396_v4 = vxor.u32 2147516416, %v3380_v59  ;;  %v3659_v45 = vmul.f32 %v5415_v35, %v6819_v0 }
 0x7f2   :  { %v3425_v3 = vunpack.c.l.bf16 %v3395_v50  ;;  %v3426_v34 = vunpack.c.h.bf16 %v3395_v50  ;;  %5424 = vrcp.f32 %v3668_v40  ;;  %v3755_v48 = vmul.f32 %v3723_v29, %v3321_v46 }
 0x7f3   :  { %v3427_v51 = vunpack.c.l.bf16 %v3396_v4  ;;  %v3428_v42 = vunpack.c.h.bf16 %v3396_v4  ;;  %v3756_v7 = vmul.f32 %v3724_v25, %v3322_v23  ;;  %5426 = vrcp.f32 %v3669_v16 }
 0x7f4   :  { %v5417_v5 = vpop.eup %5416  ;;  %v3485_v17 = vmul.f32 1.442695, %v3425_v3  ;;  %v3487_v15 = vmul.f32 1.442695, %v3426_v34  ;;  %v3775_v13 = vpack.c.bf16 %v3755_v48, %v3751_v61  ;;  %v3660_v63 = vpack.c.bf16 %v3657_v52, %v3659_v45 }
 0x7f5   :  { %v5419_v33 = vpop.eup %5418  ;;  %v3489_v22 = vmul.f32 1.442695, %v3427_v51  ;;  %v3491_v62 = vmul.f32 1.442695, %v3428_v42  ;;  %v3776_v8 = vpack.c.bf16 %v3756_v7, %v3752_v10 }
 0x7f6   :  { %v5421_v19 = vpop.eup %5420  ;;  %v3505_v38 = vpack.c.bf16 %v5419_v33, %v5417_v5  ;;  %5428 = vpow2.f32 %v3485_v17  ;;  %4061 = vmatmul.bf16.gmra.mxu3 %v3775_v13  ;;  %v3721_v61 = vunpack.c.l.bf16 %v3660_v63  ;;  %v3722_v5 = vunpack.c.h.bf16 %v3660_v63 }
 0x7f7   :  { %v5423_v1 = vpop.eup %5422  ;;  %5430 = vpow2.f32 %v3487_v15  ;;  %4090 = vmatmul.bf16.gmra.mxu0 %v3776_v8  ;;  %v7089_v63 = vunpack.c.h.bf16 %v6914_v26 }
 0x7f8   :  { %v3533_v11 = vunpack.c.l.bf16 %v3505_v38  ;;  %v3534_v12 = vunpack.c.h.bf16 %v3505_v38  ;;  %v3506_v20 = vpack.c.bf16 %v5423_v1, %v5421_v19  ;;  %5432 = vpow2.f32 %v3489_v22  ;;  %v5425_v36 = vpop.eup %5424 }
 0x7f9   :  { %5434 = vpow2.f32 %v3491_v62  ;;  %v5427_v40 = vpop.eup %5426  ;;  %v3671_v50 = vmul.f32 %v5425_v36, %v6817_v32  ;;  %v3753_v45 = vmul.f32 %v3721_v61, %v3319_v30  ;;  %v3754_v30 = vmul.f32 %v3722_v5, %v3320_v18 }
 0x7fa   :  { %v3565_v46 = vadd.f32 1.0, %v3533_v11  ;;  %v3566_v23 = vadd.f32 1.0, %v3534_v12  ;;  %v3535_v35 = vunpack.c.l.bf16 %v3506_v20  ;;  %v3536_v59 = vunpack.c.h.bf16 %v3506_v20 }
 0x7fb   :  { %v3673_v52 = vmul.f32 %v5427_v40, %v6819_v0 }
 0x7fc   :  { %v5429_v49 = vpop.eup %5428  ;;  %v3567_v10 = vadd.f32 1.0, %v3535_v35  ;;  %v3568_v4 = vadd.f32 1.0, %v3536_v59  ;;  %v3585_v16 = vpack.c.bf16 %v3566_v23, %v3565_v46 }
 0x7fd   :  { %v5431_v3 = vpop.eup %5430  ;;  %v3674_v25 = vpack.c.bf16 %v3671_v50, %v3673_v52 }
 0x7fe   :  { %v5433_v34 = vpop.eup %5432  ;;  %v3507_v29 = vpack.c.bf16 %v5431_v3, %v5429_v49  ;;  %v3675_v51 = vunpack.c.h.bf16 %v3585_v16  ;;  %v3676_v17 = vunpack.c.l.bf16 %v3585_v16  ;;  %v3586_v15 = vpack.c.bf16 %v3568_v4, %v3567_v10 }
 0x7ff   :  { %v5435_v42 = vpop.eup %5434  ;;  %v3725_v22 = vunpack.c.l.bf16 %v3674_v25  ;;  %v3726_v62 = vunpack.c.h.bf16 %v3674_v25 }
 0x800   :  { %v3537_v48 = vunpack.c.l.bf16 %v3507_v29  ;;  %v3538_v7 = vunpack.c.h.bf16 %v3507_v29  ;;  %v3508_v33 = vpack.c.bf16 %v5435_v42, %v5433_v34  ;;  %5436 = vrcp.f32 %v3675_v51 }
 0x801   :  { %v3682_v19 = vunpack.c.h.bf16 %v3586_v15  ;;  %v3683_v38 = vunpack.c.l.bf16 %v3586_v15  ;;  %v3757_v12 = vmul.f32 %v3725_v22, %v3323_v57  ;;  %v3758_v20 = vmul.f32 %v3726_v62, %v7089_v63 }
 0x802   :  { %v3569_v13 = vadd.f32 1.0, %v3537_v48  ;;  %v3570_v8 = vadd.f32 1.0, %v3538_v7  ;;  %v3539_v1 = vunpack.c.l.bf16 %v3508_v33  ;;  %v3540_v11 = vunpack.c.h.bf16 %v3508_v33 }
 0x803   :  { %5438 = vrcp.f32 %v3676_v17  ;;  %v3777_v35 = vpack.c.bf16 %v3757_v12, %v3753_v45  ;;  %v3778_v59 = vpack.c.bf16 %v3758_v20, %v3754_v30 }
 0x804   :  { %v3571_v36 = vadd.f32 1.0, %v3539_v1  ;;  %v3572_v46 = vadd.f32 1.0, %v3540_v11  ;;  %v3587_v23 = vpack.c.bf16 %v3570_v8, %v3569_v13  ;;  %5440 = vrcp.f32 %v3682_v19 }
 0x805   :  { %5442 = vrcp.f32 %v3683_v38  ;;  %4119 = vmatmul.bf16.gmra.mxu1 %v3777_v35  ;;  %4148 = vmatmul.bf16.gmra.mxu2 %v3778_v59 }
 0x806   :  { %v3689_v40 = vunpack.c.h.bf16 %v3587_v23  ;;  %v3690_v50 = vunpack.c.l.bf16 %v3587_v23  ;;  %v3588_v61 = vpack.c.bf16 %v3572_v46, %v3571_v36  ;;  %v5437_v49 = vpop.eup %5436 }
 0x807   :  { %v3678_v26 = vmul.f32 %v5437_v49, %v6817_v32 }
 0x808   :  { %5444 = vrcp.f32 %v3689_v40  ;;  %v3696_v37 = vunpack.c.h.bf16 %v3588_v61  ;;  %v3697_v18 = vunpack.c.l.bf16 %v3588_v61 }
 0x809   :  { %v5439_v57 = vpop.eup %5438  ;;  %5446 = vrcp.f32 %v3690_v50 }
 0x80a   :  { %v5441_v10 = vpop.eup %5440  ;;  %v3680_v4 = vmul.f32 %v5439_v57, %v6819_v0  ;;  %5448 = vrcp.f32 %v3696_v37 }
 0x80b   :  { %v5443_v52 = vpop.eup %5442  ;;  %v3685_v16 = vmul.f32 %v5441_v10, %v6817_v32  ;;  %5450 = vrcp.f32 %v3697_v18 }
 0x80c   :  { %v3687_v3 = vmul.f32 %v5443_v52, %v6819_v0  ;;  %v3681_v34 = vpack.c.bf16 %v3678_v26, %v3680_v4 }
 0x80e   :  { %v5445_v29 = vpop.eup %5444  ;;  %v3688_v42 = vpack.c.bf16 %v3685_v16, %v3687_v3  ;;  %v3727_v15 = vunpack.c.l.bf16 %v3681_v34  ;;  %v3728_v48 = vunpack.c.h.bf16 %v3681_v34 }
 0x80f   :  { %v5447_v25 = vpop.eup %5446  ;;  %v3692_v51 = vmul.f32 %v5445_v29, %v6817_v32 }
 0x810   :  { %v5449_v45 = vpop.eup %5448  ;;  %v3694_v5 = vmul.f32 %v5447_v25, %v6819_v0  ;;  %v3729_v62 = vunpack.c.l.bf16 %v3688_v42  ;;  %v3730_v19 = vunpack.c.h.bf16 %v3688_v42  ;;  %v3759_v1 = vmul.f32 %v3727_v15, %v3325_v14 }
 0x811   :  { %v5451_v17 = vpop.eup %5450  ;;  %v3699_v7 = vmul.f32 %v5449_v45, %v6817_v32  ;;  %v3760_v11 = vmul.f32 %v3728_v48, %v3326_v60 }
 0x812   :  { %v3695_v33 = vpack.c.bf16 %v3692_v51, %v3694_v5  ;;  %v3701_v22 = vmul.f32 %v5451_v17, %v6819_v0  ;;  %v3761_v0 = vmul.f32 %v3729_v62, %v3327_v9  ;;  %v3762_v20 = vmul.f32 %v3730_v19, %v3328_v39  ;;  %v7048_v9 = vld [vmem:[%s7084_s12] ss:$0 sm:$0xff]  ;;  %s5750_s12 = smov [#allocation19]  }
 0x813   :  { %s4355_s22 = sshll.u32 %s5750_s12, 4  ;;  %s4356_s22 = int_to_ptr.vmem [resolvable:$true] %s4355_s22 }
 0x814   :  { %v3731_v38 = vunpack.c.l.bf16 %v3695_v33  ;;  %v3732_v13 = vunpack.c.h.bf16 %v3695_v33  ;;  %v3702_v8 = vpack.c.bf16 %v3699_v7, %v3701_v22 }
 0x816   :  { %v3763_v12 = vmul.f32 %v3731_v38, %v3329_v47  ;;  %v3764_v32 = vmul.f32 %v3732_v13, %v3330_v44  ;;  %v3733_v30 = vunpack.c.l.bf16 %v3702_v8  ;;  %v3734_v63 = vunpack.c.h.bf16 %v3702_v8 }
 0x818   :  { %v3779_v36 = vpack.c.bf16 %v3763_v12, %v3759_v1  ;;  %v3780_v46 = vpack.c.bf16 %v3764_v32, %v3760_v11  ;;  %v3765_v53 = vmul.f32 %v3733_v30, %v3331_v28  ;;  %v3766_v14 = vmul.f32 %v3734_v63, %v3332_v31 }
 0x81a   :  { %4066 = vmatmul.bf16.gmra.mxu3 %v3779_v36  ;;  %4095 = vmatmul.bf16.gmra.mxu0 %v3780_v46  ;;  %v3781_v60 = vpack.c.bf16 %v3765_v53, %v3761_v0  ;;  %v3782_v41 = vpack.c.bf16 %v3766_v14, %v3762_v20 }
 0x81c   :  { %4124 = vmatmul.bf16.gmra.mxu1 %v3781_v60  ;;  %4153 = vmatmul.bf16.gmra.mxu2 %v3782_v41 }
 0x81e   :  { %v4081_v39 = vpop.f32.mrf.mxu0 }
 0x820   :  { %v4110_v44 = vpop.f32.mrf.mxu1 }
 0x824   :  { %v4052_v43 = vpop.f32.mrf.mxu3 }
 0x825   :  { %v4053_v47 = vadd.f32 %v7048_v9, %v4052_v43 }
 0x826   :  { %v4139_v55 = vpop.f32.mrf.mxu2  ;;  %v4083_v37 = vpop.f32.mrf.mxu0 }
 0x827   :  { %v4082_v28 = vadd.f32 %v4081_v39, %v4053_v47 }
 0x828   :  { %v4112_v10 = vpop.f32.mrf.mxu1 }
 0x829   :  { %v4111_v23 = vadd.f32 %v4110_v44, %v4082_v28 }
 0x82b   :  { %v4140_v31 = vadd.f32 %v4139_v55, %v4111_v23 }
 0x82c   :  { %v4054_v35 = vpop.f32.mrf.mxu3 }
 0x82d   :  { %v4159_v59 = vadd.f32 %v4140_v31, %v6646_v58  ;;  %v4055_v40 = vadd.f32 %v7048_v9, %v4054_v35 }
 0x82e   :  { %v4141_v3 = vpop.f32.mrf.mxu2 }
 0x82f   :  { %v4169_v50 = vrot.slane %v4159_v59, 1  ;;  %v4170_v61 = vrot.slane %v4159_v59, 2  ;;  %v4171_v49 = vrot.slane %v4159_v59, 3  ;;  %4197 = vst [vmem:[#allocation19] sm:$0x1] %v4159_v59  ;;  %v4172_v18 = vrot.slane %v4159_v59, 4 }
 0x830   :  { %v4084_v57 = vadd.f32 %v4083_v37, %v4055_v40  ;;  %v4173_v26 = vrot.slane %v4159_v59, 5  ;;  %v4174_v4 = vrot.slane %v4159_v59, 6  ;;  %v4175_v16 = vrot.slane %v4159_v59, 7 }
 0x831   :  { %4198 = vst [vmem:[#allocation19 + $0x4] sm:$0x1] %v4169_v50 }
 0x832   :  { %4199 = vst [vmem:[#allocation19 + $0x8] sm:$0x1] %v4170_v61  ;;  %v4113_v52 = vadd.f32 %v4112_v10, %v4084_v57 }
 0x833   :  { %4200 = vst [vmem:[#allocation19 + $0xc] sm:$0x1] %v4171_v49 }
 0x834   :  { %4201 = vst [vmem:[#allocation19 + $0x10] sm:$0x1] %v4172_v18  ;;  %v4142_v58 = vadd.f32 %v4141_v3, %v4113_v52 }
 0x835   :  { %4202 = vst [vmem:[#allocation19 + $0x14] sm:$0x1] %v4173_v26 }
 0x836   :  { %4203 = vst [vmem:[#allocation19 + $0x18] sm:$0x1] %v4174_v4  ;;  %v4160_v34 = vadd.f32 %v4142_v58, %v6650_v27 }
 0x837   :  { %4204 = vst [vmem:[#allocation19 + $0x1c] sm:$0x1] %v4175_v16 }
 0x838   :  { %v4176_v29 = vrot.slane %v4160_v34, 1  ;;  %v4177_v25 = vrot.slane %v4160_v34, 2  ;;  %v4178_v51 = vrot.slane %v4160_v34, 3  ;;  %4205 = vst [vmem:[#allocation19 + $0x20] sm:$0x1] %v4160_v34  ;;  %v4179_v42 = vrot.slane %v4160_v34, 4 }
 0x839   :  { %v4180_v45 = vrot.slane %v4160_v34, 5  ;;  %v4181_v5 = vrot.slane %v4160_v34, 6  ;;  %v4182_v17 = vrot.slane %v4160_v34, 7 }
 0x83a   :  { %4206 = vst [vmem:[#allocation19 + $0x24] sm:$0x1] %v4176_v29 }
 0x83b   :  { %4207 = vst [vmem:[#allocation19 + $0x28] sm:$0x1] %v4177_v25 }
 0x83c   :  { %4208 = vst [vmem:[#allocation19 + $0x2c] sm:$0x1] %v4178_v51 }
 0x83d   :  { %4209 = vst [vmem:[#allocation19 + $0x30] sm:$0x1] %v4179_v42 }
 0x83e   :  { %4210 = vst [vmem:[#allocation19 + $0x34] sm:$0x1] %v4180_v45 }
 0x83f   :  { %4211 = vst [vmem:[#allocation19 + $0x38] sm:$0x1] %v4181_v5 }
 0x840   :  { %4212 = vst [vmem:[#allocation19 + $0x3c] sm:$0x1] %v4182_v17 }
 0x859   :  { %v4086_v15 = vpop.f32.mrf.mxu0 }
 0x85f   :  { %v4057_v48 = vpop.f32.mrf.mxu3 }
 0x860   :  { %v4058_v27 = vadd.f32 %v7048_v9, %v4057_v48 }
 0x861   :  { %v4088_v13 = vpop.f32.mrf.mxu0 }
 0x862   :  { %v4087_v7 = vadd.f32 %v4086_v15, %v4058_v27  ;;  %v4115_v33 = vpop.f32.mrf.mxu1 }
 0x864   :  { %v4116_v22 = vadd.f32 %v4115_v33, %v4087_v7 }
 0x867   :  { %v4059_v62 = vpop.f32.mrf.mxu3 }
 0x868   :  { %v4060_v19 = vadd.f32 %v7048_v9, %v4059_v62 }
 0x869   :  { %v4144_v38 = vpop.f32.mrf.mxu2 }
 0x86a   :  { %v4145_v8 = vadd.f32 %v4144_v38, %v4116_v22  ;;  %v4089_v1 = vadd.f32 %v4088_v13, %v4060_v19  ;;  %v4117_v12 = vpop.f32.mrf.mxu1 }
 0x86c   :  { %v4161_v11 = vadd.f32 %v4145_v8, %v6654_v56  ;;  %v4118_v0 = vadd.f32 %v4117_v12, %v4089_v1 }
 0x86e   :  { %v4215_v32 = vrot.slane %v4161_v11, 1  ;;  %v4216_v30 = vrot.slane %v4161_v11, 2  ;;  %v4217_v63 = vrot.slane %v4161_v11, 3  ;;  %4243 = vst [vmem:[#allocation19 + $0x1] sm:$0x1] %v4161_v11  ;;  %v4218_v20 = vrot.slane %v4161_v11, 4 }
 0x86f   :  { %v4219_v36 = vrot.slane %v4161_v11, 5  ;;  %v4220_v46 = vrot.slane %v4161_v11, 6  ;;  %v4221_v14 = vrot.slane %v4161_v11, 7 }
 0x870   :  { %4244 = vst [vmem:[#allocation19 + $0x5] sm:$0x1] %v4215_v32 }
 0x871   :  { %4245 = vst [vmem:[#allocation19 + $0x9] sm:$0x1] %v4216_v30  ;;  %v4146_v53 = vpop.f32.mrf.mxu2 }
 0x872   :  { %4246 = vst [vmem:[#allocation19 + $0xd] sm:$0x1] %v4217_v63  ;;  %v4147_v60 = vadd.f32 %v4146_v53, %v4118_v0 }
 0x873   :  { %4247 = vst [vmem:[#allocation19 + $0x11] sm:$0x1] %v4218_v20 }
 0x874   :  { %4248 = vst [vmem:[#allocation19 + $0x15] sm:$0x1] %v4219_v36  ;;  %v4162_v41 = vadd.f32 %v4147_v60, %v6658_v24  ;;  %v4091_v31 = vpop.f32.mrf.mxu0 }
 0x875   :  { %4249 = vst [vmem:[#allocation19 + $0x19] sm:$0x1] %v4220_v46 }
 0x876   :  { %4250 = vst [vmem:[#allocation19 + $0x1d] sm:$0x1] %v4221_v14  ;;  %v4222_v56 = vrot.slane %v4162_v41, 1  ;;  %v4223_v43 = vrot.slane %v4162_v41, 2  ;;  %v4224_v39 = vrot.slane %v4162_v41, 3  ;;  %v4225_v47 = vrot.slane %v4162_v41, 4 }
 0x877   :  { %4251 = vst [vmem:[#allocation19 + $0x21] sm:$0x1] %v4162_v41  ;;  %v4226_v44 = vrot.slane %v4162_v41, 5  ;;  %v4227_v28 = vrot.slane %v4162_v41, 6  ;;  %v4228_v23 = vrot.slane %v4162_v41, 7 }
 0x878   :  { %4252 = vst [vmem:[#allocation19 + $0x25] sm:$0x1] %v4222_v56 }
 0x879   :  { %4253 = vst [vmem:[#allocation19 + $0x29] sm:$0x1] %v4223_v43  ;;  %v4062_v55 = vpop.f32.mrf.mxu3 }
 0x87a   :  { %4254 = vst [vmem:[#allocation19 + $0x2d] sm:$0x1] %v4224_v39  ;;  %v4063_v24 = vadd.f32 %v7048_v9, %v4062_v55 }
 0x87b   :  { %4255 = vst [vmem:[#allocation19 + $0x31] sm:$0x1] %v4225_v47 }
 0x87c   :  { %4256 = vst [vmem:[#allocation19 + $0x35] sm:$0x1] %v4226_v44  ;;  %v4092_v35 = vadd.f32 %v4091_v31, %v4063_v24  ;;  %v4093_v37 = vpop.f32.mrf.mxu0 }
 0x87d   :  { %4257 = vst [vmem:[#allocation19 + $0x39] sm:$0x1] %v4227_v28 }
 0x87e   :  { %4258 = vst [vmem:[#allocation19 + $0x3d] sm:$0x1] %v4228_v23 }
 0x881   :  { %v4064_v40 = vpop.f32.mrf.mxu3 }
 0x882   :  { %v4120_v59 = vpop.f32.mrf.mxu1  ;;  %v4065_v61 = vadd.f32 %v7048_v9, %v4064_v40 }
 0x883   :  { %v4121_v50 = vadd.f32 %v4120_v59, %v4092_v35 }
 0x884   :  { %v4094_v57 = vadd.f32 %v4093_v37, %v4065_v61 }
 0x888   :  { %v4149_v49 = vpop.f32.mrf.mxu2 }
 0x889   :  { %v4150_v18 = vadd.f32 %v4149_v49, %v4121_v50 }
 0x88a   :  { %v4122_v10 = vpop.f32.mrf.mxu1 }
 0x88b   :  { %v4163_v26 = vadd.f32 %v4150_v18, %v6662_v21  ;;  %v4123_v3 = vadd.f32 %v4122_v10, %v4094_v57 }
 0x88d   :  { %v4261_v4 = vrot.slane %v4163_v26, 1  ;;  %v4262_v52 = vrot.slane %v4163_v26, 2  ;;  %v4263_v16 = vrot.slane %v4163_v26, 3  ;;  %4289 = vst [vmem:[#allocation19 + $0x2] sm:$0x1] %v4163_v26  ;;  %v4264_v58 = vrot.slane %v4163_v26, 4 }
 0x88e   :  { %v4265_v34 = vrot.slane %v4163_v26, 5  ;;  %v4266_v29 = vrot.slane %v4163_v26, 6  ;;  %v4267_v51 = vrot.slane %v4163_v26, 7 }
 0x88f   :  { %4290 = vst [vmem:[#allocation19 + $0x6] sm:$0x1] %v4261_v4 }
 0x890   :  { %4291 = vst [vmem:[#allocation19 + $0xa] sm:$0x1] %v4262_v52  ;;  %v4151_v25 = vpop.f32.mrf.mxu2 }
 0x891   :  { %4292 = vst [vmem:[#allocation19 + $0xe] sm:$0x1] %v4263_v16  ;;  %v4152_v42 = vadd.f32 %v4151_v25, %v4123_v3 }
 0x892   :  { %4293 = vst [vmem:[#allocation19 + $0x12] sm:$0x1] %v4264_v58 }
 0x893   :  { %4294 = vst [vmem:[#allocation19 + $0x16] sm:$0x1] %v4265_v34  ;;  %v4164_v45 = vadd.f32 %v4152_v42, %v6666_v2 }
 0x894   :  { %4295 = vst [vmem:[#allocation19 + $0x1a] sm:$0x1] %v4266_v29 }
 0x895   :  { %4296 = vst [vmem:[#allocation19 + $0x1e] sm:$0x1] %v4267_v51  ;;  %v4268_v21 = vrot.slane %v4164_v45, 1  ;;  %v4269_v5 = vrot.slane %v4164_v45, 2  ;;  %v4270_v17 = vrot.slane %v4164_v45, 3  ;;  %v4271_v15 = vrot.slane %v4164_v45, 4 }
 0x896   :  { %4297 = vst [vmem:[#allocation19 + $0x22] sm:$0x1] %v4164_v45  ;;  %v4272_v48 = vrot.slane %v4164_v45, 5  ;;  %v4273_v27 = vrot.slane %v4164_v45, 6  ;;  %v4274_v7 = vrot.slane %v4164_v45, 7 }
 0x897   :  { %4298 = vst [vmem:[#allocation19 + $0x26] sm:$0x1] %v4268_v21  ;;  %v4096_v22 = vpop.f32.mrf.mxu0 }
 0x898   :  { %4299 = vst [vmem:[#allocation19 + $0x2a] sm:$0x1] %v4269_v5 }
 0x899   :  { %4300 = vst [vmem:[#allocation19 + $0x2e] sm:$0x1] %v4270_v17  ;;  %v4125_v62 = vpop.f32.mrf.mxu1 }
 0x89a   :  { %4301 = vst [vmem:[#allocation19 + $0x32] sm:$0x1] %v4271_v15 }
 0x89b   :  { %4302 = vst [vmem:[#allocation19 + $0x36] sm:$0x1] %v4272_v48 }
 0x89c   :  { %4303 = vst [vmem:[#allocation19 + $0x3a] sm:$0x1] %v4273_v27 }
 0x89d   :  { %v4067_v33 = vpop.f32.mrf.mxu3  ;;  %4304 = vst [vmem:[#allocation19 + $0x3e] sm:$0x1] %v4274_v7 }
 0x89e   :  { %v4068_v2 = vadd.f32 %v7048_v9, %v4067_v33 }
 0x89f   :  { %v4154_v13 = vpop.f32.mrf.mxu2  ;;  %v4098_v0 = vpop.f32.mrf.mxu0 }
 0x8a0   :  { %v4097_v19 = vadd.f32 %v4096_v22, %v4068_v2 }
 0x8a1   :  { %v4127_v53 = vpop.f32.mrf.mxu1 }
 0x8a2   :  { %v4126_v38 = vadd.f32 %v4125_v62, %v4097_v19 }
 0x8a4   :  { %v4155_v8 = vadd.f32 %v4154_v13, %v4126_v38 }
 0x8a5   :  { %v4069_v1 = vpop.f32.mrf.mxu3 }
 0x8a6   :  { %v4165_v11 = vadd.f32 %v4155_v8, %v6670_v6  ;;  %v4070_v12 = vadd.f32 %v7048_v9, %v4069_v1 }
 0x8a7   :  { %v4156_v56 = vpop.f32.mrf.mxu2 }
 0x8a8   :  { %v4307_v32 = vrot.slane %v4165_v11, 1  ;;  %v4308_v30 = vrot.slane %v4165_v11, 2  ;;  %v4309_v63 = vrot.slane %v4165_v11, 3  ;;  %4335 = vst [vmem:[#allocation19 + $0x3] sm:$0x1] %v4165_v11  ;;  %v4310_v20 = vrot.slane %v4165_v11, 4 }
 0x8a9   :  { %v4099_v36 = vadd.f32 %v4098_v0, %v4070_v12  ;;  %v4311_v46 = vrot.slane %v4165_v11, 5  ;;  %v4312_v14 = vrot.slane %v4165_v11, 6  ;;  %v4313_v41 = vrot.slane %v4165_v11, 7 }
 0x8aa   :  { %4336 = vst [vmem:[#allocation19 + $0x7] sm:$0x1] %v4307_v32 }
 0x8ab   :  { %4337 = vst [vmem:[#allocation19 + $0xb] sm:$0x1] %v4308_v30  ;;  %v4128_v60 = vadd.f32 %v4127_v53, %v4099_v36 }
 0x8ac   :  { %4338 = vst [vmem:[#allocation19 + $0xf] sm:$0x1] %v4309_v63 }
 0x8ad   :  { %4339 = vst [vmem:[#allocation19 + $0x13] sm:$0x1] %v4310_v20  ;;  %v4157_v6 = vadd.f32 %v4156_v56, %v4128_v60 }
 0x8ae   :  { %4340 = vst [vmem:[#allocation19 + $0x17] sm:$0x1] %v4311_v46 }
 0x8af   :  { %4341 = vst [vmem:[#allocation19 + $0x1b] sm:$0x1] %v4312_v14  ;;  %v4166_v9 = vadd.f32 %v4157_v6, %v6684_v54 }
 0x8b0   :  { %4342 = vst [vmem:[#allocation19 + $0x1f] sm:$0x1] %v4313_v41 }
 0x8b1   :  { %v4314_v43 = vrot.slane %v4166_v9, 1  ;;  %v4315_v39 = vrot.slane %v4166_v9, 2  ;;  %v4316_v47 = vrot.slane %v4166_v9, 3  ;;  %4343 = vst [vmem:[#allocation19 + $0x23] sm:$0x1] %v4166_v9  ;;  %v4317_v44 = vrot.slane %v4166_v9, 4 }
 0x8b2   :  { %v4318_v28 = vrot.slane %v4166_v9, 5  ;;  %v4319_v23 = vrot.slane %v4166_v9, 6  ;;  %v4320_v55 = vrot.slane %v4166_v9, 7 }
 0x8b3   :  { %4344 = vst [vmem:[#allocation19 + $0x27] sm:$0x1] %v4314_v43 }
 0x8b4   :  { %4345 = vst [vmem:[#allocation19 + $0x2b] sm:$0x1] %v4315_v39 }
 0x8b5   :  { %4346 = vst [vmem:[#allocation19 + $0x2f] sm:$0x1] %v4316_v47 }
 0x8b6   :  { %4347 = vst [vmem:[#allocation19 + $0x33] sm:$0x1] %v4317_v44 }
 0x8b7   :  { %4348 = vst [vmem:[#allocation19 + $0x37] sm:$0x1] %v4318_v28 }
 0x8b8   :  { %4349 = vst [vmem:[#allocation19 + $0x3b] sm:$0x1] %v4319_v23 }
 0x8b9   :  { %4350 = vst [vmem:[#allocation19 + $0x3f] sm:$0x1] %v4320_v55 }
 0x8ba   :  { %4363 = dma.vmem_to_hbm [thread:$0]  %s4356_s22, 1024, %s4358_s24, [#allocation4], %s5737_s18, %s5737_s18, %s5738_s8  }
 0x8bb   :  { %5728 = dma.done.wait [#allocation4], 1024  }
 0x8bc   :  { %5729 = vsyncadd [#allocation4], 4294966272 }
 0x8bd   :  { %4368 = vsyncpa [#allocation3], 1 }
 0x8be   :  { %4369 = vsyncpa [#allocation6], 1 }
 0x8bf   :  { %4370 = vsyncpa [#allocation9], 1 }
 0x8c0   :  { %4371 = vsyncpa [#allocation12], 1 }
 0x8c1   :  { %4372 = vsyncpa [#allocation15], 1 }
 0x8c2   :  { %4373 = vsyncpa [#allocation18], 1 }
 0x8c3   :  { %4374 = vsyncpa [#allocation4], 1 }

</bundles_post_ra>
